<compile_context>
chip_gen: v7x
topology: tpu7x:2x2x1
jax: 0.10.0
libtpu: 0.0.40
codegen_flags: <defaults>
</compile_context>

<pallas_src>
import functools

import jax
import jax.numpy as jnp
from jax.experimental import pallas as pl
from jax.experimental.pallas import tpu as pltpu


_VMEM_SPEC = pl.BlockSpec(memory_space=pltpu.MemorySpace.VMEM)


# ----------------------------------------------------------------------------
# Generic tiled matmul + bias + activation (bf16 MXU, f32 accumulate)
# ----------------------------------------------------------------------------

def _mm_bias_act_kernel(act, a_ref, b_ref, bias_ref, o_ref):
    acc = jnp.dot(a_ref[...], b_ref[...], preferred_element_type=jnp.float32)
    acc = acc + bias_ref[...]                       # bias_ref: (1, TN) f32
    if act == "swish":
        acc = acc * jax.nn.sigmoid(acc)
    o_ref[...] = acc.astype(o_ref.dtype)


def matmul_bias_act(a, b, bias, act="none", out_dtype=jnp.bfloat16, tm=256, tn=512):
    """a: (M, K), b: (K, N), bias: (N,) -> (M, N); 2-D parallel grid over (M, N)."""
    M, K = a.shape
    K2, N = b.shape
    assert K == K2 and bias.shape == (N,)
    TM = tm if M % tm == 0 else M
    TN = tn if N % tn == 0 else (128 if N % 128 == 0 else N)
    grid = (M // TM, N // TN)
    bias2 = bias.reshape(1, N).astype(jnp.float32)
    return pl.pallas_call(
        functools.partial(_mm_bias_act_kernel, act),
        out_shape=jax.ShapeDtypeStruct((M, N), out_dtype),
        grid=grid,
        in_specs=[
            pl.BlockSpec((TM, K), lambda i, j: (i, 0)),
            pl.BlockSpec((K, TN), lambda i, j: (0, j)),
            pl.BlockSpec((1, TN), lambda i, j: (0, j)),
        ],
        out_specs=pl.BlockSpec((TM, TN), lambda i, j: (i, j)),
        compiler_params=pltpu.CompilerParams(
            dimension_semantics=("parallel", "parallel")),
    )(a.astype(jnp.bfloat16), b.astype(jnp.bfloat16), bias2)


# ----------------------------------------------------------------------------
# Depthwise 3x3 conv + folded-BN bias + swish, fused with SE squeeze (spatial mean)
# ----------------------------------------------------------------------------

def _dwconv_pool_kernel(H, W, x_ref, w_ref, b_ref, d_ref, p_ref):
    """x_ref: (1,H+2,W+2,C) bf16   w_ref: (3,3,C) f32   b_ref: (1,C) f32
       d_ref: (1,H,W,C) bf16 (activation)   p_ref: (1,1,C) f32 (spatial mean)."""
    x = x_ref[...].astype(jnp.float32)
    w = w_ref[...]
    acc = jnp.zeros(d_ref.shape, jnp.float32)
    for ki in range(3):
        for kj in range(3):
            acc = acc + x[:, ki:ki + H, kj:kj + W, :] * w[ki, kj, :]
    acc = acc + b_ref[...]
    act = acc * jax.nn.sigmoid(acc)                  # swish
    d_ref[...] = act.astype(d_ref.dtype)
    p_ref[...] = (jnp.sum(act, axis=(1, 2)) * (1.0 / (H * W))).reshape(p_ref.shape)


def dwconv3x3_swish_pool(x_nhwc, w_33c, bias_c):
    N, H, W, C = x_nhwc.shape
    xp = jnp.pad(x_nhwc, ((0, 0), (1, 1), (1, 1), (0, 0)))
    return pl.pallas_call(
        functools.partial(_dwconv_pool_kernel, H, W),
        out_shape=(jax.ShapeDtypeStruct((N, H, W, C), jnp.bfloat16),
                   jax.ShapeDtypeStruct((N, 1, C), jnp.float32)),
        grid=(N,),
        in_specs=[
            pl.BlockSpec((1, H + 2, W + 2, C), lambda b: (b, 0, 0, 0)),
            pl.BlockSpec((3, 3, C), lambda b: (0, 0, 0)),
            pl.BlockSpec((1, C), lambda b: (0, 0)),
        ],
        out_specs=(
            pl.BlockSpec((1, H, W, C), lambda b: (b, 0, 0, 0)),
            pl.BlockSpec((1, 1, C), lambda b: (b, 0, 0)),
        ),
        compiler_params=pltpu.CompilerParams(dimension_semantics=("parallel",)),
    )(xp, w_33c.astype(jnp.float32), bias_c.reshape(1, C).astype(jnp.float32))


# ----------------------------------------------------------------------------
# SE MLP (reduce -> swish -> expand -> sigmoid) in one tiny kernel
# ----------------------------------------------------------------------------

def _se_mlp_kernel(p_ref, wr_ref, br_ref, we_ref, be_ref, s_ref):
    p = p_ref[...].reshape(p_ref.shape[0], p_ref.shape[2])        # (N, C1)
    h = jnp.dot(p, wr_ref[...], preferred_element_type=jnp.float32) + br_ref[...]
    h = h * jax.nn.sigmoid(h)
    e = jnp.dot(h, we_ref[...], preferred_element_type=jnp.float32) + be_ref[...]
    s_ref[...] = jax.nn.sigmoid(e).reshape(s_ref.shape)


def se_mlp(pooled, wr, br, we, be):
    N, _, C1 = pooled.shape
    return pl.pallas_call(
        _se_mlp_kernel,
        out_shape=jax.ShapeDtypeStruct((N, 1, C1), jnp.float32),
        in_specs=[_VMEM_SPEC] * 5,
        out_specs=_VMEM_SPEC,
    )(pooled,
      wr.astype(jnp.float32), br.reshape(1, -1).astype(jnp.float32),
      we.astype(jnp.float32), be.reshape(1, -1).astype(jnp.float32))


# ----------------------------------------------------------------------------
# Fused: SE channel scale + (project*head) 1x1 conv + swish + global average pool
# ----------------------------------------------------------------------------

def _se_projhead_gap_kernel(inv_hw, x_ref, s_ref, w_ref, b_ref, o_ref):
    """x_ref: (TM, C1) bf16   s_ref: (1, C1) f32   w_ref: (C1, CH) bf16   b_ref: (1, CH) f32
       o_ref: (1, CH) f32 resident accumulator across the spatial grid axis."""
    m = pl.program_id(1)

    @pl.when(m == 0)
    def _():
        o_ref[...] = jnp.zeros_like(o_ref)

    a = x_ref[...].astype(jnp.float32) * s_ref[...]                 # SE scaling (free VPU)
    z = jnp.dot(a.astype(jnp.bfloat16), w_ref[...],
                preferred_element_type=jnp.float32) + b_ref[...]
    z = z * jax.nn.sigmoid(z)                                       # swish
    o_ref[...] += jnp.sum(z, axis=0, keepdims=True)                 # partial spatial sum

    @pl.when(m == pl.num_programs(1) - 1)
    def _():
        o_ref[...] = o_ref[...] * inv_hw                            # finalize mean


def se_projhead_gap(d_flat, s, w_comb, b_comb, tm=256):
    """d_flat: (N, HW, C1) bf16, s: (N, 1, C1) f32, w_comb: (C1, CH), b_comb: (CH,)
       -> pooled features (N, 1, CH) f32; the (N*HW, CH) activation never touches HBM."""
    N, HW, C1 = d_flat.shape
    CH = w_comb.shape[1]
    TM = tm if HW % tm == 0 else HW
    inv_hw = 1.0 / float(HW)
    return pl.pallas_call(
        functools.partial(_se_projhead_gap_kernel, inv_hw),
        out_shape=jax.ShapeDtypeStruct((N, 1, CH), jnp.float32),
        grid=(N, HW // TM),
        in_specs=[
            pl.BlockSpec((None, TM, C1), lambda b, m: (b, m, 0)),
            pl.BlockSpec((None, 1, C1), lambda b, m: (b, 0, 0)),
            pl.BlockSpec((C1, CH), lambda b, m: (0, 0)),
            pl.BlockSpec((1, CH), lambda b, m: (0, 0)),
        ],
        out_specs=pl.BlockSpec((None, 1, CH), lambda b, m: (b, 0, 0)),
        compiler_params=pltpu.CompilerParams(
            dimension_semantics=("parallel", "arbitrary")),
    )(d_flat, s.astype(jnp.float32), w_comb.astype(jnp.bfloat16),
      b_comb.reshape(1, CH).astype(jnp.float32))


# ----------------------------------------------------------------------------
# Parameter construction (deterministic, synthetic) + BatchNorm folding
# ----------------------------------------------------------------------------

def _fold_bn(w_oihw, gamma, beta, mean, var, eps=1e-3):
    scale = gamma / jnp.sqrt(var + eps)
    return w_oihw * scale[:, None, None, None], beta - mean * scale


def _bn_params(key, c):
    k1, k2, k3, k4 = jax.random.split(key, 4)
    gamma = 1.0 + 0.1 * jax.random.normal(k1, (c,))
    beta = 0.1 * jax.random.normal(k2, (c,))
    mean = 0.1 * jax.random.normal(k3, (c,))
    var = 0.5 + 0.1 * jnp.abs(jax.random.normal(k4, (c,)))
    return gamma, beta, mean, var


def init_params(key):
    C_STEM, C_PROJ, C_SE, C_HEAD, OUT = 32, 16, 8, 1280, 5
    keys = jax.random.split(key, 16)
    p = {}

    # stem: Conv2d(3, 32, 3, stride=2, pad=1, bias=False) + BN
    w = 0.1 * jax.random.normal(keys[0], (C_STEM, 3, 3, 3))
    p["stem_w"], p["stem_b"] = _fold_bn(w, *_bn_params(keys[1], C_STEM))

    # MBConv (expand_ratio=1): depthwise 3x3 + BN + swish
    w = 0.1 * jax.random.normal(keys[2], (C_STEM, 1, 3, 3))
    p["dw_w"], p["dw_b"] = _fold_bn(w, *_bn_params(keys[3], C_STEM))

    # SE: 1x1 reduce (32->8) swish, 1x1 expand (8->32) sigmoid (acts on pooled features)
    p["se_r_w"] = 0.1 * jax.random.normal(keys[4], (C_SE, C_STEM))
    p["se_r_b"] = 0.05 * jax.random.normal(keys[5], (C_SE,))
    p["se_e_w"] = 0.1 * jax.random.normal(keys[6], (C_STEM, C_SE))
    p["se_e_b"] = 0.05 * jax.random.normal(keys[7], (C_STEM,))

    # project: Conv2d(32, 16, 1, bias=False) + BN (no activation)
    w = 0.1 * jax.random.normal(keys[8], (C_PROJ, C_STEM, 1, 1))
    p["proj_w"], p["proj_b"] = _fold_bn(w, *_bn_params(keys[9], C_PROJ))

    # head: Conv2d(16, 1280, 1, bias=False) + BN + swish  (=> _fc.in_features == 1280)
    w = 0.05 * jax.random.normal(keys[10], (C_HEAD, C_PROJ, 1, 1))
    p["head_w"], p["head_b"] = _fold_bn(w, *_bn_params(keys[11], C_HEAD))

    # myfc: Linear(1280, 5)
    p["fc_w"] = 0.03 * jax.random.normal(keys[12], (OUT, C_HEAD))
    p["fc_b"] = 0.01 * jax.random.normal(keys[13], (OUT,))
    return p


# ----------------------------------------------------------------------------
# Forward pass (glue in plain JAX, hot paths in Pallas)
# ----------------------------------------------------------------------------

def forward(params, x_nchw):
    N, Cin, H, W = x_nchw.shape
    x = jnp.transpose(x_nchw, (0, 2, 3, 1)).astype(jnp.float32)       # -> NHWC

    # ---- stem: 3x3 / stride 2 / pad 1 conv via im2col + tiled bf16 Pallas matmul + swish
    Ho, Wo = H // 2, W // 2
    xp = jnp.pad(x, ((0, 0), (1, 1), (1, 1), (0, 0)))
    patches = [xp[:, ki:ki + 2 * Ho:2, kj:kj + 2 * Wo:2, :]
               for ki in range(3) for kj in range(3)]
    patches = jnp.concatenate(patches, axis=-1)                        # (N, Ho, Wo, 9*Cin)
    K_raw = 9 * Cin
    K_pad = ((K_raw + 31) // 32) * 32                                  # 27 -> 32 MXU alignment
    a = patches.reshape(N * Ho * Wo, K_raw)
    a = jnp.pad(a, ((0, 0), (0, K_pad - K_raw)))
    wm = jnp.transpose(params["stem_w"], (2, 3, 1, 0)).reshape(K_raw, -1)   # (9*Cin, 32)
    wm = jnp.pad(wm, ((0, K_pad - K_raw), (0, 0)))
    C1 = wm.shape[1]
    y = matmul_bias_act(a, wm, params["stem_b"], act="swish",
                        out_dtype=jnp.bfloat16)                        # (N*Ho*Wo, C1) bf16
    y = y.reshape(N, Ho, Wo, C1)

    # ---- MBConv: depthwise 3x3 (+BN+swish) fused with SE squeeze (spatial mean)
    dw_w = jnp.transpose(params["dw_w"][:, 0], (1, 2, 0))              # (3, 3, C1)
    d, pooled = dwconv3x3_swish_pool(y, dw_w, params["dw_b"])          # (N,Ho,Wo,C1) bf16, (N,1,C1)

    # ---- SE excite MLP (one kernel)
    s = se_mlp(pooled, params["se_r_w"].T, params["se_r_b"],
               params["se_e_w"].T, params["se_e_b"])                   # (N, 1, C1) f32

    # ---- fused: SE scale + (project @ head) 1x1 conv + swish + global average pool
    w_proj = params["proj_w"][:, :, 0, 0].T                            # (C1, 16)
    w_head = params["head_w"][:, :, 0, 0].T                            # (16, 1280)
    w_comb = jnp.dot(w_proj, w_head)                                   # (C1, 1280)  exact fusion
    b_comb = jnp.dot(params["proj_b"], w_head) + params["head_b"]      # (1280,)
    feat = se_projhead_gap(d.reshape(N, Ho * Wo, C1), s, w_comb, b_comb)   # (N, 1, 1280)
    feat = feat.reshape(N, -1)

    # ---- myfc: Linear(1280, 5), output lane-padded to 128 then sliced
    OUT = params["fc_w"].shape[0]
    w_fc = jnp.pad(params["fc_w"].T, ((0, 0), (0, 128 - OUT)))         # (1280, 128)
    b_fc = jnp.pad(params["fc_b"], (0, 128 - OUT))                     # (128,)
    logits = matmul_bias_act(feat, w_fc, b_fc, act="none",
                             out_dtype=jnp.float32)                    # (N, 128)
    return logits[:, :OUT]                                             # (N, 5)


if __name__ == "__main__":
    key = jax.random.PRNGKey(0)
    kx, kp = jax.random.split(key)
    x = jax.random.normal(kx, (2, 3, 32, 32), dtype=jnp.float32)       # NCHW like PyTorch
    params = init_params(kp)

    fwd = jax.jit(forward)
    out = jax.block_until_ready(fwd(params, x))
    assert out.shape == (2, 5), out.shape
    assert bool(jnp.all(jnp.isfinite(out)))
    print("KERNEL_OK")
</pallas_src>

<mosaic_0001>
module attributes {stable_mosaic.version = 11 : i64} {
  func.func @_mm_bias_act_kernel(%arg0: i32, %arg1: i32, %arg2: memref<256x32xbf16, #tpu.memory_space<vmem>>, %arg3: memref<32x32xbf16, #tpu.memory_space<vmem>>, %arg4: memref<1x32xf32, #tpu.memory_space<vmem>>, %arg5: memref<256x32xbf16, #tpu.memory_space<vmem>>) attributes {dimension_semantics = [#tpu.dimension_semantics<parallel>, #tpu.dimension_semantics<parallel>], iteration_bounds = array<i64: 2, 1>, scalar_prefetch = 0 : i64, scratch_operands = 0 : i64, tpu.core_type = #tpu.core_type<tc>, window_params = [{transform_indices = @transform_0, window_bounds = array<i64: 256, 32>}, {transform_indices = @transform_1, window_bounds = array<i64: 32, 32>}, {transform_indices = @transform_2, window_bounds = array<i64: 1, 32>}, {transform_indices = @transform_3, window_bounds = array<i64: 256, 32>}]} {
    %c0 = arith.constant 0 : index
    %c0_0 = arith.constant 0 : index
    %0 = vector.load %arg2[%c0, %c0_0] : memref<256x32xbf16, #tpu.memory_space<vmem>>, vector<256x32xbf16>
    %c0_1 = arith.constant 0 : index
    %c0_2 = arith.constant 0 : index
    %1 = vector.load %arg3[%c0_1, %c0_2] : memref<32x32xbf16, #tpu.memory_space<vmem>>, vector<32x32xbf16>
    %cst = arith.constant dense<0.000000e+00> : vector<256x32xf32>
    %2 = tpu.matmul %0, %1, %cst {dimension_numbers = #tpu.dot_dimension_numbers<[1], [0], [0], [1], [0, 0, 1, 1], [], []>} : vector<256x32xbf16>, vector<32x32xbf16>, vector<256x32xf32> -> vector<256x32xf32>
    %c0_3 = arith.constant 0 : index
    %c0_4 = arith.constant 0 : index
    %3 = vector.load %arg4[%c0_3, %c0_4] : memref<1x32xf32, #tpu.memory_space<vmem>>, vector<1x32xf32>
    %4 = vector.broadcast %3 : vector<1x32xf32> to vector<256x32xf32>
    %5 = arith.addf %2, %4 : vector<256x32xf32>
    %6 = arith.negf %5 : vector<256x32xf32>
    %7 = math.exp %6 : vector<256x32xf32>
    %cst_5 = arith.constant 1.000000e+00 : f32
    %8 = vector.broadcast %cst_5 : f32 to vector<256x32xf32>
    %9 = arith.addf %8, %7 : vector<256x32xf32>
    %10 = arith.divf %8, %9 : vector<256x32xf32>
    %11 = arith.mulf %5, %10 : vector<256x32xf32>
    %12 = arith.truncf %11 : vector<256x32xf32> to vector<256x32xbf16>
    %c0_6 = arith.constant 0 : index
    %c0_7 = arith.constant 0 : index
    %13 = vector.load %arg5[%c0_6, %c0_7] : memref<256x32xbf16, #tpu.memory_space<vmem>>, vector<256x32xbf16>
    tpu.vector_store %arg5[%c0_6, %c0_7], %12 {strides = array<i32>} : memref<256x32xbf16, #tpu.memory_space<vmem>>, vector<256x32xbf16>,
    return
  }
  func.func @transform_0(%arg0: i32, %arg1: i32) -> (i32, i32) {
    %c0_i32 = arith.constant 0 : i32
    %c0_i32_0 = arith.constant 0 : i32
    return %arg0, %c0_i32 : i32, i32
  }
  func.func @transform_1(%arg0: i32, %arg1: i32) -> (i32, i32) {
    %c0_i32 = arith.constant 0 : i32
    %c0_i32_0 = arith.constant 0 : i32
    return %c0_i32, %arg1 : i32, i32
  }
  func.func @transform_2(%arg0: i32, %arg1: i32) -> (i32, i32) {
    %c0_i32 = arith.constant 0 : i32
    %c0_i32_0 = arith.constant 0 : i32
    return %c0_i32, %arg1 : i32, i32
  }
  func.func @transform_3(%arg0: i32, %arg1: i32) -> (i32, i32) {
    %c0_i32 = arith.constant 0 : i32
    return %arg0, %arg1 : i32, i32
  }
}

module attributes {stable_mosaic.version = 11 : i64} {
  func.func @_dwconv_pool_kernel(%arg0: i32, %arg1: memref<1x18x18x32xbf16, #tpu.memory_space<vmem>>, %arg2: memref<3x3x32xf32, #tpu.memory_space<vmem>>, %arg3: memref<1x32xf32, #tpu.memory_space<vmem>>, %arg4: memref<1x16x16x32xbf16, #tpu.memory_space<vmem>>, %arg5: memref<1x1x32xf32, #tpu.memory_space<vmem>>) attributes {dimension_semantics = [#tpu.dimension_semantics<parallel>], iteration_bounds = array<i64: 2>, scalar_prefetch = 0 : i64, scratch_operands = 0 : i64, tpu.core_type = #tpu.core_type<tc>, window_params = [{transform_indices = @transform_0, window_bounds = array<i64: 1, 18, 18, 32>}, {pipeline_mode = #tpu.pipeline_mode<synchronous>, transform_indices = @transform_1, window_bounds = array<i64: 3, 3, 32>}, {pipeline_mode = #tpu.pipeline_mode<synchronous>, transform_indices = @transform_2, window_bounds = array<i64: 1, 32>}, {transform_indices = @transform_3, window_bounds = array<i64: 1, 16, 16, 32>}, {transform_indices = @transform_4, window_bounds = array<i64: 1, 1, 32>}]} {
    %c0 = arith.constant 0 : index
    %c0_0 = arith.constant 0 : index
    %c0_1 = arith.constant 0 : index
    %c0_2 = arith.constant 0 : index
    %0 = vector.load %arg1[%c0, %c0_0, %c0_1, %c0_2] : memref<1x18x18x32xbf16, #tpu.memory_space<vmem>>, vector<1x18x18x32xbf16>
    %1 = arith.extf %0 : vector<1x18x18x32xbf16> to vector<1x18x18x32xf32>
    %c0_3 = arith.constant 0 : index
    %c0_4 = arith.constant 0 : index
    %c0_5 = arith.constant 0 : index
    %2 = vector.load %arg2[%c0_3, %c0_4, %c0_5] : memref<3x3x32xf32, #tpu.memory_space<vmem>>, vector<3x3x32xf32>
    %cst = arith.constant 0.000000e+00 : f32
    %3 = vector.broadcast %cst : f32 to vector<1x16x16x32xf32>
    %4 = vector.extract_strided_slice %1 {offsets = [0, 0, 0, 0], sizes = [1, 16, 16, 32], strides = [1, 1, 1, 1]} : vector<1x18x18x32xf32> to vector<1x16x16x32xf32>
    %5 = vector.extract_strided_slice %2 {offsets = [0, 0, 0], sizes = [1, 1, 32], strides = [1, 1, 1]} : vector<3x3x32xf32> to vector<1x1x32xf32>
    %6 = vector.shape_cast %5 : vector<1x1x32xf32> to vector<32xf32>
    %7 = vector.shape_cast %6 : vector<32xf32> to vector<1x1x1x32xf32>
    %8 = vector.broadcast %7 : vector<1x1x1x32xf32> to vector<1x16x16x32xf32>
    %9 = arith.mulf %4, %8 : vector<1x16x16x32xf32>
    %10 = arith.addf %3, %9 : vector<1x16x16x32xf32>
    %11 = vector.extract_strided_slice %1 {offsets = [0, 0, 1, 0], sizes = [1, 16, 16, 32], strides = [1, 1, 1, 1]} : vector<1x18x18x32xf32> to vector<1x16x16x32xf32>
    %12 = vector.extract_strided_slice %2 {offsets = [0, 1, 0], sizes = [1, 1, 32], strides = [1, 1, 1]} : vector<3x3x32xf32> to vector<1x1x32xf32>
    %13 = vector.shape_cast %12 : vector<1x1x32xf32> to vector<32xf32>
    %14 = vector.shape_cast %13 : vector<32xf32> to vector<1x1x1x32xf32>
    %15 = vector.broadcast %14 : vector<1x1x1x32xf32> to vector<1x16x16x32xf32>
    %16 = arith.mulf %11, %15 : vector<1x16x16x32xf32>
    %17 = arith.addf %10, %16 : vector<1x16x16x32xf32>
    %18 = vector.extract_strided_slice %1 {offsets = [0, 0, 2, 0], sizes = [1, 16, 16, 32], strides = [1, 1, 1, 1]} : vector<1x18x18x32xf32> to vector<1x16x16x32xf32>
    %19 = vector.extract_strided_slice %2 {offsets = [0, 2, 0], sizes = [1, 1, 32], strides = [1, 1, 1]} : vector<3x3x32xf32> to vector<1x1x32xf32>
    %20 = vector.shape_cast %19 : vector<1x1x32xf32> to vector<32xf32>
    %21 = vector.shape_cast %20 : vector<32xf32> to vector<1x1x1x32xf32>
    %22 = vector.broadcast %21 : vector<1x1x1x32xf32> to vector<1x16x16x32xf32>
    %23 = arith.mulf %18, %22 : vector<1x16x16x32xf32>
    %24 = arith.addf %17, %23 : vector<1x16x16x32xf32>
    %25 = vector.extract_strided_slice %1 {offsets = [0, 1, 0, 0], sizes = [1, 16, 16, 32], strides = [1, 1, 1, 1]} : vector<1x18x18x32xf32> to vector<1x16x16x32xf32>
    %26 = vector.extract_strided_slice %2 {offsets = [1, 0, 0], sizes = [1, 1, 32], strides = [1, 1, 1]} : vector<3x3x32xf32> to vector<1x1x32xf32>
    %27 = vector.shape_cast %26 : vector<1x1x32xf32> to vector<32xf32>
    %28 = vector.shape_cast %27 : vector<32xf32> to vector<1x1x1x32xf32>
    %29 = vector.broadcast %28 : vector<1x1x1x32xf32> to vector<1x16x16x32xf32>
    %30 = arith.mulf %25, %29 : vector<1x16x16x32xf32>
    %31 = arith.addf %24, %30 : vector<1x16x16x32xf32>
    %32 = vector.extract_strided_slice %1 {offsets = [0, 1, 1, 0], sizes = [1, 16, 16, 32], strides = [1, 1, 1, 1]} : vector<1x18x18x32xf32> to vector<1x16x16x32xf32>
    %33 = vector.extract_strided_slice %2 {offsets = [1, 1, 0], sizes = [1, 1, 32], strides = [1, 1, 1]} : vector<3x3x32xf32> to vector<1x1x32xf32>
    %34 = vector.shape_cast %33 : vector<1x1x32xf32> to vector<32xf32>
    %35 = vector.shape_cast %34 : vector<32xf32> to vector<1x1x1x32xf32>
    %36 = vector.broadcast %35 : vector<1x1x1x32xf32> to vector<1x16x16x32xf32>
    %37 = arith.mulf %32, %36 : vector<1x16x16x32xf32>
    %38 = arith.addf %31, %37 : vector<1x16x16x32xf32>
    %39 = vector.extract_strided_slice %1 {offsets = [0, 1, 2, 0], sizes = [1, 16, 16, 32], strides = [1, 1, 1, 1]} : vector<1x18x18x32xf32> to vector<1x16x16x32xf32>
    %40 = vector.extract_strided_slice %2 {offsets = [1, 2, 0], sizes = [1, 1, 32], strides = [1, 1, 1]} : vector<3x3x32xf32> to vector<1x1x32xf32>
    %41 = vector.shape_cast %40 : vector<1x1x32xf32> to vector<32xf32>
    %42 = vector.shape_cast %41 : vector<32xf32> to vector<1x1x1x32xf32>
    %43 = vector.broadcast %42 : vector<1x1x1x32xf32> to vector<1x16x16x32xf32>
    %44 = arith.mulf %39, %43 : vector<1x16x16x32xf32>
    %45 = arith.addf %38, %44 : vector<1x16x16x32xf32>
    %46 = vector.extract_strided_slice %1 {offsets = [0, 2, 0, 0], sizes = [1, 16, 16, 32], strides = [1, 1, 1, 1]} : vector<1x18x18x32xf32> to vector<1x16x16x32xf32>
    %47 = vector.extract_strided_slice %2 {offsets = [2, 0, 0], sizes = [1, 1, 32], strides = [1, 1, 1]} : vector<3x3x32xf32> to vector<1x1x32xf32>
    %48 = vector.shape_cast %47 : vector<1x1x32xf32> to vector<32xf32>
    %49 = vector.shape_cast %48 : vector<32xf32> to vector<1x1x1x32xf32>
    %50 = vector.broadcast %49 : vector<1x1x1x32xf32> to vector<1x16x16x32xf32>
    %51 = arith.mulf %46, %50 : vector<1x16x16x32xf32>
    %52 = arith.addf %45, %51 : vector<1x16x16x32xf32>
    %53 = vector.extract_strided_slice %1 {offsets = [0, 2, 1, 0], sizes = [1, 16, 16, 32], strides = [1, 1, 1, 1]} : vector<1x18x18x32xf32> to vector<1x16x16x32xf32>
    %54 = vector.extract_strided_slice %2 {offsets = [2, 1, 0], sizes = [1, 1, 32], strides = [1, 1, 1]} : vector<3x3x32xf32> to vector<1x1x32xf32>
    %55 = vector.shape_cast %54 : vector<1x1x32xf32> to vector<32xf32>
    %56 = vector.shape_cast %55 : vector<32xf32> to vector<1x1x1x32xf32>
    %57 = vector.broadcast %56 : vector<1x1x1x32xf32> to vector<1x16x16x32xf32>
    %58 = arith.mulf %53, %57 : vector<1x16x16x32xf32>
    %59 = arith.addf %52, %58 : vector<1x16x16x32xf32>
    %60 = vector.extract_strided_slice %1 {offsets = [0, 2, 2, 0], sizes = [1, 16, 16, 32], strides = [1, 1, 1, 1]} : vector<1x18x18x32xf32> to vector<1x16x16x32xf32>
    %61 = vector.extract_strided_slice %2 {offsets = [2, 2, 0], sizes = [1, 1, 32], strides = [1, 1, 1]} : vector<3x3x32xf32> to vector<1x1x32xf32>
    %62 = vector.shape_cast %61 : vector<1x1x32xf32> to vector<32xf32>
    %63 = vector.shape_cast %62 : vector<32xf32> to vector<1x1x1x32xf32>
    %64 = vector.broadcast %63 : vector<1x1x1x32xf32> to vector<1x16x16x32xf32>
    %65 = arith.mulf %60, %64 : vector<1x16x16x32xf32>
    %66 = arith.addf %59, %65 : vector<1x16x16x32xf32>
    %c0_6 = arith.constant 0 : index
    %c0_7 = arith.constant 0 : index
    %67 = vector.load %arg3[%c0_6, %c0_7] : memref<1x32xf32, #tpu.memory_space<vmem>>, vector<1x32xf32>
    %68 = vector.shape_cast %67 : vector<1x32xf32> to vector<1x1x1x32xf32>
    %69 = vector.broadcast %68 : vector<1x1x1x32xf32> to vector<1x16x16x32xf32>
    %70 = arith.addf %66, %69 : vector<1x16x16x32xf32>
    %71 = arith.negf %70 : vector<1x16x16x32xf32>
    %72 = math.exp %71 : vector<1x16x16x32xf32>
    %cst_8 = arith.constant 1.000000e+00 : f32
    %73 = vector.broadcast %cst_8 : f32 to vector<1x16x16x32xf32>
    %74 = arith.addf %73, %72 : vector<1x16x16x32xf32>
    %75 = arith.divf %73, %74 : vector<1x16x16x32xf32>
    %76 = arith.mulf %70, %75 : vector<1x16x16x32xf32>
    %77 = arith.truncf %76 : vector<1x16x16x32xf32> to vector<1x16x16x32xbf16>
    %c0_9 = arith.constant 0 : index
    %c0_10 = arith.constant 0 : index
    %c0_11 = arith.constant 0 : index
    %c0_12 = arith.constant 0 : index
    %78 = vector.load %arg4[%c0_9, %c0_10, %c0_11, %c0_12] : memref<1x16x16x32xbf16, #tpu.memory_space<vmem>>, vector<1x16x16x32xbf16>
    tpu.vector_store %arg4[%c0_9, %c0_10, %c0_11, %c0_12], %77 {strides = array<i32>} : memref<1x16x16x32xbf16, #tpu.memory_space<vmem>>, vector<1x16x16x32xbf16>,
    %cst_13 = arith.constant dense<0.000000e+00> : vector<1x32xf32>
    %79 = vector.multi_reduction <add>, %76, %cst_13 [1, 2] : vector<1x16x16x32xf32> to vector<1x32xf32>
    %cst_14 = arith.constant 3.906250e-03 : f32
    %80 = vector.broadcast %cst_14 : f32 to vector<1x32xf32>
    %81 = arith.mulf %79, %80 : vector<1x32xf32>
    %82 = vector.shape_cast %81 : vector<1x32xf32> to vector<1x1x32xf32>
    %c0_15 = arith.constant 0 : index
    %c0_16 = arith.constant 0 : index
    %c0_17 = arith.constant 0 : index
    %83 = vector.load %arg5[%c0_15, %c0_16, %c0_17] : memref<1x1x32xf32, #tpu.memory_space<vmem>>, vector<1x1x32xf32>
    tpu.vector_store %arg5[%c0_15, %c0_16, %c0_17], %82 {strides = array<i32>} : memref<1x1x32xf32, #tpu.memory_space<vmem>>, vector<1x1x32xf32>,
    return
  }
  func.func @transform_0(%arg0: i32) -> (i32, i32, i32, i32) {
    %c0_i32 = arith.constant 0 : i32
    %c0_i32_0 = arith.constant 0 : i32
    %c0_i32_1 = arith.constant 0 : i32
    %c0_i32_2 = arith.constant 0 : i32
    return %arg0, %c0_i32, %c0_i32_0, %c0_i32_1 : i32, i32, i32, i32
  }
  func.func @transform_1(%arg0: i32) -> (i32, i32, i32) {
    %c0_i32 = arith.constant 0 : i32
    %c0_i32_0 = arith.constant 0 : i32
    %c0_i32_1 = arith.constant 0 : i32
    %c0_i32_2 = arith.constant 0 : i32
    return %c0_i32, %c0_i32_0, %c0_i32_1 : i32, i32, i32
  }
  func.func @transform_2(%arg0: i32) -> (i32, i32) {
    %c0_i32 = arith.constant 0 : i32
    %c0_i32_0 = arith.constant 0 : i32
    %c0_i32_1 = arith.constant 0 : i32
    return %c0_i32, %c0_i32_0 : i32, i32
  }
  func.func @transform_3(%arg0: i32) -> (i32, i32, i32, i32) {
    %c0_i32 = arith.constant 0 : i32
    %c0_i32_0 = arith.constant 0 : i32
    %c0_i32_1 = arith.constant 0 : i32
    %c0_i32_2 = arith.constant 0 : i32
    return %arg0, %c0_i32, %c0_i32_0, %c0_i32_1 : i32, i32, i32, i32
  }
  func.func @transform_4(%arg0: i32) -> (i32, i32, i32) {
    %c0_i32 = arith.constant 0 : i32
    %c0_i32_0 = arith.constant 0 : i32
    %c0_i32_1 = arith.constant 0 : i32
    return %arg0, %c0_i32, %c0_i32_0 : i32, i32, i32
  }
}

module attributes {stable_mosaic.version = 11 : i64} {
  func.func @_se_mlp_kernel(%arg0: memref<2x1x32xf32, #tpu.memory_space<vmem>>, %arg1: memref<32x8xf32, #tpu.memory_space<vmem>>, %arg2: memref<1x8xf32, #tpu.memory_space<vmem>>, %arg3: memref<8x32xf32, #tpu.memory_space<vmem>>, %arg4: memref<1x32xf32, #tpu.memory_space<vmem>>, %arg5: memref<2x1x32xf32, #tpu.memory_space<vmem>>) attributes {dimension_semantics = [], scalar_prefetch = 0 : i64, scratch_operands = 0 : i64, tpu.core_type = #tpu.core_type<tc>} {
    %c0 = arith.constant 0 : index
    %c0_0 = arith.constant 0 : index
    %c0_1 = arith.constant 0 : index
    %0 = vector.load %arg0[%c0, %c0_0, %c0_1] : memref<2x1x32xf32, #tpu.memory_space<vmem>>, vector<2x1x32xf32>
    %1 = vector.shape_cast %0 : vector<2x1x32xf32> to vector<2x32xf32>
    %c0_2 = arith.constant 0 : index
    %c0_3 = arith.constant 0 : index
    %2 = vector.load %arg1[%c0_2, %c0_3] : memref<32x8xf32, #tpu.memory_space<vmem>>, vector<32x8xf32>
    %cst = arith.constant dense<0.000000e+00> : vector<2x8xf32>
    %3 = tpu.matmul %1, %2, %cst {dimension_numbers = #tpu.dot_dimension_numbers<[1], [0], [0], [1], [0, 0, 1, 1], [], []>} : vector<2x32xf32>, vector<32x8xf32>, vector<2x8xf32> -> vector<2x8xf32>
    %c0_4 = arith.constant 0 : index
    %c0_5 = arith.constant 0 : index
    %4 = vector.load %arg2[%c0_4, %c0_5] : memref<1x8xf32, #tpu.memory_space<vmem>>, vector<1x8xf32>
    %5 = vector.broadcast %4 : vector<1x8xf32> to vector<2x8xf32>
    %6 = arith.addf %3, %5 : vector<2x8xf32>
    %7 = arith.negf %6 : vector<2x8xf32>
    %8 = math.exp %7 : vector<2x8xf32>
    %cst_6 = arith.constant 1.000000e+00 : f32
    %9 = vector.broadcast %cst_6 : f32 to vector<2x8xf32>
    %10 = arith.addf %9, %8 : vector<2x8xf32>
    %11 = arith.divf %9, %10 : vector<2x8xf32>
    %12 = arith.mulf %6, %11 : vector<2x8xf32>
    %c0_7 = arith.constant 0 : index
    %c0_8 = arith.constant 0 : index
    %13 = vector.load %arg3[%c0_7, %c0_8] : memref<8x32xf32, #tpu.memory_space<vmem>>, vector<8x32xf32>
    %cst_9 = arith.constant dense<0.000000e+00> : vector<2x32xf32>
    %14 = tpu.matmul %12, %13, %cst_9 {dimension_numbers = #tpu.dot_dimension_numbers<[1], [0], [0], [1], [0, 0, 1, 1], [], []>} : vector<2x8xf32>, vector<8x32xf32>, vector<2x32xf32> -> vector<2x32xf32>
    %c0_10 = arith.constant 0 : index
    %c0_11 = arith.constant 0 : index
    %15 = vector.load %arg4[%c0_10, %c0_11] : memref<1x32xf32, #tpu.memory_space<vmem>>, vector<1x32xf32>
    %16 = vector.broadcast %15 : vector<1x32xf32> to vector<2x32xf32>
    %17 = arith.addf %14, %16 : vector<2x32xf32>
    %18 = arith.negf %17 : vector<2x32xf32>
    %19 = math.exp %18 : vector<2x32xf32>
    %cst_12 = arith.constant 1.000000e+00 : f32
    %20 = vector.broadcast %cst_12 : f32 to vector<2x32xf32>
    %21 = arith.addf %20, %19 : vector<2x32xf32>
    %22 = arith.divf %20, %21 : vector<2x32xf32>
    %23 = vector.shape_cast %22 : vector<2x32xf32> to vector<2x1x32xf32>
    %c0_13 = arith.constant 0 : index
    %c0_14 = arith.constant 0 : index
    %c0_15 = arith.constant 0 : index
    %24 = vector.load %arg5[%c0_13, %c0_14, %c0_15] : memref<2x1x32xf32, #tpu.memory_space<vmem>>, vector<2x1x32xf32>
    tpu.vector_store %arg5[%c0_13, %c0_14, %c0_15], %23 {strides = array<i32>} : memref<2x1x32xf32, #tpu.memory_space<vmem>>, vector<2x1x32xf32>,
    return
  }
}

module attributes {stable_mosaic.version = 11 : i64} {
  func.func @_se_projhead_gap_kernel(%arg0: i32, %arg1: i32, %arg2: memref<1x256x32xbf16, #tpu.memory_space<vmem>>, %arg3: memref<1x1x32xf32, #tpu.memory_space<vmem>>, %arg4: memref<32x1280xbf16, #tpu.memory_space<vmem>>, %arg5: memref<1x1280xf32, #tpu.memory_space<vmem>>, %arg6: memref<1x1x1280xf32, #tpu.memory_space<vmem>>) attributes {dimension_semantics = [#tpu.dimension_semantics<parallel>, #tpu.dimension_semantics<arbitrary>], iteration_bounds = array<i64: 2, 1>, scalar_prefetch = 0 : i64, scratch_operands = 0 : i64, tpu.core_type = #tpu.core_type<tc>, window_params = [{transform_indices = @transform_0, window_bounds = array<i64: 1, 256, 32>}, {transform_indices = @transform_1, window_bounds = array<i64: 1, 1, 32>}, {pipeline_mode = #tpu.pipeline_mode<synchronous>, transform_indices = @transform_2, window_bounds = array<i64: 32, 1280>}, {pipeline_mode = #tpu.pipeline_mode<synchronous>, transform_indices = @transform_3, window_bounds = array<i64: 1, 1280>}, {transform_indices = @transform_4, window_bounds = array<i64: 1, 1, 1280>}]} {
    %c0_i32 = arith.constant 0 : i32
    %0 = arith.cmpi eq, %arg1, %c0_i32 : i32
    %1 = arith.extui %0 : i1 to i32
    %c0_i32_0 = arith.constant 0 : i32
    %2 = arith.cmpi ne, %1, %c0_i32_0 : i32
    scf.if %2 {
      %cst_20 = arith.constant 0.000000e+00 : f32
      %33 = vector.broadcast %cst_20 : f32 to vector<1x1280xf32>
      %c0_21 = arith.constant 0 : index
      %c0_22 = arith.constant 0 : index
      %c0_23 = arith.constant 0 : index
      %34 = vector.load %arg6[%c0_21, %c0_22, %c0_23] : memref<1x1x1280xf32, #tpu.memory_space<vmem>>, vector<1x1x1280xf32>
      %35 = vector.shape_cast %34 : vector<1x1x1280xf32> to vector<1x1280xf32>
      %36 = vector.shape_cast %33 : vector<1x1280xf32> to vector<1x1x1280xf32>
      tpu.vector_store %arg6[%c0_21, %c0_22, %c0_23], %36 {strides = array<i32>} : memref<1x1x1280xf32, #tpu.memory_space<vmem>>, vector<1x1x1280xf32>,
    } else {
    }
    %c0 = arith.constant 0 : index
    %c0_1 = arith.constant 0 : index
    %c0_2 = arith.constant 0 : index
    %3 = vector.load %arg2[%c0, %c0_1, %c0_2] : memref<1x256x32xbf16, #tpu.memory_space<vmem>>, vector<1x256x32xbf16>
    %4 = vector.shape_cast %3 : vector<1x256x32xbf16> to vector<256x32xbf16>
    %5 = arith.extf %4 : vector<256x32xbf16> to vector<256x32xf32>
    %c0_3 = arith.constant 0 : index
    %c0_4 = arith.constant 0 : index
    %c0_5 = arith.constant 0 : index
    %6 = vector.load %arg3[%c0_3, %c0_4, %c0_5] : memref<1x1x32xf32, #tpu.memory_space<vmem>>, vector<1x1x32xf32>
    %7 = vector.shape_cast %6 : vector<1x1x32xf32> to vector<1x32xf32>
    %8 = vector.broadcast %7 : vector<1x32xf32> to vector<256x32xf32>
    %9 = arith.mulf %5, %8 : vector<256x32xf32>
    %10 = arith.truncf %9 : vector<256x32xf32> to vector<256x32xbf16>
    %c0_6 = arith.constant 0 : index
    %c0_7 = arith.constant 0 : index
    %11 = vector.load %arg4[%c0_6, %c0_7] : memref<32x1280xbf16, #tpu.memory_space<vmem>>, vector<32x1280xbf16>
    %cst = arith.constant dense<0.000000e+00> : vector<256x1280xf32>
    %12 = tpu.matmul %10, %11, %cst {dimension_numbers = #tpu.dot_dimension_numbers<[1], [0], [0], [1], [0, 0, 1, 1], [], []>} : vector<256x32xbf16>, vector<32x1280xbf16>, vector<256x1280xf32> -> vector<256x1280xf32>
    %c0_8 = arith.constant 0 : index
    %c0_9 = arith.constant 0 : index
    %13 = vector.load %arg5[%c0_8, %c0_9] : memref<1x1280xf32, #tpu.memory_space<vmem>>, vector<1x1280xf32>
    %14 = vector.broadcast %13 : vector<1x1280xf32> to vector<256x1280xf32>
    %15 = arith.addf %12, %14 : vector<256x1280xf32>
    %16 = arith.negf %15 : vector<256x1280xf32>
    %17 = math.exp %16 : vector<256x1280xf32>
    %cst_10 = arith.constant 1.000000e+00 : f32
    %18 = vector.broadcast %cst_10 : f32 to vector<256x1280xf32>
    %19 = arith.addf %18, %17 : vector<256x1280xf32>
    %20 = arith.divf %18, %19 : vector<256x1280xf32>
    %21 = arith.mulf %15, %20 : vector<256x1280xf32>
    %c0_11 = arith.constant 0 : index
    %c0_12 = arith.constant 0 : index
    %c0_13 = arith.constant 0 : index
    %22 = vector.load %arg6[%c0_11, %c0_12, %c0_13] : memref<1x1x1280xf32, #tpu.memory_space<vmem>>, vector<1x1x1280xf32>
    %23 = vector.shape_cast %22 : vector<1x1x1280xf32> to vector<1x1280xf32>
    %cst_14 = arith.constant dense<0.000000e+00> : vector<1280xf32>
    %24 = vector.multi_reduction <add>, %21, %cst_14 [0] : vector<256x1280xf32> to vector<1280xf32>
    %25 = vector.shape_cast %24 : vector<1280xf32> to vector<1x1280xf32>
    %26 = arith.addf %23, %25 : vector<1x1280xf32>
    %c0_15 = arith.constant 0 : index
    %c0_16 = arith.constant 0 : index
    %c0_17 = arith.constant 0 : index
    %27 = vector.load %arg6[%c0_15, %c0_16, %c0_17] : memref<1x1x1280xf32, #tpu.memory_space<vmem>>, vector<1x1x1280xf32>
    %28 = vector.shape_cast %27 : vector<1x1x1280xf32> to vector<1x1280xf32>
    %29 = vector.shape_cast %26 : vector<1x1280xf32> to vector<1x1x1280xf32>
    tpu.vector_store %arg6[%c0_15, %c0_16, %c0_17], %29 {strides = array<i32>} : memref<1x1x1280xf32, #tpu.memory_space<vmem>>, vector<1x1x1280xf32>,
    %c0_i32_18 = arith.constant 0 : i32
    %30 = arith.cmpi eq, %arg1, %c0_i32_18 : i32
    %31 = arith.extui %30 : i1 to i32
    %c0_i32_19 = arith.constant 0 : i32
    %32 = arith.cmpi ne, %31, %c0_i32_19 : i32
    scf.if %32 {
      %c0_20 = arith.constant 0 : index
      %c0_21 = arith.constant 0 : index
      %c0_22 = arith.constant 0 : index
      %33 = vector.load %arg6[%c0_20, %c0_21, %c0_22] : memref<1x1x1280xf32, #tpu.memory_space<vmem>>, vector<1x1x1280xf32>
      %34 = vector.shape_cast %33 : vector<1x1x1280xf32> to vector<1x1280xf32>
      %cst_23 = arith.constant 3.906250e-03 : f32
      %35 = vector.broadcast %cst_23 : f32 to vector<1x1280xf32>
      %36 = arith.mulf %34, %35 : vector<1x1280xf32>
      %c0_24 = arith.constant 0 : index
      %c0_25 = arith.constant 0 : index
      %c0_26 = arith.constant 0 : index
      %37 = vector.load %arg6[%c0_24, %c0_25, %c0_26] : memref<1x1x1280xf32, #tpu.memory_space<vmem>>, vector<1x1x1280xf32>
      %38 = vector.shape_cast %37 : vector<1x1x1280xf32> to vector<1x1280xf32>
      %39 = vector.shape_cast %36 : vector<1x1280xf32> to vector<1x1x1280xf32>
      tpu.vector_store %arg6[%c0_24, %c0_25, %c0_26], %39 {strides = array<i32>} : memref<1x1x1280xf32, #tpu.memory_space<vmem>>, vector<1x1x1280xf32>,
    } else {
    }
    return
  }
  func.func @transform_0(%arg0: i32, %arg1: i32) -> (i32, i32, i32) {
    %c0_i32 = arith.constant 0 : i32
    %c0_i32_0 = arith.constant 0 : i32
    return %arg0, %arg1, %c0_i32 : i32, i32, i32
  }
  func.func @transform_1(%arg0: i32, %arg1: i32) -> (i32, i32, i32) {
    %c0_i32 = arith.constant 0 : i32
    %c0_i32_0 = arith.constant 0 : i32
    %c0_i32_1 = arith.constant 0 : i32
    return %arg0, %c0_i32, %c0_i32_0 : i32, i32, i32
  }
  func.func @transform_2(%arg0: i32, %arg1: i32) -> (i32, i32) {
    %c0_i32 = arith.constant 0 : i32
    %c0_i32_0 = arith.constant 0 : i32
    %c0_i32_1 = arith.constant 0 : i32
    return %c0_i32, %c0_i32_0 : i32, i32
  }
  func.func @transform_3(%arg0: i32, %arg1: i32) -> (i32, i32) {
    %c0_i32 = arith.constant 0 : i32
    %c0_i32_0 = arith.constant 0 : i32
    %c0_i32_1 = arith.constant 0 : i32
    return %c0_i32, %c0_i32_0 : i32, i32
  }
  func.func @transform_4(%arg0: i32, %arg1: i32) -> (i32, i32, i32) {
    %c0_i32 = arith.constant 0 : i32
    %c0_i32_0 = arith.constant 0 : i32
    %c0_i32_1 = arith.constant 0 : i32
    return %arg0, %c0_i32, %c0_i32_0 : i32, i32, i32
  }
}

module attributes {stable_mosaic.version = 11 : i64} {
  func.func @_mm_bias_act_kernel(%arg0: i32, %arg1: i32, %arg2: memref<2x1280xbf16, #tpu.memory_space<vmem>>, %arg3: memref<1280x128xbf16, #tpu.memory_space<vmem>>, %arg4: memref<1x128xf32, #tpu.memory_space<vmem>>, %arg5: memref<2x128xf32, #tpu.memory_space<vmem>>) attributes {dimension_semantics = [#tpu.dimension_semantics<parallel>, #tpu.dimension_semantics<parallel>], iteration_bounds = array<i64: 1, 1>, scalar_prefetch = 0 : i64, scratch_operands = 0 : i64, tpu.core_type = #tpu.core_type<tc>, window_params = [{transform_indices = @transform_0, window_bounds = array<i64: 2, 1280>}, {transform_indices = @transform_1, window_bounds = array<i64: 1280, 128>}, {transform_indices = @transform_2, window_bounds = array<i64: 1, 128>}, {transform_indices = @transform_3, window_bounds = array<i64: 2, 128>}]} {
    %c0 = arith.constant 0 : index
    %c0_0 = arith.constant 0 : index
    %0 = vector.load %arg2[%c0, %c0_0] : memref<2x1280xbf16, #tpu.memory_space<vmem>>, vector<2x1280xbf16>
    %c0_1 = arith.constant 0 : index
    %c0_2 = arith.constant 0 : index
    %1 = vector.load %arg3[%c0_1, %c0_2] : memref<1280x128xbf16, #tpu.memory_space<vmem>>, vector<1280x128xbf16>
    %cst = arith.constant dense<0.000000e+00> : vector<2x128xf32>
    %2 = tpu.matmul %0, %1, %cst {dimension_numbers = #tpu.dot_dimension_numbers<[1], [0], [0], [1], [0, 0, 1, 1], [], []>} : vector<2x1280xbf16>, vector<1280x128xbf16>, vector<2x128xf32> -> vector<2x128xf32>
    %c0_3 = arith.constant 0 : index
    %c0_4 = arith.constant 0 : index
    %3 = vector.load %arg4[%c0_3, %c0_4] : memref<1x128xf32, #tpu.memory_space<vmem>>, vector<1x128xf32>
    %4 = vector.broadcast %3 : vector<1x128xf32> to vector<2x128xf32>
    %5 = arith.addf %2, %4 : vector<2x128xf32>
    %c0_5 = arith.constant 0 : index
    %c0_6 = arith.constant 0 : index
    %6 = vector.load %arg5[%c0_5, %c0_6] : memref<2x128xf32, #tpu.memory_space<vmem>>, vector<2x128xf32>
    tpu.vector_store %arg5[%c0_5, %c0_6], %5 {strides = array<i32>} : memref<2x128xf32, #tpu.memory_space<vmem>>, vector<2x128xf32>,
    return
  }
  func.func @transform_0(%arg0: i32, %arg1: i32) -> (i32, i32) {
    %c0_i32 = arith.constant 0 : i32
    %c0_i32_0 = arith.constant 0 : i32
    return %arg0, %c0_i32 : i32, i32
  }
  func.func @transform_1(%arg0: i32, %arg1: i32) -> (i32, i32) {
    %c0_i32 = arith.constant 0 : i32
    %c0_i32_0 = arith.constant 0 : i32
    return %c0_i32, %arg1 : i32, i32
  }
  func.func @transform_2(%arg0: i32, %arg1: i32) -> (i32, i32) {
    %c0_i32 = arith.constant 0 : i32
    %c0_i32_0 = arith.constant 0 : i32
    return %c0_i32, %arg1 : i32, i32
  }
  func.func @transform_3(%arg0: i32, %arg1: i32) -> (i32, i32) {
    %c0_i32 = arith.constant 0 : i32
    return %arg0, %arg1 : i32, i32
  }
}

</mosaic_0001>

<bundles_post_ra>
// kernel: forward.7
= control target key start
LH: loop header
LB: loop body
LE: loop exit
PB: predicated region body
PF: predicated region fallthrough
CT: control target
= control target key end

     0   :  { %v297_v0 = vmov 0.0|0.0   ;;  %vm298_vm0 = vmmov 0   ;;  %v299_v4 = vmov 0.0   ;;  %v300_v5 = vmov 1966171168   ;;  %s364_s1 = inlined_call_operand.vmem [shape: f32[32,8], index: 1, kind: input, shape index: {}]   ;;  %s365_s0 = inlined_call_operand.vmem [shape: f32[2,1,32], index: 0, kind: input, shape index: {}]   ;;  %s366_s3 = inlined_call_operand.vmem [shape: f32[8,32], index: 3, kind: input, shape index: {}]   ;;  %s367_s2 = inlined_call_operand.vmem [shape: f32[1,8], index: 2, kind: input, shape index: {}]   ;;  %s368_s4 = inlined_call_operand.vmem [shape: f32[1,32], index: 4, kind: input, shape index: {}]   ;;  %s369_s5 = inlined_call_operand.vmem [shape: f32[2,1,32], index: 5, kind: output, shape index: {}]  }
   0x1   :  { %279 = vmatprep.subr.bf16.mxu0 %v297_v0  ;;  %v22_v1 = vld [vmem:[%s364_s1] sm:$0xff]  ;;  %v23_v2 = vld [vmem:[%s364_s1 + $0x8] sm:$0xff]  ;;  %v24_v3 = vld [vmem:[%s364_s1 + $0x10] sm:$0xff]  ;;  %271 = vmatprep.mubr.msk.f32.mxu0 %vm298_vm0, %v299_v4  ;;  %v37_v6 = vunpack.c.l.s4 %v300_v5  ;;  %v39_v7 = vlaneseq  ;;  %vm50_vm1 = vcmask 261120   ;;  %vm138_vm2 = vcmask 64512  }
   0x2   :  { %v280_v8 = vpack.c.bf16 %v23_v2, %v22_v1  ;;  %v25_v9 = vld [vmem:[%s364_s1 + $0x18] sm:$0xff]  ;;  %v20_v10 = vld [vmem:[%s365_s0] sm:$0x1]  ;;  %v21_v11 = vld [vmem:[%s365_s0 + $0x1] sm:$0x1]  ;;  %274 = vmatprep.subr.mxu1 %v299_v4  ;;  %276 = vmatprep.mubr.msk.f32.mxu1 %vm298_vm0, %v299_v4  ;;  %vm243_vm3 = vcmask 253952  }
   0x3   :  { %v35_v12 = vcombine.low %v20_v10, %v21_v11  ;;  %v38_v13 = vunpack.c.0.s8 %v37_v6  ;;  %v40_v14 = vshrl.u32 %v39_v7, 7  ;;  %v283_v15 = vpack.c.bf16 %v25_v9, %v24_v3  ;;  %v130_v19 = vld [vmem:[%s366_s3] sm:$0xff] }
   0x4   :  { %281 = vmatpush3.bf16.msra.mxu0 %v280_v8  ;;  %275 = vmatpush3.msra.mxu1 %v130_v19  ;;  %v250_v20 = vld [vmem:[%s367_s2] ss:$0 sm:$0xff] }
   0x5   :  { %282 = vmatprep.subr.bf16.mxu0 %v297_v0  ;;  %v41_v16 = vsub.s32 %v38_v13, %v40_v14  ;;  %v253_v29 = vld [vmem:[%s368_s4] ss:$0 sm:$0xff] }
   0x7   :  { %v42_v17 = vrot.slane %v35_v12, %v41_v16 }
   0x8   :  { %284 = vmatpush3.bf16.msra.mxu0 %v283_v15 }
   0x9   :  { %v49_v18 = vrot.slane %v42_v17, %v41_v16 }
   0xb   :  { %272 = vmatmul.mubr.msk.f32.vlgmr.msra.gmra.mrb[0].mxu0 %vm50_vm1, %v49_v18 }
  0xde   :  { %v119_v21 = vpop.f32.mrb[0].mxu0 }
  0xdf   :  { %v120_v22 = vadd.f32 %v250_v20, %v119_v21  ;;  %v273_v23 = vpop.f32.mrb[1].mxu0 }
  0xe1   :  { %v252_v24 = vmul.f32 -1.442695, %v120_v22 }
  0xe3   :  { %289 = vpow2.f32 %v252_v24 }
  0xed   :  { %v290_v25 = vpop.eup %289 }
  0xee   :  { %v126_v26 = vadd.f32 1.0, %v290_v25 }
  0xf0   :  { %291 = vrcp.f32 %v126_v26 }
  0xfa   :  { %v292_v27 = vpop.eup %291 }
  0xfb   :  { %v129_v28 = vmul.f32 %v292_v27, %v120_v22 }
  0xfd   :  { %277 = vmatmul.mubr.msk.f32.vlgmr.msra.gmra.mrb[0].mxu1 %vm138_vm2, %v129_v28 }
 0x1d0   :  { %v208_v30 = vpop.f32.mrb[0].mxu1 }
 0x1d1   :  { %v209_v31 = vadd.f32 %v253_v29, %v208_v30  ;;  %v278_v32 = vpop.f32.mrb[1].mxu1 }
 0x1d3   :  { %v255_v33 = vmul.f32 -1.442695, %v209_v31 }
 0x1d5   :  { %293 = vpow2.f32 %v255_v33 }
 0x1df   :  { %v294_v34 = vpop.eup %293 }
 0x1e0   :  { %v215_v35 = vadd.f32 1.0, %v294_v34 }
 0x1e2   :  { %295 = vrcp.f32 %v215_v35 }
 0x1ec   :  { %v296_v36 = vpop.eup %295 }
 0x1ed   :  { %v225_v37 = vrot.slane %v296_v36, %v41_v16 }
 0x1ef   :  { %v226_v38 = vcombine.high %v225_v37, %v225_v37  ;;  %v233_v39 = vrot.slane %v225_v37, %v41_v16 }
 0x1f1   :  { %v240_v40 = vrot.slane %v226_v38, %v41_v16  ;;  %244 = vst.msk [vmem:[%s369_s5] sm:$0x1] %vm243_vm3, %v233_v39 }
 0x1f3   :  { %245 = vst.msk [vmem:[%s369_s5 + $0x1] sm:$0x1] %vm243_vm3, %v240_v40 }

// kernel: forward.5
= control target key start
LH: loop header
LB: loop body
LE: loop exit
PB: predicated region body
PF: predicated region fallthrough
CT: control target
= control target key end

     0   :  { %s1474_s12 = smov 0   ;;  %s1476_s13 = smov 0   ;;  %s1806_s0 = inlined_call_operand.vmem [shape: bf16[512,32], index: 0, kind: input, shape index: {}]   ;;  %s1807_s1 = inlined_call_operand.vmem [shape: bf16[32,32], index: 1, kind: input, shape index: {}]   ;;  %s1808_s2 = inlined_call_operand.vmem [shape: f32[1,32], index: 2, kind: input, shape index: {}]   ;;  %s1809_s3 = inlined_call_operand.vmem [shape: bf16[512,32], index: 3, kind: output, shape index: {}]  }
   0x1   :  { %s1478_s14 = smov 0  }
   0x2 LB: > { %s25_s15 = sadd.s32 1, %s1448_s13  ;;  %p1064_p0 = scmp.ge.s32.totalorder %s1452_s14, 1  ;;  %s1452_s14 = sphi %s1478_s14, %s13_s14   ;;  %s1448_s13 = sphi %s1476_s13, %s1811_s13   ;;  %s1444_s12 = sphi %s1474_s12, %s1810_s12  }
   0x3   : > { %p27_p1 = scmp.ge.s32.totalorder %s25_s15, 2  ;;  %p169_p2 = scmp.lt.s32.totalorder %s1452_s14, 3 }
   0x5   : > { %s1813_s15 = smov (%p27_p1, %s25_s15), 0  ;;  %p170_p3 = pnand %p1064_p0, %p169_p2 }
   0x6   : > { %v1284_v0 = vld [vmem:[%s1807_s1] sm:$0xff] (!%p170_p3)   ;;  %s1065_s18 = sshll.u32 (!%p170_p3), %s1444_s12, 5  ;;  %v1285_v1 = vld [vmem:[%s1807_s1 + $0x8] sm:$0xff] (!%p170_p3)   ;;  %vm361_vm0 = vcmask (!%p170_p3), 261120   ;;  %vm923_vm1 = vcmask (!%p170_p3), 257024  }
   0x7   : > { %173 = sbr.rel (%p170_p3) target bundleno = 323 (0x143), region = 32  ;;  %p204_p4 = scmp.lt.s32.totalorder (!%p170_p3), %s1065_s18, 63  ;;  %1220 = vmatprep.subr.bf16.mxu0 (!%p170_p3), %v1284_v0  ;;  %1256 = vmatprep.subr.bf16.mxu1 (!%p170_p3), %v1284_v0  ;;  %v1543_v18 = vld [vmem:[%s1808_s2] ss:$0 sm:$0xff] (!%p170_p3) }
   0x8   : > { %1221 = vmatpush3.bf16.msra.mxu0 (!%p170_p3), %v1284_v0  ;;  %1258 = vmatpush3.bf16.msra.mxu1 (!%p170_p3), %v1284_v0 }
   0x9   : > { %1222 = vmatprep.subr.bf16.mxu0 (!%p170_p3), %v1285_v1  ;;  %1257 = vmatprep.subr.bf16.mxu1 (!%p170_p3), %v1285_v1 }
   0xc   : > { %1223 = vmatpush3.bf16.msra.mxu0 (!%p170_p3), %v1285_v1  ;;  %1259 = vmatpush3.bf16.msra.mxu1 (!%p170_p3), %v1285_v1 }
   0xe   : > { %s1815_s18 = smov (!%p204_p4, %s1065_s18), 63 }
   0xf   : > { %s1066_s21 = sshll.u32 %s1815_s18, 2 }
  0x10   : > { %s1506_s24 = scalar_lea.vmem %s1806_s0, %s1066_s21  ;;  %s1650_s29 = scalar_lea.vmem %s1809_s3, %s1066_s21 }
  0x11   : > { %v1286_v2 = vld [vmem:[%s1506_s24] sm:$0xff]   ;;  %v1288_v4 = vld [vmem:[%s1506_s24 + $0x8] sm:$0xff]   ;;  %v1290_v6 = vld [vmem:[%s1506_s24 + $0x10] sm:$0xff]  }
  0x12   : > { %v1287_v3 = vld [vmem:[%s1506_s24 + $0x40] sm:$0xff]   ;;  %1224 = vmatprep.mubr.msk.bf16.mxu0 %vm361_vm0, %v1286_v2  ;;  %v1289_v5 = vld [vmem:[%s1506_s24 + $0x48] sm:$0xff]   ;;  %v1291_v7 = vld [vmem:[%s1506_s24 + $0x50] sm:$0xff]  }
  0x13   : > { %1240 = vmatprep.mubr.msk.bf16.mxu1 %vm361_vm0, %v1287_v3  ;;  %1225 = vmatmul.mubr.msk.bf16.vlgmr.msra.gmra.mrb[0].mxu0 %vm361_vm0, %v1288_v4  ;;  %v1292_v8 = vld [vmem:[%s1506_s24 + $0x18] sm:$0xff]   ;;  %v1294_v10 = vld [vmem:[%s1506_s24 + $0x20] sm:$0xff]   ;;  %v1296_v12 = vld [vmem:[%s1506_s24 + $0x28] sm:$0xff]  }
  0x14   : > { %1241 = vmatmul.mubr.msk.bf16.vlgmr.msra.gmra.mrb[0].mxu1 %vm361_vm0, %v1289_v5  ;;  %1228 = vmatprep.mubr.msk.bf16.mxu0 %vm361_vm0, %v1290_v6  ;;  %v1293_v9 = vld [vmem:[%s1506_s24 + $0x58] sm:$0xff]   ;;  %v1295_v11 = vld [vmem:[%s1506_s24 + $0x60] sm:$0xff]   ;;  %v1297_v13 = vld [vmem:[%s1506_s24 + $0x68] sm:$0xff]  }
  0x15   : > { %1244 = vmatprep.mubr.msk.bf16.mxu1 %vm361_vm0, %v1291_v7  ;;  %v1298_v14 = vld [vmem:[%s1506_s24 + $0x30] sm:$0xff]   ;;  %v1300_v16 = vld [vmem:[%s1506_s24 + $0x38] sm:$0xff]  }
  0x16   : > { %v1299_v15 = vld [vmem:[%s1506_s24 + $0x70] sm:$0xff]   ;;  %v1301_v17 = vld [vmem:[%s1506_s24 + $0x78] sm:$0xff]  }
  0x1b   : > { %1229 = vmatmul.mubr.msk.bf16.gmra.mrb[4].mxu0 %vm361_vm0, %v1292_v8 }
  0x1c   : > { %1245 = vmatmul.mubr.msk.bf16.gmra.mrb[4].mxu1 %vm361_vm0, %v1293_v9  ;;  %1232 = vmatprep.mubr.msk.bf16.mxu0 %vm361_vm0, %v1294_v10 }
  0x1d   : > { %1248 = vmatprep.mubr.msk.bf16.mxu1 %vm361_vm0, %v1295_v11 }
  0x23   : > { %1233 = vmatmul.mubr.msk.bf16.gmra.mrb[8].mxu0 %vm361_vm0, %v1296_v12 }
  0x24   : > { %1249 = vmatmul.mubr.msk.bf16.gmra.mrb[8].mxu1 %vm361_vm0, %v1297_v13  ;;  %1236 = vmatprep.mubr.msk.bf16.mxu0 %vm361_vm0, %v1298_v14 }
  0x25   : > { %1252 = vmatprep.mubr.msk.bf16.mxu1 %vm361_vm0, %v1299_v15 }
  0x2b   : > { %1237 = vmatmul.mubr.msk.bf16.gmra.mrb[12].mxu0 %vm361_vm0, %v1300_v16 }
  0x2c   : > { %1253 = vmatmul.mubr.msk.bf16.gmra.mrb[12].mxu1 %vm361_vm0, %v1301_v17 }
  0xe6   : > { %v1226_v19 = vpop.f32.mrb[0].mxu0 }
  0xe7   : > { %v1546_v20 = vadd.f32 %v1226_v19, %v1543_v18  ;;  %v1242_v21 = vpop.f32.mrb[0].mxu1  ;;  %v444_v22 = vpop.f32.mrb[1].mxu0 }
  0xe8   : > { %v1549_v23 = vadd.f32 %v1242_v21, %v1543_v18  ;;  %v1552_v24 = vadd.f32 %v1543_v18, %v444_v22  ;;  %v508_v25 = vpop.f32.mrb[1].mxu1  ;;  %v1227_v26 = vpop.f32.mrb[2].mxu0 }
  0xe9   : > { %v1106_v27 = vmul.f32 -1.442695, %v1546_v20  ;;  %v1556_v28 = vadd.f32 %v1543_v18, %v508_v25  ;;  %v1559_v29 = vadd.f32 %v1227_v26, %v1543_v18  ;;  %v1243_v30 = vpop.f32.mrb[2].mxu1  ;;  %v447_v31 = vpop.f32.mrb[3].mxu0 }
  0xea   : > { %v1122_v32 = vmul.f32 -1.442695, %v1549_v23  ;;  %v1104_v33 = vmul.f32 -1.442695, %v1552_v24  ;;  %v1564_v34 = vadd.f32 %v1243_v30, %v1543_v18  ;;  %v1567_v35 = vadd.f32 %v1543_v18, %v447_v31  ;;  %v511_v36 = vpop.f32.mrb[3].mxu1 }
  0xeb   : > { %1302 = vpow2.f32 %v1106_v27  ;;  %v1120_v37 = vmul.f32 -1.442695, %v1556_v28  ;;  %v1107_v38 = vmul.f32 -1.442695, %v1559_v29  ;;  %v1572_v39 = vadd.f32 %v1543_v18, %v511_v36 }
  0xec   : > { %1304 = vpow2.f32 %v1122_v32  ;;  %v1123_v40 = vmul.f32 -1.442695, %v1564_v34  ;;  %v1105_v41 = vmul.f32 -1.442695, %v1567_v35 }
  0xed   : > { %1306 = vpow2.f32 %v1104_v33  ;;  %v1121_v42 = vmul.f32 -1.442695, %v1572_v39 }
  0xee   : > { %1308 = vpow2.f32 %v1120_v37  ;;  %v1230_v43 = vpop.f32.mrb[4].mxu0 }
  0xef   : > { %1310 = vpow2.f32 %v1107_v38  ;;  %v1578_v44 = vadd.f32 %v1230_v43, %v1543_v18  ;;  %v1246_v45 = vpop.f32.mrb[4].mxu1  ;;  %v460_v46 = vpop.f32.mrb[5].mxu0 }
  0xf0   : > { %1312 = vpow2.f32 %v1123_v40  ;;  %v1581_v47 = vadd.f32 %v1246_v45, %v1543_v18  ;;  %v1584_v48 = vadd.f32 %v1543_v18, %v460_v46  ;;  %v524_v49 = vpop.f32.mrb[5].mxu1  ;;  %v1231_v50 = vpop.f32.mrb[6].mxu0 }
  0xf1   : > { %1314 = vpow2.f32 %v1105_v41  ;;  %v1110_v51 = vmul.f32 -1.442695, %v1578_v44  ;;  %v1588_v52 = vadd.f32 %v1543_v18, %v524_v49  ;;  %v1591_v53 = vadd.f32 %v1231_v50, %v1543_v18  ;;  %v1247_v54 = vpop.f32.mrb[6].mxu1  ;;  %v463_v55 = vpop.f32.mrb[7].mxu0 }
  0xf2   : > { %1316 = vpow2.f32 %v1121_v42  ;;  %v1126_v56 = vmul.f32 -1.442695, %v1581_v47  ;;  %v1108_v57 = vmul.f32 -1.442695, %v1584_v48  ;;  %v527_v58 = vpop.f32.mrb[7].mxu1  ;;  %v1600_v19 = vadd.f32 %v1247_v54, %v1543_v18 }
  0xf3   : > { %1318 = vpow2.f32 %v1110_v51  ;;  %v1124_v59 = vmul.f32 -1.442695, %v1588_v52  ;;  %v1111_v60 = vmul.f32 -1.442695, %v1591_v53  ;;  %v1603_v25 = vadd.f32 %v1543_v18, %v463_v55 }
  0xf4   : > { %1320 = vpow2.f32 %v1126_v56  ;;  %v1606_v30 = vadd.f32 %v1543_v18, %v527_v58  ;;  %v1127_v41 = vmul.f32 -1.442695, %v1600_v19 }
  0xf5   : > { %v1303_v61 = vpop.eup %1302  ;;  %1322 = vpow2.f32 %v1108_v57  ;;  %v1109_v50 = vmul.f32 -1.442695, %v1603_v25 }
  0xf6   : > { %v1305_v62 = vpop.eup %1304  ;;  %v669_v63 = vadd.f32 1.0, %v1303_v61  ;;  %1324 = vpow2.f32 %v1124_v59  ;;  %v1234_v0 = vpop.f32.mrb[8].mxu0  ;;  %v1125_v58 = vmul.f32 -1.442695, %v1606_v30 }
  0xf7   : > { %v1307_v1 = vpop.eup %1306  ;;  %v685_v2 = vadd.f32 1.0, %v1305_v62  ;;  %1326 = vpow2.f32 %v1111_v60  ;;  %v1250_v3 = vpop.f32.mrb[8].mxu1  ;;  %v1609_v33 = vadd.f32 %v1234_v0, %v1543_v18 }
  0xf8   : > { %v476_v4 = vpop.f32.mrb[9].mxu0  ;;  %v1309_v5 = vpop.eup %1308  ;;  %1328 = vrcp.f32 %v669_v63  ;;  %v667_v6 = vadd.f32 1.0, %v1307_v1  ;;  %v1612_v36 = vadd.f32 %v1250_v3, %v1543_v18 }
  0xf9   : > { %v540_v7 = vpop.f32.mrb[9].mxu1  ;;  %v1235_v8 = vpop.f32.mrb[10].mxu0  ;;  %1330 = vrcp.f32 %v685_v2  ;;  %v683_v10 = vadd.f32 1.0, %v1309_v5  ;;  %v1616_v42 = vadd.f32 %v1543_v18, %v476_v4  ;;  %v1114_v0 = vmul.f32 -1.442695, %v1609_v33 }
  0xfa   : > { %v1311_v9 = vpop.eup %1310  ;;  %v1251_v11 = vpop.f32.mrb[10].mxu1  ;;  %1332 = vrcp.f32 %v667_v6  ;;  %v1622_v51 = vadd.f32 %v1543_v18, %v540_v7  ;;  %v1630_v59 = vadd.f32 %v1235_v8, %v1543_v18  ;;  %v1130_v1 = vmul.f32 -1.442695, %v1612_v36 }
  0xfb   : > { %v479_v12 = vpop.f32.mrb[11].mxu0  ;;  %v1313_v13 = vpop.eup %1312  ;;  %v670_v14 = vadd.f32 1.0, %v1311_v9  ;;  %1334 = vrcp.f32 %v683_v10  ;;  %v1112_v5 = vmul.f32 -1.442695, %v1616_v42  ;;  %v1643_v6 = vadd.f32 %v1251_v11, %v1543_v18 }
  0xfc   : > { %v1597_v15 = vpop.f32.mrb[11].mxu1  ;;  %v1315_v16 = vpop.eup %1314  ;;  %v686_v17 = vadd.f32 1.0, %v1313_v13  ;;  %v1128_v9 = vmul.f32 -1.442695, %v1622_v51 }
  0xfd   : > { %v1317_v21 = vpop.eup %1316  ;;  %1336 = vrcp.f32 %v670_v14  ;;  %v668_v22 = vadd.f32 1.0, %v1315_v16  ;;  %v1115_v14 = vmul.f32 -1.442695, %v1630_v59 }
  0xfe   : > { %v1319_v26 = vpop.eup %1318  ;;  %1338 = vrcp.f32 %v686_v17  ;;  %v684_v27 = vadd.f32 1.0, %v1317_v21  ;;  %v1238_v37 = vpop.f32.mrb[12].mxu0 }
  0xff   : > { %v1321_v31 = vpop.eup %1320  ;;  %1340 = vrcp.f32 %v668_v22  ;;  %v673_v32 = vadd.f32 1.0, %v1319_v26  ;;  %v1254_v43 = vpop.f32.mrb[12].mxu1 }
 0x100   : > { %v1323_v38 = vpop.eup %1322  ;;  %1342 = vrcp.f32 %v684_v27  ;;  %v689_v40 = vadd.f32 1.0, %v1321_v31  ;;  %v1618_v45 = vpop.f32.mrb[13].mxu0 }
 0x101   : > { %v1325_v46 = vpop.eup %1324  ;;  %1344 = vrcp.f32 %v673_v32  ;;  %v671_v49 = vadd.f32 1.0, %v1323_v38  ;;  %v1624_v54 = vpop.f32.mrb[13].mxu1 }
 0x102   : > { %v1626_v55 = vpop.f32.mrb[14].mxu0  ;;  %v1327_v56 = vpop.eup %1326  ;;  %1346 = vrcp.f32 %v689_v40  ;;  %v687_v57 = vadd.f32 1.0, %v1325_v46  ;;  %v1678_v40 = vadd.f32 %v1254_v43, %v1543_v18 }
 0x103   : > { %v1632_v60 = vpop.f32.mrb[14].mxu1  ;;  %v1634_v61 = vpop.f32.mrb[15].mxu0  ;;  %1348 = vrcp.f32 %v671_v49  ;;  %v674_v63 = vadd.f32 1.0, %v1327_v56 }
 0x104   : > { %v1329_v62 = vpop.eup %1328  ;;  %v1638_v2 = vpop.f32.mrb[15].mxu1  ;;  %1350 = vrcp.f32 %v687_v57 }
 0x105   : > { %v1331_v3 = vpop.eup %1330  ;;  %v765_v4 = vmul.f32 %v1329_v62, %v1546_v20  ;;  %1352 = vrcp.f32 %v674_v63  ;;  %v1655_v20 = vadd.f32 %v1543_v18, %v479_v12 }
 0x106   : > { %v1333_v7 = vpop.eup %1332  ;;  %v781_v8 = vmul.f32 %v1331_v3, %v1549_v23  ;;  %1354 = vpow2.f32 %v1127_v41  ;;  %v1662_v23 = vadd.f32 %v1543_v18, %v1597_v15  ;;  %v1672_v15 = vadd.f32 %v1238_v37, %v1543_v18 }
 0x107   : > { %v1335_v10 = vpop.eup %1334  ;;  %v1172_v13 = vpack.c.bf16 %v765_v4, %v765_v4  ;;  %v763_v11 = vmul.f32 %v1333_v7, %v1552_v24  ;;  %1356 = vpow2.f32 %v1109_v50  ;;  %v1131_v24 = vmul.f32 -1.442695, %v1643_v6 }
 0x108   : > { %v1337_v16 = vpop.eup %1336  ;;  %v1188_v17 = vpack.c.bf16 %v781_v8, %v781_v8  ;;  %v779_v21 = vmul.f32 %v1335_v10, %v1556_v28  ;;  %1358 = vpow2.f32 %v1125_v58  ;;  %v1113_v37 = vmul.f32 -1.442695, %v1655_v20 }
 0x109   : > { %v1339_v12 = vpop.eup %1338  ;;  %926 = vst.msk [vmem:[%s1650_s29 + $0x8] sm:$0xf] %vm923_vm1, %v1172_v13  ;;  %v1170_v22 = vpack.c.bf16 %v763_v11, %v763_v11  ;;  %v766_v26 = vmul.f32 %v1337_v16, %v1559_v29  ;;  %1360 = vpow2.f32 %v1114_v0  ;;  %v1129_v43 = vmul.f32 -1.442695, %v1662_v23 }
 0x10a   : > { %v1341_v27 = vpop.eup %1340  ;;  %942 = vst.msk [vmem:[%s1650_s29 + $0x48] sm:$0xf] %vm923_vm1, %v1188_v17  ;;  %v1186_v28 = vpack.c.bf16 %v779_v21, %v779_v21  ;;  %v782_v31 = vmul.f32 %v1339_v12, %v1564_v34  ;;  %1362 = vpow2.f32 %v1130_v1  ;;  %v1118_v58 = vmul.f32 -1.442695, %v1672_v15 }
 0x10b   : > { %v1343_v32 = vpop.eup %1342  ;;  %924 = vst.msk [vmem:[%s1650_s29] sm:$0xf] %vm923_vm1, %v1170_v22  ;;  %v1173_v38 = vpack.c.bf16 %v766_v26, %v766_v26  ;;  %v764_v29 = vmul.f32 %v1341_v27, %v1567_v35  ;;  %1364 = vpow2.f32 %v1112_v5  ;;  %v1134_v0 = vmul.f32 -1.442695, %v1678_v40 }
 0x10c   : > { %v1345_v41 = vpop.eup %1344  ;;  %940 = vst.msk [vmem:[%s1650_s29 + $0x40] sm:$0xf] %vm923_vm1, %v1186_v28  ;;  %v1189_v34 = vpack.c.bf16 %v782_v31, %v782_v31  ;;  %v780_v46 = vmul.f32 %v1343_v32, %v1572_v39  ;;  %1366 = vpow2.f32 %v1128_v9  ;;  %v1712_v31 = vadd.f32 %v1543_v18, %v1618_v45 }
 0x10d   : > { %v1347_v49 = vpop.eup %1346  ;;  %927 = vst.msk [vmem:[%s1650_s29 + $0xc] sm:$0xf] %vm923_vm1, %v1173_v38  ;;  %v1171_v50 = vpack.c.bf16 %v764_v29, %v764_v29  ;;  %v769_v35 = vmul.f32 %v1345_v41, %v1578_v44  ;;  %1368 = vpow2.f32 %v1115_v14  ;;  %v1716_v29 = vadd.f32 %v1543_v18, %v1624_v54 }
 0x10e   : > { %v1349_v56 = vpop.eup %1348  ;;  %943 = vst.msk [vmem:[%s1650_s29 + $0x4c] sm:$0xf] %vm923_vm1, %v1189_v34  ;;  %v1187_v57 = vpack.c.bf16 %v780_v46, %v780_v46  ;;  %v785_v39 = vmul.f32 %v1347_v49, %v1581_v47  ;;  %1370 = vpow2.f32 %v1131_v24  ;;  %v1720_v46 = vadd.f32 %v1626_v55, %v1543_v18 }
 0x10f   : > { %v1351_v62 = vpop.eup %1350  ;;  %925 = vst.msk [vmem:[%s1650_s29 + $0x4] sm:$0xf] %vm923_vm1, %v1171_v50  ;;  %v1176_v63 = vpack.c.bf16 %v769_v35, %v769_v35  ;;  %v767_v44 = vmul.f32 %v1349_v56, %v1584_v48  ;;  %1372 = vpow2.f32 %v1113_v37  ;;  %v1724_v45 = vadd.f32 %v1632_v60, %v1543_v18 }
 0x110   : > { %v1353_v1 = vpop.eup %1352  ;;  %941 = vst.msk [vmem:[%s1650_s29 + $0x44] sm:$0xf] %vm923_vm1, %v1187_v57  ;;  %v1192_v3 = vpack.c.bf16 %v785_v39, %v785_v39  ;;  %v783_v47 = vmul.f32 %v1351_v62, %v1588_v52  ;;  %1374 = vpow2.f32 %v1129_v43  ;;  %v1116_v54 = vmul.f32 -1.442695, %v1712_v31 }
 0x111   : > { %v1355_v4 = vpop.eup %1354  ;;  %930 = vst.msk [vmem:[%s1650_s29 + $0x18] sm:$0xf] %vm923_vm1, %v1176_v63  ;;  %v1174_v5 = vpack.c.bf16 %v767_v44, %v767_v44  ;;  %v770_v7 = vmul.f32 %v1353_v1, %v1591_v53  ;;  %1376 = vpow2.f32 %v1118_v58  ;;  %v1729_v43 = vadd.f32 %v1543_v18, %v1634_v61 }
 0x112   : > { %v1357_v48 = vpop.eup %1356  ;;  %946 = vst.msk [vmem:[%s1650_s29 + $0x58] sm:$0xf] %vm923_vm1, %v1192_v3  ;;  %v1190_v8 = vpack.c.bf16 %v783_v47, %v783_v47  ;;  %v690_v9 = vadd.f32 1.0, %v1355_v4  ;;  %1378 = vpow2.f32 %v1134_v0  ;;  %v1132_v57 = vmul.f32 -1.442695, %v1716_v29 }
 0x113   : > { %v1359_v10 = vpop.eup %1358  ;;  %928 = vst.msk [vmem:[%s1650_s29 + $0x10] sm:$0xf] %vm923_vm1, %v1174_v5  ;;  %v1177_v52 = vpack.c.bf16 %v770_v7, %v770_v7  ;;  %v672_v13 = vadd.f32 1.0, %v1357_v48  ;;  %v1734_v39 = vadd.f32 %v1543_v18, %v1638_v2  ;;  %v1119_v62 = vmul.f32 -1.442695, %v1720_v46 }
 0x114   : > { %v1361_v11 = vpop.eup %1360  ;;  %944 = vst.msk [vmem:[%s1650_s29 + $0x50] sm:$0xf] %vm923_vm1, %v1190_v8  ;;  %1380 = vrcp.f32 %v690_v9  ;;  %v688_v14 = vadd.f32 1.0, %v1359_v10  ;;  %v1135_v44 = vmul.f32 -1.442695, %v1724_v45 }
 0x115   : > { %v1363_v53 = vpop.eup %1362  ;;  %931 = vst.msk [vmem:[%s1650_s29 + $0x1c] sm:$0xf] %vm923_vm1, %v1177_v52  ;;  %1382 = vrcp.f32 %v672_v13  ;;  %v677_v16 = vadd.f32 1.0, %v1361_v11  ;;  %v1117_v18 = vmul.f32 -1.442695, %v1729_v43 }
 0x116   : > { %v1365_v17 = vpop.eup %1364  ;;  %1384 = vrcp.f32 %v688_v14  ;;  %v693_v21 = vadd.f32 1.0, %v1363_v53  ;;  %v1133_v4 = vmul.f32 -1.442695, %v1734_v39 }
 0x117   : > { %v1367_v12 = vpop.eup %1366  ;;  %1386 = vrcp.f32 %v677_v16  ;;  %v675_v22 = vadd.f32 1.0, %v1365_v17 }
 0x118   : > { %v1369_v26 = vpop.eup %1368  ;;  %1388 = vrcp.f32 %v693_v21  ;;  %v691_v24 = vadd.f32 1.0, %v1367_v12 }
 0x119   : > { %v1371_v27 = vpop.eup %1370  ;;  %1390 = vrcp.f32 %v675_v22  ;;  %v678_v28 = vadd.f32 1.0, %v1369_v26 }
 0x11a   : > { %v1373_v32 = vpop.eup %1372  ;;  %1392 = vrcp.f32 %v691_v24  ;;  %v694_v38 = vadd.f32 1.0, %v1371_v27 }
 0x11b   : > { %v1375_v41 = vpop.eup %1374  ;;  %1394 = vrcp.f32 %v678_v28  ;;  %v676_v34 = vadd.f32 1.0, %v1373_v32 }
 0x11c   : > { %v1377_v37 = vpop.eup %1376  ;;  %1396 = vrcp.f32 %v694_v38  ;;  %v692_v49 = vadd.f32 1.0, %v1375_v41 }
 0x11d   : > { %v1379_v50 = vpop.eup %1378  ;;  %1398 = vrcp.f32 %v676_v34  ;;  %v681_v35 = vadd.f32 1.0, %v1377_v37 }
 0x11e   : > { %v1381_v56 = vpop.eup %1380  ;;  %1400 = vrcp.f32 %v692_v49  ;;  %v697_v55 = vadd.f32 1.0, %v1379_v50 }
 0x11f   : > { %v1383_v60 = vpop.eup %1382  ;;  %v786_v58 = vmul.f32 %v1381_v56, %v1600_v19  ;;  %1402 = vrcp.f32 %v681_v35 }
 0x120   : > { %v1385_v63 = vpop.eup %1384  ;;  %v768_v61 = vmul.f32 %v1383_v60, %v1603_v25  ;;  %1404 = vrcp.f32 %v697_v55 }
 0x121   : > { %v1387_v0 = vpop.eup %1386  ;;  %v1193_v1 = vpack.c.bf16 %v786_v58, %v786_v58  ;;  %v784_v3 = vmul.f32 %v1385_v63, %v1606_v30  ;;  %1406 = vpow2.f32 %v1116_v54 }
 0x122   : > { %v1389_v2 = vpop.eup %1388  ;;  %v1175_v19 = vpack.c.bf16 %v768_v61, %v768_v61  ;;  %v773_v47 = vmul.f32 %v1387_v0, %v1609_v33  ;;  %1408 = vpow2.f32 %v1132_v57 }
 0x123   : > { %v1391_v25 = vpop.eup %1390  ;;  %947 = vst.msk [vmem:[%s1650_s29 + $0x5c] sm:$0xf] %vm923_vm1, %v1193_v1  ;;  %v1191_v5 = vpack.c.bf16 %v784_v3, %v784_v3  ;;  %v789_v7 = vmul.f32 %v1389_v2, %v1612_v36  ;;  %1410 = vpow2.f32 %v1119_v62 }
 0x124   : > { %v1393_v30 = vpop.eup %1392  ;;  %929 = vst.msk [vmem:[%s1650_s29 + $0x14] sm:$0xf] %vm923_vm1, %v1175_v19  ;;  %v1180_v48 = vpack.c.bf16 %v773_v47, %v773_v47  ;;  %v771_v8 = vmul.f32 %v1391_v25, %v1616_v42  ;;  %1412 = vpow2.f32 %v1135_v44 }
 0x125   : > { %v1395_v33 = vpop.eup %1394  ;;  %945 = vst.msk [vmem:[%s1650_s29 + $0x54] sm:$0xf] %vm923_vm1, %v1191_v5  ;;  %v1196_v9 = vpack.c.bf16 %v789_v7, %v789_v7  ;;  %v787_v10 = vmul.f32 %v1393_v30, %v1622_v51  ;;  %1414 = vpow2.f32 %v1117_v18 }
 0x126   : > { %v1397_v52 = vpop.eup %1396  ;;  %934 = vst.msk [vmem:[%s1650_s29 + $0x28] sm:$0xf] %vm923_vm1, %v1180_v48  ;;  %v1178_v36 = vpack.c.bf16 %v771_v8, %v771_v8  ;;  %v774_v13 = vmul.f32 %v1395_v33, %v1630_v59  ;;  %1416 = vpow2.f32 %v1133_v4 }
 0x127   : > { %v1399_v11 = vpop.eup %1398  ;;  %950 = vst.msk [vmem:[%s1650_s29 + $0x68] sm:$0xf] %vm923_vm1, %v1196_v9  ;;  %v1194_v42 = vpack.c.bf16 %v787_v10, %v787_v10  ;;  %v790_v14 = vmul.f32 %v1397_v52, %v1643_v6 }
 0x128   : > { %v1401_v53 = vpop.eup %1400  ;;  %932 = vst.msk [vmem:[%s1650_s29 + $0x20] sm:$0xf] %vm923_vm1, %v1178_v36  ;;  %v1181_v51 = vpack.c.bf16 %v774_v13, %v774_v13  ;;  %v772_v16 = vmul.f32 %v1399_v11, %v1655_v20 }
 0x129   : > { %v1403_v17 = vpop.eup %1402  ;;  %948 = vst.msk [vmem:[%s1650_s29 + $0x60] sm:$0xf] %vm923_vm1, %v1194_v42  ;;  %v1197_v59 = vpack.c.bf16 %v790_v14, %v790_v14  ;;  %v788_v21 = vmul.f32 %v1401_v53, %v1662_v23 }
 0x12a   : > { %v1405_v12 = vpop.eup %1404  ;;  %935 = vst.msk [vmem:[%s1650_s29 + $0x2c] sm:$0xf] %vm923_vm1, %v1181_v51  ;;  %v1179_v22 = vpack.c.bf16 %v772_v16, %v772_v16  ;;  %v777_v6 = vmul.f32 %v1403_v17, %v1672_v15 }
 0x12b   : > { %v1407_v26 = vpop.eup %1406  ;;  %951 = vst.msk [vmem:[%s1650_s29 + $0x6c] sm:$0xf] %vm923_vm1, %v1197_v59  ;;  %v1195_v24 = vpack.c.bf16 %v788_v21, %v788_v21  ;;  %v793_v20 = vmul.f32 %v1405_v12, %v1678_v40 }
 0x12c   : > { %v1409_v27 = vpop.eup %1408  ;;  %933 = vst.msk [vmem:[%s1650_s29 + $0x24] sm:$0xf] %vm923_vm1, %v1179_v22  ;;  %v1184_v28 = vpack.c.bf16 %v777_v6, %v777_v6  ;;  %v679_v32 = vadd.f32 1.0, %v1407_v26 }
 0x12d   : > { %v1411_v23 = vpop.eup %1410  ;;  %949 = vst.msk [vmem:[%s1650_s29 + $0x64] sm:$0xf] %vm923_vm1, %v1195_v24  ;;  %v1200_v38 = vpack.c.bf16 %v793_v20, %v793_v20  ;;  %v695_v41 = vadd.f32 1.0, %v1409_v27 }
 0x12e   : > { %v1413_v34 = vpop.eup %1412  ;;  %938 = vst.msk [vmem:[%s1650_s29 + $0x38] sm:$0xf] %vm923_vm1, %v1184_v28  ;;  %1418 = vrcp.f32 %v679_v32  ;;  %v682_v15 = vadd.f32 1.0, %v1411_v23 }
 0x12f   : > { %v1415_v37 = vpop.eup %1414  ;;  %954 = vst.msk [vmem:[%s1650_s29 + $0x78] sm:$0xf] %vm923_vm1, %v1200_v38  ;;  %1420 = vrcp.f32 %v695_v41  ;;  %v698_v40 = vadd.f32 1.0, %v1413_v34 }
 0x130   : > { %v1417_v49 = vpop.eup %1416  ;;  %1422 = vrcp.f32 %v682_v15  ;;  %v680_v50 = vadd.f32 1.0, %v1415_v37 }
 0x131   : > { %1424 = vrcp.f32 %v698_v40  ;;  %v696_v35 = vadd.f32 1.0, %v1417_v49 }
 0x132   : > { %1426 = vrcp.f32 %v680_v50 }
 0x133   : > { %1428 = vrcp.f32 %v696_v35 }
 0x138   : > { %v1419_v54 = vpop.eup %1418 }
 0x139   : > { %v1421_v56 = vpop.eup %1420  ;;  %v775_v55 = vmul.f32 %v1419_v54, %v1712_v31 }
 0x13a   : > { %v1423_v57 = vpop.eup %1422  ;;  %v791_v60 = vmul.f32 %v1421_v56, %v1716_v29 }
 0x13b   : > { %v1425_v58 = vpop.eup %1424  ;;  %v1182_v62 = vpack.c.bf16 %v775_v55, %v775_v55  ;;  %v778_v63 = vmul.f32 %v1423_v57, %v1720_v46 }
 0x13c   : > { %v1427_v61 = vpop.eup %1426  ;;  %v1198_v44 = vpack.c.bf16 %v791_v60, %v791_v60  ;;  %v794_v0 = vmul.f32 %v1425_v58, %v1724_v45 }
 0x13d   : > { %v1429_v1 = vpop.eup %1428  ;;  %936 = vst.msk [vmem:[%s1650_s29 + $0x30] sm:$0xf] %vm923_vm1, %v1182_v62  ;;  %v1185_v3 = vpack.c.bf16 %v778_v63, %v778_v63  ;;  %v776_v31 = vmul.f32 %v1427_v61, %v1729_v43 }
 0x13e   : > { %952 = vst.msk [vmem:[%s1650_s29 + $0x70] sm:$0xf] %vm923_vm1, %v1198_v44  ;;  %v1201_v29 = vpack.c.bf16 %v794_v0, %v794_v0  ;;  %v792_v18 = vmul.f32 %v1429_v1, %v1734_v39 }
 0x13f   : > { %939 = vst.msk [vmem:[%s1650_s29 + $0x3c] sm:$0xf] %vm923_vm1, %v1185_v3  ;;  %v1183_v2 = vpack.c.bf16 %v776_v31, %v776_v31 }
 0x140   : > { %955 = vst.msk [vmem:[%s1650_s29 + $0x7c] sm:$0xf] %vm923_vm1, %v1201_v29  ;;  %v1199_v46 = vpack.c.bf16 %v792_v18, %v792_v18 }
 0x141   : > { %937 = vst.msk [vmem:[%s1650_s29 + $0x34] sm:$0xf] %vm923_vm1, %v1183_v2 }
 0x142   : > { %953 = vst.msk [vmem:[%s1650_s29 + $0x74] sm:$0xf] %vm923_vm1, %v1199_v46 }
 0x143 PF: > { %s13_s14 = sadd.s32 1, %s1452_s14   ;;  %s1810_s12 = smov %s1448_s13 }
 0x144   : > { %p10_p5 = scmp.ge.s32.totalorder %s13_s14, 4   ;;  %s1811_s13 = smov %s1813_s15 }
 0x146   :  { %12 = sbr.rel (!%p10_p5) target bundleno = 2 (0x2), region = 68 }

// kernel: forward.6
= control target key start
LH: loop header
LB: loop body
LE: loop exit
PB: predicated region body
PF: predicated region fallthrough
CT: control target
= control target key end

     0   :  { %s2889_s15 = smov 0   ;;  %s4556_s0 = inlined_call_operand.vmem [shape: bf16[2,18,18,32], index: 0, kind: input, shape index: {}]   ;;  %s4557_s1 = inlined_call_operand.vmem [shape: f32[3,3,32], index: 1, kind: input, shape index: {}]   ;;  %s4558_s2 = inlined_call_operand.vmem [shape: f32[1,32], index: 2, kind: input, shape index: {}]   ;;  %s4559_s3 = inlined_call_operand.vmem [shape: bf16[2,16,16,32], index: 3, kind: output, shape index: {0}]   ;;  %s4560_s4 = inlined_call_operand.vmem [shape: f32[2,1,32], index: 4, kind: output, shape index: {1}]  }
   0x1 LB: > { %s2565_s16 = sadd.s32 4294967295, %s2862_s15   ;;  %p2569_p0 = scmp.ge.s32.totalorder %s2862_s15, 1  ;;  %s2862_s15 = sphi %s2889_s15, %s15_s15  }
   0x2   : > { %p165_p1 = scmp.lt.s32.totalorder %s2862_s15, 3 }
   0x4   : > { %p166_p2 = pnand %p2569_p0, %p165_p1 }
   0x5   : > { %p194_p3 = scmp.lt.s32.totalorder (!%p166_p2), %s2565_s16, 1  ;;  %v318_v0 = vlaneseq (!%p166_p2)  ;;  %v315_v2 = vld [vmem:[%s4557_s1] sm:$0x7] (!%p166_p2)  ;;  %v316_v3 = vld [vmem:[%s4557_s1 + $0x4] sm:$0x7] (!%p166_p2)  ;;  %vm486_vm0 = vcmask (!%p166_p2), 1046528  }
   0x6   : > { %169 = sbr.rel (%p166_p2) target bundleno = 435 (0x1b3), region = 32  ;;  %v317_v4 = vld [vmem:[%s4557_s1 + $0x8] sm:$0x7] (!%p166_p2)  ;;  %vm731_vm1 = vcmask (!%p166_p2), 1045504   ;;  %vm2412_vm2 = vcmask (!%p166_p2), 261120   ;;  %vm2379_vm3 = vcmask (!%p166_p2), 257024  }
   0x7   : > { %v319_v1 = vshrl.u32 (!%p166_p2), %v318_v0, 7  ;;  %vm2483_vm4 = vcmask (!%p166_p2), 253952  }
   0x9   : > { %v320_v5 = vsub.s32 (!%p166_p2), 0, %v319_v1  ;;  %v388_v6 = vsub.s32 (!%p166_p2), 1, %v319_v1  ;;  %v633_v7 = vsub.s32 (!%p166_p2), 2, %v319_v1 }
   0xb   : > { %v2914_v8 = vrot.slane (!%p166_p2), %v315_v2, %v320_v5  ;;  %v2916_v9 = vrot.slane (!%p166_p2), %v315_v2, %v388_v6  ;;  %v2918_v10 = vrot.slane (!%p166_p2), %v315_v2, %v633_v7  ;;  %v2920_v11 = vrot.slane (!%p166_p2), %v316_v3, %v320_v5 }
   0xc   : > { %v2925_v15 = vrot.slane (!%p166_p2), %v316_v3, %v388_v6  ;;  %v2927_v16 = vrot.slane (!%p166_p2), %v316_v3, %v633_v7  ;;  %v2929_v17 = vrot.slane (!%p166_p2), %v317_v4, %v320_v5  ;;  %v2931_v18 = vrot.slane (!%p166_p2), %v317_v4, %v388_v6 }
   0xd   : > { %s4562_s16 = smov (!%p194_p3, %s2565_s16), 1  ;;  %v2942_v26 = vrot.slane %v317_v4, %v633_v7 }
   0xe   : > { %s2717_s21 = smul.u32 216, %s4562_s16  ;;  %s2640_s29 = sshll.u32 %s4562_s16, 7 }
   0xf   : > { %s3167_s6 = scalar_lea.vmem %s4559_s3, %s2640_s29  ;;  %s206_s13 = scalar_lea.vmem %s4560_s4, %s4562_s16 }
  0x10   : > { %s2912_s26 = scalar_lea.vmem %s4556_s0, %s2717_s21 }
  0x11   : > { %v2674_v12 = vld [vmem:[%s2912_s26] sm:$0xff]   ;;  %v210_v13 = vld [vmem:[%s2912_s26 + $0xc] sm:$0xff]   ;;  %v2709_v14 = vld [vmem:[%s2912_s26 + $0x18] sm:$0xff]  }
  0x12   : > { %v2675_v19 = vunpack.c.l.bf16 %v2674_v12  ;;  %v2676_v20 = vunpack.c.h.bf16 %v2674_v12  ;;  %v2933_v21 = vunpack.c.l.bf16 %v2709_v14  ;;  %v2935_v22 = vunpack.c.h.bf16 %v2709_v14  ;;  %v209_v23 = vld [vmem:[%s2912_s26 + $0x8] sm:$0x1]  ;;  %v212_v48 = vld [vmem:[%s2912_s26 + $0x14] sm:$0x1]  ;;  %v215_v49 = vld [vmem:[%s2912_s26 + $0x20] sm:$0x1] }
  0x13   : > { %v2938_v24 = vunpack.c.l.bf16 %v210_v13  ;;  %v2940_v25 = vunpack.c.h.bf16 %v210_v13  ;;  %v263_v27 = vunpack.c.l.bf16 %v209_v23  ;;  %v2975_v60 = vunpack.c.l.bf16 %v212_v48  ;;  %v216_v14 = vld [vmem:[%s2912_s26 + $0x24] sm:$0xff]  }
  0x14   : > { %v322_v28 = vmul.f32 %v2675_v19, %v2914_v8  ;;  %v390_v29 = vmul.f32 %v2675_v19, %v2916_v9  ;;  %v391_v30 = vmul.f32 %v2676_v20, %v2916_v9  ;;  %v635_v31 = vmul.f32 %v2675_v19, %v2918_v10 }
  0x15   : > { %v636_v32 = vmul.f32 %v2676_v20, %v2918_v10  ;;  %v880_v33 = vmul.f32 %v2920_v11, %v2938_v24  ;;  %v948_v34 = vmul.f32 %v2925_v15, %v2938_v24  ;;  %v949_v35 = vmul.f32 %v2925_v15, %v2940_v25 }
  0x16   : > { %v487_v36 = vrot.slane %v390_v29, 1  ;;  %v488_v37 = vrot.slane %v391_v30, 1  ;;  %v732_v38 = vrot.slane %v635_v31, 2  ;;  %v1192_v39 = vmul.f32 %v2927_v16, %v2938_v24 }
  0x17   : > { %v733_v40 = vrot.slane %v636_v32, 2  ;;  %v1044_v41 = vrot.slane %v948_v34, 1  ;;  %v1045_v42 = vrot.slane %v949_v35, 1  ;;  %v1193_v43 = vmul.f32 %v2927_v16, %v2940_v25 }
  0x18   : > { %v489_v44 = vsel %vm486_vm0, %v487_v36, %v488_v37  ;;  %v1288_v45 = vrot.slane %v1192_v39, 2  ;;  %v1436_v46 = vmul.f32 %v2933_v21, %v2929_v17  ;;  %v1504_v47 = vmul.f32 %v2933_v21, %v2931_v18 }
  0x19   : > { %v599_v50 = vadd.f32 %v489_v44, %v322_v28  ;;  %v734_v51 = vsel %vm731_vm1, %v732_v38, %v733_v40  ;;  %v1046_v52 = vsel %vm486_vm0, %v1044_v41, %v1045_v42  ;;  %v1289_v53 = vrot.slane %v1193_v43, 2 }
  0x1a   : > { %v1505_v54 = vmul.f32 %v2935_v22, %v2931_v18  ;;  %v1600_v55 = vrot.slane %v1504_v47, 1  ;;  %v1748_v56 = vmul.f32 %v2933_v21, %v2942_v26  ;;  %v1749_v57 = vmul.f32 %v2935_v22, %v2942_v26 }
  0x1b   : > { %v844_v58 = vadd.f32 %v734_v51, %v599_v50  ;;  %v1290_v59 = vsel %vm731_vm1, %v1288_v45, %v1289_v53  ;;  %v2977_v61 = vunpack.c.l.bf16 %v215_v49  ;;  %v323_v1 = vmul.f32 %v2676_v20, %v2914_v8 }
  0x1c   : > { %v1601_v62 = vrot.slane %v1505_v54, 1  ;;  %v1844_v63 = vrot.slane %v1748_v56, 2  ;;  %v1845_v0 = vrot.slane %v1749_v57, 2  ;;  %v392_v3 = vmul.f32 %v2916_v9, %v263_v27 }
  0x1d   : > { %v912_v2 = vadd.f32 %v880_v33, %v844_v58  ;;  %v637_v4 = vmul.f32 %v2918_v10, %v263_v27  ;;  %v881_v5 = vmul.f32 %v2920_v11, %v2940_v25  ;;  %v950_v12 = vmul.f32 %v2925_v15, %v2975_v60 }
  0x1e   : > { %v1602_v6 = vsel %vm486_vm0, %v1600_v55, %v1601_v62  ;;  %v1846_v7 = vsel %vm731_vm1, %v1844_v63, %v1845_v0  ;;  %v1194_v13 = vmul.f32 %v2927_v16, %v2975_v60  ;;  %v490_v20 = vrot.slane %v392_v3, 1 }
  0x1f   : > { %v1156_v19 = vadd.f32 %v1046_v52, %v912_v2  ;;  %v735_v23 = vrot.slane %v637_v4, 2  ;;  %v1437_v27 = vmul.f32 %v2935_v22, %v2929_v17  ;;  %v1047_v28 = vrot.slane %v950_v12, 1  ;;  %v3024_v52 = vld [vmem:[%s4558_s2] ss:$0 sm:$0xff] }
  0x20   : > { %v1291_v29 = vrot.slane %v1194_v13, 2  ;;  %v1506_v30 = vmul.f32 %v2931_v18, %v2977_v61  ;;  %v1750_v31 = vmul.f32 %v2942_v26, %v2977_v61  ;;  %v491_v33 = vsel %vm486_vm0, %v488_v37, %v490_v20 }
  0x21   : > { %v1400_v32 = vadd.f32 %v1290_v59, %v1156_v19  ;;  %v736_v34 = vsel %vm731_vm1, %v733_v40, %v735_v23  ;;  %v2999_v35 = vunpack.c.l.bf16 %v216_v14  ;;  %v600_v36 = vadd.f32 %v491_v33, %v323_v1 }
  0x22   : > { %v1048_v38 = vsel %vm486_vm0, %v1045_v42, %v1047_v28  ;;  %v1292_v39 = vsel %vm731_vm1, %v1289_v53, %v1291_v29  ;;  %v1603_v41 = vrot.slane %v1506_v30, 1  ;;  %v1847_v44 = vrot.slane %v1750_v31, 2 }
  0x23   : > { %v1468_v43 = vadd.f32 %v1436_v46, %v1400_v32  ;;  %v3003_v45 = vunpack.c.h.bf16 %v216_v14  ;;  %v324_v47 = vmul.f32 %v2914_v8, %v2938_v24  ;;  %v845_v48 = vadd.f32 %v736_v34, %v600_v36  ;;  %v218_v32 = vld [vmem:[%s2912_s26 + $0x2c] sm:$0x1] }
  0x24   : > { %v1604_v37 = vsel %vm486_vm0, %v1601_v62, %v1603_v41  ;;  %v393_v40 = vmul.f32 %v2916_v9, %v2938_v24  ;;  %v3012_v49 = vmul.f32 %v2916_v9, %v2940_v25  ;;  %v1848_v50 = vsel %vm731_vm1, %v1845_v0, %v1847_v44 }
  0x25   : > { %v1712_v42 = vadd.f32 %v1602_v6, %v1468_v43  ;;  %v638_v46 = vmul.f32 %v2918_v10, %v2938_v24  ;;  %v3019_v51 = vmul.f32 %v2918_v10, %v2940_v25  ;;  %v913_v53 = vadd.f32 %v881_v5, %v845_v48 }
  0x26   : > { %v492_v54 = vrot.slane %v393_v40, 1  ;;  %v493_v55 = vrot.slane %v3012_v49, 1  ;;  %v882_v56 = vmul.f32 %v2933_v21, %v2920_v11  ;;  %v951_v59 = vmul.f32 %v2933_v21, %v2925_v15 }
  0x27   : > { %v1956_v57 = vadd.f32 %v1846_v7, %v1712_v42  ;;  %v737_v58 = vrot.slane %v638_v46, 2  ;;  %v738_v24 = vrot.slane %v3019_v51, 2  ;;  %v1157_v62 = vadd.f32 %v1048_v38, %v913_v53 }
  0x28   : > { %v494_v63 = vsel %vm486_vm0, %v492_v54, %v493_v55  ;;  %v952_v0 = vmul.f32 %v2935_v22, %v2925_v15  ;;  %v1195_v1 = vmul.f32 %v2933_v21, %v2927_v16  ;;  %v1049_v5 = vrot.slane %v951_v59, 1 }
  0x29   : > { %v3038_v2 = vadd.f32 %v3024_v52, %v1956_v57  ;;  %v601_v3 = vadd.f32 %v494_v63, %v324_v47  ;;  %v739_v4 = vsel %vm731_vm1, %v737_v58, %v738_v24  ;;  %v1401_v6 = vadd.f32 %v1292_v39, %v1157_v62 }
  0x2a   : > { %v1050_v7 = vrot.slane %v952_v0, 1  ;;  %v1196_v12 = vmul.f32 %v2935_v22, %v2927_v16  ;;  %v1293_v13 = vrot.slane %v1195_v1, 2  ;;  %v1438_v20 = vmul.f32 %v2929_v17, %v2999_v35 }
  0x2b   : > { %v2574_v14 = vmul.f32 -1.442695, %v3038_v2  ;;  %v846_v19 = vadd.f32 %v739_v4, %v601_v3  ;;  %v1507_v23 = vmul.f32 %v2931_v18, %v2999_v35  ;;  %v1469_v28 = vadd.f32 %v1437_v27, %v1401_v6  ;;  %v2710_v4 = vld [vmem:[%s2912_s26 + $0x30] sm:$0xff]  }
  0x2c   : > { %v1051_v29 = vsel %vm486_vm0, %v1049_v5, %v1050_v7  ;;  %v1294_v30 = vrot.slane %v1196_v12, 2  ;;  %v1508_v31 = vmul.f32 %v2931_v18, %v3003_v45  ;;  %v1751_v36 = vmul.f32 %v2942_v26, %v2999_v35 }
  0x2d   : > { %2726 = vpow2.f32 %v2574_v14  ;;  %v914_v33 = vadd.f32 %v882_v56, %v846_v19  ;;  %v1605_v34 = vrot.slane %v1507_v23, 1  ;;  %v1713_v38 = vadd.f32 %v1604_v37, %v1469_v28 }
  0x2e   : > { %v1295_v39 = vsel %vm731_vm1, %v1293_v13, %v1294_v30  ;;  %v1606_v41 = vrot.slane %v1508_v31, 1  ;;  %v1752_v27 = vmul.f32 %v2942_v26, %v3003_v45  ;;  %v1849_v44 = vrot.slane %v1751_v36, 2 }
  0x2f   : > { %v1158_v43 = vadd.f32 %v1051_v29, %v914_v33  ;;  %v3057_v47 = vunpack.c.l.bf16 %v218_v32  ;;  %v325_v48 = vmul.f32 %v2914_v8, %v2940_v25  ;;  %v1957_v40 = vadd.f32 %v1848_v50, %v1713_v38 }
  0x30   : > { %v1607_v49 = vsel %vm486_vm0, %v1605_v34, %v1606_v41  ;;  %v1850_v42 = vrot.slane %v1752_v27, 2  ;;  %v395_v37 = vmul.f32 %v2916_v9, %v2975_v60  ;;  %v640_v51 = vmul.f32 %v2918_v10, %v2975_v60 }
  0x31   : > { %v1402_v46 = vadd.f32 %v1295_v39, %v1158_v43  ;;  %v883_v53 = vmul.f32 %v2935_v22, %v2920_v11  ;;  %v953_v54 = vmul.f32 %v2925_v15, %v2977_v61  ;;  %v3071_v25 = vadd.f32 %v3024_v52, %v1957_v40 }
  0x32   : > { %v1851_v50 = vsel %vm731_vm1, %v1849_v44, %v1850_v42  ;;  %v495_v56 = vrot.slane %v395_v37, 1  ;;  %v1197_v57 = vmul.f32 %v2927_v16, %v2977_v61  ;;  %v740_v59 = vrot.slane %v640_v51, 2 }
  0x33   : > { %v1470_v58 = vadd.f32 %v1438_v20, %v1402_v46  ;;  %v1052_v62 = vrot.slane %v953_v54, 1  ;;  %v1439_v60 = vmul.f32 %v2929_v17, %v3003_v45  ;;  %v2575_v63 = vmul.f32 -1.442695, %v3071_v25 }
  0x34   : > { %v496_v0 = vsel %vm486_vm0, %v493_v55, %v495_v56  ;;  %v1296_v1 = vrot.slane %v1197_v57, 2  ;;  %v1509_v3 = vmul.f32 %v2931_v18, %v3057_v47  ;;  %v741_v12 = vsel %vm731_vm1, %v738_v24, %v740_v59 }
  0x35   : > { %v1714_v5 = vadd.f32 %v1607_v49, %v1470_v58  ;;  %v602_v6 = vadd.f32 %v496_v0, %v325_v48  ;;  %v1053_v13 = vsel %vm486_vm0, %v1050_v7, %v1052_v62  ;;  %2728 = vpow2.f32 %v2575_v63 }
  0x36   : > { %v1297_v14 = vsel %vm731_vm1, %v1294_v30, %v1296_v1  ;;  %v1608_v19 = vrot.slane %v1509_v3, 1  ;;  %v1753_v20 = vmul.f32 %v2942_v26, %v3057_v47  ;;  %v3088_v29 = vunpack.c.l.bf16 %v2710_v4 }
  0x37   : > { %v2727_v23 = vpop.eup %2726  ;;  %v1958_v55 = vadd.f32 %v1851_v50, %v1714_v5  ;;  %v847_v28 = vadd.f32 %v741_v12, %v602_v6  ;;  %v3090_v31 = vunpack.c.h.bf16 %v2710_v4  ;;  %v326_v7 = vmul.f32 %v2933_v21, %v2914_v8 }
  0x38   : > { %v2123_v32 = vadd.f32 1.0, %v2727_v23  ;;  %v1609_v33 = vsel %vm486_vm0, %v1606_v41, %v1608_v19  ;;  %v1852_v24 = vrot.slane %v1753_v20, 2  ;;  %v396_v36 = vmul.f32 %v2933_v21, %v2916_v9 }
  0x39   : > { %v3096_v30 = vadd.f32 %v3024_v52, %v1958_v55  ;;  %v915_v34 = vadd.f32 %v883_v53, %v847_v28  ;;  %v3102_v38 = vmul.f32 %v2935_v22, %v2916_v9  ;;  %v641_v41 = vmul.f32 %v2933_v21, %v2918_v10 }
  0x3a   : > { %2730 = vrcp.f32 %v2123_v32  ;;  %v1853_v39 = vsel %vm731_vm1, %v1850_v42, %v1852_v24  ;;  %v3109_v27 = vmul.f32 %v2935_v22, %v2918_v10  ;;  %v497_v48 = vrot.slane %v396_v36, 1 }
  0x3b   : > { %v2576_v43 = vmul.f32 -1.442695, %v3096_v30  ;;  %v1159_v44 = vadd.f32 %v1053_v13, %v915_v34  ;;  %v498_v40 = vrot.slane %v3102_v38, 1  ;;  %v742_v49 = vrot.slane %v641_v41, 2 }
  0x3c   : > { %v743_v37 = vrot.slane %v3109_v27, 2  ;;  %v884_v42 = vmul.f32 %v2920_v11, %v2999_v35  ;;  %v954_v21 = vmul.f32 %v2925_v15, %v2999_v35  ;;  %v3123_v53 = vmul.f32 %v2925_v15, %v3003_v45 }
  0x3d   : > { %2732 = vpow2.f32 %v2576_v43  ;;  %v1403_v46 = vadd.f32 %v1297_v14, %v1159_v44  ;;  %v499_v51 = vsel %vm486_vm0, %v497_v48, %v498_v40  ;;  %v1198_v57 = vmul.f32 %v2927_v16, %v2999_v35  ;;  %v221_v14 = vld [vmem:[%s2912_s26 + $0x38] sm:$0x1] }
  0x3e   : > { %v603_v54 = vadd.f32 %v499_v51, %v326_v7  ;;  %v744_v50 = vsel %vm731_vm1, %v742_v49, %v743_v37  ;;  %v1054_v56 = vrot.slane %v954_v21, 1  ;;  %v1055_v59 = vrot.slane %v3123_v53, 1 }
  0x3f   : > { %v1471_v58 = vadd.f32 %v1439_v60, %v1403_v46  ;;  %v3133_v62 = vmul.f32 %v2927_v16, %v3003_v45  ;;  %v1440_v63 = vmul.f32 %v3088_v29, %v2929_v17  ;;  %v2729_v0 = vpop.eup %2728  ;;  %v1298_v3 = vrot.slane %v1198_v57, 2 }
  0x40   : > { %v848_v1 = vadd.f32 %v744_v50, %v603_v54  ;;  %v1510_v4 = vmul.f32 %v3088_v29, %v2931_v18  ;;  %v3141_v5 = vmul.f32 %v3090_v31, %v2931_v18  ;;  %v2124_v60 = vadd.f32 1.0, %v2729_v0 }
  0x41   : > { %v1715_v6 = vadd.f32 %v1609_v33, %v1471_v58  ;;  %v1056_v12 = vsel %vm486_vm0, %v1054_v56, %v1055_v59  ;;  %v1299_v13 = vrot.slane %v3133_v62, 2  ;;  %v1754_v55 = vmul.f32 %v3088_v29, %v2942_v26 }
  0x42   : > { %v916_v19 = vadd.f32 %v884_v42, %v848_v1  ;;  %v1610_v20 = vrot.slane %v1510_v4, 1  ;;  %v1611_v23 = vrot.slane %v3141_v5, 1  ;;  %2734 = vrcp.f32 %v2124_v60 }
  0x43   : > { %v1959_v28 = vadd.f32 %v1853_v39, %v1715_v6  ;;  %v1300_v32 = vsel %vm731_vm1, %v1298_v3, %v1299_v13  ;;  %v1755_v33 = vmul.f32 %v3090_v31, %v2942_v26  ;;  %v1854_v36 = vrot.slane %v1754_v55, 2  ;;  %v222_v3 = vld [vmem:[%s2912_s26 + $0x3c] sm:$0xff]  }
  0x44   : > { %v2731_v24 = vpop.eup %2730  ;;  %v1160_v7 = vadd.f32 %v1056_v12, %v916_v19  ;;  %v1612_v34 = vsel %vm486_vm0, %v1610_v20, %v1611_v23  ;;  %v3156_v41 = vunpack.c.l.bf16 %v221_v14  ;;  %v327_v39 = vmul.f32 %v2935_v22, %v2914_v8 }
  0x45   : > { %v2219_v43 = vmul.f32 %v2731_v24, %v3038_v2  ;;  %v3160_v44 = vadd.f32 %v3024_v52, %v1959_v28  ;;  %v1855_v48 = vrot.slane %v1755_v33, 2  ;;  %v398_v42 = vmul.f32 %v2916_v9, %v2977_v61 }
  0x46   : > { %v1404_v49 = vadd.f32 %v1300_v32, %v1160_v7  ;;  %v643_v2 = vmul.f32 %v2918_v10, %v2977_v61  ;;  %v885_v21 = vmul.f32 %v2920_v11, %v3003_v45  ;;  %v956_v61 = vmul.f32 %v2925_v15, %v3057_v47 }
  0x47   : > { %v2733_v46 = vpop.eup %2732  ;;  %v2641_v51 = vpack.c.bf16 %v2219_v43, %v2219_v43  ;;  %v2413_v22 = vsel %vm2412_vm2, %v2219_v43, 0.0  ;;  %v2577_v54 = vmul.f32 -1.442695, %v3160_v44  ;;  %v1856_v50 = vsel %vm731_vm1, %v1854_v36, %v1855_v48 }
  0x48   : > { %v2125_v56 = vadd.f32 1.0, %v2733_v46  ;;  %v1472_v57 = vadd.f32 %v1440_v63, %v1404_v49  ;;  %v500_v58 = vrot.slane %v398_v42, 1  ;;  %v745_v62 = vrot.slane %v643_v2, 2 }
  0x49   : > { %2380 = vst.msk [vmem:[%s3167_s6] sm:$0xf] %vm2379_vm3, %v2641_v51  ;;  %2736 = vpow2.f32 %v2577_v54  ;;  %v1200_v0 = vmul.f32 %v2927_v16, %v3057_v47  ;;  %v1441_v1 = vmul.f32 %v3090_v31, %v2929_v17  ;;  %v1057_v6 = vrot.slane %v956_v61, 1 }
  0x4a   : > { %2738 = vrcp.f32 %v2125_v56  ;;  %v1716_v4 = vadd.f32 %v1612_v34, %v1472_v57  ;;  %v501_v63 = vsel %vm486_vm0, %v498_v40, %v500_v58  ;;  %v746_v5 = vsel %vm731_vm1, %v743_v37, %v745_v62 }
  0x4b   : > { %v604_v60 = vadd.f32 %v501_v63, %v327_v39  ;;  %v1301_v12 = vrot.slane %v1200_v0, 2  ;;  %v1512_v14 = vmul.f32 %v2931_v18, %v3156_v41  ;;  %v1756_v20 = vmul.f32 %v2942_v26, %v3156_v41 }
  0x4c   : > { %v1960_v19 = vadd.f32 %v1856_v50, %v1716_v4  ;;  %v3197_v55 = vunpack.c.l.bf16 %v222_v3  ;;  %v3199_v28 = vunpack.c.h.bf16 %v222_v3  ;;  %v2735_v38 = vpop.eup %2734  ;;  %v1058_v27 = vsel %vm486_vm0, %v1055_v59, %v1057_v6 }
  0x4d   : > { %v849_v40 = vadd.f32 %v746_v5, %v604_v60  ;;  %v1302_v37 = vsel %vm731_vm1, %v1299_v13, %v1301_v12  ;;  %v1613_v32 = vrot.slane %v1512_v14, 1  ;;  %v2220_v33 = vmul.f32 %v2735_v38, %v3071_v25 }
  0x4e   : > { %v3207_v24 = vadd.f32 %v3024_v52, %v1960_v19  ;;  %v1857_v7 = vrot.slane %v1756_v20, 2  ;;  %v328_v34 = vmul.f32 %v2914_v8, %v2999_v35  ;;  %v399_v53 = vmul.f32 %v2916_v9, %v2999_v35 }
  0x4f   : > { %v917_v36 = vadd.f32 %v885_v21, %v849_v40  ;;  %v1614_v43 = vsel %vm486_vm0, %v1611_v23, %v1613_v32  ;;  %v3216_v59 = vmul.f32 %v2916_v9, %v3003_v45  ;;  %v2642_v13 = vpack.c.bf16 %v2220_v33, %v2220_v33 }
  0x50   : > { %v2414_v25 = vsel %vm2412_vm2, %v2220_v33, 0.0  ;;  %v2578_v39 = vmul.f32 -1.442695, %v3207_v24  ;;  %v1858_v49 = vsel %vm731_vm1, %v1855_v48, %v1857_v7  ;;  %v502_v46 = vrot.slane %v399_v53, 1 }
  0x51   : > { %v2415_v42 = vadd.f32 %v2414_v25, %v2413_v22  ;;  %v1161_v2 = vadd.f32 %v1058_v27, %v917_v36  ;;  %v503_v21 = vrot.slane %v3216_v59, 1  ;;  %2381 = vst.msk [vmem:[%s3167_s6 + $0x4] sm:$0xf] %vm2379_vm3, %v2642_v13  ;;  %v644_v23 = vmul.f32 %v2918_v10, %v2999_v35 }
  0x52   : > { %2740 = vpow2.f32 %v2578_v39  ;;  %v3228_v51 = vmul.f32 %v2918_v10, %v3003_v45  ;;  %v886_v54 = vmul.f32 %v3088_v29, %v2920_v11  ;;  %v957_v56 = vmul.f32 %v3088_v29, %v2925_v15 }
  0x53   : > { %v2737_v50 = vpop.eup %2736  ;;  %v1405_v48 = vadd.f32 %v1302_v37, %v1161_v2  ;;  %v504_v22 = vsel %vm486_vm0, %v502_v46, %v503_v21  ;;  %v3239_v57 = vmul.f32 %v3090_v31, %v2925_v15  ;;  %v747_v61 = vrot.slane %v644_v23, 2  ;;  %v224_v37 = vld [vmem:[%s2912_s26 + $0x44] sm:$0x1] }
  0x54   : > { %v2739_v35 = vpop.eup %2738  ;;  %v2126_v58 = vadd.f32 1.0, %v2737_v50  ;;  %v605_v62 = vadd.f32 %v504_v22, %v328_v34  ;;  %v748_v0 = vrot.slane %v3228_v51, 2  ;;  %v1059_v63 = vrot.slane %v957_v56, 1 }
  0x55   : > { %v2221_v3 = vmul.f32 %v2739_v35, %v3096_v30  ;;  %v1473_v4 = vadd.f32 %v1441_v1, %v1405_v48  ;;  %v1060_v5 = vrot.slane %v3239_v57, 1  ;;  %v1201_v6 = vmul.f32 %v3088_v29, %v2927_v16 }
  0x56   : > { %2742 = vrcp.f32 %v2126_v58  ;;  %v749_v60 = vsel %vm731_vm1, %v747_v61, %v748_v0  ;;  %v1202_v12 = vmul.f32 %v3090_v31, %v2927_v16  ;;  %v1442_v7 = vmul.f32 %v2929_v17, %v3197_v55 }
  0x57   : > { %v2643_v14 = vpack.c.bf16 %v2221_v3, %v2221_v3  ;;  %v2416_v19 = vsel %vm2412_vm2, %v2221_v3, 0.0  ;;  %v1717_v20 = vadd.f32 %v1614_v43, %v1473_v4  ;;  %v850_v30 = vadd.f32 %v749_v60, %v605_v62 }
  0x58   : > { %v2417_v38 = vadd.f32 %v2416_v19, %v2415_v42  ;;  %v1061_v1 = vsel %vm486_vm0, %v1059_v63, %v1060_v5  ;;  %v1303_v40 = vrot.slane %v1201_v6, 2  ;;  %v1304_v27 = vrot.slane %v1202_v12, 2 }
  0x59   : > { %2382 = vst.msk [vmem:[%s3167_s6 + $0x8] sm:$0xf] %vm2379_vm3, %v2643_v14  ;;  %v1961_v32 = vadd.f32 %v1858_v49, %v1717_v20  ;;  %v918_v33 = vadd.f32 %v886_v54, %v850_v30  ;;  %v1513_v34 = vmul.f32 %v2931_v18, %v3197_v55  ;;  %v1514_v43 = vmul.f32 %v2931_v18, %v3199_v28 }
  0x5a   : > { %v1305_v36 = vsel %vm731_vm1, %v1303_v40, %v1304_v27  ;;  %v1757_v53 = vmul.f32 %v2942_v26, %v3197_v55  ;;  %v3265_v13 = vmul.f32 %v2942_v26, %v3199_v28  ;;  %v3270_v42 = vunpack.c.l.bf16 %v224_v37  ;;  %v2711_v37 = vld [vmem:[%s2912_s26 + $0x48] sm:$0xff]  }
  0x5b   : > { %v3268_v25 = vadd.f32 %v3024_v52, %v1961_v32  ;;  %v1162_v39 = vadd.f32 %v1061_v1, %v918_v33  ;;  %v1615_v49 = vrot.slane %v1513_v34, 1  ;;  %v1616_v46 = vrot.slane %v1514_v43, 1 }
  0x5c   : > { %v2741_v2 = vpop.eup %2740  ;;  %v1859_v23 = vrot.slane %v1757_v53, 2  ;;  %v1860_v51 = vrot.slane %v3265_v13, 2  ;;  %v329_v54 = vmul.f32 %v2914_v8, %v3003_v45  ;;  %v401_v56 = vmul.f32 %v2916_v9, %v3057_v47 }
  0x5d   : > { %v2127_v50 = vadd.f32 1.0, %v2741_v2  ;;  %v2579_v48 = vmul.f32 -1.442695, %v3268_v25  ;;  %v1406_v22 = vadd.f32 %v1305_v36, %v1162_v39  ;;  %v1617_v57 = vsel %vm486_vm0, %v1615_v49, %v1616_v46 }
  0x5e   : > { %v1861_v35 = vsel %vm731_vm1, %v1859_v23, %v1860_v51  ;;  %v646_v58 = vmul.f32 %v2918_v10, %v3057_v47  ;;  %v887_v62 = vmul.f32 %v3090_v31, %v2920_v11  ;;  %v505_v45 = vrot.slane %v401_v56, 1 }
  0x5f   : > { %2744 = vrcp.f32 %v2127_v50  ;;  %v1474_v61 = vadd.f32 %v1442_v7, %v1406_v22  ;;  %v959_v3 = vmul.f32 %v2925_v15, %v3156_v41  ;;  %v1203_v60 = vmul.f32 %v2927_v16, %v3156_v41 }
  0x60   : > { %v2743_v4 = vpop.eup %2742  ;;  %2746 = vpow2.f32 %v2579_v48  ;;  %v750_v63 = vrot.slane %v646_v58, 2  ;;  %v1443_v6 = vmul.f32 %v2929_v17, %v3199_v28  ;;  %v506_v14 = vsel %vm486_vm0, %v503_v21, %v505_v45 }
  0x61   : > { %v2222_v47 = vmul.f32 %v2743_v4, %v3160_v44  ;;  %v1718_v12 = vadd.f32 %v1617_v57, %v1474_v61  ;;  %v1062_v19 = vrot.slane %v959_v3, 1  ;;  %v606_v20 = vadd.f32 %v506_v14, %v329_v54 }
  0x62   : > { %v751_v30 = vsel %vm731_vm1, %v748_v0, %v750_v63  ;;  %v1306_v1 = vrot.slane %v1203_v60, 2  ;;  %v1515_v40 = vmul.f32 %v2931_v18, %v3270_v42  ;;  %v1759_v43 = vmul.f32 %v2942_v26, %v3270_v42 }
  0x63   : > { %v2644_v32 = vpack.c.bf16 %v2222_v47, %v2222_v47  ;;  %v2418_v33 = vsel %vm2412_vm2, %v2222_v47, 0.0  ;;  %v1962_v7 = vadd.f32 %v1861_v35, %v1718_v12  ;;  %v1063_v44 = vsel %vm486_vm0, %v1060_v5, %v1062_v19 }
  0x64   : > { %v2419_v34 = vadd.f32 %v2418_v33, %v2417_v38  ;;  %v851_v59 = vadd.f32 %v751_v30, %v606_v20  ;;  %v1307_v36 = vsel %vm731_vm1, %v1304_v27, %v1306_v1  ;;  %v1618_v21 = vrot.slane %v1515_v40, 1 }
  0x65   : > { %2383 = vst.msk [vmem:[%s3167_s6 + $0xc] sm:$0xf] %vm2379_vm3, %v2644_v32  ;;  %v3304_v0 = vadd.f32 %v3024_v52, %v1962_v7  ;;  %v3308_v53 = vunpack.c.l.bf16 %v2711_v37  ;;  %v3310_v13 = vunpack.c.h.bf16 %v2711_v37  ;;  %v330_v38 = vmul.f32 %v3088_v29, %v2914_v8 }
  0x66   : > { %v919_v39 = vadd.f32 %v887_v62, %v851_v59  ;;  %v1619_v5 = vsel %vm486_vm0, %v1616_v46, %v1618_v21  ;;  %v402_v27 = vmul.f32 %v3088_v29, %v2916_v9  ;;  %v1862_v2 = vrot.slane %v1759_v43, 2 }
  0x67   : > { %v2580_v49 = vmul.f32 -1.442695, %v3304_v0  ;;  %v3320_v23 = vmul.f32 %v3090_v31, %v2916_v9  ;;  %v647_v54 = vmul.f32 %v3088_v29, %v2918_v10  ;;  %v3326_v46 = vmul.f32 %v3090_v31, %v2918_v10 }
  0x68   : > { %v1163_v50 = vadd.f32 %v1063_v44, %v919_v39  ;;  %v507_v48 = vrot.slane %v402_v27, 1  ;;  %v888_v22 = vmul.f32 %v2920_v11, %v3197_v55  ;;  %v1863_v57 = vsel %vm731_vm1, %v1860_v51, %v1862_v2 }
  0x69   : > { %v2745_v56 = vpop.eup %2744  ;;  %2748 = vpow2.f32 %v2580_v49  ;;  %v508_v35 = vrot.slane %v3320_v23, 1  ;;  %v752_v58 = vrot.slane %v647_v54, 2  ;;  %v753_v45 = vrot.slane %v3326_v46, 2 }
  0x6a   : > { %v2747_v62 = vpop.eup %2746  ;;  %v2223_v61 = vmul.f32 %v2745_v56, %v3207_v24  ;;  %v1407_v29 = vadd.f32 %v1307_v36, %v1163_v50  ;;  %v960_v3 = vmul.f32 %v2925_v15, %v3197_v55  ;;  %v961_v51 = vmul.f32 %v2925_v15, %v3199_v28 }
  0x6b   : > { %v2128_v4 = vadd.f32 1.0, %v2747_v62  ;;  %v509_v63 = vsel %vm486_vm0, %v507_v48, %v508_v35  ;;  %v1204_v60 = vmul.f32 %v2927_v16, %v3197_v55  ;;  %v754_v20 = vsel %vm731_vm1, %v752_v58, %v753_v45 }
  0x6c   : > { %v2645_v47 = vpack.c.bf16 %v2223_v61, %v2223_v61  ;;  %v2420_v24 = vsel %vm2412_vm2, %v2223_v61, 0.0  ;;  %v1475_v12 = vadd.f32 %v1443_v6, %v1407_v29  ;;  %v607_v14 = vadd.f32 %v509_v63, %v330_v38 }
  0x6d   : > { %v2421_v19 = vadd.f32 %v2420_v24, %v2419_v34  ;;  %2750 = vrcp.f32 %v2128_v4  ;;  %v1064_v30 = vrot.slane %v960_v3, 1  ;;  %v1065_v37 = vrot.slane %v961_v51, 1  ;;  %v227_v34 = vld [vmem:[%s2912_s26 + $0x50] sm:$0x1] }
  0x6e   : > { %2384 = vst.msk [vmem:[%s3167_s6 + $0x10] sm:$0xf] %vm2379_vm3, %v2645_v47  ;;  %v1719_v1 = vadd.f32 %v1619_v5, %v1475_v12  ;;  %v852_v40 = vadd.f32 %v754_v20, %v607_v14  ;;  %v1205_v32 = vmul.f32 %v2927_v16, %v3199_v28  ;;  %v1308_v33 = vrot.slane %v1204_v60, 2 }
  0x6f   : > { %v1444_v6 = vmul.f32 %v3308_v53, %v2929_v17  ;;  %v1516_v7 = vmul.f32 %v3308_v53, %v2931_v18  ;;  %v1517_v44 = vmul.f32 %v3310_v13, %v2931_v18  ;;  %v1066_v21 = vsel %vm486_vm0, %v1064_v30, %v1065_v37 }
  0x70   : > { %v1963_v59 = vadd.f32 %v1863_v57, %v1719_v1  ;;  %v920_v36 = vadd.f32 %v888_v22, %v852_v40  ;;  %v1309_v43 = vrot.slane %v1205_v32, 2  ;;  %v1760_v38 = vmul.f32 %v3308_v53, %v2942_v26 }
  0x71   : > { %v1620_v39 = vrot.slane %v1516_v7, 1  ;;  %v1621_v5 = vrot.slane %v1517_v44, 1  ;;  %v1761_v27 = vmul.f32 %v3310_v13, %v2942_v26  ;;  %v3367_v50 = vunpack.c.l.bf16 %v227_v34  ;;  %v228_v34 = vld [vmem:[%s2912_s26 + $0x54] sm:$0xff]  }
  0x72   : > { %v3364_v49 = vadd.f32 %v3024_v52, %v1963_v59  ;;  %v1164_v2 = vadd.f32 %v1066_v21, %v920_v36  ;;  %v1310_v54 = vsel %vm731_vm1, %v1308_v33, %v1309_v43  ;;  %v1864_v56 = vrot.slane %v1760_v38, 2 }
  0x73   : > { %v2749_v48 = vpop.eup %2748  ;;  %v1622_v22 = vsel %vm486_vm0, %v1620_v39, %v1621_v5  ;;  %v1865_v57 = vrot.slane %v1761_v27, 2  ;;  %v331_v58 = vmul.f32 %v3090_v31, %v2914_v8  ;;  %v404_v3 = vmul.f32 %v2916_v9, %v3156_v41 }
  0x74   : > { %v2129_v62 = vadd.f32 1.0, %v2749_v48  ;;  %v2581_v61 = vmul.f32 -1.442695, %v3364_v49  ;;  %v1408_v29 = vadd.f32 %v1310_v54, %v1164_v2  ;;  %v649_v63 = vmul.f32 %v2918_v10, %v3156_v41 }
  0x75   : > { %v1866_v4 = vsel %vm731_vm1, %v1864_v56, %v1865_v57  ;;  %v889_v51 = vmul.f32 %v2920_v11, %v3199_v28  ;;  %v962_v60 = vmul.f32 %v2925_v15, %v3270_v42  ;;  %v510_v47 = vrot.slane %v404_v3, 1 }
  0x76   : > { %2752 = vrcp.f32 %v2129_v62  ;;  %v1476_v31 = vadd.f32 %v1444_v6, %v1408_v29  ;;  %v1206_v24 = vmul.f32 %v2927_v16, %v3270_v42  ;;  %v755_v14 = vrot.slane %v649_v63, 2 }
  0x77   : > { %v2751_v12 = vpop.eup %2750  ;;  %2754 = vpow2.f32 %v2581_v61  ;;  %v1067_v20 = vrot.slane %v962_v60, 1  ;;  %v1445_v41 = vmul.f32 %v3310_v13, %v2929_v17  ;;  %v511_v40 = vsel %vm486_vm0, %v508_v35, %v510_v47 }
  0x78   : > { %v2224_v30 = vmul.f32 %v2751_v12, %v3268_v25  ;;  %v1720_v1 = vadd.f32 %v1622_v22, %v1476_v31  ;;  %v1311_v32 = vrot.slane %v1206_v24, 2  ;;  %v608_v33 = vadd.f32 %v511_v40, %v331_v58 }
  0x79   : > { %v756_v6 = vsel %vm731_vm1, %v753_v45, %v755_v14  ;;  %v1068_v7 = vsel %vm486_vm0, %v1065_v37, %v1067_v20  ;;  %v1518_v44 = vmul.f32 %v2931_v18, %v3367_v50  ;;  %v1762_v46 = vmul.f32 %v2942_v26, %v3367_v50 }
  0x7a   : > { %v2646_v59 = vpack.c.bf16 %v2224_v30, %v2224_v30  ;;  %v2422_v25 = vsel %vm2412_vm2, %v2224_v30, 0.0  ;;  %v1964_v36 = vadd.f32 %v1866_v4, %v1720_v1  ;;  %v1312_v23 = vsel %vm731_vm1, %v1309_v43, %v1311_v32 }
  0x7b   : > { %v2423_v21 = vadd.f32 %v2422_v25, %v2421_v19  ;;  %v853_v35 = vadd.f32 %v756_v6, %v608_v33  ;;  %v1623_v39 = vrot.slane %v1518_v44, 1  ;;  %v3406_v37 = vunpack.c.l.bf16 %v228_v34  ;;  %v230_v25 = vld [vmem:[%s2912_s26 + $0x5c] sm:$0x1] }
  0x7c   : > { %2385 = vst.msk [vmem:[%s3167_s6 + $0x14] sm:$0xf] %vm2379_vm3, %v2646_v59  ;;  %v3404_v45 = vadd.f32 %v3024_v52, %v1964_v36  ;;  %v3408_v38 = vunpack.c.h.bf16 %v228_v34  ;;  %v332_v27 = vmul.f32 %v2914_v8, %v3197_v55  ;;  %v1867_v43 = vrot.slane %v1762_v46, 2 }
  0x7d   : > { %v921_v2 = vadd.f32 %v889_v51, %v853_v35  ;;  %v1624_v19 = vsel %vm486_vm0, %v1621_v5, %v1623_v39  ;;  %v405_v54 = vmul.f32 %v2916_v9, %v3197_v55  ;;  %v3418_v22 = vmul.f32 %v2916_v9, %v3199_v28 }
  0x7e   : > { %v2582_v48 = vmul.f32 -1.442695, %v3404_v45  ;;  %v650_v56 = vmul.f32 %v2918_v10, %v3197_v55  ;;  %v3424_v58 = vmul.f32 %v2918_v10, %v3199_v28  ;;  %v1868_v5 = vsel %vm731_vm1, %v1865_v57, %v1867_v43 }
  0x7f   : > { %v1165_v62 = vadd.f32 %v1068_v7, %v921_v2  ;;  %v512_v61 = vrot.slane %v405_v54, 1  ;;  %v890_v29 = vmul.f32 %v3308_v53, %v2920_v11  ;;  %v513_v4 = vrot.slane %v3418_v22, 1 }
  0x80   : > { %v2753_v3 = vpop.eup %2752  ;;  %2756 = vpow2.f32 %v2582_v48  ;;  %v757_v63 = vrot.slane %v650_v56, 2  ;;  %v758_v51 = vrot.slane %v3424_v58, 2  ;;  %v963_v47 = vmul.f32 %v3308_v53, %v2925_v15 }
  0x81   : > { %v2755_v60 = vpop.eup %2754  ;;  %v2225_v55 = vmul.f32 %v2753_v3, %v3304_v0  ;;  %v1409_v31 = vadd.f32 %v1312_v23, %v1165_v62  ;;  %v3436_v57 = vmul.f32 %v3310_v13, %v2925_v15  ;;  %v514_v12 = vsel %vm486_vm0, %v512_v61, %v513_v4 }
  0x82   : > { %v2130_v24 = vadd.f32 1.0, %v2755_v60  ;;  %v759_v14 = vsel %vm731_vm1, %v757_v63, %v758_v51  ;;  %v1207_v0 = vmul.f32 %v3308_v53, %v2927_v16  ;;  %v609_v40 = vadd.f32 %v514_v12, %v332_v27 }
  0x83   : > { %v2647_v20 = vpack.c.bf16 %v2225_v55, %v2225_v55  ;;  %v2424_v30 = vsel %vm2412_vm2, %v2225_v55, 0.0  ;;  %v1477_v1 = vadd.f32 %v1445_v41, %v1409_v31  ;;  %v1069_v33 = vrot.slane %v963_v47, 1 }
  0x84   : > { %v2425_v32 = vadd.f32 %v2424_v30, %v2423_v21  ;;  %2758 = vrcp.f32 %v2130_v24  ;;  %v1070_v6 = vrot.slane %v3436_v57, 1  ;;  %v854_v44 = vadd.f32 %v759_v14, %v609_v40 }
  0x85   : > { %2386 = vst.msk [vmem:[%s3167_s6 + $0x18] sm:$0xf] %vm2379_vm3, %v2647_v20  ;;  %v1721_v7 = vadd.f32 %v1624_v19, %v1477_v1  ;;  %v1208_v34 = vmul.f32 %v3310_v13, %v2927_v16  ;;  %v1313_v59 = vrot.slane %v1207_v0, 2  ;;  %v1446_v41 = vmul.f32 %v2929_v17, %v3406_v37 }
  0x86   : > { %v1071_v36 = vsel %vm486_vm0, %v1069_v33, %v1070_v6  ;;  %v1519_v23 = vmul.f32 %v2931_v18, %v3406_v37  ;;  %v1520_v21 = vmul.f32 %v2931_v18, %v3408_v38  ;;  %v922_v39 = vadd.f32 %v890_v29, %v854_v44 }
  0x87   : > { %v1965_v35 = vadd.f32 %v1868_v5, %v1721_v7  ;;  %v1314_v46 = vrot.slane %v1208_v34, 2  ;;  %v1763_v27 = vmul.f32 %v2942_v26, %v3406_v37  ;;  %v1764_v43 = vmul.f32 %v2942_v26, %v3408_v38 }
  0x88   : > { %v1625_v2 = vrot.slane %v1519_v23, 1  ;;  %v1626_v19 = vrot.slane %v1520_v21, 1  ;;  %v3462_v54 = vunpack.c.l.bf16 %v230_v25  ;;  %v1166_v22 = vadd.f32 %v1071_v36, %v922_v39 }
  0x89   : > { %v3465_v48 = vadd.f32 %v3024_v52, %v1965_v35  ;;  %v1315_v56 = vsel %vm731_vm1, %v1313_v59, %v1314_v46  ;;  %v1869_v62 = vrot.slane %v1763_v27, 2  ;;  %v1870_v29 = vrot.slane %v1764_v43, 2 }
  0x8a   : > { %v2757_v5 = vpop.eup %2756  ;;  %v1627_v61 = vsel %vm486_vm0, %v1625_v2, %v1626_v19  ;;  %v333_v3 = vmul.f32 %v2914_v8, %v3199_v28  ;;  %v407_v63 = vmul.f32 %v2916_v9, %v3270_v42  ;;  %v1410_v31 = vadd.f32 %v1315_v56, %v1166_v22 }
  0x8b   : > { %v2131_v60 = vadd.f32 1.0, %v2757_v5  ;;  %v2583_v55 = vmul.f32 -1.442695, %v3465_v48  ;;  %v652_v47 = vmul.f32 %v2918_v10, %v3270_v42  ;;  %v1871_v57 = vsel %vm731_vm1, %v1869_v62, %v1870_v29 }
  0x8c   : > { %v515_v24 = vrot.slane %v407_v63, 1  ;;  %v891_v12 = vmul.f32 %v3310_v13, %v2920_v11  ;;  %v965_v14 = vmul.f32 %v2925_v15, %v3367_v50  ;;  %v1478_v28 = vadd.f32 %v1446_v41, %v1410_v31  ;;  %v2712_v41 = vld [vmem:[%s2912_s26 + $0x60] sm:$0xff]  }
  0x8d   : > { %2760 = vrcp.f32 %v2131_v60  ;;  %v760_v0 = vrot.slane %v652_v47, 2  ;;  %v1209_v20 = vmul.f32 %v2927_v16, %v3367_v50  ;;  %v1447_v40 = vmul.f32 %v2929_v17, %v3408_v38 }
  0x8e   : > { %v2759_v30 = vpop.eup %2758  ;;  %2762 = vpow2.f32 %v2583_v55  ;;  %v516_v42 = vsel %vm486_vm0, %v513_v4, %v515_v24  ;;  %v1072_v1 = vrot.slane %v965_v14, 1  ;;  %v1722_v7 = vadd.f32 %v1627_v61, %v1478_v28 }
  0x8f   : > { %v2226_v33 = vmul.f32 %v2759_v30, %v3364_v49  ;;  %v610_v44 = vadd.f32 %v516_v42, %v333_v3  ;;  %v761_v34 = vsel %vm731_vm1, %v758_v51, %v760_v0  ;;  %v1316_v25 = vrot.slane %v1209_v20, 2 }
  0x90   : > { %v1073_v59 = vsel %vm486_vm0, %v1070_v6, %v1072_v1  ;;  %v1521_v36 = vmul.f32 %v2931_v18, %v3462_v54  ;;  %v1765_v4 = vmul.f32 %v2942_v26, %v3462_v54  ;;  %v1966_v21 = vadd.f32 %v1871_v57, %v1722_v7 }
  0x91   : > { %v2648_v23 = vpack.c.bf16 %v2226_v33, %v2226_v33  ;;  %v2426_v49 = vsel %vm2412_vm2, %v2226_v33, 0.0  ;;  %v855_v35 = vadd.f32 %v761_v34, %v610_v44  ;;  %v1317_v58 = vsel %vm731_vm1, %v1314_v46, %v1316_v25 }
  0x92   : > { %v2427_v39 = vadd.f32 %v2426_v49, %v2425_v32  ;;  %v1628_v27 = vrot.slane %v1521_v36, 1  ;;  %v1872_v51 = vrot.slane %v1765_v4, 2  ;;  %v3501_v6 = vadd.f32 %v3024_v52, %v1966_v21 }
  0x93   : > { %2387 = vst.msk [vmem:[%s3167_s6 + $0x1c] sm:$0xf] %vm2379_vm3, %v2648_v23  ;;  %v923_v2 = vadd.f32 %v891_v12, %v855_v35  ;;  %v3503_v43 = vunpack.c.l.bf16 %v2712_v41  ;;  %v3505_v22 = vunpack.c.h.bf16 %v2712_v41  ;;  %v334_v32 = vmul.f32 %v3308_v53, %v2914_v8  ;;  %v233_v41 = vld [vmem:[%s2912_s26 + $0x68] sm:$0x1] }
  0x94   : > { %v1629_v56 = vsel %vm486_vm0, %v1626_v19, %v1628_v27  ;;  %v1873_v62 = vsel %vm731_vm1, %v1870_v29, %v1872_v51  ;;  %v408_v46 = vmul.f32 %v3308_v53, %v2916_v9  ;;  %v2584_v5 = vmul.f32 -1.442695, %v3501_v6 }
  0x95   : > { %v1167_v61 = vadd.f32 %v1073_v59, %v923_v2  ;;  %v3516_v52 = vmul.f32 %v3310_v13, %v2916_v9  ;;  %v653_v3 = vmul.f32 %v3308_v53, %v2918_v10  ;;  %v3522_v19 = vmul.f32 %v3310_v13, %v2918_v10  ;;  %v3562_v2 = vld [vmem:[%s4558_s2] ss:$0 sm:$0xff] }
  0x96   : > { %v517_v63 = vrot.slane %v408_v46, 1  ;;  %v892_v29 = vmul.f32 %v2920_v11, %v3406_v37  ;;  %v966_v60 = vmul.f32 %v2925_v15, %v3406_v37  ;;  %2764 = vpow2.f32 %v2584_v5 }
  0x97   : > { %v2761_v55 = vpop.eup %2760  ;;  %v1411_v31 = vadd.f32 %v1317_v58, %v1167_v61  ;;  %v518_v47 = vrot.slane %v3516_v52, 1  ;;  %v762_v57 = vrot.slane %v653_v3, 2  ;;  %v763_v12 = vrot.slane %v3522_v19, 2 }
  0x98   : > { %v2763_v24 = vpop.eup %2762  ;;  %v2227_v53 = vmul.f32 %v2761_v55, %v3404_v45  ;;  %v3533_v14 = vmul.f32 %v2925_v15, %v3408_v38  ;;  %v1074_v28 = vrot.slane %v966_v60, 1  ;;  %v1210_v42 = vmul.f32 %v2927_v16, %v3406_v37 }
  0x99   : > { %v2132_v0 = vadd.f32 1.0, %v2763_v24  ;;  %v1479_v20 = vadd.f32 %v1447_v40, %v1411_v31  ;;  %v519_v30 = vsel %vm486_vm0, %v517_v63, %v518_v47  ;;  %v764_v7 = vsel %vm731_vm1, %v762_v57, %v763_v12 }
  0x9a   : > { %v2649_v1 = vpack.c.bf16 %v2227_v53, %v2227_v53  ;;  %v2428_v33 = vsel %vm2412_vm2, %v2227_v53, 0.0  ;;  %v611_v45 = vadd.f32 %v519_v30, %v334_v32  ;;  %v1075_v59 = vrot.slane %v3533_v14, 1 }
  0x9b   : > { %v2429_v44 = vadd.f32 %v2428_v33, %v2427_v39  ;;  %2766 = vrcp.f32 %v2132_v0  ;;  %v1723_v34 = vadd.f32 %v1629_v56, %v1479_v20  ;;  %v1211_v25 = vmul.f32 %v2927_v16, %v3408_v38 }
  0x9c   : > { %2388 = vst.msk [vmem:[%s3167_s6 + $0x20] sm:$0xf] %vm2379_vm3, %v2649_v1  ;;  %v856_v40 = vadd.f32 %v764_v7, %v611_v45  ;;  %v1318_v36 = vrot.slane %v1210_v42, 2  ;;  %v1448_v4 = vmul.f32 %v3503_v43, %v2929_v17  ;;  %v1076_v49 = vsel %vm486_vm0, %v1074_v28, %v1075_v59 }
  0x9d   : > { %v1967_v23 = vadd.f32 %v1873_v62, %v1723_v34  ;;  %v1522_v21 = vmul.f32 %v3503_v43, %v2931_v18  ;;  %v1523_v35 = vmul.f32 %v3505_v22, %v2931_v18  ;;  %v1319_v58 = vrot.slane %v1211_v25, 2 }
  0x9e   : > { %v924_v39 = vadd.f32 %v892_v29, %v856_v40  ;;  %v1766_v27 = vmul.f32 %v3503_v43, %v2942_v26  ;;  %v1767_v51 = vmul.f32 %v3505_v22, %v2942_v26  ;;  %v3567_v46 = vunpack.c.l.bf16 %v233_v41 }
  0x9f   : > { %v3565_v56 = vadd.f32 %v3562_v2, %v1967_v23  ;;  %v1630_v62 = vrot.slane %v1522_v21, 1  ;;  %v1631_v32 = vrot.slane %v1523_v35, 1  ;;  %v1320_v61 = vsel %vm731_vm1, %v1318_v36, %v1319_v58 }
  0xa0   : > { %v1168_v5 = vadd.f32 %v1076_v49, %v924_v39  ;;  %v1874_v52 = vrot.slane %v1766_v27, 2  ;;  %v1875_v3 = vrot.slane %v1767_v51, 2  ;;  %v2765_v63 = vpop.eup %2764  ;;  %v335_v55 = vmul.f32 %v3310_v13, %v2914_v8  ;;  %v234_v49 = vld [vmem:[%s2912_s26 + $0x6c] sm:$0xff]  }
  0xa1   : > { %v2585_v29 = vmul.f32 -1.442695, %v3565_v56  ;;  %v1632_v60 = vsel %vm486_vm0, %v1630_v62, %v1631_v32  ;;  %v410_v31 = vmul.f32 %v2916_v9, %v3367_v50  ;;  %v2133_v57 = vadd.f32 1.0, %v2765_v63 }
  0xa2   : > { %v1412_v24 = vadd.f32 %v1320_v61, %v1168_v5  ;;  %v1876_v53 = vsel %vm731_vm1, %v1874_v52, %v1875_v3  ;;  %v655_v14 = vmul.f32 %v2918_v10, %v3367_v50  ;;  %v893_v0 = vmul.f32 %v2920_v11, %v3408_v38 }
  0xa3   : > { %2768 = vpow2.f32 %v2585_v29  ;;  %v520_v28 = vrot.slane %v410_v31, 1  ;;  %v968_v20 = vmul.f32 %v2925_v15, %v3462_v54  ;;  %v1212_v42 = vmul.f32 %v2927_v16, %v3462_v54 }
  0xa4   : > { %2770 = vrcp.f32 %v2133_v57  ;;  %v1480_v13 = vadd.f32 %v1448_v4, %v1412_v24  ;;  %v765_v30 = vrot.slane %v655_v14, 2  ;;  %v1449_v50 = vmul.f32 %v3505_v22, %v2929_v17 }
  0xa5   : > { %v2767_v1 = vpop.eup %2766  ;;  %v521_v33 = vsel %vm486_vm0, %v518_v47, %v520_v28  ;;  %v1077_v45 = vrot.slane %v968_v20, 1  ;;  %v1524_v7 = vmul.f32 %v2931_v18, %v3567_v46  ;;  %v1321_v41 = vrot.slane %v1212_v42, 2 }
  0xa6   : > { %v2228_v34 = vmul.f32 %v2767_v1, %v3465_v48  ;;  %v1724_v40 = vadd.f32 %v1632_v60, %v1480_v13  ;;  %v612_v25 = vadd.f32 %v521_v33, %v335_v55  ;;  %v766_v36 = vsel %vm731_vm1, %v763_v12, %v765_v30 }
  0xa7   : > { %v1078_v4 = vsel %vm486_vm0, %v1075_v59, %v1077_v45  ;;  %v1633_v47 = vrot.slane %v1524_v7, 1  ;;  %v1768_v23 = vmul.f32 %v2942_v26, %v3567_v46  ;;  %v1322_v51 = vsel %vm731_vm1, %v1319_v58, %v1321_v41 }
  0xa8   : > { %v2650_v21 = vpack.c.bf16 %v2228_v34, %v2228_v34  ;;  %v2430_v35 = vsel %vm2412_vm2, %v2228_v34, 0.0  ;;  %v1968_v39 = vadd.f32 %v1876_v53, %v1724_v40  ;;  %v857_v48 = vadd.f32 %v766_v36, %v612_v25 }
  0xa9   : > { %v2431_v27 = vadd.f32 %v2430_v35, %v2429_v44  ;;  %v1634_v19 = vsel %vm486_vm0, %v1631_v32, %v1633_v47  ;;  %v1877_v62 = vrot.slane %v1768_v23, 2  ;;  %v3606_v5 = vunpack.c.l.bf16 %v234_v49 }
  0xaa   : > { %2389 = vst.msk [vmem:[%s3167_s6 + $0x24] sm:$0xf] %vm2379_vm3, %v2650_v21  ;;  %v3604_v12 = vadd.f32 %v3562_v2, %v1968_v39  ;;  %v925_v59 = vadd.f32 %v893_v0, %v857_v48  ;;  %v3608_v61 = vunpack.c.h.bf16 %v234_v49  ;;  %v336_v44 = vmul.f32 %v2914_v8, %v3406_v37  ;;  %v236_v21 = vld [vmem:[%s2912_s26 + $0x74] sm:$0x1] }
  0xab   : > { %v1878_v52 = vsel %vm731_vm1, %v1875_v3, %v1877_v62  ;;  %v411_v58 = vmul.f32 %v2916_v9, %v3406_v37  ;;  %v3617_v32 = vmul.f32 %v2916_v9, %v3408_v38  ;;  %v656_v60 = vmul.f32 %v2918_v10, %v3406_v37 }
  0xac   : > { %v2586_v63 = vmul.f32 -1.442695, %v3604_v12  ;;  %v1169_v29 = vadd.f32 %v1078_v4, %v925_v59  ;;  %v3624_v55 = vmul.f32 %v2918_v10, %v3408_v38  ;;  %v894_v24 = vmul.f32 %v3503_v43, %v2920_v11 }
  0xad   : > { %v2769_v3 = vpop.eup %2768  ;;  %v522_v31 = vrot.slane %v411_v58, 1  ;;  %v523_v57 = vrot.slane %v3617_v32, 1  ;;  %v969_v53 = vmul.f32 %v3503_v43, %v2925_v15  ;;  %v767_v20 = vrot.slane %v656_v60, 2 }
  0xae   : > { %v2771_v14 = vpop.eup %2770  ;;  %v2134_v28 = vadd.f32 1.0, %v2769_v3  ;;  %2772 = vpow2.f32 %v2586_v63  ;;  %v1413_v0 = vadd.f32 %v1322_v51, %v1169_v29  ;;  %v768_v30 = vrot.slane %v3624_v55, 2 }
  0xaf   : > { %v2229_v37 = vmul.f32 %v2771_v14, %v3501_v6  ;;  %v524_v13 = vsel %vm486_vm0, %v522_v31, %v523_v57  ;;  %v3638_v42 = vmul.f32 %v3505_v22, %v2925_v15  ;;  %v1079_v45 = vrot.slane %v969_v53, 1 }
  0xb0   : > { %2774 = vrcp.f32 %v2134_v28  ;;  %v1481_v1 = vadd.f32 %v1449_v50, %v1413_v0  ;;  %v613_v33 = vadd.f32 %v524_v13, %v336_v44  ;;  %v769_v6 = vsel %vm731_vm1, %v767_v20, %v768_v30 }
  0xb1   : > { %v2651_v7 = vpack.c.bf16 %v2229_v37, %v2229_v37  ;;  %v2432_v34 = vsel %vm2412_vm2, %v2229_v37, 0.0  ;;  %v1080_v40 = vrot.slane %v3638_v42, 1  ;;  %v1213_v41 = vmul.f32 %v3503_v43, %v2927_v16 }
  0xb2   : > { %v2433_v25 = vadd.f32 %v2432_v34, %v2431_v27  ;;  %v1725_v36 = vadd.f32 %v1634_v19, %v1481_v1  ;;  %v858_v4 = vadd.f32 %v769_v6, %v613_v33  ;;  %v1214_v47 = vmul.f32 %v3505_v22, %v2927_v16 }
  0xb3   : > { %2390 = vst.msk [vmem:[%s3167_s6 + $0x28] sm:$0xf] %vm2379_vm3, %v2651_v7  ;;  %v1081_v50 = vsel %vm486_vm0, %v1079_v45, %v1080_v40  ;;  %v1450_v23 = vmul.f32 %v2929_v17, %v3606_v5  ;;  %v1525_v49 = vmul.f32 %v2931_v18, %v3606_v5  ;;  %v1323_v48 = vrot.slane %v1213_v41, 2 }
  0xb4   : > { %v1969_v35 = vadd.f32 %v1878_v52, %v1725_v36  ;;  %v926_v39 = vadd.f32 %v894_v24, %v858_v4  ;;  %v3659_v27 = vmul.f32 %v2931_v18, %v3608_v61  ;;  %v1324_v51 = vrot.slane %v1214_v47, 2 }
  0xb5   : > { %v1635_v19 = vrot.slane %v1525_v49, 1  ;;  %v1769_v62 = vmul.f32 %v2942_v26, %v3606_v5  ;;  %v1770_v59 = vmul.f32 %v2942_v26, %v3608_v61  ;;  %v3669_v63 = vunpack.c.l.bf16 %v236_v21 }
  0xb6   : > { %v3666_v44 = vadd.f32 %v3562_v2, %v1969_v35  ;;  %v1170_v58 = vadd.f32 %v1081_v50, %v926_v39  ;;  %v1636_v52 = vrot.slane %v3659_v27, 1  ;;  %v1325_v29 = vsel %vm731_vm1, %v1323_v48, %v1324_v51  ;;  %v2713_v50 = vld [vmem:[%s2912_s26 + $0x78] sm:$0xff]  }
  0xb7   : > { %v1879_v60 = vrot.slane %v1769_v62, 2  ;;  %v1880_v3 = vrot.slane %v1770_v59, 2  ;;  %v337_v31 = vmul.f32 %v2914_v8, %v3408_v38  ;;  %v413_v0 = vmul.f32 %v2916_v9, %v3462_v54 }
  0xb8   : > { %v2773_v24 = vpop.eup %2772  ;;  %v2587_v53 = vmul.f32 -1.442695, %v3666_v44  ;;  %v1414_v14 = vadd.f32 %v1325_v29, %v1170_v58  ;;  %v1637_v28 = vsel %vm486_vm0, %v1635_v19, %v1636_v52  ;;  %v658_v13 = vmul.f32 %v2918_v10, %v3462_v54 }
  0xb9   : > { %v2135_v20 = vadd.f32 1.0, %v2773_v24  ;;  %v1881_v37 = vsel %vm731_vm1, %v1879_v60, %v1880_v3  ;;  %v895_v42 = vmul.f32 %v3505_v22, %v2920_v11  ;;  %v525_v33 = vrot.slane %v413_v0, 1 }
  0xba   : > { %v2775_v38 = vpop.eup %2774  ;;  %2776 = vpow2.f32 %v2587_v53  ;;  %v1482_v1 = vadd.f32 %v1450_v23, %v1414_v14  ;;  %v971_v45 = vmul.f32 %v2925_v15, %v3567_v46  ;;  %v770_v34 = vrot.slane %v658_v13, 2 }
  0xbb   : > { %v2230_v7 = vmul.f32 %v2775_v38, %v3565_v56  ;;  %2778 = vrcp.f32 %v2135_v20  ;;  %v1215_v6 = vmul.f32 %v2927_v16, %v3567_v46  ;;  %v526_v54 = vsel %vm486_vm0, %v523_v57, %v525_v33 }
  0xbc   : > { %v1726_v36 = vadd.f32 %v1637_v28, %v1482_v1  ;;  %v1082_v4 = vrot.slane %v971_v45, 1  ;;  %v1451_v41 = vmul.f32 %v2929_v17, %v3608_v61  ;;  %v614_v56 = vadd.f32 %v526_v54, %v337_v31 }
  0xbd   : > { %v2652_v47 = vpack.c.bf16 %v2230_v7, %v2230_v7  ;;  %v2434_v23 = vsel %vm2412_vm2, %v2230_v7, 0.0  ;;  %v771_v49 = vsel %vm731_vm1, %v768_v30, %v770_v34  ;;  %v1326_v32 = vrot.slane %v1215_v6, 2 }
  0xbe   : > { %v2435_v21 = vadd.f32 %v2434_v23, %v2433_v25  ;;  %v1970_v35 = vadd.f32 %v1881_v37, %v1726_v36  ;;  %v1083_v39 = vsel %vm486_vm0, %v1080_v40, %v1082_v4  ;;  %v859_v57 = vadd.f32 %v771_v49, %v614_v56 }
  0xbf   : > { %2391 = vst.msk [vmem:[%s3167_s6 + $0x2c] sm:$0xf] %vm2379_vm3, %v2652_v47  ;;  %v1527_v48 = vmul.f32 %v2931_v18, %v3669_v63  ;;  %v1771_v27 = vmul.f32 %v2942_v26, %v3669_v63  ;;  %v3705_v19 = vunpack.c.l.bf16 %v2713_v50  ;;  %v1327_v30 = vsel %vm731_vm1, %v1324_v51, %v1326_v32 }
  0xc0   : > { %v3708_v55 = vadd.f32 %v3562_v2, %v1970_v35  ;;  %v3711_v25 = vunpack.c.h.bf16 %v2713_v50  ;;  %v338_v40 = vmul.f32 %v3503_v43, %v2914_v8  ;;  %v927_v62 = vadd.f32 %v895_v42, %v859_v57 }
  0xc1   : > { %v1638_v59 = vrot.slane %v1527_v48, 1  ;;  %v1882_v58 = vrot.slane %v1771_v27, 2  ;;  %v414_v29 = vmul.f32 %v3503_v43, %v2916_v9  ;;  %v3720_v31 = vmul.f32 %v3505_v22, %v2916_v9 }
  0xc2   : > { %v2588_v60 = vmul.f32 -1.442695, %v3708_v55  ;;  %v659_v51 = vmul.f32 %v3503_v43, %v2918_v10  ;;  %v3726_v24 = vmul.f32 %v3505_v22, %v2918_v10  ;;  %v1171_v53 = vadd.f32 %v1083_v39, %v927_v62  ;;  %v239_v39 = vld [vmem:[%s2912_s26 + $0x80] sm:$0x1] }
  0xc3   : > { %v1639_v14 = vsel %vm486_vm0, %v1636_v52, %v1638_v59  ;;  %v1883_v28 = vsel %vm731_vm1, %v1880_v3, %v1882_v58  ;;  %v527_v0 = vrot.slane %v414_v29, 1  ;;  %v528_v37 = vrot.slane %v3720_v31, 1 }
  0xc4   : > { %v2777_v20 = vpop.eup %2776  ;;  %2780 = vpow2.f32 %v2588_v60  ;;  %v772_v13 = vrot.slane %v659_v51, 2  ;;  %v773_v42 = vrot.slane %v3726_v24, 2  ;;  %v1415_v43 = vadd.f32 %v1327_v30, %v1171_v53 }
  0xc5   : > { %v2779_v38 = vpop.eup %2778  ;;  %v2136_v1 = vadd.f32 1.0, %v2777_v20  ;;  %v896_v33 = vmul.f32 %v2920_v11, %v3606_v5  ;;  %v972_v45 = vmul.f32 %v2925_v15, %v3606_v5  ;;  %v529_v3 = vsel %vm486_vm0, %v527_v0, %v528_v37 }
  0xc6   : > { %v2231_v52 = vmul.f32 %v2779_v38, %v3604_v12  ;;  %v774_v7 = vsel %vm731_vm1, %v772_v13, %v773_v42  ;;  %v3745_v34 = vmul.f32 %v2925_v15, %v3608_v61  ;;  %v1483_v6 = vadd.f32 %v1451_v41, %v1415_v43 }
  0xc7   : > { %2782 = vrcp.f32 %v2136_v1  ;;  %v615_v36 = vadd.f32 %v529_v3, %v338_v40  ;;  %v1084_v54 = vrot.slane %v972_v45, 1  ;;  %v1216_v47 = vmul.f32 %v2927_v16, %v3606_v5 }
  0xc8   : > { %v2653_v4 = vpack.c.bf16 %v2231_v52, %v2231_v52  ;;  %v2436_v12 = vsel %vm2412_vm2, %v2231_v52, 0.0  ;;  %v1085_v50 = vrot.slane %v3745_v34, 1  ;;  %v1727_v56 = vadd.f32 %v1639_v14, %v1483_v6 }
  0xc9   : > { %v2437_v23 = vadd.f32 %v2436_v12, %v2435_v21  ;;  %v860_v49 = vadd.f32 %v774_v7, %v615_v36  ;;  %v1217_v35 = vmul.f32 %v2927_v16, %v3608_v61  ;;  %v1328_v32 = vrot.slane %v1216_v47, 2 }
  0xca   : > { %2392 = vst.msk [vmem:[%s3167_s6 + $0x30] sm:$0xf] %vm2379_vm3, %v2653_v4  ;;  %v1086_v41 = vsel %vm486_vm0, %v1084_v54, %v1085_v50  ;;  %v1452_v57 = vmul.f32 %v3705_v19, %v2929_v17  ;;  %v1528_v48 = vmul.f32 %v3705_v19, %v2931_v18  ;;  %v1971_v27 = vadd.f32 %v1883_v28, %v1727_v56 }
  0xcb   : > { %v928_v30 = vadd.f32 %v896_v33, %v860_v49  ;;  %v1329_v21 = vrot.slane %v1217_v35, 2  ;;  %v3763_v40 = vmul.f32 %v3711_v25, %v2931_v18  ;;  %v1772_v59 = vmul.f32 %v3705_v19, %v2942_v26 }
  0xcc   : > { %v1640_v62 = vrot.slane %v1528_v48, 1  ;;  %v1773_v58 = vmul.f32 %v3711_v25, %v2942_v26  ;;  %v3769_v29 = vunpack.c.l.bf16 %v239_v39  ;;  %v3772_v60 = vadd.f32 %v3562_v2, %v1971_v27  ;;  %v240_v39 = vld [vmem:[%s2912_s26 + $0x84] sm:$0xff]  }
  0xcd   : > { %v1172_v51 = vadd.f32 %v1086_v41, %v928_v30  ;;  %v1330_v53 = vsel %vm731_vm1, %v1328_v32, %v1329_v21  ;;  %v1641_v14 = vrot.slane %v3763_v40, 1  ;;  %v1884_v0 = vrot.slane %v1772_v59, 2 }
  0xce   : > { %v2781_v28 = vpop.eup %2780  ;;  %v1885_v20 = vrot.slane %v1773_v58, 2  ;;  %v339_v13 = vmul.f32 %v3505_v22, %v2914_v8  ;;  %v416_v38 = vmul.f32 %v2916_v9, %v3567_v46  ;;  %v2589_v43 = vmul.f32 -1.442695, %v3772_v60 }
  0xcf   : > { %v2137_v1 = vadd.f32 1.0, %v2781_v28  ;;  %v1416_v33 = vadd.f32 %v1330_v53, %v1172_v51  ;;  %v1642_v45 = vsel %vm486_vm0, %v1640_v62, %v1641_v14  ;;  %v661_v7 = vmul.f32 %v2918_v10, %v3567_v46 }
  0xd0   : > { %v1886_v52 = vsel %vm731_vm1, %v1884_v0, %v1885_v20  ;;  %v530_v3 = vrot.slane %v416_v38, 1  ;;  %v897_v34 = vmul.f32 %v2920_v11, %v3608_v61  ;;  %v974_v36 = vmul.f32 %v2925_v15, %v3669_v63 }
  0xd1   : > { %v2783_v22 = vpop.eup %2782  ;;  %2784 = vrcp.f32 %v2137_v1  ;;  %v1484_v6 = vadd.f32 %v1452_v57, %v1416_v33  ;;  %v1218_v54 = vmul.f32 %v2927_v16, %v3669_v63  ;;  %v775_v12 = vrot.slane %v661_v7, 2 }
  0xd2   : > { %v2232_v4 = vmul.f32 %v2783_v22, %v3666_v44  ;;  %2786 = vpow2.f32 %v2589_v43  ;;  %v531_v46 = vsel %vm486_vm0, %v528_v37, %v530_v3  ;;  %v1087_v49 = vrot.slane %v974_v36, 1 }
  0xd3   : > { %v1728_v47 = vadd.f32 %v1642_v45, %v1484_v6  ;;  %v616_v56 = vadd.f32 %v531_v46, %v339_v13  ;;  %v1331_v35 = vrot.slane %v1218_v54, 2  ;;  %v776_v57 = vsel %vm731_vm1, %v773_v42, %v775_v12 }
  0xd4   : > { %v2654_v41 = vpack.c.bf16 %v2232_v4, %v2232_v4  ;;  %v2438_v32 = vsel %vm2412_vm2, %v2232_v4, 0.0  ;;  %v1453_v44 = vmul.f32 %v3711_v25, %v2929_v17  ;;  %v1088_v37 = vsel %vm486_vm0, %v1085_v50, %v1087_v49 }
  0xd5   : > { %v2439_v31 = vadd.f32 %v2438_v32, %v2437_v23  ;;  %v1972_v48 = vadd.f32 %v1886_v52, %v1728_v47  ;;  %v861_v27 = vadd.f32 %v776_v57, %v616_v56  ;;  %v1332_v30 = vsel %vm731_vm1, %v1329_v21, %v1331_v35 }
  0xd6   : > { %2393 = vst.msk [vmem:[%s3167_s6 + $0x34] sm:$0xf] %vm2379_vm3, %v2654_v41  ;;  %v1530_v40 = vmul.f32 %v2931_v18, %v3769_v29  ;;  %v1774_v24 = vmul.f32 %v2942_v26, %v3769_v29  ;;  %v3810_v62 = vunpack.c.l.bf16 %v240_v39  ;;  %v3815_v59 = vunpack.c.h.bf16 %v240_v39 }
  0xd7   : > { %v3813_v42 = vadd.f32 %v3562_v2, %v1972_v48  ;;  %v929_v23 = vadd.f32 %v897_v34, %v861_v27  ;;  %v340_v50 = vmul.f32 %v2914_v8, %v3606_v5  ;;  %v417_v21 = vmul.f32 %v2916_v9, %v3606_v5 }
  0xd8   : > { %v1643_v58 = vrot.slane %v1530_v40, 1  ;;  %v1887_v51 = vrot.slane %v1774_v24, 2  ;;  %v3823_v53 = vmul.f32 %v2916_v9, %v3608_v61  ;;  %v662_v13 = vmul.f32 %v2918_v10, %v3606_v5 }
  0xd9   : > { %v2590_v28 = vmul.f32 -1.442695, %v3813_v42  ;;  %v1173_v0 = vadd.f32 %v1088_v37, %v929_v23  ;;  %v3830_v38 = vmul.f32 %v2918_v10, %v3608_v61  ;;  %v532_v33 = vrot.slane %v417_v21, 1 }
  0xda   : > { %v1644_v1 = vsel %vm486_vm0, %v1641_v14, %v1643_v58  ;;  %v1888_v43 = vsel %vm731_vm1, %v1885_v20, %v1887_v51  ;;  %v533_v45 = vrot.slane %v3823_v53, 1  ;;  %v777_v7 = vrot.slane %v662_v13, 2 }
  0xdb   : > { %v2785_v52 = vpop.eup %2784  ;;  %2788 = vpow2.f32 %v2590_v28  ;;  %v1417_v3 = vadd.f32 %v1332_v30, %v1173_v0  ;;  %v778_v34 = vrot.slane %v3830_v38, 2  ;;  %v898_v14 = vmul.f32 %v3705_v19, %v2920_v11  ;;  %v242_v30 = vld [vmem:[%s2912_s26 + $0x8c] sm:$0x1] }
  0xdc   : > { %v2787_v22 = vpop.eup %2786  ;;  %v2233_v5 = vmul.f32 %v2785_v52, %v3708_v55  ;;  %v534_v6 = vsel %vm486_vm0, %v532_v33, %v533_v45  ;;  %v975_v20 = vmul.f32 %v3705_v19, %v2925_v15  ;;  %v976_v47 = vmul.f32 %v3711_v25, %v2925_v15 }
  0xdd   : > { %v2138_v36 = vadd.f32 1.0, %v2787_v22  ;;  %v1485_v54 = vadd.f32 %v1453_v44, %v1417_v3  ;;  %v617_v4 = vadd.f32 %v534_v6, %v340_v50  ;;  %v779_v46 = vsel %vm731_vm1, %v777_v7, %v778_v34 }
  0xde   : > { %v2655_v12 = vpack.c.bf16 %v2233_v5, %v2233_v5  ;;  %v2440_v55 = vsel %vm2412_vm2, %v2233_v5, 0.0  ;;  %v1089_v56 = vrot.slane %v975_v20, 1  ;;  %v1090_v41 = vrot.slane %v976_v47, 1 }
  0xdf   : > { %v2441_v49 = vadd.f32 %v2440_v55, %v2439_v31  ;;  %2790 = vrcp.f32 %v2138_v36  ;;  %v1729_v35 = vadd.f32 %v1644_v1, %v1485_v54  ;;  %v862_v39 = vadd.f32 %v779_v46, %v617_v4 }
  0xe0   : > { %2394 = vst.msk [vmem:[%s3167_s6 + $0x38] sm:$0xf] %vm2379_vm3, %v2655_v12  ;;  %v1219_v32 = vmul.f32 %v3705_v19, %v2927_v16  ;;  %v1220_v57 = vmul.f32 %v3711_v25, %v2927_v16  ;;  %v1454_v44 = vmul.f32 %v2929_v17, %v3810_v62  ;;  %v1531_v31 = vmul.f32 %v2931_v18, %v3810_v62 }
  0xe1   : > { %v1973_v48 = vadd.f32 %v1888_v43, %v1729_v35  ;;  %v930_v27 = vadd.f32 %v898_v14, %v862_v39  ;;  %v1532_v37 = vmul.f32 %v2931_v18, %v3815_v59  ;;  %v1091_v40 = vsel %vm486_vm0, %v1089_v56, %v1090_v41 }
  0xe2   : > { %v1333_v24 = vrot.slane %v1219_v32, 2  ;;  %v1334_v23 = vrot.slane %v1220_v57, 2  ;;  %v1775_v50 = vmul.f32 %v2942_v26, %v3810_v62  ;;  %v1645_v21 = vrot.slane %v1531_v31, 1 }
  0xe3   : > { %v3867_v58 = vadd.f32 %v3562_v2, %v1973_v48  ;;  %v1174_v51 = vadd.f32 %v1091_v40, %v930_v27  ;;  %v1646_v28 = vrot.slane %v1532_v37, 1  ;;  %v1776_v13 = vmul.f32 %v2942_v26, %v3815_v59 }
  0xe4   : > { %v1335_v0 = vsel %vm731_vm1, %v1333_v24, %v1334_v23  ;;  %v1889_v1 = vrot.slane %v1775_v50, 2  ;;  %v3872_v43 = vunpack.c.l.bf16 %v242_v30  ;;  %v341_v22 = vmul.f32 %v2914_v8, %v3608_v61  ;;  %v2714_v30 = vld [vmem:[%s2912_s26 + $0x90] sm:$0xff]  }
  0xe5   : > { %v2789_v33 = vpop.eup %2788  ;;  %v2591_v52 = vmul.f32 -1.442695, %v3867_v58  ;;  %v1418_v3 = vadd.f32 %v1335_v0, %v1174_v51  ;;  %v1647_v7 = vsel %vm486_vm0, %v1645_v21, %v1646_v28  ;;  %v1890_v6 = vrot.slane %v1776_v13, 2 }
  0xe6   : > { %v2139_v5 = vadd.f32 1.0, %v2789_v33  ;;  %v419_v14 = vmul.f32 %v2916_v9, %v3669_v63  ;;  %v664_v20 = vmul.f32 %v2918_v10, %v3669_v63  ;;  %v899_v54 = vmul.f32 %v3711_v25, %v2920_v11 }
  0xe7   : > { %2792 = vpow2.f32 %v2591_v52  ;;  %v1486_v36 = vadd.f32 %v1454_v44, %v1418_v3  ;;  %v977_v4 = vmul.f32 %v2925_v15, %v3769_v29  ;;  %v1891_v46 = vsel %vm731_vm1, %v1889_v1, %v1890_v6 }
  0xe8   : > { %2794 = vrcp.f32 %v2139_v5  ;;  %v535_v61 = vrot.slane %v419_v14, 1  ;;  %v780_v12 = vrot.slane %v664_v20, 2  ;;  %v1221_v63 = vmul.f32 %v2927_v16, %v3769_v29 }
  0xe9   : > { %v2791_v55 = vpop.eup %2790  ;;  %v1730_v47 = vadd.f32 %v1647_v7, %v1486_v36  ;;  %v1092_v56 = vrot.slane %v977_v4, 1  ;;  %v1455_v35 = vmul.f32 %v2929_v17, %v3815_v59  ;;  %v1533_v44 = vmul.f32 %v2931_v18, %v3872_v43 }
  0xea   : > { %v2234_v39 = vmul.f32 %v2791_v55, %v3772_v60  ;;  %v536_v32 = vsel %vm486_vm0, %v533_v45, %v535_v61  ;;  %v781_v57 = vsel %vm731_vm1, %v778_v34, %v780_v12  ;;  %v1336_v37 = vrot.slane %v1221_v63, 2 }
  0xeb   : > { %v1974_v48 = vadd.f32 %v1891_v46, %v1730_v47  ;;  %v618_v27 = vadd.f32 %v536_v32, %v341_v22  ;;  %v1093_v31 = vsel %vm486_vm0, %v1090_v41, %v1092_v56  ;;  %v1648_v53 = vrot.slane %v1533_v44, 1 }
  0xec   : > { %v2656_v40 = vpack.c.bf16 %v2234_v39, %v2234_v39  ;;  %v2442_v60 = vsel %vm2412_vm2, %v2234_v39, 0.0  ;;  %v1777_v45 = vmul.f32 %v2942_v26, %v3872_v43  ;;  %v1337_v50 = vsel %vm731_vm1, %v1334_v23, %v1336_v37 }
  0xed   : > { %v2443_v38 = vadd.f32 %v2442_v60, %v2441_v49  ;;  %v3906_v24 = vadd.f32 %v3562_v2, %v1974_v48  ;;  %v863_v34 = vadd.f32 %v781_v57, %v618_v27  ;;  %v1649_v41 = vsel %vm486_vm0, %v1646_v28, %v1648_v53  ;;  %v245_v60 = vld [vmem:[%s2912_s26 + $0x98] sm:$0x1] }
  0xee   : > { %2395 = vst.msk [vmem:[%s3167_s6 + $0x3c] sm:$0xf] %vm2379_vm3, %v2656_v40  ;;  %v1892_v51 = vrot.slane %v1777_v45, 2  ;;  %v3912_v21 = vunpack.c.l.bf16 %v2714_v30  ;;  %v3914_v0 = vunpack.c.h.bf16 %v2714_v30  ;;  %v342_v49 = vmul.f32 %v3705_v19, %v2914_v8 }
  0xef   : > { %v2592_v13 = vmul.f32 -1.442695, %v3906_v24  ;;  %v931_v1 = vadd.f32 %v899_v54, %v863_v34  ;;  %v420_v33 = vmul.f32 %v3705_v19, %v2916_v9  ;;  %v3924_v52 = vmul.f32 %v3711_v25, %v2916_v9 }
  0xf0   : > { %v1893_v23 = vsel %vm731_vm1, %v1890_v6, %v1892_v51  ;;  %v665_v28 = vmul.f32 %v3705_v19, %v2918_v10  ;;  %v3930_v3 = vmul.f32 %v3711_v25, %v2918_v10  ;;  %v900_v14 = vmul.f32 %v2920_v11, %v3810_v62 }
  0xf1   : > { %v2793_v7 = vpop.eup %2792  ;;  %2796 = vpow2.f32 %v2592_v13  ;;  %v1175_v22 = vadd.f32 %v1093_v31, %v931_v1  ;;  %v537_v5 = vrot.slane %v420_v33, 1  ;;  %v538_v36 = vrot.slane %v3924_v52, 1 }
  0xf2   : > { %v2795_v20 = vpop.eup %2794  ;;  %v2140_v6 = vadd.f32 1.0, %v2793_v7  ;;  %v782_v54 = vrot.slane %v665_v28, 2  ;;  %v783_v4 = vrot.slane %v3930_v3, 2  ;;  %v978_v61 = vmul.f32 %v2925_v15, %v3810_v62 }
  0xf3   : > { %v2235_v19 = vmul.f32 %v2795_v20, %v3813_v42  ;;  %v1419_v46 = vadd.f32 %v1337_v50, %v1175_v22  ;;  %v3941_v12 = vmul.f32 %v2925_v15, %v3815_v59  ;;  %v539_v55 = vsel %vm486_vm0, %v537_v5, %v538_v36 }
  0xf4   : > { %2798 = vrcp.f32 %v2140_v6  ;;  %v784_v47 = vsel %vm731_vm1, %v782_v54, %v783_v4  ;;  %v1222_v42 = vmul.f32 %v2927_v16, %v3810_v62  ;;  %v619_v32 = vadd.f32 %v539_v55, %v342_v49 }
  0xf5   : > { %v2657_v56 = vpack.c.bf16 %v2235_v19, %v2235_v19  ;;  %v2444_v63 = vsel %vm2412_vm2, %v2235_v19, 0.0  ;;  %v1487_v39 = vadd.f32 %v1455_v35, %v1419_v46  ;;  %v1094_v44 = vrot.slane %v978_v61, 1 }
  0xf6   : > { %v2445_v57 = vadd.f32 %v2444_v63, %v2443_v38  ;;  %v1095_v48 = vrot.slane %v3941_v12, 1  ;;  %v1223_v27 = vmul.f32 %v2927_v16, %v3815_v59  ;;  %v864_v37 = vadd.f32 %v784_v47, %v619_v32 }
  0xf7   : > { %2396 = vst.msk [vmem:[%s3167_s6 + $0x40] sm:$0xf] %vm2379_vm3, %v2657_v56  ;;  %v1731_v31 = vadd.f32 %v1649_v41, %v1487_v39  ;;  %v1338_v30 = vrot.slane %v1222_v42, 2  ;;  %v1456_v40 = vmul.f32 %v3912_v21, %v2929_v17  ;;  %v1534_v45 = vmul.f32 %v3912_v21, %v2931_v18 }
  0xf8   : > { %v1096_v53 = vsel %vm486_vm0, %v1094_v44, %v1095_v48  ;;  %v1339_v35 = vrot.slane %v1223_v27, 2  ;;  %v3963_v38 = vmul.f32 %v3914_v0, %v2931_v18  ;;  %v932_v50 = vadd.f32 %v900_v14, %v864_v37 }
  0xf9   : > { %v1975_v34 = vadd.f32 %v1893_v23, %v1731_v31  ;;  %v1778_v41 = vmul.f32 %v3912_v21, %v2942_v26  ;;  %v1779_v51 = vmul.f32 %v3914_v0, %v2942_v26  ;;  %v1650_v1 = vrot.slane %v1534_v45, 1 }
  0xfa   : > { %v1340_v13 = vsel %vm731_vm1, %v1338_v30, %v1339_v35  ;;  %v1651_v49 = vrot.slane %v3963_v38, 1  ;;  %v3971_v33 = vunpack.c.l.bf16 %v245_v60  ;;  %v1176_v7 = vadd.f32 %v1096_v53, %v932_v50  ;;  %v246_v60 = vld [vmem:[%s2912_s26 + $0x9c] sm:$0xff]  }
  0xfb   : > { %v2797_v52 = vpop.eup %2796  ;;  %v3974_v28 = vadd.f32 %v3562_v2, %v1975_v34  ;;  %v1894_v23 = vrot.slane %v1778_v41, 2  ;;  %v1895_v22 = vrot.slane %v1779_v51, 2  ;;  %v343_v20 = vmul.f32 %v3711_v25, %v2914_v8 }
  0xfc   : > { %v2141_v5 = vadd.f32 1.0, %v2797_v52  ;;  %v1652_v14 = vsel %vm486_vm0, %v1650_v1, %v1651_v49  ;;  %v422_v6 = vmul.f32 %v2916_v9, %v3769_v29  ;;  %v1420_v19 = vadd.f32 %v1340_v13, %v1176_v7 }
  0xfd   : > { %v2593_v54 = vmul.f32 -1.442695, %v3974_v28  ;;  %v1896_v46 = vsel %vm731_vm1, %v1894_v23, %v1895_v22  ;;  %v667_v61 = vmul.f32 %v2918_v10, %v3769_v29  ;;  %v901_v47 = vmul.f32 %v2920_v11, %v3815_v59 }
  0xfe   : > { %v2799_v12 = vpop.eup %2798  ;;  %2800 = vrcp.f32 %v2141_v5  ;;  %v540_v55 = vrot.slane %v422_v6, 1  ;;  %v980_v25 = vmul.f32 %v2925_v15, %v3872_v43  ;;  %v1488_v56 = vadd.f32 %v1456_v40, %v1420_v19 }
  0xff   : > { %v2236_v42 = vmul.f32 %v2799_v12, %v3867_v58  ;;  %2802 = vpow2.f32 %v2593_v54  ;;  %v785_v63 = vrot.slane %v667_v61, 2  ;;  %v1224_v29 = vmul.f32 %v2927_v16, %v3872_v43 }
 0x100   : > { %v541_v39 = vsel %vm486_vm0, %v538_v36, %v540_v55  ;;  %v1097_v32 = vrot.slane %v980_v25, 1  ;;  %v1457_v44 = vmul.f32 %v3914_v0, %v2929_v17  ;;  %v1732_v37 = vadd.f32 %v1652_v14, %v1488_v56 }
 0x101   : > { %v2658_v27 = vpack.c.bf16 %v2236_v42, %v2236_v42  ;;  %v2446_v31 = vsel %vm2412_vm2, %v2236_v42, 0.0  ;;  %v620_v30 = vadd.f32 %v541_v39, %v343_v20  ;;  %v786_v40 = vsel %vm731_vm1, %v783_v4, %v785_v63 }
 0x102   : > { %v2447_v58 = vadd.f32 %v2446_v31, %v2445_v57  ;;  %v1098_v36 = vsel %vm486_vm0, %v1095_v48, %v1097_v32  ;;  %v1341_v53 = vrot.slane %v1224_v29, 2  ;;  %v1976_v45 = vadd.f32 %v1896_v46, %v1732_v37 }
 0x103   : > { %2397 = vst.msk [vmem:[%s3167_s6 + $0x44] sm:$0xf] %vm2379_vm3, %v2658_v27  ;;  %v865_v38 = vadd.f32 %v786_v40, %v620_v30  ;;  %v1536_v34 = vmul.f32 %v2931_v18, %v3971_v33  ;;  %v1780_v50 = vmul.f32 %v2942_v26, %v3971_v33  ;;  %v4008_v57 = vunpack.c.l.bf16 %v246_v60 }
 0x104   : > { %v1342_v41 = vsel %vm731_vm1, %v1339_v35, %v1341_v53  ;;  %v4010_v3 = vunpack.c.h.bf16 %v246_v60  ;;  %v344_v4 = vmul.f32 %v2914_v8, %v3810_v62  ;;  %v4015_v48 = vadd.f32 %v3562_v2, %v1976_v45 }
 0x105   : > { %v933_v51 = vadd.f32 %v901_v47, %v865_v38  ;;  %v1653_v13 = vrot.slane %v1536_v34, 1  ;;  %v1897_v1 = vrot.slane %v1780_v50, 2  ;;  %v423_v52 = vmul.f32 %v2916_v9, %v3810_v62 }
 0x106   : > { %v4021_v7 = vmul.f32 %v2916_v9, %v3815_v59  ;;  %v668_v35 = vmul.f32 %v2918_v10, %v3810_v62  ;;  %v4027_v23 = vmul.f32 %v2918_v10, %v3815_v59  ;;  %v2594_v5 = vmul.f32 -1.442695, %v4015_v48 }
 0x107   : > { %v1177_v14 = vadd.f32 %v1098_v36, %v933_v51  ;;  %v1654_v20 = vsel %vm486_vm0, %v1651_v49, %v1653_v13  ;;  %v1898_v6 = vsel %vm731_vm1, %v1895_v22, %v1897_v1  ;;  %v542_v19 = vrot.slane %v423_v52, 1 }
 0x108   : > { %v2801_v54 = vpop.eup %2800  ;;  %v543_v46 = vrot.slane %v4021_v7, 1  ;;  %v787_v61 = vrot.slane %v668_v35, 2  ;;  %v788_v12 = vrot.slane %v4027_v23, 2  ;;  %2804 = vpow2.f32 %v2594_v5 }
 0x109   : > { %v2803_v55 = vpop.eup %2802  ;;  %v2237_v62 = vmul.f32 %v2801_v54, %v3906_v24  ;;  %v1421_v47 = vadd.f32 %v1342_v41, %v1177_v14  ;;  %v902_v25 = vmul.f32 %v3912_v21, %v2920_v11  ;;  %v981_v56 = vmul.f32 %v3912_v21, %v2925_v15  ;;  %v248_v41 = vld [vmem:[%s2912_s26 + $0xa4] sm:$0x1] }
 0x10a   : > { %v2142_v42 = vadd.f32 1.0, %v2803_v55  ;;  %v544_v49 = vsel %vm486_vm0, %v542_v19, %v543_v46  ;;  %v789_v22 = vsel %vm731_vm1, %v787_v61, %v788_v12  ;;  %v982_v27 = vmul.f32 %v3914_v0, %v2925_v15 }
 0x10b   : > { %v2659_v63 = vpack.c.bf16 %v2237_v62, %v2237_v62  ;;  %v2448_v24 = vsel %vm2412_vm2, %v2237_v62, 0.0  ;;  %v1489_v39 = vadd.f32 %v1457_v44, %v1421_v47  ;;  %v621_v32 = vadd.f32 %v544_v49, %v344_v4 }
 0x10c   : > { %v2449_v29 = vadd.f32 %v2448_v24, %v2447_v58  ;;  %2806 = vrcp.f32 %v2142_v42  ;;  %v1099_v31 = vrot.slane %v981_v56, 1  ;;  %v1225_v60 = vmul.f32 %v3912_v21, %v2927_v16 }
 0x10d   : > { %2398 = vst.msk [vmem:[%s3167_s6 + $0x48] sm:$0xf] %vm2379_vm3, %v2659_v63  ;;  %v1733_v37 = vadd.f32 %v1654_v20, %v1489_v39  ;;  %v866_v30 = vadd.f32 %v789_v22, %v621_v32  ;;  %v1226_v40 = vmul.f32 %v3914_v0, %v2927_v16  ;;  %v1100_v36 = vrot.slane %v982_v27, 1 }
 0x10e   : > { %v1458_v44 = vmul.f32 %v2929_v17, %v4008_v57  ;;  %v1537_v58 = vmul.f32 %v2931_v18, %v4008_v57  ;;  %v4060_v53 = vmul.f32 %v2931_v18, %v4010_v3  ;;  %v1343_v34 = vrot.slane %v1225_v60, 2 }
 0x10f   : > { %v1977_v45 = vadd.f32 %v1898_v6, %v1733_v37  ;;  %v934_v38 = vadd.f32 %v902_v25, %v866_v30  ;;  %v1344_v50 = vrot.slane %v1226_v40, 2  ;;  %v1101_v4 = vsel %vm486_vm0, %v1099_v31, %v1100_v36 }
 0x110   : > { %v1655_v51 = vrot.slane %v1537_v58, 1  ;;  %v1656_v13 = vrot.slane %v4060_v53, 1  ;;  %v1781_v1 = vmul.f32 %v2942_v26, %v4008_v57  ;;  %v1782_v14 = vmul.f32 %v2942_v26, %v4010_v3  ;;  %v2715_v53 = vld [vmem:[%s2912_s26 + $0xa8] sm:$0xff]  }
 0x111   : > { %v4068_v52 = vadd.f32 %v3562_v2, %v1977_v45  ;;  %v1178_v35 = vadd.f32 %v1101_v4, %v934_v38  ;;  %v1345_v5 = vsel %vm731_vm1, %v1343_v34, %v1344_v50  ;;  %v4074_v54 = vunpack.c.l.bf16 %v248_v41 }
 0x112   : > { %v1657_v20 = vsel %vm486_vm0, %v1655_v51, %v1656_v13  ;;  %v1899_v6 = vrot.slane %v1781_v1, 2  ;;  %v345_v19 = vmul.f32 %v2914_v8, %v3815_v59  ;;  %v2805_v61 = vpop.eup %2804  ;;  %v1900_v2 = vrot.slane %v1782_v14, 2 }
 0x113   : > { %v2595_v55 = vmul.f32 -1.442695, %v4068_v52  ;;  %v1422_v62 = vadd.f32 %v1345_v5, %v1178_v35  ;;  %v425_v47 = vmul.f32 %v2916_v9, %v3872_v43  ;;  %v2143_v25 = vadd.f32 1.0, %v2805_v61 }
 0x114   : > { %v670_v42 = vmul.f32 %v2918_v10, %v3872_v43  ;;  %v903_v49 = vmul.f32 %v3914_v0, %v2920_v11  ;;  %v983_v22 = vmul.f32 %v2925_v15, %v3971_v33  ;;  %v1901_v56 = vsel %vm731_vm1, %v1899_v6, %v1900_v2 }
 0x115   : > { %2808 = vpow2.f32 %v2595_v55  ;;  %v1490_v59 = vadd.f32 %v1458_v44, %v1422_v62  ;;  %v545_v63 = vrot.slane %v425_v47, 1  ;;  %v1227_v27 = vmul.f32 %v2927_v16, %v3971_v33 }
 0x116   : > { %v2807_v24 = vpop.eup %2806  ;;  %2810 = vrcp.f32 %v2143_v25  ;;  %v790_v39 = vrot.slane %v670_v42, 2  ;;  %v1102_v32 = vrot.slane %v983_v22, 1  ;;  %v1459_v30 = vmul.f32 %v2929_v17, %v4010_v3 }
 0x117   : > { %v2238_v43 = vmul.f32 %v2807_v24, %v3974_v28  ;;  %v1734_v31 = vadd.f32 %v1657_v20, %v1490_v59  ;;  %v546_v37 = vsel %vm486_vm0, %v543_v46, %v545_v63  ;;  %v1346_v58 = vrot.slane %v1227_v27, 2 }
 0x118   : > { %v622_v60 = vadd.f32 %v546_v37, %v345_v19  ;;  %v791_v40 = vsel %vm731_vm1, %v788_v12, %v790_v39  ;;  %v1103_v44 = vsel %vm486_vm0, %v1100_v36, %v1102_v32  ;;  %v1539_v7 = vmul.f32 %v2931_v18, %v4074_v54  ;;  %v4112_v12 = vld [vmem:[%s4558_s2] ss:$0 sm:$0xff] }
 0x119   : > { %v2660_v45 = vpack.c.bf16 %v2238_v43, %v2238_v43  ;;  %v2450_v28 = vsel %vm2412_vm2, %v2238_v43, 0.0  ;;  %v1978_v38 = vadd.f32 %v1901_v56, %v1734_v31  ;;  %v1347_v41 = vsel %vm731_vm1, %v1344_v50, %v1346_v58 }
 0x11a   : > { %v2451_v46 = vadd.f32 %v2450_v28, %v2449_v29  ;;  %v867_v34 = vadd.f32 %v791_v40, %v622_v60  ;;  %v1783_v23 = vmul.f32 %v2942_v26, %v4074_v54  ;;  %v1658_v4 = vrot.slane %v1539_v7, 1  ;;  %v251_v28 = vld [vmem:[%s2912_s26 + $0xb0] sm:$0x1] }
 0x11b   : > { %2399 = vst.msk [vmem:[%s3167_s6 + $0x4c] sm:$0xf] %vm2379_vm3, %v2660_v45  ;;  %v4115_v36 = vadd.f32 %v4112_v12, %v1978_v38  ;;  %v4117_v51 = vunpack.c.l.bf16 %v2715_v53  ;;  %v4119_v29 = vunpack.c.h.bf16 %v2715_v53  ;;  %v346_v35 = vmul.f32 %v3912_v21, %v2914_v8 }
 0x11c   : > { %v935_v1 = vadd.f32 %v903_v49, %v867_v34  ;;  %v1902_v50 = vrot.slane %v1783_v23, 2  ;;  %v426_v5 = vmul.f32 %v3912_v21, %v2916_v9  ;;  %v1659_v20 = vsel %vm486_vm0, %v1656_v13, %v1658_v4 }
 0x11d   : > { %v2596_v14 = vmul.f32 -1.442695, %v4115_v36  ;;  %v4129_v6 = vmul.f32 %v3914_v0, %v2916_v9  ;;  %v671_v19 = vmul.f32 %v3912_v21, %v2918_v10  ;;  %v4136_v47 = vmul.f32 %v3914_v0, %v2918_v10 }
 0x11e   : > { %v1179_v61 = vadd.f32 %v1103_v44, %v935_v1  ;;  %v1903_v55 = vsel %vm731_vm1, %v1900_v2, %v1902_v50  ;;  %v547_v62 = vrot.slane %v426_v5, 1  ;;  %v904_v49 = vmul.f32 %v2920_v11, %v4008_v57 }
 0x11f   : > { %v2809_v25 = vpop.eup %2808  ;;  %2812 = vpow2.f32 %v2596_v14  ;;  %v548_v42 = vrot.slane %v4129_v6, 1  ;;  %v792_v13 = vrot.slane %v671_v19, 2  ;;  %v793_v21 = vrot.slane %v4136_v47, 2 }
 0x120   : > { %v2811_v22 = vpop.eup %2810  ;;  %v2144_v59 = vadd.f32 1.0, %v2809_v25  ;;  %v1423_v56 = vadd.f32 %v1347_v41, %v1179_v61  ;;  %v984_v2 = vmul.f32 %v2925_v15, %v4008_v57  ;;  %v4150_v39 = vmul.f32 %v2925_v15, %v4010_v3 }
 0x121   : > { %v2239_v63 = vmul.f32 %v2811_v22, %v4015_v48  ;;  %v549_v24 = vsel %vm486_vm0, %v547_v62, %v548_v42  ;;  %v1228_v32 = vmul.f32 %v2927_v16, %v4008_v57  ;;  %v794_v48 = vsel %vm731_vm1, %v792_v13, %v793_v21 }
 0x122   : > { %2814 = vrcp.f32 %v2144_v59  ;;  %v1491_v27 = vadd.f32 %v1459_v30, %v1423_v56  ;;  %v623_v43 = vadd.f32 %v549_v24, %v346_v35  ;;  %v1104_v60 = vrot.slane %v984_v2, 1 }
 0x123   : > { %v2661_v31 = vpack.c.bf16 %v2239_v63, %v2239_v63  ;;  %v2452_v37 = vsel %vm2412_vm2, %v2239_v63, 0.0  ;;  %v1105_v40 = vrot.slane %v4150_v39, 1  ;;  %v1229_v45 = vmul.f32 %v2927_v16, %v4010_v3 }
 0x124   : > { %v2453_v44 = vadd.f32 %v2452_v37, %v2451_v46  ;;  %v1735_v58 = vadd.f32 %v1659_v20, %v1491_v27  ;;  %v868_v53 = vadd.f32 %v794_v48, %v623_v43  ;;  %v1348_v38 = vrot.slane %v1228_v32, 2 }
 0x125   : > { %2400 = vst.msk [vmem:[%s3167_s6 + $0x50] sm:$0xf] %vm2379_vm3, %v2661_v31  ;;  %v1106_v30 = vsel %vm486_vm0, %v1104_v60, %v1105_v40  ;;  %v1460_v7 = vmul.f32 %v4117_v51, %v2929_v17  ;;  %v1540_v34 = vmul.f32 %v4117_v51, %v2931_v18  ;;  %v1349_v46 = vrot.slane %v1229_v45, 2 }
 0x126   : > { %v1979_v41 = vadd.f32 %v1903_v55, %v1735_v58  ;;  %v936_v23 = vadd.f32 %v904_v49, %v868_v53  ;;  %v4171_v4 = vmul.f32 %v4119_v29, %v2931_v18  ;;  %v1784_v50 = vmul.f32 %v4117_v51, %v2942_v26 }
 0x127   : > { %v1660_v1 = vrot.slane %v1540_v34, 1  ;;  %v1785_v35 = vmul.f32 %v4119_v29, %v2942_v26  ;;  %v4177_v5 = vunpack.c.l.bf16 %v251_v28  ;;  %v1350_v19 = vsel %vm731_vm1, %v1348_v38, %v1349_v46  ;;  %v252_v28 = vld [vmem:[%s2912_s26 + $0xb4] sm:$0xff]  }
 0x128   : > { %v4180_v14 = vadd.f32 %v4112_v12, %v1979_v41  ;;  %v1180_v20 = vadd.f32 %v1106_v30, %v936_v23  ;;  %v1661_v61 = vrot.slane %v4171_v4, 1  ;;  %v1904_v62 = vrot.slane %v1784_v50, 2 }
 0x129   : > { %v2813_v55 = vpop.eup %2812  ;;  %v1905_v25 = vrot.slane %v1785_v35, 2  ;;  %v347_v13 = vmul.f32 %v3914_v0, %v2914_v8  ;;  %v428_v49 = vmul.f32 %v2916_v9, %v3971_v33  ;;  %v673_v39 = vmul.f32 %v2918_v10, %v3971_v33 }
 0x12a   : > { %v2145_v22 = vadd.f32 1.0, %v2813_v55  ;;  %v2597_v59 = vmul.f32 -1.442695, %v4180_v14  ;;  %v1424_v56 = vadd.f32 %v1350_v19, %v1180_v20  ;;  %v1662_v2 = vsel %vm486_vm0, %v1660_v1, %v1661_v61 }
 0x12b   : > { %v1906_v63 = vsel %vm731_vm1, %v1904_v62, %v1905_v25  ;;  %v550_v24 = vrot.slane %v428_v49, 1  ;;  %v905_v32 = vmul.f32 %v2920_v11, %v4010_v3  ;;  %v986_v43 = vmul.f32 %v2925_v15, %v4074_v54 }
 0x12c   : > { %v2815_v0 = vpop.eup %2814  ;;  %2816 = vrcp.f32 %v2145_v22  ;;  %v1492_v27 = vadd.f32 %v1460_v7, %v1424_v56  ;;  %v1230_v48 = vmul.f32 %v2927_v16, %v4074_v54  ;;  %v795_v37 = vrot.slane %v673_v39, 2 }
 0x12d   : > { %v2240_v31 = vmul.f32 %v2815_v0, %v4068_v52  ;;  %2818 = vpow2.f32 %v2597_v59  ;;  %v551_v33 = vsel %vm486_vm0, %v548_v42, %v550_v24  ;;  %v1107_v53 = vrot.slane %v986_v43, 1 }
 0x12e   : > { %v1736_v60 = vadd.f32 %v1662_v2, %v1492_v27  ;;  %v624_v58 = vadd.f32 %v551_v33, %v347_v13  ;;  %v1351_v45 = vrot.slane %v1230_v48, 2  ;;  %v796_v7 = vsel %vm731_vm1, %v793_v21, %v795_v37 }
 0x12f   : > { %v2662_v30 = vpack.c.bf16 %v2240_v31, %v2240_v31  ;;  %v2454_v38 = vsel %vm2412_vm2, %v2240_v31, 0.0  ;;  %v1461_v52 = vmul.f32 %v4119_v29, %v2929_v17  ;;  %v1108_v42 = vsel %vm486_vm0, %v1105_v40, %v1107_v53 }
 0x130   : > { %v2455_v6 = vadd.f32 %v2454_v38, %v2453_v44  ;;  %v1980_v34 = vadd.f32 %v1906_v63, %v1736_v60  ;;  %v869_v41 = vadd.f32 %v796_v7, %v624_v58  ;;  %v1352_v23 = vsel %vm731_vm1, %v1349_v46, %v1351_v45 }
 0x131   : > { %2401 = vst.msk [vmem:[%s3167_s6 + $0x54] sm:$0xf] %vm2379_vm3, %v2662_v30  ;;  %v1542_v4 = vmul.f32 %v2931_v18, %v4177_v5  ;;  %v1786_v47 = vmul.f32 %v2942_v26, %v4177_v5  ;;  %v4218_v1 = vunpack.c.l.bf16 %v252_v28  ;;  %v4223_v50 = vunpack.c.h.bf16 %v252_v28 }
 0x132   : > { %v4221_v21 = vadd.f32 %v4112_v12, %v1980_v34  ;;  %v937_v44 = vadd.f32 %v905_v32, %v869_v41  ;;  %v348_v40 = vmul.f32 %v2914_v8, %v4008_v57  ;;  %v429_v46 = vmul.f32 %v2916_v9, %v4008_v57 }
 0x133   : > { %v1663_v35 = vrot.slane %v1542_v4, 1  ;;  %v1907_v20 = vrot.slane %v1786_v47, 2  ;;  %v4231_v19 = vmul.f32 %v2916_v9, %v4010_v3  ;;  %v674_v13 = vmul.f32 %v2918_v10, %v4008_v57 }
 0x134   : > { %v2598_v55 = vmul.f32 -1.442695, %v4221_v21  ;;  %v1181_v62 = vadd.f32 %v1108_v42, %v937_v44  ;;  %v4238_v49 = vmul.f32 %v2918_v10, %v4010_v3  ;;  %v552_v56 = vrot.slane %v429_v46, 1 }
 0x135   : > { %v1664_v22 = vsel %vm486_vm0, %v1661_v61, %v1663_v35  ;;  %v1908_v59 = vsel %vm731_vm1, %v1905_v25, %v1907_v20  ;;  %v553_v2 = vrot.slane %v4231_v19, 1  ;;  %v797_v39 = vrot.slane %v674_v13, 2 }
 0x136   : > { %v2817_v63 = vpop.eup %2816  ;;  %2820 = vpow2.f32 %v2598_v55  ;;  %v1425_v24 = vadd.f32 %v1352_v23, %v1181_v62  ;;  %v798_v32 = vrot.slane %v4238_v49, 2  ;;  %v906_v61 = vmul.f32 %v4117_v51, %v2920_v11  ;;  %v254_v23 = vld [vmem:[%s2912_s26 + $0xbc] sm:$0x1] }
 0x137   : > { %v2819_v0 = vpop.eup %2818  ;;  %v2241_v57 = vmul.f32 %v2817_v63, %v4115_v36  ;;  %v554_v27 = vsel %vm486_vm0, %v552_v56, %v553_v2  ;;  %v987_v25 = vmul.f32 %v4117_v51, %v2925_v15  ;;  %v988_v60 = vmul.f32 %v4119_v29, %v2925_v15 }
 0x138   : > { %v2146_v43 = vadd.f32 1.0, %v2819_v0  ;;  %v1493_v48 = vadd.f32 %v1461_v52, %v1425_v24  ;;  %v625_v31 = vadd.f32 %v554_v27, %v348_v40  ;;  %v799_v33 = vsel %vm731_vm1, %v797_v39, %v798_v32 }
 0x139   : > { %v2663_v37 = vpack.c.bf16 %v2241_v57, %v2241_v57  ;;  %v2456_v36 = vsel %vm2412_vm2, %v2241_v57, 0.0  ;;  %v1109_v58 = vrot.slane %v987_v25, 1  ;;  %v1110_v30 = vrot.slane %v988_v60, 1 }
 0x13a   : > { %v2457_v53 = vadd.f32 %v2456_v36, %v2455_v6  ;;  %2822 = vrcp.f32 %v2146_v43  ;;  %v1737_v45 = vadd.f32 %v1664_v22, %v1493_v48  ;;  %v870_v28 = vadd.f32 %v799_v33, %v625_v31 }
 0x13b   : > { %2402 = vst.msk [vmem:[%s3167_s6 + $0x58] sm:$0xf] %vm2379_vm3, %v2663_v37  ;;  %v1231_v38 = vmul.f32 %v4117_v51, %v2927_v16  ;;  %v1232_v7 = vmul.f32 %v4119_v29, %v2927_v16  ;;  %v1462_v52 = vmul.f32 %v2929_v17, %v4218_v1  ;;  %v1543_v6 = vmul.f32 %v2931_v18, %v4218_v1 }
 0x13c   : > { %v1981_v34 = vadd.f32 %v1908_v59, %v1737_v45  ;;  %v938_v41 = vadd.f32 %v906_v61, %v870_v28  ;;  %v1544_v42 = vmul.f32 %v2931_v18, %v4223_v50  ;;  %v1111_v4 = vsel %vm486_vm0, %v1109_v58, %v1110_v30 }
 0x13d   : > { %v1353_v47 = vrot.slane %v1231_v38, 2  ;;  %v1354_v44 = vrot.slane %v1232_v7, 2  ;;  %v1787_v40 = vmul.f32 %v2942_v26, %v4218_v1  ;;  %v1665_v46 = vrot.slane %v1543_v6, 1 }
 0x13e   : > { %v4275_v35 = vadd.f32 %v4112_v12, %v1981_v34  ;;  %v1182_v20 = vadd.f32 %v1111_v4, %v938_v41  ;;  %v1666_v55 = vrot.slane %v1544_v42, 1  ;;  %v1788_v13 = vmul.f32 %v2942_v26, %v4223_v50 }
 0x13f   : > { %v1355_v62 = vsel %vm731_vm1, %v1353_v47, %v1354_v44  ;;  %v1909_v22 = vrot.slane %v1787_v40, 2  ;;  %v4280_v59 = vunpack.c.l.bf16 %v254_v23  ;;  %v349_v0 = vmul.f32 %v2914_v8, %v4010_v3  ;;  %v2716_v23 = vld [vmem:[%s2912_s26 + $0xc0] sm:$0xff]  }
 0x140   : > { %v2821_v56 = vpop.eup %2820  ;;  %v2599_v63 = vmul.f32 -1.442695, %v4275_v35  ;;  %v1426_v24 = vadd.f32 %v1355_v62, %v1182_v20  ;;  %v1667_v39 = vsel %vm486_vm0, %v1665_v46, %v1666_v55  ;;  %v1910_v27 = vrot.slane %v1788_v13, 2 }
 0x141   : > { %v2147_v57 = vadd.f32 1.0, %v2821_v56  ;;  %v431_v61 = vmul.f32 %v2916_v9, %v4074_v54  ;;  %v676_v25 = vmul.f32 %v2918_v10, %v4074_v54  ;;  %v907_v48 = vmul.f32 %v4119_v29, %v2920_v11 }
 0x142   : > { %2824 = vpow2.f32 %v2599_v63  ;;  %v1494_v43 = vadd.f32 %v1462_v52, %v1426_v24  ;;  %v989_v31 = vmul.f32 %v2925_v15, %v4177_v5  ;;  %v1911_v33 = vsel %vm731_vm1, %v1909_v22, %v1910_v27 }
 0x143   : > { %2826 = vrcp.f32 %v2147_v57  ;;  %v555_v3 = vrot.slane %v431_v61, 1  ;;  %v800_v37 = vrot.slane %v676_v25, 2  ;;  %v1233_v54 = vmul.f32 %v2927_v16, %v4177_v5 }
 0x144   : > { %v2823_v36 = vpop.eup %2822  ;;  %v1738_v60 = vadd.f32 %v1667_v39, %v1494_v43  ;;  %v1112_v58 = vrot.slane %v989_v31, 1  ;;  %v1463_v45 = vmul.f32 %v2929_v17, %v4223_v50  ;;  %v1545_v52 = vmul.f32 %v2931_v18, %v4280_v59 }
 0x145   : > { %v2242_v28 = vmul.f32 %v2823_v36, %v4180_v14  ;;  %v556_v38 = vsel %vm486_vm0, %v553_v2, %v555_v3  ;;  %v801_v7 = vsel %vm731_vm1, %v798_v32, %v800_v37  ;;  %v1356_v42 = vrot.slane %v1233_v54, 2 }
 0x146   : > { %v1982_v34 = vadd.f32 %v1911_v33, %v1738_v60  ;;  %v626_v41 = vadd.f32 %v556_v38, %v349_v0  ;;  %v1113_v6 = vsel %vm486_vm0, %v1110_v30, %v1112_v58  ;;  %v1668_v19 = vrot.slane %v1545_v52, 1 }
 0x147   : > { %v2664_v4 = vpack.c.bf16 %v2242_v28, %v2242_v28  ;;  %v2458_v14 = vsel %vm2412_vm2, %v2242_v28, 0.0  ;;  %v1789_v2 = vmul.f32 %v2942_v26, %v4280_v59  ;;  %v1357_v40 = vsel %vm731_vm1, %v1354_v44, %v1356_v42 }
 0x148   : > { %v2459_v49 = vadd.f32 %v2458_v14, %v2457_v53  ;;  %v4314_v47 = vadd.f32 %v4112_v12, %v1982_v34  ;;  %v871_v32 = vadd.f32 %v801_v7, %v626_v41  ;;  %v1669_v30 = vsel %vm486_vm0, %v1666_v55, %v1668_v19 }
 0x149   : > { %2403 = vst.msk [vmem:[%s3167_s6 + $0x5c] sm:$0xf] %vm2379_vm3, %v2664_v4  ;;  %v1912_v20 = vrot.slane %v1789_v2, 2  ;;  %v4320_v46 = vunpack.c.l.bf16 %v2716_v23  ;;  %v4322_v62 = vunpack.c.h.bf16 %v2716_v23  ;;  %v350_v53 = vmul.f32 %v4117_v51, %v2914_v8  ;;  %v257_v2 = vld [vmem:[%s2912_s26 + $0xc8] sm:$0x1] }
 0x14a   : > { %v2600_v13 = vmul.f32 -1.442695, %v4314_v47  ;;  %v939_v22 = vadd.f32 %v907_v48, %v871_v32  ;;  %v432_v56 = vmul.f32 %v4117_v51, %v2916_v9  ;;  %v4332_v63 = vmul.f32 %v4119_v29, %v2916_v9 }
 0x14b   : > { %v1913_v44 = vsel %vm731_vm1, %v1910_v27, %v1912_v20  ;;  %v677_v55 = vmul.f32 %v4117_v51, %v2918_v10  ;;  %v4338_v24 = vmul.f32 %v4119_v29, %v2918_v10  ;;  %v908_v61 = vmul.f32 %v2920_v11, %v4218_v1 }
 0x14c   : > { %v2825_v39 = vpop.eup %2824  ;;  %2828 = vpow2.f32 %v2600_v13  ;;  %v1183_v0 = vadd.f32 %v1113_v6, %v939_v22  ;;  %v557_v57 = vrot.slane %v432_v56, 1  ;;  %v558_v43 = vrot.slane %v4332_v63, 1 }
 0x14d   : > { %v2827_v25 = vpop.eup %2826  ;;  %v2148_v27 = vadd.f32 1.0, %v2825_v39  ;;  %v802_v48 = vrot.slane %v677_v55, 2  ;;  %v803_v31 = vrot.slane %v4338_v24, 2  ;;  %v990_v3 = vmul.f32 %v2925_v15, %v4218_v1 }
 0x14e   : > { %v2243_v51 = vmul.f32 %v2827_v25, %v4221_v21  ;;  %v1427_v33 = vadd.f32 %v1357_v40, %v1183_v0  ;;  %v4349_v37 = vmul.f32 %v2925_v15, %v4223_v50  ;;  %v559_v36 = vsel %vm486_vm0, %v557_v57, %v558_v43 }
 0x14f   : > { %2830 = vrcp.f32 %v2148_v27  ;;  %v804_v60 = vsel %vm731_vm1, %v802_v48, %v803_v31  ;;  %v1234_v58 = vmul.f32 %v2927_v16, %v4218_v1  ;;  %v627_v38 = vadd.f32 %v559_v36, %v350_v53 }
 0x150   : > { %v2665_v21 = vpack.c.bf16 %v2243_v51, %v2243_v51  ;;  %v2460_v54 = vsel %vm2412_vm2, %v2243_v51, 0.0  ;;  %v1495_v28 = vadd.f32 %v1463_v45, %v1427_v33  ;;  %v1114_v52 = vrot.slane %v990_v3, 1 }
 0x151   : > { %v4358_v7 = vadd.f32 %v2460_v54, %v2459_v49  ;;  %v1115_v34 = vrot.slane %v4349_v37, 1  ;;  %v1235_v41 = vmul.f32 %v2927_v16, %v4223_v50  ;;  %v872_v42 = vadd.f32 %v804_v60, %v627_v38 }
 0x152   : > { %2404 = vst.msk [vmem:[%s3167_s6 + $0x60] sm:$0xf] %vm2379_vm3, %v2665_v21  ;;  %v1739_v6 = vadd.f32 %v1669_v30, %v1495_v28  ;;  %v1358_v23 = vrot.slane %v1234_v58, 2  ;;  %v1546_v45 = vmul.f32 %v4320_v46, %v2931_v18  ;;  %v4370_v19 = vmul.f32 %v4322_v62, %v2931_v18 }
 0x153   : > { %v1116_v4 = vsel %vm486_vm0, %v1114_v52, %v1115_v34  ;;  %v1359_v14 = vrot.slane %v1235_v41, 2  ;;  %v940_v32 = vadd.f32 %v908_v61, %v872_v42  ;;  %v1790_v40 = vmul.f32 %v4320_v46, %v2942_v26 }
 0x154   : > { %v1983_v49 = vadd.f32 %v1913_v44, %v1739_v6  ;;  %v4377_v30 = vmul.f32 %v4322_v62, %v2942_v26  ;;  %v1670_v13 = vrot.slane %v1546_v45, 1  ;;  %v1671_v22 = vrot.slane %v4370_v19, 1  ;;  %v258_v6 = vld [vmem:[%s2912_s26 + $0xcc] sm:$0xff]  }
 0x155   : > { %v1360_v20 = vsel %vm731_vm1, %v1358_v23, %v1359_v14  ;;  %v1184_v63 = vadd.f32 %v1116_v4, %v940_v32  ;;  %v1464_v44 = vmul.f32 %v4320_v46, %v2929_v17  ;;  %v4386_v55 = vunpack.c.l.bf16 %v257_v2 }
 0x156   : > { %v2829_v53 = vpop.eup %2828  ;;  %v4382_v56 = vadd.f32 %v4112_v12, %v1983_v49  ;;  %v1914_v0 = vrot.slane %v1790_v40, 2  ;;  %v1915_v57 = vrot.slane %v4377_v30, 2  ;;  %v434_v61 = vmul.f32 %v2916_v9, %v4177_v5 }
 0x157   : > { %v2149_v39 = vadd.f32 1.0, %v2829_v53  ;;  %v1428_v27 = vadd.f32 %v1360_v20, %v1184_v63  ;;  %v351_v48 = vmul.f32 %v4119_v29, %v2914_v8  ;;  %v679_v51 = vmul.f32 %v2918_v10, %v4177_v5 }
 0x158   : > { %v2601_v25 = vmul.f32 -1.442695, %v4382_v56  ;;  %v1672_v3 = vsel %vm486_vm0, %v1670_v13, %v1671_v22  ;;  %v560_v37 = vrot.slane %v434_v61, 1  ;;  %v992_v36 = vmul.f32 %v2925_v15, %v4280_v59 }
 0x159   : > { %v2831_v33 = vpop.eup %2830  ;;  %2832 = vrcp.f32 %v2149_v39  ;;  %v1496_v29 = vadd.f32 %v1464_v44, %v1428_v27  ;;  %v805_v58 = vrot.slane %v679_v51, 2  ;;  %v1916_v5 = vsel %vm731_vm1, %v1914_v0, %v1915_v57 }
 0x15a   : > { %v4402_v60 = vmul.f32 %v2831_v33, %v4275_v35  ;;  %2834 = vpow2.f32 %v2601_v25  ;;  %v561_v21 = vsel %vm486_vm0, %v558_v43, %v560_v37  ;;  %v1117_v54 = vrot.slane %v992_v36, 1 }
 0x15b   : > { %v1236_v28 = vmul.f32 %v2927_v16, %v4280_v59  ;;  %v1740_v52 = vadd.f32 %v1672_v3, %v1496_v29  ;;  %v628_v41 = vadd.f32 %v561_v21, %v351_v48  ;;  %v909_v35 = vmul.f32 %v2920_v11, %v4223_v50 }
 0x15c   : > { %v2666_v38 = vpack.c.bf16 %v4402_v60, %v4402_v60  ;;  %v806_v42 = vsel %vm731_vm1, %v803_v31, %v805_v58  ;;  %v1548_v45 = vmul.f32 %v2931_v18, %v4386_v55  ;;  %v1792_v2 = vmul.f32 %v2942_v26, %v4386_v55 }
 0x15d   : > { %v1361_v23 = vrot.slane %v1236_v28, 2  ;;  %v1984_v43 = vadd.f32 %v1916_v5, %v1740_v52  ;;  %v873_v4 = vadd.f32 %v806_v42, %v628_v41  ;;  %v1118_v49 = vsel %vm486_vm0, %v1115_v34, %v1117_v54 }
 0x15e   : > { %2405 = vst.msk [vmem:[%s3167_s6 + $0x64] sm:$0xf] %vm2379_vm3, %v2666_v38  ;;  %v1465_v24 = vmul.f32 %v4322_v62, %v2929_v17  ;;  %v312_v40 = vunpack.c.l.bf16 %v258_v6  ;;  %v1673_v13 = vrot.slane %v1548_v45, 1  ;;  %v4431_v53 = vunpack.c.h.bf16 %v258_v6 }
 0x15f   : > { %v1362_v32 = vsel %vm731_vm1, %v1359_v14, %v1361_v23  ;;  %v4429_v31 = vadd.f32 %v4112_v12, %v1984_v43  ;;  %v941_v20 = vadd.f32 %v909_v35, %v873_v4  ;;  %v435_v63 = vmul.f32 %v2916_v9, %v4218_v1 }
 0x160   : > { %v4437_v44 = vmul.f32 %v2916_v9, %v4223_v50  ;;  %v680_v34 = vmul.f32 %v2918_v10, %v4218_v1  ;;  %v4443_v14 = vmul.f32 %v2918_v10, %v4223_v50  ;;  %v1917_v61 = vrot.slane %v1792_v2, 2 }
 0x161   : > { %v2602_v39 = vmul.f32 -1.442695, %v4429_v31  ;;  %v1185_v0 = vadd.f32 %v1118_v49, %v941_v20  ;;  %v352_v25 = vmul.f32 %v2914_v8, %v4218_v1  ;;  %v562_v48 = vrot.slane %v435_v63, 1 }
 0x162   : > { %v563_v51 = vrot.slane %v4437_v44, 1  ;;  %v807_v33 = vrot.slane %v680_v34, 2  ;;  %v808_v3 = vrot.slane %v4443_v14, 2  ;;  %v1674_v58 = vsel %vm486_vm0, %v1671_v22, %v1673_v13 }
 0x163   : > { %v2833_v27 = vpop.eup %2832  ;;  %2836 = vpow2.f32 %v2602_v39  ;;  %v1429_v29 = vadd.f32 %v1362_v32, %v1185_v0  ;;  %v910_v19 = vmul.f32 %v4320_v46, %v2920_v11  ;;  %v1918_v22 = vsel %vm731_vm1, %v1915_v57, %v1917_v61 }
 0x164   : > { %v2835_v37 = vpop.eup %2834  ;;  %v4451_v36 = vmul.f32 %v2833_v27, %v4314_v47  ;;  %v564_v1 = vsel %vm486_vm0, %v562_v48, %v563_v51  ;;  %v809_v21 = vsel %vm731_vm1, %v807_v33, %v808_v3  ;;  %v993_v47 = vmul.f32 %v4320_v46, %v2925_v15  ;;  %v260_v27 = vld [vmem:[%s2912_s26 + $0xd4] sm:$0x1] }
 0x165   : > { %v2150_v5 = vadd.f32 1.0, %v2835_v37  ;;  %v1497_v28 = vadd.f32 %v1465_v24, %v1429_v29  ;;  %v629_v38 = vadd.f32 %v564_v1, %v352_v25  ;;  %v994_v52 = vmul.f32 %v4322_v62, %v2925_v15 }
 0x166   : > { %v2667_v54 = vpack.c.bf16 %v4451_v36, %v4451_v36  ;;  %v1119_v41 = vrot.slane %v993_v47, 1  ;;  %v1237_v42 = vmul.f32 %v4320_v46, %v2927_v16  ;;  %v1238_v23 = vmul.f32 %v4322_v62, %v2927_v16 }
 0x167   : > { %2838 = vrcp.f32 %v2150_v5  ;;  %v1741_v35 = vadd.f32 %v1674_v58, %v1497_v28  ;;  %v874_v6 = vadd.f32 %v809_v21, %v629_v38  ;;  %v1120_v43 = vrot.slane %v994_v52, 1 }
 0x168   : > { %2406 = vst.msk [vmem:[%s3167_s6 + $0x68] sm:$0xf] %vm2379_vm3, %v2667_v54  ;;  %v1466_v4 = vmul.f32 %v2929_v17, %v312_v40  ;;  %v1549_v30 = vmul.f32 %v2931_v18, %v312_v40  ;;  %v4483_v57 = vmul.f32 %v2931_v18, %v4431_v53  ;;  %v1363_v49 = vrot.slane %v1237_v42, 2 }
 0x169   : > { %v1985_v45 = vadd.f32 %v1918_v22, %v1741_v35  ;;  %v942_v2 = vadd.f32 %v910_v19, %v874_v6  ;;  %v1364_v32 = vrot.slane %v1238_v23, 2  ;;  %v1121_v24 = vsel %vm486_vm0, %v1119_v41, %v1120_v43 }
 0x16a   : > { %v1675_v46 = vrot.slane %v1549_v30, 1  ;;  %v1676_v20 = vrot.slane %v4483_v57, 1  ;;  %v1793_v13 = vmul.f32 %v2942_v26, %v312_v40  ;;  %v1794_v0 = vmul.f32 %v2942_v26, %v4431_v53 }
 0x16b   : > { %v4489_v63 = vadd.f32 %v4112_v12, %v1985_v45  ;;  %v1186_v34 = vadd.f32 %v1121_v24, %v942_v2  ;;  %v1365_v39 = vsel %vm731_vm1, %v1363_v49, %v1364_v32  ;;  %v437_v40 = vmul.f32 %v2916_v9, %v4280_v59 }
 0x16c   : > { %v1677_v61 = vsel %vm486_vm0, %v1675_v46, %v1676_v20  ;;  %v1919_v25 = vrot.slane %v1793_v13, 2  ;;  %v1920_v29 = vrot.slane %v1794_v0, 2  ;;  %v353_v5 = vmul.f32 %v2914_v8, %v4223_v50 }
 0x16d   : > { %v2837_v48 = vpop.eup %2836  ;;  %v2603_v33 = vmul.f32 -1.442695, %v4489_v63  ;;  %v1430_v37 = vadd.f32 %v1365_v39, %v1186_v34  ;;  %v682_v1 = vmul.f32 %v2918_v10, %v4280_v59  ;;  %v995_v21 = vmul.f32 %v2925_v15, %v4386_v55 }
 0x16e   : > { %v2151_v58 = vadd.f32 1.0, %v2837_v48  ;;  %v314_v54 = vunpack.c.l.bf16 %v260_v27  ;;  %v565_v28 = vrot.slane %v437_v40, 1  ;;  %v1921_v19 = vsel %vm731_vm1, %v1919_v25, %v1920_v29 }
 0x16f   : > { %2840 = vpow2.f32 %v2603_v33  ;;  %v1498_v47 = vadd.f32 %v1466_v4, %v1430_v37  ;;  %v810_v9 = vrot.slane %v682_v1, 2  ;;  %v1239_v22 = vmul.f32 %v2927_v16, %v4386_v55 }
 0x170   : > { %2842 = vrcp.f32 %v2151_v58  ;;  %v566_v10 = vsel %vm486_vm0, %v563_v51, %v565_v28  ;;  %v1122_v15 = vrot.slane %v995_v21, 1  ;;  %v911_v41 = vmul.f32 %v4322_v62, %v2920_v11 }
 0x171   : > { %v2839_v38 = vpop.eup %2838  ;;  %v1742_v50 = vadd.f32 %v1677_v61, %v1498_v47  ;;  %v630_v59 = vadd.f32 %v566_v10, %v353_v5  ;;  %v811_v52 = vsel %vm731_vm1, %v808_v3, %v810_v9  ;;  %v1366_v42 = vrot.slane %v1239_v22, 2 }
 0x172   : > { %v2246_v8 = vmul.f32 %v2839_v38, %v4382_v56  ;;  %v1551_v16 = vmul.f32 %v2931_v18, %v314_v54  ;;  %v1123_v44 = vsel %vm486_vm0, %v1120_v43, %v1122_v15  ;;  %v1795_v51 = vmul.f32 %v2942_v26, %v314_v54 }
 0x173   : > { %v1986_v6 = vadd.f32 %v1921_v19, %v1742_v50  ;;  %v875_v56 = vadd.f32 %v811_v52, %v630_v59  ;;  %v1367_v3 = vsel %vm731_vm1, %v1364_v32, %v1366_v42  ;;  %v1467_v62 = vmul.f32 %v2929_v17, %v4431_v53 }
 0x174   : > { %v2668_v35 = vpack.c.bf16 %v2246_v8, %v2246_v8  ;;  %v1678_v4 = vrot.slane %v1551_v16, 1  ;;  %v1922_v30 = vrot.slane %v1795_v51, 2  ;;  %v2464_v27 = vsel %vm2412_vm2, %v4451_v36, 0.0 }
 0x175   : > { %v2025_v55 = vadd.f32 %v4112_v12, %v1986_v6  ;;  %v943_v14 = vadd.f32 %v911_v41, %v875_v56  ;;  %v2466_v48 = vsel %vm2412_vm2, %v2246_v8, 0.0 }
 0x176   : > { %2407 = vst.msk [vmem:[%s3167_s6 + $0x6c] sm:$0xf] %vm2379_vm3, %v2668_v35  ;;  %v1679_v26 = vsel %vm486_vm0, %v1676_v20, %v1678_v4  ;;  %v1923_v32 = vsel %vm731_vm1, %v1920_v29, %v1922_v30 }
 0x177   : > { %v2604_v23 = vmul.f32 -1.442695, %v2025_v55  ;;  %v1187_v11 = vadd.f32 %v1123_v44, %v943_v14 }
 0x179   : > { %v2841_v18 = vpop.eup %2840  ;;  %2844 = vpow2.f32 %v2604_v23  ;;  %v1431_v2 = vadd.f32 %v1367_v3, %v1187_v11 }
 0x17a   : > { %v2843_v57 = vpop.eup %2842  ;;  %v2152_v45 = vadd.f32 1.0, %v2841_v18 }
 0x17b   : > { %v2247_v43 = vmul.f32 %v2843_v57, %v4429_v31  ;;  %v1499_v49 = vadd.f32 %v1467_v62, %v1431_v2  ;;  %v2462_v31 = vsel %vm2412_vm2, %v4402_v60, 0.0 }
 0x17c   : > { %2846 = vrcp.f32 %v2152_v45  ;;  %v2463_v25 = vadd.f32 %v2462_v31, %v4358_v7 }
 0x17d   : > { %v2669_v24 = vpack.c.bf16 %v2247_v43, %v2247_v43  ;;  %v1743_v46 = vadd.f32 %v1679_v26, %v1499_v49 }
 0x17f   : > { %2408 = vst.msk [vmem:[%s3167_s6 + $0x70] sm:$0xf] %vm2379_vm3, %v2669_v24  ;;  %v1987_v17 = vadd.f32 %v1923_v32, %v1743_v46 }
 0x181   : > { %v2026_v53 = vadd.f32 %v4112_v12, %v1987_v17  ;;  %v2465_v12 = vadd.f32 %v2464_v27, %v2463_v25 }
 0x183   : > { %v2845_v13 = vpop.eup %2844  ;;  %v2605_v39 = vmul.f32 -1.442695, %v2026_v53  ;;  %v2467_v40 = vadd.f32 %v2466_v48, %v2465_v12 }
 0x184   : > { %v2153_v34 = vadd.f32 1.0, %v2845_v13 }
 0x186   : > { %v2847_v0 = vpop.eup %2846  ;;  %2848 = vrcp.f32 %v2153_v34 }
 0x187   : > { %v2248_v20 = vmul.f32 %v2847_v0, %v4489_v63  ;;  %2850 = vpow2.f32 %v2605_v39  ;;  %v2468_v63 = vsel %vm2412_vm2, %v2247_v43, 0.0 }
 0x188   : > { %v2469_v7 = vadd.f32 %v2468_v63, %v2467_v40 }
 0x189   : > { %v2670_v61 = vpack.c.bf16 %v2248_v20, %v2248_v20  ;;  %v2470_v36 = vsel %vm2412_vm2, %v2248_v20, 0.0 }
 0x18a   : > { %v2471_v5 = vadd.f32 %v2470_v36, %v2469_v7 }
 0x18b   : > { %2409 = vst.msk [vmem:[%s3167_s6 + $0x74] sm:$0xf] %vm2379_vm3, %v2670_v61 }
 0x190   : > { %v2849_v33 = vpop.eup %2848 }
 0x191   : > { %v2851_v37 = vpop.eup %2850  ;;  %v2249_v29 = vmul.f32 %v2849_v33, %v2025_v55 }
 0x192   : > { %v2154_v60 = vadd.f32 1.0, %v2851_v37 }
 0x193   : > { %v2671_v58 = vpack.c.bf16 %v2249_v29, %v2249_v29  ;;  %v2472_v1 = vsel %vm2412_vm2, %v2249_v29, 0.0 }
 0x194   : > { %2852 = vrcp.f32 %v2154_v60  ;;  %v2473_v47 = vadd.f32 %v2472_v1, %v2471_v5 }
 0x195   : > { %2410 = vst.msk [vmem:[%s3167_s6 + $0x78] sm:$0xf] %vm2379_vm3, %v2671_v58 }
 0x19e   : > { %v2853_v21 = vpop.eup %2852 }
 0x19f   : > { %v2250_v54 = vmul.f32 %v2853_v21, %v2026_v53 }
 0x1a1   : > { %v2672_v28 = vpack.c.bf16 %v2250_v54, %v2250_v54  ;;  %v2474_v38 = vsel %vm2412_vm2, %v2250_v54, 0.0 }
 0x1a2   : > { %v2475_v19 = vadd.f32 %v2474_v38, %v2473_v47 }
 0x1a3   : > { %2411 = vst.msk [vmem:[%s3167_s6 + $0x7c] sm:$0xf] %vm2379_vm3, %v2672_v28 }
 0x1a4   : > { %v2476_v9 = vrot.slane %v2475_v19, 4 }
 0x1a6   : > { %v2477_v22 = vadd.f32 %v2476_v9, %v2475_v19 }
 0x1a8   : > { %v2478_v8 = vrot.slane %v2477_v22, 2 }
 0x1aa   : > { %v2479_v50 = vadd.f32 %v2478_v8, %v2477_v22 }
 0x1ac   : > { %v2480_v10 = vrot.slane %v2479_v50, 1 }
 0x1ae   : > { %v2481_v15 = vadd.f32 %v2480_v10, %v2479_v50 }
 0x1b0   : > { %v2482_v59 = vmul.f32 0.00390625, %v2481_v15 }
 0x1b2   : > { %2484 = vst.msk [vmem:[%s206_s13] sm:$0x1] %vm2483_vm4, %v2482_v59 }
 0x1b3 PF: > { %s15_s15 = sadd.s32 1, %s2862_s15  }
 0x1b4   : > { %p12_p4 = scmp.ge.s32.totalorder %s15_s15, 4  }
 0x1b6   :  { %14 = sbr.rel (!%p12_p4) target bundleno = 1 (0x1), region = 74 }

// kernel: forward.9
= control target key start
LH: loop header
LB: loop body
LE: loop exit
PB: predicated region body
PF: predicated region fallthrough
CT: control target
= control target key end

     0   :  { %v191_v27 = vlaneseq  ;;  %v1262_v35 = vmov 1966171168   ;;  %s1560_s0 = inlined_call_operand.vmem [shape: bf16[2,1280], index: 0, kind: input, shape index: {}]   ;;  %s1561_s1 = inlined_call_operand.vmem [shape: bf16[1280,128], index: 1, kind: input, shape index: {}]   ;;  %s1562_s2 = inlined_call_operand.vmem [shape: f32[1,128], index: 2, kind: input, shape index: {}]   ;;  %s1563_s3 = inlined_call_operand.hbm [shape: f32[2,128], index: 3, kind: output, shape index: {}]  }
   0x1   :  { %v1157_v0 = vld [vmem:[%s1561_s1 + $0x40] sm:$0xff]   ;;  %v1161_v4 = vld [vmem:[%s1561_s1 + $0x48] sm:$0xff]   ;;  %v1165_v8 = vld [vmem:[%s1561_s1 + $0x50] sm:$0xff]   ;;  %v189_v36 = vunpack.c.l.s4 %v1262_v35 }
   0x2   :  { %v1158_v1 = vld [vmem:[%s1561_s1] sm:$0xff]   ;;  %1045 = vmatprep.subr.bf16.mxu0 %v1157_v0  ;;  %v1162_v5 = vld [vmem:[%s1561_s1 + $0x8] sm:$0xff]   ;;  %v1166_v9 = vld [vmem:[%s1561_s1 + $0x10] sm:$0xff]   ;;  %v192_v32 = vshrl.u32 %v191_v27, 7 }
   0x3   :  { %v1159_v2 = vld [vmem:[%s1561_s1 + $0xc0] sm:$0xff]   ;;  %1046 = vmatpush3.bf16.msra.mxu0 %v1158_v1  ;;  %v1163_v6 = vld [vmem:[%s1561_s1 + $0xc8] sm:$0xff]   ;;  %v1167_v10 = vld [vmem:[%s1561_s1 + $0xd0] sm:$0xff]   ;;  %v190_v39 = vunpack.c.0.s8 %v189_v36 }
   0x4   :  { %v1160_v3 = vld [vmem:[%s1561_s1 + $0x80] sm:$0xff]   ;;  %1067 = vmatprep.subr.bf16.mxu1 %v1159_v2  ;;  %1047 = vmatprep.subr.bf16.mxu0 %v1161_v4  ;;  %v1164_v7 = vld [vmem:[%s1561_s1 + $0x88] sm:$0xff]   ;;  %v1168_v11 = vld [vmem:[%s1561_s1 + $0x90] sm:$0xff]  }
   0x5   :  { %1068 = vmatpush3.bf16.msra.mxu1 %v1160_v3  ;;  %v1169_v12 = vld [vmem:[%s1561_s1 + $0x58] sm:$0xff]   ;;  %v1173_v16 = vld [vmem:[%s1561_s1 + $0x60] sm:$0xff]   ;;  %v1177_v20 = vld [vmem:[%s1561_s1 + $0x68] sm:$0xff]   ;;  %v1389_v41 = vsub.s32 %v190_v39, %v192_v32 }
   0x6   :  { %1069 = vmatprep.subr.bf16.mxu1 %v1163_v6  ;;  %v1170_v13 = vld [vmem:[%s1561_s1 + $0x18] sm:$0xff]   ;;  %v1174_v17 = vld [vmem:[%s1561_s1 + $0x20] sm:$0xff]   ;;  %v1178_v21 = vld [vmem:[%s1561_s1 + $0x28] sm:$0xff]  }
   0x7   :  { %1048 = vmatpush3.bf16.msra.mxu0 %v1162_v5  ;;  %v1171_v14 = vld [vmem:[%s1561_s1 + $0xd8] sm:$0xff]   ;;  %v1175_v18 = vld [vmem:[%s1561_s1 + $0xe0] sm:$0xff]   ;;  %v1179_v22 = vld [vmem:[%s1561_s1 + $0xe8] sm:$0xff]  }
   0x8   :  { %1049 = vmatprep.subr.bf16.mxu0 %v1165_v8  ;;  %v1172_v15 = vld [vmem:[%s1561_s1 + $0x98] sm:$0xff]   ;;  %v1176_v19 = vld [vmem:[%s1561_s1 + $0xa0] sm:$0xff]   ;;  %v1180_v23 = vld [vmem:[%s1561_s1 + $0xa8] sm:$0xff]  }
   0x9   :  { %1070 = vmatpush3.bf16.msra.mxu1 %v1164_v7  ;;  %v1181_v24 = vld [vmem:[%s1561_s1 + $0x70] sm:$0xff]   ;;  %v1185_v29 = vld [vmem:[%s1561_s1 + $0x78] sm:$0xff]   ;;  %v16_v33 = vld [vmem:[%s1560_s0] sm:$0xff] }
   0xa   :  { %1071 = vmatprep.subr.bf16.mxu1 %v1167_v10  ;;  %v1182_v25 = vld [vmem:[%s1561_s1 + $0x30] sm:$0xff]   ;;  %v1186_v30 = vld [vmem:[%s1561_s1 + $0x38] sm:$0xff]   ;;  %v1190_v37 = vld [vmem:[%s1561_s1 + $0x140] sm:$0xff]   ;;  %v187_v38 = vcombine.high %v16_v33, %v16_v33  ;;  %v194_v42 = vrot.slane %v16_v33, %v1389_v41 }
   0xb   :  { %1050 = vmatpush3.bf16.msra.mxu0 %v1166_v9  ;;  %v1183_v26 = vld [vmem:[%s1561_s1 + $0xf0] sm:$0xff]   ;;  %v1187_v31 = vld [vmem:[%s1561_s1 + $0xf8] sm:$0xff]   ;;  %v1192_v40 = vld [vmem:[%s1561_s1 + $0x1c0] sm:$0xff]  }
   0xc   :  { %1051 = vmatprep.subr.bf16.mxu0 %v1169_v12  ;;  %v1184_v28 = vld [vmem:[%s1561_s1 + $0xb0] sm:$0xff]   ;;  %v1189_v34 = vld [vmem:[%s1561_s1 + $0xb8] sm:$0xff]   ;;  %v1393_v43 = vrot.slane %v187_v38, %v1389_v41  ;;  %v202_v44 = vcombine.high %v194_v42, %v194_v42  ;;  %v210_v45 = vrot.slane %v194_v42, %v1389_v41  ;;  %v1191_v48 = vld [vmem:[%s1561_s1 + $0x100] sm:$0xff]  }
   0xd   :  { %1072 = vmatpush3.bf16.msra.mxu1 %v1168_v11  ;;  %v1194_v51 = vld [vmem:[%s1561_s1 + $0x148] sm:$0xff]   ;;  %v1193_v53 = vld [vmem:[%s1561_s1 + $0x180] sm:$0xff]   ;;  %v1198_v57 = vld [vmem:[%s1561_s1 + $0x150] sm:$0xff]  }
   0xe   :  { %1073 = vmatprep.subr.bf16.mxu1 %v1171_v14  ;;  %v203_v46 = vcombine.high %v1393_v43, %v1393_v43  ;;  %v224_v47 = vrot.slane %v202_v44, %v1389_v41  ;;  %v232_v50 = vcombine.high %v210_v45, %v210_v45  ;;  %v1196_v54 = vld [vmem:[%s1561_s1 + $0x1c8] sm:$0xff]   ;;  %v1200_v59 = vld [vmem:[%s1561_s1 + $0x1d0] sm:$0xff]   ;;  %v1202_v61 = vld [vmem:[%s1561_s1 + $0x158] sm:$0xff]  }
   0xf   :  { %1052 = vmatpush3.bf16.msra.mxu0 %v1170_v13  ;;  %v1195_v56 = vld [vmem:[%s1561_s1 + $0x108] sm:$0xff]   ;;  %v1199_v60 = vld [vmem:[%s1561_s1 + $0x110] sm:$0xff]   ;;  %v1204_v63 = vld [vmem:[%s1561_s1 + $0x1d8] sm:$0xff]  }
  0x10   :  { %1053 = vmatprep.subr.bf16.mxu0 %v1173_v16  ;;  %v231_v49 = vrot.slane %v203_v46, %v1389_v41  ;;  %780 = vmatprep.mubr.bf16.mxu0 %v224_v47  ;;  %v234_v52 = vcombine.high %v224_v47, %v224_v47  ;;  %v1197_v58 = vld [vmem:[%s1561_s1 + $0x188] sm:$0xff]   ;;  %v1201_v62 = vld [vmem:[%s1561_s1 + $0x190] sm:$0xff]   ;;  %v1203_v0 = vld [vmem:[%s1561_s1 + $0x118] sm:$0xff]  }
  0x11   :  { %1074 = vmatpush3.bf16.msra.mxu1 %v1172_v15  ;;  %v1206_v1 = vld [vmem:[%s1561_s1 + $0x160] sm:$0xff]   ;;  %v1205_v2 = vld [vmem:[%s1561_s1 + $0x198] sm:$0xff]   ;;  %v1210_v5 = vld [vmem:[%s1561_s1 + $0x168] sm:$0xff]  }
  0x12   :  { %1075 = vmatprep.subr.bf16.mxu1 %v1175_v18  ;;  %v235_v55 = vcombine.high %v231_v49, %v231_v49  ;;  %820 = vmatprep.mubr.bf16.mxu1 %v234_v52  ;;  %v1208_v3 = vld [vmem:[%s1561_s1 + $0x1e0] sm:$0xff]   ;;  %v1212_v7 = vld [vmem:[%s1561_s1 + $0x1e8] sm:$0xff]   ;;  %v1214_v9 = vld [vmem:[%s1561_s1 + $0x170] sm:$0xff]  }
  0x13   :  { %1054 = vmatpush3.bf16.msra.mxu0 %v1174_v17  ;;  %v1207_v4 = vld [vmem:[%s1561_s1 + $0x120] sm:$0xff]   ;;  %v1211_v8 = vld [vmem:[%s1561_s1 + $0x128] sm:$0xff]   ;;  %v1216_v11 = vld [vmem:[%s1561_s1 + $0x1f0] sm:$0xff]   ;;  %v217_v17 = vrot.slane %v1393_v43, %v1389_v41 }
  0x14   :  { %1055 = vmatprep.subr.bf16.mxu0 %v1177_v20  ;;  %v1209_v6 = vld [vmem:[%s1561_s1 + $0x1a0] sm:$0xff]   ;;  %v1213_v10 = vld [vmem:[%s1561_s1 + $0x1a8] sm:$0xff]   ;;  %v1215_v12 = vld [vmem:[%s1561_s1 + $0x130] sm:$0xff]  }
  0x15   :  { %1076 = vmatpush3.bf16.msra.mxu1 %v1176_v19  ;;  %v1218_v13 = vld [vmem:[%s1561_s1 + $0x178] sm:$0xff]   ;;  %v1217_v14 = vld [vmem:[%s1561_s1 + $0x1b0] sm:$0xff]   ;;  %v1222_v18 = vld [vmem:[%s1561_s1 + $0x240] sm:$0xff]  }
  0x16   :  { %1077 = vmatprep.subr.bf16.mxu1 %v1179_v22  ;;  %v1220_v15 = vld [vmem:[%s1561_s1 + $0x1f8] sm:$0xff]   ;;  %v1223_v20 = vld [vmem:[%s1561_s1 + $0x200] sm:$0xff]   ;;  %v1224_v22 = vld [vmem:[%s1561_s1 + $0x248] sm:$0xff]  }
  0x17   :  { %1056 = vmatpush3.bf16.msra.mxu0 %v1178_v21  ;;  %v1219_v16 = vld [vmem:[%s1561_s1 + $0x138] sm:$0xff]   ;;  %v233_v21 = vcombine.high %v217_v17, %v217_v17 }
  0x18   :  { %1057 = vmatprep.subr.bf16.mxu0 %v1181_v24  ;;  %v1221_v19 = vld [vmem:[%s1561_s1 + $0x1b8] sm:$0xff]   ;;  %v1226_v24 = vld [vmem:[%s1561_s1 + $0x250] sm:$0xff]  }
  0x19   :  { %1078 = vmatpush3.bf16.msra.mxu1 %v1180_v23  ;;  %v1225_v23 = vld [vmem:[%s1561_s1 + $0x208] sm:$0xff]  }
  0x1a   :  { %1079 = vmatprep.subr.bf16.mxu1 %v1183_v26 }
  0x1b   :  { %1058 = vmatpush3.bf16.msra.mxu0 %v1182_v25  ;;  %v964_v25 = vld.sshfl [vmem:[%s1560_s0 + $0x8] sm:$0x11 pattern:$0x75316420] }
  0x1c   :  { %1059 = vmatprep.subr.bf16.mxu0 %v1185_v29  ;;  %v243_v26 = vcombine.high %v964_v25, %v964_v25 }
  0x1d   :  { %1080 = vmatpush3.bf16.msra.mxu1 %v1184_v28 }
  0x1e   :  { %1081 = vmatprep.subr.bf16.mxu1 %v1187_v31 }
  0x1f   :  { %1060 = vmatpush3.bf16.msra.mxu0 %v1186_v30 }
  0x20   :  { %1089 = vmatprep.subr.bf16.mxu0 %v1190_v37 }
  0x21   :  { %1082 = vmatpush3.bf16.msra.mxu1 %v1189_v34 }
  0x22   :  { %1111 = vmatprep.subr.bf16.mxu1 %v1192_v40  ;;  %781 = vmatmul.mubr.bf16.vlgmr.msra.gmra.mrb[0].mxu0 %v210_v45 }
  0x23   :  { %1090 = vmatpush3.bf16.msra.mxu0 %v1191_v48  ;;  %860 = vmatprep.mubr.bf16.mxu0 %v231_v49 }
  0x24   :  { %821 = vmatmul.mubr.bf16.vlgmr.msra.gmra.mrb[0].mxu1 %v232_v50  ;;  %1091 = vmatprep.subr.bf16.mxu0 %v1194_v51 }
  0x25   :  { %1112 = vmatpush3.bf16.msra.mxu1 %v1193_v53  ;;  %900 = vmatprep.mubr.bf16.mxu1 %v235_v55 }
  0x26   :  { %1113 = vmatprep.subr.bf16.mxu1 %v1196_v54 }
  0x27   :  { %1092 = vmatpush3.bf16.msra.mxu0 %v1195_v56 }
  0x28   :  { %1093 = vmatprep.subr.bf16.mxu0 %v1198_v57 }
  0x29   :  { %1114 = vmatpush3.bf16.msra.mxu1 %v1197_v58 }
  0x2a   :  { %1115 = vmatprep.subr.bf16.mxu1 %v1200_v59 }
  0x2b   :  { %1094 = vmatpush3.bf16.msra.mxu0 %v1199_v60 }
  0x2c   :  { %1095 = vmatprep.subr.bf16.mxu0 %v1202_v61 }
  0x2d   :  { %1116 = vmatpush3.bf16.msra.mxu1 %v1201_v62 }
  0x2e   :  { %1117 = vmatprep.subr.bf16.mxu1 %v1204_v63 }
  0x2f   :  { %1096 = vmatpush3.bf16.msra.mxu0 %v1203_v0 }
  0x30   :  { %1097 = vmatprep.subr.bf16.mxu0 %v1206_v1 }
  0x31   :  { %1118 = vmatpush3.bf16.msra.mxu1 %v1205_v2 }
  0x32   :  { %1119 = vmatprep.subr.bf16.mxu1 %v1208_v3 }
  0x33   :  { %1098 = vmatpush3.bf16.msra.mxu0 %v1207_v4 }
  0x34   :  { %1099 = vmatprep.subr.bf16.mxu0 %v1210_v5 }
  0x35   :  { %1120 = vmatpush3.bf16.msra.mxu1 %v1209_v6 }
  0x36   :  { %1121 = vmatprep.subr.bf16.mxu1 %v1212_v7 }
  0x37   :  { %1100 = vmatpush3.bf16.msra.mxu0 %v1211_v8 }
  0x38   :  { %1101 = vmatprep.subr.bf16.mxu0 %v1214_v9 }
  0x39   :  { %1122 = vmatpush3.bf16.msra.mxu1 %v1213_v10 }
  0x3a   :  { %1123 = vmatprep.subr.bf16.mxu1 %v1216_v11 }
  0x3b   :  { %1102 = vmatpush3.bf16.msra.mxu0 %v1215_v12 }
  0x3c   :  { %1103 = vmatprep.subr.bf16.mxu0 %v1218_v13 }
  0x3d   :  { %1124 = vmatpush3.bf16.msra.mxu1 %v1217_v14 }
  0x3e   :  { %1125 = vmatprep.subr.bf16.mxu1 %v1220_v15 }
  0x3f   :  { %1104 = vmatpush3.bf16.msra.mxu0 %v1219_v16 }
  0x40   :  { %1133 = vmatprep.subr.bf16.mxu0 %v1222_v18 }
  0x41   :  { %1126 = vmatpush3.bf16.msra.mxu1 %v1221_v19 }
  0x42   :  { %861 = vmatmul.mubr.bf16.vlgmr.msra.gmra.mrb[4].mxu0 %v217_v17 }
  0x43   :  { %1134 = vmatpush3.bf16.msra.mxu0 %v1223_v20 }
  0x44   :  { %901 = vmatmul.mubr.bf16.vlgmr.msra.gmra.mrb[4].mxu1 %v233_v21  ;;  %1135 = vmatprep.subr.bf16.mxu0 %v1224_v22 }
  0x45   :  { %8 = vsyncpa [#allocation3], 0  ;;  %v1227_v27 = vld [vmem:[%s1561_s1 + $0x210] sm:$0xff]   ;;  %v1228_v28 = vld [vmem:[%s1561_s1 + $0x258] sm:$0xff]   ;;  %v257_v29 = vrot.slane %v243_v26, %v1389_v41  ;;  %v250_v39 = vrot.slane %v964_v25, %v1389_v41 }
  0x46   :  { %v1229_v30 = vld [vmem:[%s1561_s1 + $0x218] sm:$0xff]   ;;  %v1230_v31 = vld [vmem:[%s1561_s1 + $0x260] sm:$0xff]   ;;  %v1232_v33 = vld [vmem:[%s1561_s1 + $0x268] sm:$0xff]  }
  0x47   :  { %1136 = vmatpush3.bf16.msra.mxu0 %v1225_v23  ;;  %940 = vmatprep.mubr.bf16.mxu0 %v257_v29  ;;  %v1231_v32 = vld [vmem:[%s1561_s1 + $0x220] sm:$0xff]   ;;  %v1233_v34 = vld [vmem:[%s1561_s1 + $0x228] sm:$0xff]   ;;  %v1234_v35 = vld [vmem:[%s1561_s1 + $0x270] sm:$0xff]  }
  0x48   :  { %1137 = vmatprep.subr.bf16.mxu0 %v1226_v24  ;;  %v1235_v36 = vld [vmem:[%s1561_s1 + $0x230] sm:$0xff]   ;;  %v1236_v37 = vld [vmem:[%s1561_s1 + $0x278] sm:$0xff]   ;;  %v963_v42 = vld [vmem:[%s1562_s2] ss:$0 sm:$0xff] }
  0x49   :  { %v1237_v38 = vld [vmem:[%s1561_s1 + $0x238] sm:$0xff]   ;;  %s1263_s1 = smov [#allocation2]  }
  0x4a   :  { %s955_s2 = sshll.u32 %s1263_s1, 4  ;;  %s956_s2 = int_to_ptr.vmem [resolvable:$true] %s955_s2 }
  0x4b   :  { %1138 = vmatpush3.bf16.msra.mxu0 %v1227_v27  ;;  %s1238_s15 = scalar_lea.vmem %s956_s2, 32  ;;  %p1243_p1 = scmp.lt.s32.totalorder %s956_s2, %s956_s2 }
  0x4c   :  { %1139 = vmatprep.subr.bf16.mxu0 %v1228_v28  ;;  %p1239_p0 = scmp.ne.s32.totalorder %s956_s2, %s1238_s15  ;;  %p1244_p2 = scmp.lt.s32.totalorder %s1238_s15, %s1238_s15 }
  0x4e   :  { %p1245_p3 = por %p1244_p2, %p1243_p1 }
  0x4f   :  { %1140 = vmatpush3.bf16.msra.mxu0 %v1229_v30 }
  0x50   :  { %1141 = vmatprep.subr.bf16.mxu0 %v1230_v31  ;;  %p1246_p4 = pnand %p1245_p3, %p1239_p0 }
  0x53   :  { %1142 = vmatpush3.bf16.msra.mxu0 %v1231_v32 }
  0x54   :  { %1143 = vmatprep.subr.bf16.mxu0 %v1232_v33 }
  0x57   :  { %1144 = vmatpush3.bf16.msra.mxu0 %v1233_v34 }
  0x58   :  { %1145 = vmatprep.subr.bf16.mxu0 %v1234_v35 }
  0x5b   :  { %1146 = vmatpush3.bf16.msra.mxu0 %v1235_v36 }
  0x5c   :  { %1147 = vmatprep.subr.bf16.mxu0 %v1236_v37 }
  0x5f   :  { %1148 = vmatpush3.bf16.msra.mxu0 %v1237_v38 }
  0x62   :  { %941 = vmatmul.mubr.bf16.vlgmr.msra.gmra.mrb[8].mxu0 %v250_v39 }
  0xf5   :  { %v1061_v40 = vpop.f32.mrb[0].mxu0 }
  0xf6   :  { %v1062_v43 = vpop.f32.mrb[1].mxu0 }
  0xf7   :  { %v1063_v44 = vadd.f32 %v1062_v43, %v1061_v40  ;;  %v1064_v45 = vpop.f32.mrb[2].mxu0  ;;  %v1083_v46 = vpop.f32.mrb[0].mxu1 }
  0xf8   :  { %v1065_v47 = vpop.f32.mrb[3].mxu0  ;;  %v1084_v48 = vpop.f32.mrb[1].mxu1 }
  0xf9   :  { %v783_v49 = vadd.f32 %v1063_v44, %v963_v42  ;;  %v1085_v50 = vadd.f32 %v1084_v48, %v1083_v46  ;;  %v1086_v51 = vpop.f32.mrb[2].mxu1 }
  0xfa   :  { %v1087_v52 = vpop.f32.mrb[3].mxu1 }
  0xfb   :  { %v823_v53 = vadd.f32 %v1085_v50, %v783_v49 }
 0x115   :  { %v1105_v54 = vpop.f32.mrb[4].mxu0 }
 0x116   :  { %v1106_v41 = vpop.f32.mrb[5].mxu0 }
 0x117   :  { %v1107_v55 = vadd.f32 %v1106_v41, %v1105_v54  ;;  %v1108_v56 = vpop.f32.mrb[6].mxu0  ;;  %v1127_v57 = vpop.f32.mrb[4].mxu1 }
 0x118   :  { %v1109_v58 = vpop.f32.mrb[7].mxu0  ;;  %v1128_v59 = vpop.f32.mrb[5].mxu1 }
 0x119   :  { %v863_v60 = vadd.f32 %v1107_v55, %v823_v53  ;;  %v1129_v61 = vadd.f32 %v1128_v59, %v1127_v57  ;;  %v1130_v62 = vpop.f32.mrb[6].mxu1 }
 0x11a   :  { %v1131_v63 = vpop.f32.mrb[7].mxu1 }
 0x11b   :  { %v903_v0 = vadd.f32 %v1129_v61, %v863_v60 }
 0x135   :  { %v1149_v1 = vpop.f32.mrb[8].mxu0 }
 0x136   :  { %v1150_v2 = vpop.f32.mrb[9].mxu0 }
 0x137   :  { %v1151_v3 = vadd.f32 %v1150_v2, %v1149_v1  ;;  %v1152_v4 = vpop.f32.mrb[10].mxu0 }
 0x138   :  { %v1153_v5 = vpop.f32.mrb[11].mxu0 }
 0x139   :  { %v943_v6 = vadd.f32 %v1151_v3, %v903_v0 }
 0x13b   :  { %948 = vst [vmem:[#allocation2] sm:$0x3] %v943_v6 }
 0x13c   :  { %1249 = shalt.err (!%p1246_p4)
}
 0x13d   :  { %s1250_s18 = scalar_lea.hbm %s1563_s3, 32 }
 0x13e   :  { %p1251_p5 = scmp.ne.s32.totalorder %s1563_s3, %s1250_s18  ;;  %p1254_p6 = scmp.lt.u32.totalorder %s1250_s18, %s1563_s3 }
 0x140   :  { %p1256_p7 = pnand %p1254_p6, %p1251_p5 }
 0x142   :  { %1259 = shalt.err (!%p1256_p7)
}
 0x143   :  { %958 = dma.vmem_to_hbm [thread:$0]  %s956_s2, 32, %s1563_s3, [#allocation3]  }
 0x144   :  { %1260 = dma.done.wait [#allocation3], 32  }
 0x145   :  { %1261 = vsyncadd [#allocation3], 4294967264 }
 0x146   :  { %962 = vsyncpa [#allocation3], 1 }

// kernel: forward.8
= control target key start
LH: loop header
LB: loop body
LE: loop exit
PB: predicated region body
PF: predicated region fallthrough
CT: control target
= control target key end

     0   :  { %s6243_s15 = smov 0   ;;  %s6245_s16 = smov 0   ;;  %s9503_s0 = inlined_call_operand.vmem [shape: bf16[2,256,32], index: 0, kind: input, shape index: {}]   ;;  %s9504_s1 = inlined_call_operand.vmem [shape: f32[2,1,32], index: 1, kind: input, shape index: {}]   ;;  %s9505_s2 = inlined_call_operand.vmem [shape: bf16[32,1280], index: 2, kind: input, shape index: {}]   ;;  %s9506_s3 = inlined_call_operand.vmem [shape: f32[1,1280], index: 3, kind: input, shape index: {}]   ;;  %s9507_s4 = inlined_call_operand.vmem [shape: f32[2,1,1280], index: 4, kind: output, shape index: {}]  }
   0x1   :  { %s6247_s17 = smov 0  }
   0x2 LB: > { %s26_s18 = sadd.s32 1, %s6209_s16  ;;  %p4341_p0 = scmp.ge.s32.totalorder %s6213_s17, 1  ;;  %s6213_s17 = sphi %s6247_s17, %s14_s17   ;;  %s6209_s16 = sphi %s6245_s16, %s10080_s16   ;;  %s6205_s15 = sphi %s6243_s15, %s10079_s15  }
   0x3   : > { %p28_p1 = scmp.ge.s32.totalorder %s26_s18, 2  ;;  %p189_p2 = scmp.lt.s32.totalorder %s6213_s17, 3 }
   0x5   : > { %s10082_s18 = smov (%p28_p1, %s26_s18), 0  ;;  %p190_p3 = pnand %p4341_p0, %p189_p2 }
   0x7   : > { %193 = sbr.rel (%p190_p3) target bundleno = 954 (0x3ba), region = 36 }
   0xe   : > { %v4879_v0 = vld [vmem:[%s9505_s2 + $0x4] ss:$40 sps:$4 sm:$0xff]   ;;  %p222_p4 = scmp.lt.s32.totalorder %s6205_s15, 1  ;;  %v4881_v1 = vld [vmem:[%s9505_s2] ss:$40 sps:$4 sm:$0xff]   ;;  %v9511_v2 = vmov 0  }
   0xf   : > { %623 = vmatprep.mubr.bf16.mxu0 %v9511_v2  ;;  %703 = vmatprep.mubr.bf16.mxu1 %v9511_v2  ;;  %v4882_v3 = vld [vmem:[%s9505_s2 + $0x54] ss:$40 sps:$4 sm:$0xff]   ;;  %v4884_v4 = vld [vmem:[%s9505_s2 + $0x50] ss:$40 sps:$4 sm:$0xff]   ;;  %vm542_vm0 = vcmask 261120  }
  0x10   : > { %4847 = vmatprep.subr.bf16.mxu1 %v4879_v0  ;;  %591 = vmatprep.subr.bf16.mxu0 %v4879_v0  ;;  %s10084_s15 = smov (!%p222_p4, %s6205_s15), 1  ;;  %v4887_v5 = vld [vmem:[%s9505_s2 + $0xc] ss:$40 sps:$4 sm:$0xff]   ;;  %v4885_v20 = vld [vmem:[%s9505_s2 + $0x8] ss:$40 sps:$4 sm:$0xff]  }
  0x11   : > { %4849 = vmatpush1.bf16.msra.mxu1 %v4881_v1  ;;  %592 = vmatpush1.bf16.msra.mxu0 %v4881_v1  ;;  %s4767_s29 = sshll.u32 %s10084_s15, 7  ;;  %s233_s6 = scalar_lea.vmem %s9504_s1, %s10084_s15  ;;  %v4890_v7 = vld [vmem:[%s9505_s2 + $0x14] ss:$40 sps:$4 sm:$0xff]   ;;  %v4888_v25 = vld [vmem:[%s9505_s2 + $0x10] ss:$40 sps:$4 sm:$0xff]  }
  0x12   : > { %4848 = vmatprep.subr.bf16.mxu1 %v4882_v3  ;;  %593 = vmatprep.subr.bf16.mxu0 %v4882_v3  ;;  %s6288_s9 = scalar_lea.vmem %s9503_s0, %s4767_s29  ;;  %v6290_v6 = vld [vmem:[%s233_s6] ss:$0 sm:$0xff]  ;;  %v4893_v29 = vld [vmem:[%s9505_s2 + $0x5c] ss:$40 sps:$4 sm:$0xff]   ;;  %s4851_s30 = smul.u32 10, %s10084_s15 }
  0x13   : > { %v4769_v8 = vld [vmem:[%s6288_s9] sm:$0xff]   ;;  %v4832_v10 = vld [vmem:[%s6288_s9 + $0x8] sm:$0xff]   ;;  %v4833_v34 = vld [vmem:[%s6288_s9 + $0x10] sm:$0xff]  }
  0x14   : > { %v4839_v9 = vld [vmem:[%s6288_s9 + $0x40] sm:$0xff]   ;;  %v4770_v11 = vunpack.c.l.bf16 %v4769_v8  ;;  %v4771_v12 = vunpack.c.h.bf16 %v4769_v8  ;;  %v4840_v15 = vld [vmem:[%s6288_s9 + $0x48] sm:$0xff]   ;;  %v4774_v16 = vunpack.c.l.bf16 %v4832_v10  ;;  %v4775_v17 = vunpack.c.h.bf16 %v4832_v10  ;;  %v4841_v35 = vld [vmem:[%s6288_s9 + $0x50] sm:$0xff]   ;;  %s9186_s7 = scalar_lea.vmem %s9507_s4, %s4851_s30 }
  0x15   : > { %4850 = vmatpush1.bf16.msra.mxu1 %v4884_v4  ;;  %594 = vmatpush1.bf16.msra.mxu0 %v4884_v4  ;;  %v4802_v13 = vunpack.c.l.bf16 %v4839_v9  ;;  %v4803_v14 = vunpack.c.h.bf16 %v4839_v9  ;;  %v4806_v18 = vunpack.c.l.bf16 %v4840_v15  ;;  %v4807_v19 = vunpack.c.h.bf16 %v4840_v15  ;;  %v4896_v30 = vld [vmem:[%s9505_s2 + $0x64] ss:$40 sps:$4 sm:$0xff]   ;;  %v4891_v36 = vld [vmem:[%s9505_s2 + $0x58] ss:$40 sps:$4 sm:$0xff]  }
  0x16   : > { %784 = vmatprep.subr.bf16.mxu1 %v4887_v5  ;;  %977 = vmatprep.subr.bf16.mxu0 %v4890_v7  ;;  %v320_v21 = vmul.f32 %v4770_v11, %v6290_v6  ;;  %v321_v22 = vmul.f32 %v4771_v12, %v6290_v6  ;;  %v322_v28 = vmul.f32 %v4774_v16, %v6290_v6  ;;  %v4894_v37 = vld [vmem:[%s9505_s2 + $0x60] ss:$40 sps:$4 sm:$0xff]   ;;  %v4899_v38 = vld [vmem:[%s9505_s2 + $0x1c] ss:$40 sps:$4 sm:$0xff]   ;;  %v4778_v39 = vunpack.c.l.bf16 %v4833_v34 }
  0x17   : > { %v336_v23 = vmul.f32 %v4802_v13, %v6290_v6  ;;  %v337_v24 = vmul.f32 %v4803_v14, %v6290_v6  ;;  %v323_v31 = vmul.f32 %v4775_v17, %v6290_v6  ;;  %v338_v32 = vmul.f32 %v4806_v18, %v6290_v6  ;;  %v4902_v41 = vld [vmem:[%s9505_s2 + $0x24] ss:$40 sps:$4 sm:$0xff]   ;;  %v4834_v50 = vld [vmem:[%s6288_s9 + $0x18] sm:$0xff]  }
  0x18   : > { %v6309_v26 = vpack.c.bf16 %v321_v22, %v320_v21  ;;  %v339_v33 = vmul.f32 %v4807_v19, %v6290_v6  ;;  %v4779_v40 = vunpack.c.h.bf16 %v4833_v34  ;;  %v4810_v44 = vunpack.c.l.bf16 %v4841_v35  ;;  %v4842_v51 = vld [vmem:[%s6288_s9 + $0x58] sm:$0xff]   ;;  %v4835_v62 = vld [vmem:[%s6288_s9 + $0x20] sm:$0xff]   ;;  %v4836_v12 = vld [vmem:[%s6288_s9 + $0x28] sm:$0xff]  }
  0x19   : > { %v6311_v27 = vpack.c.bf16 %v337_v24, %v336_v23  ;;  %v6343_v42 = vpack.c.bf16 %v323_v31, %v322_v28  ;;  %v4811_v45 = vunpack.c.h.bf16 %v4841_v35  ;;  %v324_v46 = vmul.f32 %v4778_v39, %v6290_v6  ;;  %v4843_v63 = vld [vmem:[%s6288_s9 + $0x60] sm:$0xff]   ;;  %v4844_v13 = vld [vmem:[%s6288_s9 + $0x68] sm:$0xff]   ;;  %v4837_v24 = vld [vmem:[%s6288_s9 + $0x30] sm:$0xff]  }
  0x1a   : > { %4365 = vmatmul.mubr.msk.bf16.vlgmr.msra.gmra.mrb[0].mxu0 %vm542_vm0, %v6309_v26  ;;  %v6345_v43 = vpack.c.bf16 %v339_v33, %v338_v32  ;;  %v325_v47 = vmul.f32 %v4779_v40, %v6290_v6  ;;  %v340_v48 = vmul.f32 %v4810_v44, %v6290_v6  ;;  %v4782_v52 = vunpack.c.l.bf16 %v4834_v50  ;;  %v4846_v39 = vld [vmem:[%s6288_s9 + $0x78] sm:$0xff]  }
  0x1b   : > { %4373 = vmatmul.mubr.msk.bf16.vlgmr.msra.gmra.mrb[0].mxu1 %vm542_vm0, %v6311_v27  ;;  %978 = vmatpush1.bf16.msra.mxu0 %v4888_v25  ;;  %v341_v49 = vmul.f32 %v4811_v45, %v6290_v6  ;;  %v4783_v53 = vunpack.c.h.bf16 %v4834_v50  ;;  %v4814_v56 = vunpack.c.l.bf16 %v4842_v51  ;;  %v4815_v57 = vunpack.c.h.bf16 %v4842_v51  ;;  %v4845_v25 = vld [vmem:[%s6288_s9 + $0x70] sm:$0xff]  }
  0x1c   : > { %785 = vmatpush1.bf16.msra.mxu1 %v4885_v20  ;;  %633 = vmatprep.mubr.bf16.mxu0 %v9511_v2  ;;  %v6359_v54 = vpack.c.bf16 %v325_v47, %v324_v46  ;;  %v326_v58 = vmul.f32 %v4782_v52, %v6290_v6  ;;  %v4786_v0 = vunpack.c.l.bf16 %v4835_v62  ;;  %v4787_v1 = vunpack.c.h.bf16 %v4835_v62 }
  0x1d   : > { %713 = vmatprep.mubr.bf16.mxu1 %v9511_v2  ;;  %786 = vmatprep.subr.bf16.mxu1 %v4893_v29  ;;  %v6361_v55 = vpack.c.bf16 %v341_v49, %v340_v48  ;;  %v327_v59 = vmul.f32 %v4783_v53, %v6290_v6  ;;  %v342_v60 = vmul.f32 %v4814_v56, %v6290_v6  ;;  %v4818_v5 = vunpack.c.l.bf16 %v4843_v63  ;;  %v4900_v56 = vld [vmem:[%s9505_s2 + $0x20] ss:$40 sps:$4 sm:$0xff]  }
  0x1e   : > { %979 = vmatprep.subr.bf16.mxu0 %v4896_v30  ;;  %v343_v61 = vmul.f32 %v4815_v57, %v6290_v6  ;;  %v4819_v7 = vunpack.c.h.bf16 %v4843_v63  ;;  %v328_v8 = vmul.f32 %v4786_v0, %v6290_v6  ;;  %v329_v9 = vmul.f32 %v4787_v1, %v6290_v6  ;;  %v4905_v57 = vld [vmem:[%s9505_s2 + $0x6c] ss:$40 sps:$4 sm:$0xff]   ;;  %v388_v63 = vld [vmem:[%s9506_s3] sm:$0xff] }
  0x1f   : > { %980 = vmatpush1.bf16.msra.mxu0 %v4894_v37  ;;  %v6375_v3 = vpack.c.bf16 %v327_v59, %v326_v58  ;;  %v344_v10 = vmul.f32 %v4818_v5, %v6290_v6  ;;  %v4790_v14 = vunpack.c.l.bf16 %v4836_v12  ;;  %v4791_v15 = vunpack.c.h.bf16 %v4836_v12  ;;  %v4908_v58 = vld [vmem:[%s9505_s2 + $0x74] ss:$40 sps:$4 sm:$0xff]   ;;  %v4903_v59 = vld [vmem:[%s9505_s2 + $0x68] ss:$40 sps:$4 sm:$0xff]  }
  0x20   : > { %787 = vmatpush1.bf16.msra.mxu1 %v4891_v36  ;;  %1363 = vmatprep.subr.bf16.mxu0 %v4902_v41  ;;  %v6377_v4 = vpack.c.bf16 %v343_v61, %v342_v60  ;;  %v345_v11 = vmul.f32 %v4819_v7, %v6290_v6  ;;  %v6391_v16 = vpack.c.bf16 %v329_v9, %v328_v8  ;;  %v4822_v18 = vunpack.c.l.bf16 %v4844_v13  ;;  %v4906_v60 = vld [vmem:[%s9505_s2 + $0x70] ss:$40 sps:$4 sm:$0xff]  }
  0x21   : > { %1170 = vmatprep.subr.bf16.mxu1 %v4899_v38  ;;  %v4823_v19 = vunpack.c.h.bf16 %v4844_v13  ;;  %v330_v20 = vmul.f32 %v4790_v14, %v6290_v6  ;;  %v331_v21 = vmul.f32 %v4791_v15, %v6290_v6  ;;  %v4794_v28 = vunpack.c.l.bf16 %v4837_v24  ;;  %v4838_v38 = vld [vmem:[%s6288_s9 + $0x38] sm:$0xff]  }
  0x22   : > { %4366 = vmatmul.mubr.msk.bf16.gmra.mrb[4].mxu0 %vm542_vm0, %v6343_v42  ;;  %v6393_v17 = vpack.c.bf16 %v345_v11, %v344_v10  ;;  %v346_v22 = vmul.f32 %v4822_v18, %v6290_v6  ;;  %v4795_v29 = vunpack.c.h.bf16 %v4837_v24  ;;  %v4826_v32 = vunpack.c.l.bf16 %v4845_v25 }
  0x23   : > { %4374 = vmatmul.mubr.msk.bf16.gmra.mrb[4].mxu1 %vm542_vm0, %v6345_v43  ;;  %643 = vmatprep.mubr.bf16.mxu0 %v9511_v2  ;;  %v347_v23 = vmul.f32 %v4823_v19, %v6290_v6  ;;  %v6407_v30 = vpack.c.bf16 %v331_v21, %v330_v20  ;;  %v4827_v33 = vunpack.c.h.bf16 %v4845_v25  ;;  %v332_v34 = vmul.f32 %v4794_v28, %v6290_v6 }
  0x24   : > { %723 = vmatprep.mubr.bf16.mxu1 %v9511_v2  ;;  %v333_v35 = vmul.f32 %v4795_v29, %v6290_v6  ;;  %v348_v36 = vmul.f32 %v4826_v32, %v6290_v6  ;;  %v4798_v40 = vunpack.c.l.bf16 %v4838_v38  ;;  %v4799_v41 = vunpack.c.h.bf16 %v4838_v38 }
  0x25   : > { %v6409_v31 = vpack.c.bf16 %v347_v23, %v346_v22  ;;  %v349_v37 = vmul.f32 %v4827_v33, %v6290_v6  ;;  %v4830_v46 = vunpack.c.l.bf16 %v4846_v39  ;;  %v4831_v47 = vunpack.c.h.bf16 %v4846_v39 }
  0x26   : > { %v6423_v44 = vpack.c.bf16 %v333_v35, %v332_v34  ;;  %v334_v48 = vmul.f32 %v4798_v40, %v6290_v6  ;;  %v335_v49 = vmul.f32 %v4799_v41, %v6290_v6  ;;  %v9508_v61 = vlaneseq }
  0x27   : > { %v6425_v45 = vpack.c.bf16 %v349_v37, %v348_v36  ;;  %v350_v50 = vmul.f32 %v4830_v46, %v6290_v6  ;;  %v351_v51 = vmul.f32 %v4831_v47, %v6290_v6  ;;  %v4897_v6 = vld [vmem:[%s9505_s2 + $0x18] ss:$40 sps:$4 sm:$0xff]  }
  0x28   : > { %v6437_v52 = vpack.c.bf16 %v335_v49, %v334_v48  ;;  %v6572_v62 = vshrl.u32 %v9508_v61, 7 }
  0x29   : > { %v6439_v53 = vpack.c.bf16 %v351_v51, %v350_v50 }
  0x2a   : > { %4367 = vmatmul.mubr.msk.bf16.gmra.mrb[8].mxu0 %vm542_vm0, %v6359_v54  ;;  %9567 = vst [vmem:[#allocation2_spill] sm:$0xff] %v6572_v62  ;;  %v9509_v0 = vsub.s32 1, %v6572_v62 }
  0x2b   : > { %4375 = vmatmul.mubr.msk.bf16.gmra.mrb[8].mxu1 %vm542_vm0, %v6361_v55  ;;  %653 = vmatprep.mubr.bf16.mxu0 %v9511_v2 }
  0x2c   : > { %733 = vmatprep.mubr.bf16.mxu1 %v9511_v2  ;;  %v6591_v1 = vrot.slane %v388_v63, %v9509_v0 }
  0x32   : > { %4368 = vmatmul.mubr.msk.bf16.gmra.mrb[12].mxu0 %vm542_vm0, %v6375_v3 }
  0x33   : > { %4376 = vmatmul.mubr.msk.bf16.gmra.mrb[12].mxu1 %vm542_vm0, %v6377_v4  ;;  %663 = vmatprep.mubr.bf16.mxu0 %v9511_v2 }
  0x34   : > { %743 = vmatprep.mubr.bf16.mxu1 %v9511_v2 }
  0x3a   : > { %4369 = vmatmul.mubr.msk.bf16.gmra.mrb[16].mxu0 %vm542_vm0, %v6391_v16 }
  0x3b   : > { %4377 = vmatmul.mubr.msk.bf16.gmra.mrb[16].mxu1 %vm542_vm0, %v6393_v17  ;;  %673 = vmatprep.mubr.bf16.mxu0 %v9511_v2 }
  0x3c   : > { %753 = vmatprep.mubr.bf16.mxu1 %v9511_v2 }
  0x42   : > { %4370 = vmatmul.mubr.msk.bf16.gmra.mrb[20].mxu0 %vm542_vm0, %v6407_v30 }
  0x43   : > { %4378 = vmatmul.mubr.msk.bf16.gmra.mrb[20].mxu1 %vm542_vm0, %v6409_v31  ;;  %683 = vmatprep.mubr.bf16.mxu0 %v9511_v2 }
  0x44   : > { %763 = vmatprep.mubr.bf16.mxu1 %v9511_v2 }
  0x4a   : > { %4371 = vmatmul.mubr.msk.bf16.gmra.mrb[24].mxu0 %vm542_vm0, %v6423_v44 }
  0x4b   : > { %4379 = vmatmul.mubr.msk.bf16.gmra.mrb[24].mxu1 %vm542_vm0, %v6425_v45  ;;  %693 = vmatprep.mubr.bf16.mxu0 %v9511_v2 }
  0x4c   : > { %773 = vmatprep.mubr.bf16.mxu1 %v9511_v2 }
  0x52   : > { %4372 = vmatmul.mubr.msk.bf16.gmra.mrb[28].mxu0 %vm542_vm0, %v6437_v52 }
  0x53   : > { %4380 = vmatmul.mubr.msk.bf16.gmra.mrb[28].mxu1 %vm542_vm0, %v6439_v53  ;;  %1009 = vmatprep.mubr.bf16.mxu0 %v9511_v2 }
  0x54   : > { %816 = vmatprep.mubr.bf16.mxu1 %v9511_v2 }
  0x5a   : > { %4397 = vmatmul.mubr.msk.bf16.vlgmr.msra.gmra.mrb[32].mxu0 %vm542_vm0, %v6309_v26 }
  0x5b   : > { %4381 = vmatmul.mubr.msk.bf16.vlgmr.msra.gmra.mrb[32].mxu1 %vm542_vm0, %v6309_v26  ;;  %1364 = vmatpush1.bf16.msra.mxu0 %v4900_v56 }
  0x5c   : > { %1171 = vmatpush1.bf16.msra.mxu1 %v4897_v6  ;;  %826 = vmatprep.mubr.bf16.mxu1 %v9511_v2 }
  0x5d   : > { %1019 = vmatprep.mubr.bf16.mxu0 %v9511_v2  ;;  %1172 = vmatprep.subr.bf16.mxu1 %v4905_v57 }
  0x5e   : > { %1365 = vmatprep.subr.bf16.mxu0 %v4908_v58 }
  0x5f   : > { %1366 = vmatpush1.bf16.msra.mxu0 %v4906_v60 }
  0x60   : > { %1173 = vmatpush1.bf16.msra.mxu1 %v4903_v59 }
  0x62   : > { %4398 = vmatmul.mubr.msk.bf16.gmra.mrb[36].mxu0 %vm542_vm0, %v6343_v42 }
  0x63   : > { %4382 = vmatmul.mubr.msk.bf16.gmra.mrb[36].mxu1 %vm542_vm0, %v6343_v42  ;;  %1029 = vmatprep.mubr.bf16.mxu0 %v9511_v2 }
  0x64   : > { %836 = vmatprep.mubr.bf16.mxu1 %v9511_v2 }
  0x6a   : > { %4399 = vmatmul.mubr.msk.bf16.gmra.mrb[40].mxu0 %vm542_vm0, %v6359_v54 }
  0x6b   : > { %4383 = vmatmul.mubr.msk.bf16.gmra.mrb[40].mxu1 %vm542_vm0, %v6359_v54  ;;  %1039 = vmatprep.mubr.bf16.mxu0 %v9511_v2 }
  0x6c   : > { %846 = vmatprep.mubr.bf16.mxu1 %v9511_v2 }
  0x72   : > { %4400 = vmatmul.mubr.msk.bf16.gmra.mrb[44].mxu0 %vm542_vm0, %v6375_v3 }
  0x73   : > { %4384 = vmatmul.mubr.msk.bf16.gmra.mrb[44].mxu1 %vm542_vm0, %v6375_v3  ;;  %1049 = vmatprep.mubr.bf16.mxu0 %v9511_v2 }
  0x74   : > { %856 = vmatprep.mubr.bf16.mxu1 %v9511_v2 }
  0x7a   : > { %4401 = vmatmul.mubr.msk.bf16.gmra.mrb[48].mxu0 %vm542_vm0, %v6391_v16 }
  0x7b   : > { %4385 = vmatmul.mubr.msk.bf16.gmra.mrb[48].mxu1 %vm542_vm0, %v6391_v16  ;;  %1059 = vmatprep.mubr.bf16.mxu0 %v9511_v2 }
  0x7c   : > { %866 = vmatprep.mubr.bf16.mxu1 %v9511_v2 }
  0x82   : > { %4402 = vmatmul.mubr.msk.bf16.gmra.mrb[52].mxu0 %vm542_vm0, %v6407_v30 }
  0x83   : > { %4386 = vmatmul.mubr.msk.bf16.gmra.mrb[52].mxu1 %vm542_vm0, %v6407_v30  ;;  %1069 = vmatprep.mubr.bf16.mxu0 %v9511_v2 }
  0x84   : > { %876 = vmatprep.mubr.bf16.mxu1 %v9511_v2 }
  0x8a   : > { %4403 = vmatmul.mubr.msk.bf16.gmra.mrb[56].mxu0 %vm542_vm0, %v6423_v44 }
  0x8b   : > { %4387 = vmatmul.mubr.msk.bf16.gmra.mrb[56].mxu1 %vm542_vm0, %v6423_v44  ;;  %1079 = vmatprep.mubr.bf16.mxu0 %v9511_v2 }
  0x8c   : > { %886 = vmatprep.mubr.bf16.mxu1 %v9511_v2 }
  0x92   : > { %4404 = vmatmul.mubr.msk.bf16.gmra.mrb[60].mxu0 %vm542_vm0, %v6437_v52 }
  0x93   : > { %4388 = vmatmul.mubr.msk.bf16.gmra.mrb[60].mxu1 %vm542_vm0, %v6437_v52  ;;  %1089 = vmatprep.mubr.bf16.mxu0 %v9511_v2 }
  0x94   : > { %896 = vmatprep.mubr.bf16.mxu1 %v9511_v2 }
  0x9a   : > { %4405 = vmatmul.mubr.msk.bf16.gmra.mrb[64].mxu0 %vm542_vm0, %v6311_v27 }
  0x9b   : > { %4389 = vmatmul.mubr.msk.bf16.gmra.mrb[64].mxu1 %vm542_vm0, %v6311_v27  ;;  %1099 = vmatprep.mubr.bf16.mxu0 %v9511_v2 }
  0x9c   : > { %906 = vmatprep.mubr.bf16.mxu1 %v9511_v2 }
  0xa2   : > { %4406 = vmatmul.mubr.msk.bf16.gmra.mrb[68].mxu0 %vm542_vm0, %v6345_v43 }
  0xa3   : > { %4390 = vmatmul.mubr.msk.bf16.gmra.mrb[68].mxu1 %vm542_vm0, %v6345_v43  ;;  %1109 = vmatprep.mubr.bf16.mxu0 %v9511_v2 }
  0xa4   : > { %916 = vmatprep.mubr.bf16.mxu1 %v9511_v2 }
  0xaa   : > { %4407 = vmatmul.mubr.msk.bf16.gmra.mrb[72].mxu0 %vm542_vm0, %v6361_v55 }
  0xab   : > { %4391 = vmatmul.mubr.msk.bf16.gmra.mrb[72].mxu1 %vm542_vm0, %v6361_v55  ;;  %1119 = vmatprep.mubr.bf16.mxu0 %v9511_v2 }
  0xac   : > { %926 = vmatprep.mubr.bf16.mxu1 %v9511_v2 }
  0xb2   : > { %4408 = vmatmul.mubr.msk.bf16.gmra.mrb[76].mxu0 %vm542_vm0, %v6377_v4 }
  0xb3   : > { %4392 = vmatmul.mubr.msk.bf16.gmra.mrb[76].mxu1 %vm542_vm0, %v6377_v4  ;;  %1129 = vmatprep.mubr.bf16.mxu0 %v9511_v2 }
  0xb4   : > { %936 = vmatprep.mubr.bf16.mxu1 %v9511_v2 }
  0xba   : > { %4409 = vmatmul.mubr.msk.bf16.gmra.mrb[80].mxu0 %vm542_vm0, %v6393_v17 }
  0xbb   : > { %4393 = vmatmul.mubr.msk.bf16.gmra.mrb[80].mxu1 %vm542_vm0, %v6393_v17  ;;  %1139 = vmatprep.mubr.bf16.mxu0 %v9511_v2 }
  0xbc   : > { %946 = vmatprep.mubr.bf16.mxu1 %v9511_v2 }
  0xc2   : > { %4410 = vmatmul.mubr.msk.bf16.gmra.mrb[84].mxu0 %vm542_vm0, %v6409_v31 }
  0xc3   : > { %4394 = vmatmul.mubr.msk.bf16.gmra.mrb[84].mxu1 %vm542_vm0, %v6409_v31  ;;  %1149 = vmatprep.mubr.bf16.mxu0 %v9511_v2 }
  0xc4   : > { %956 = vmatprep.mubr.bf16.mxu1 %v9511_v2 }
  0xca   : > { %4411 = vmatmul.mubr.msk.bf16.gmra.mrb[88].mxu0 %vm542_vm0, %v6425_v45 }
  0xcb   : > { %4395 = vmatmul.mubr.msk.bf16.gmra.mrb[88].mxu1 %vm542_vm0, %v6425_v45  ;;  %1159 = vmatprep.mubr.bf16.mxu0 %v9511_v2 }
  0xcc   : > { %966 = vmatprep.mubr.bf16.mxu1 %v9511_v2 }
  0xd2   : > { %4412 = vmatmul.mubr.msk.bf16.gmra.mrb[92].mxu0 %vm542_vm0, %v6439_v53 }
  0xd3   : > { %4396 = vmatmul.mubr.msk.bf16.gmra.mrb[92].mxu1 %vm542_vm0, %v6439_v53  ;;  %1395 = vmatprep.mubr.bf16.mxu0 %v9511_v2 }
  0xd4   : > { %1202 = vmatprep.mubr.bf16.mxu1 %v9511_v2 }
  0xda   : > { %4429 = vmatmul.mubr.msk.bf16.vlgmr.msra.gmra.mrb[96].mxu0 %vm542_vm0, %v6309_v26 }
  0xdb   : > { %4413 = vmatmul.mubr.msk.bf16.vlgmr.msra.gmra.mrb[96].mxu1 %vm542_vm0, %v6309_v26  ;;  %1405 = vmatprep.mubr.bf16.mxu0 %v9511_v2  ;;  %v9510_v26 = vsub.s32 0, %v6572_v62 }
  0xdc   : > { %1212 = vmatprep.mubr.bf16.mxu1 %v9511_v2 }
  0xe2   : > { %4430 = vmatmul.mubr.msk.bf16.gmra.mrb[100].mxu0 %vm542_vm0, %v6343_v42 }
  0xe3   : > { %4414 = vmatmul.mubr.msk.bf16.gmra.mrb[100].mxu1 %vm542_vm0, %v6343_v42  ;;  %1415 = vmatprep.mubr.bf16.mxu0 %v9511_v2  ;;  %v6587_v42 = vrot.slane %v388_v63, %v9510_v26 }
  0xe4   : > { %1222 = vmatprep.mubr.bf16.mxu1 %v9511_v2 }
  0xea   : > { %4431 = vmatmul.mubr.msk.bf16.gmra.mrb[104].mxu0 %vm542_vm0, %v6359_v54 }
  0xeb   : > { %4415 = vmatmul.mubr.msk.bf16.gmra.mrb[104].mxu1 %vm542_vm0, %v6359_v54  ;;  %1425 = vmatprep.mubr.bf16.mxu0 %v9511_v2 }
  0xec   : > { %1232 = vmatprep.mubr.bf16.mxu1 %v9511_v2 }
  0xed   : > { %v625_v5 = vpop.f32.mrb[0].mxu0 }
  0xee   : > { %v705_v7 = vpop.f32.mrb[0].mxu1  ;;  %v6596_v8 = vadd.f32 %v625_v5, %v6587_v42  ;;  %v627_v54 = vpop.f32.mrb[1].mxu0 }
  0xef   : > { %v6599_v9 = vadd.f32 %v705_v7, %v6587_v42  ;;  %v707_v10 = vpop.f32.mrb[1].mxu1  ;;  %v6602_v11 = vadd.f32 %v627_v54, %v6591_v1  ;;  %v629_v13 = vpop.f32.mrb[2].mxu0 }
  0xf0   : > { %v6605_v12 = vadd.f32 %v707_v10, %v6591_v1  ;;  %v709_v14 = vpop.f32.mrb[2].mxu1  ;;  %v4445_v15 = vmul.f32 -1.442695, %v6596_v8  ;;  %v6610_v19 = vadd.f32 %v629_v13, %v6587_v42  ;;  %v631_v21 = vpop.f32.mrb[3].mxu0 }
  0xf1   : > { %9568 = vst [vmem:[#allocation3_spill] sm:$0xff] %v6599_v9  ;;  %v4605_v18 = vmul.f32 -1.442695, %v6599_v9  ;;  %v6613_v20 = vadd.f32 %v709_v14, %v6587_v42  ;;  %v711_v22 = vpop.f32.mrb[3].mxu1  ;;  %v4446_v23 = vmul.f32 -1.442695, %v6602_v11  ;;  %v6618_v25 = vadd.f32 %v631_v21, %v6591_v1 }
  0xf2   : > { %9569 = vst [vmem:[#allocation4_spill] sm:$0xff] %v6605_v12  ;;  %v4606_v24 = vmul.f32 -1.442695, %v6605_v12  ;;  %v6621_v28 = vadd.f32 %v711_v22, %v6591_v1  ;;  %4909 = vpow2.f32 %v4445_v15  ;;  %v4455_v29 = vmul.f32 -1.442695, %v6610_v19  ;;  %4432 = vmatmul.mubr.msk.bf16.gmra.mrb[108].mxu0 %vm542_vm0, %v6375_v3 }
  0xf3   : > { %9570 = vst [vmem:[#allocation5_spill] sm:$0xff] %v6613_v20  ;;  %4416 = vmatmul.mubr.msk.bf16.gmra.mrb[108].mxu1 %vm542_vm0, %v6375_v3  ;;  %4911 = vpow2.f32 %v4605_v18  ;;  %v4615_v32 = vmul.f32 -1.442695, %v6613_v20  ;;  %1435 = vmatprep.mubr.bf16.mxu0 %v9511_v2  ;;  %v4456_v33 = vmul.f32 -1.442695, %v6618_v25 }
  0xf4   : > { %9571 = vst [vmem:[#allocation6_spill] sm:$0xff] %v6621_v28  ;;  %1242 = vmatprep.mubr.bf16.mxu1 %v9511_v2  ;;  %4913 = vpow2.f32 %v4446_v23  ;;  %v4616_v34 = vmul.f32 -1.442695, %v6621_v28 }
  0xf5   : > { %4915 = vpow2.f32 %v4606_v24  ;;  %v635_v35 = vpop.f32.mrb[4].mxu0 }
  0xf6   : > { %v715_v36 = vpop.f32.mrb[4].mxu1  ;;  %4917 = vpow2.f32 %v4455_v29  ;;  %v6634_v37 = vadd.f32 %v635_v35, %v6587_v42  ;;  %v637_v38 = vpop.f32.mrb[5].mxu0 }
  0xf7   : > { %v6637_v3 = vadd.f32 %v715_v36, %v6587_v42  ;;  %v717_v39 = vpop.f32.mrb[5].mxu1  ;;  %4919 = vpow2.f32 %v4615_v32  ;;  %v6640_v40 = vadd.f32 %v637_v38, %v6591_v1  ;;  %v639_v46 = vpop.f32.mrb[6].mxu0 }
  0xf8   : > { %v6643_v41 = vadd.f32 %v717_v39, %v6591_v1  ;;  %v719_v47 = vpop.f32.mrb[6].mxu1  ;;  %4921 = vpow2.f32 %v4456_v33  ;;  %v4465_v48 = vmul.f32 -1.442695, %v6634_v37  ;;  %v6648_v50 = vadd.f32 %v639_v46, %v6587_v42  ;;  %v641_v51 = vpop.f32.mrb[7].mxu0 }
  0xf9   : > { %9572 = vst [vmem:[#allocation7_spill] sm:$0xff] %v6637_v3  ;;  %v4625_v49 = vmul.f32 -1.442695, %v6637_v3  ;;  %v721_v6 = vpop.f32.mrb[7].mxu1  ;;  %4923 = vpow2.f32 %v4616_v34  ;;  %v4466_v56 = vmul.f32 -1.442695, %v6640_v40  ;;  %v6670_v39 = vadd.f32 %v719_v47, %v6587_v42 }
  0xfa   : > { %9573 = vst [vmem:[#allocation8_spill] sm:$0xff] %v6643_v41  ;;  %v4626_v57 = vmul.f32 -1.442695, %v6643_v41  ;;  %4925 = vpow2.f32 %v4465_v48  ;;  %v4475_v58 = vmul.f32 -1.442695, %v6648_v50  ;;  %4433 = vmatmul.mubr.msk.bf16.gmra.mrb[112].mxu0 %vm542_vm0, %v6391_v16  ;;  %v6678_v47 = vadd.f32 %v721_v6, %v6591_v1 }
  0xfb   : > { %4417 = vmatmul.mubr.msk.bf16.gmra.mrb[112].mxu1 %vm542_vm0, %v6391_v16  ;;  %4927 = vpow2.f32 %v4625_v49  ;;  %1445 = vmatprep.mubr.bf16.mxu0 %v9511_v2  ;;  %9574 = vst [vmem:[#allocation9_spill] sm:$0xff] %v6670_v39 }
  0xfc   : > { %1252 = vmatprep.mubr.bf16.mxu1 %v9511_v2  ;;  %v4910_v59 = vpop.eup %4909  ;;  %4929 = vpow2.f32 %v4466_v56  ;;  %9575 = vst [vmem:[#allocation10_spill] sm:$0xff] %v6678_v47 }
  0xfd   : > { %v4912_v60 = vpop.eup %4911  ;;  %v2516_v63 = vadd.f32 1.0, %v4910_v59  ;;  %4931 = vpow2.f32 %v4626_v57  ;;  %v645_v5 = vpop.f32.mrb[8].mxu0  ;;  %v6675_v57 = vadd.f32 %v641_v51, %v6591_v1 }
  0xfe   : > { %v725_v7 = vpop.f32.mrb[8].mxu1  ;;  %v4914_v54 = vpop.eup %4913  ;;  %v2676_v10 = vadd.f32 1.0, %v4912_v60  ;;  %4933 = vpow2.f32 %v4475_v58 }
  0xff   : > { %v647_v13 = vpop.f32.mrb[9].mxu0  ;;  %v727_v14 = vpop.f32.mrb[9].mxu1  ;;  %4935 = vrcp.f32 %v2516_v63  ;;  %v2517_v16 = vadd.f32 1.0, %v4914_v54  ;;  %v6691_v6 = vadd.f32 %v725_v7, %v6587_v42  ;;  %v4636_v7 = vmul.f32 -1.442695, %v6678_v47 }
 0x100   : > { %v4916_v15 = vpop.eup %4915  ;;  %v649_v18 = vpop.f32.mrb[10].mxu0  ;;  %4937 = vrcp.f32 %v2676_v10 }
 0x101   : > { %v6659_v21 = vpop.f32.mrb[10].mxu1  ;;  %v4918_v22 = vpop.eup %4917  ;;  %v2677_v23 = vadd.f32 1.0, %v4916_v15  ;;  %4939 = vrcp.f32 %v2517_v16  ;;  %v4635_v15 = vmul.f32 -1.442695, %v6670_v39  ;;  %v6684_v16 = vadd.f32 %v645_v5, %v6587_v42  ;;  %9576 = vst [vmem:[#allocation11_spill] sm:$0xff] %v6691_v6 }
 0x102   : > { %v6661_v24 = vpop.f32.mrb[11].mxu0  ;;  %v4920_v29 = vpop.eup %4919  ;;  %v2526_v32 = vadd.f32 1.0, %v4918_v22  ;;  %4434 = vmatmul.mubr.msk.bf16.gmra.mrb[116].mxu0 %vm542_vm0, %v6407_v30 }
 0x103   : > { %v6663_v33 = vpop.f32.mrb[11].mxu1  ;;  %v4922_v34 = vpop.eup %4921  ;;  %4941 = vrcp.f32 %v2677_v23  ;;  %v2686_v35 = vadd.f32 1.0, %v4920_v29  ;;  %4418 = vmatmul.mubr.msk.bf16.gmra.mrb[116].mxu1 %vm542_vm0, %v6407_v30  ;;  %1455 = vmatprep.mubr.bf16.mxu0 %v9511_v2 }
 0x104   : > { %v4924_v36 = vpop.eup %4923  ;;  %4943 = vrcp.f32 %v2526_v32  ;;  %v2527_v38 = vadd.f32 1.0, %v4922_v34  ;;  %1262 = vmatprep.mubr.bf16.mxu1 %v9511_v2  ;;  %v6694_v32 = vadd.f32 %v647_v13, %v6591_v1  ;;  %v6710_v13 = vadd.f32 %v649_v18, %v6587_v42 }
 0x105   : > { %v4926_v46 = vpop.eup %4925  ;;  %4945 = vrcp.f32 %v2686_v35  ;;  %v2687_v48 = vadd.f32 1.0, %v4924_v36  ;;  %v655_v30 = vpop.f32.mrb[12].mxu0 }
 0x106   : > { %v4928_v49 = vpop.eup %4927  ;;  %4947 = vrcp.f32 %v2527_v38  ;;  %v2536_v56 = vadd.f32 1.0, %v4926_v46  ;;  %v735_v60 = vpop.f32.mrb[12].mxu1  ;;  %v4476_v38 = vmul.f32 -1.442695, %v6675_v57  ;;  %v6702_v46 = vadd.f32 %v727_v14, %v6591_v1 }
 0x107   : > { %v4930_v58 = vpop.eup %4929  ;;  %4949 = vrcp.f32 %v2687_v48  ;;  %v2696_v59 = vadd.f32 1.0, %v4928_v49  ;;  %v6680_v63 = vpop.f32.mrb[13].mxu0  ;;  %v4485_v14 = vmul.f32 -1.442695, %v6684_v16  ;;  %v4495_v0 = vmul.f32 -1.442695, %v6710_v13 }
 0x108   : > { %v4932_v54 = vpop.eup %4931  ;;  %4951 = vrcp.f32 %v2536_v56  ;;  %v2537_v10 = vadd.f32 1.0, %v4930_v58  ;;  %v6686_v51 = vpop.f32.mrb[13].mxu1  ;;  %9577 = vst [vmem:[#allocation12_spill] sm:$0xff] %v6702_v46  ;;  %v6719_v58 = vadd.f32 %v6659_v21, %v6587_v42  ;;  %v6734_v21 = vadd.f32 %v6663_v33, %v6591_v1 }
 0x109   : > { %v6688_v22 = vpop.f32.mrb[14].mxu0  ;;  %v4934_v23 = vpop.eup %4933  ;;  %4953 = vrcp.f32 %v2696_v59  ;;  %v2697_v29 = vadd.f32 1.0, %v4932_v54  ;;  %v4645_v59 = vmul.f32 -1.442695, %v6691_v6  ;;  %v4486_v54 = vmul.f32 -1.442695, %v6694_v32 }
 0x10a   : > { %v6696_v34 = vpop.f32.mrb[14].mxu1  ;;  %v6698_v35 = vpop.f32.mrb[15].mxu0  ;;  %4955 = vrcp.f32 %v2537_v10  ;;  %v2546_v5 = vadd.f32 1.0, %v4934_v23  ;;  %4435 = vmatmul.mubr.msk.bf16.gmra.mrb[120].mxu0 %vm542_vm0, %v6423_v44  ;;  %9579 = vst [vmem:[#allocation14_spill] sm:$0xff] %v6719_v58  ;;  %v4646_v10 = vmul.f32 -1.442695, %v6702_v46  ;;  %v6730_v23 = vadd.f32 %v6661_v24, %v6591_v1 }
 0x10b   : > { %v4936_v36 = vpop.eup %4935  ;;  %v6704_v48 = vpop.f32.mrb[15].mxu1  ;;  %4957 = vrcp.f32 %v2697_v29  ;;  %4419 = vmatmul.mubr.msk.bf16.gmra.mrb[120].mxu1 %vm542_vm0, %v6423_v44  ;;  %1465 = vmatprep.mubr.bf16.mxu0 %v9511_v2  ;;  %9581 = vst [vmem:[#allocation16_spill] sm:$0xff] %v6734_v21  ;;  %v4655_v33 = vmul.f32 -1.442695, %v6719_v58  ;;  %v6751_v46 = vadd.f32 %v655_v30, %v6587_v42  ;;  %v6754_v6 = vadd.f32 %v735_v60, %v6587_v42 }
 0x10c   : > { %v6706_v49 = vpop.eup %4937  ;;  %4959 = vrcp.f32 %v2546_v5  ;;  %1272 = vmatprep.mubr.bf16.mxu1 %v9511_v2  ;;  %v3476_v61 = vmul.f32 %v4936_v36, %v6596_v8  ;;  %v4496_v60 = vmul.f32 -1.442695, %v6730_v23 }
 0x10d   : > { %9578 = vst [vmem:[#allocation13_spill] sm:$0xff] %v6706_v49  ;;  %v4940_v56 = vpop.eup %4939  ;;  %4961 = vpow2.f32 %v4635_v15  ;;  %v6736_v29 = vpop.f32.mrb[16].mxu0  ;;  %9583 = vst [vmem:[#allocation18_spill] sm:$0xff] %v6754_v6 }
 0x10e   : > { %v6723_v18 = vpop.eup %4941  ;;  %4963 = vpow2.f32 %v4476_v38  ;;  %v6738_v5 = vpop.f32.mrb[16].mxu1 }
 0x10f   : > { %9580 = vst [vmem:[#allocation15_spill] sm:$0xff] %v6723_v18  ;;  %v4944_v44 = vpop.eup %4943  ;;  %4965 = vpow2.f32 %v4636_v7  ;;  %v6745_v26 = vpop.f32.mrb[17].mxu0  ;;  %v3477_v7 = vmul.f32 %v4940_v56, %v6602_v11  ;;  %v4656_v11 = vmul.f32 -1.442695, %v6734_v21 }
 0x110   : > { %v6740_v15 = vpop.eup %4945  ;;  %v3486_v38 = vmul.f32 %v4944_v44, %v6610_v19  ;;  %v6747_v24 = vpop.f32.mrb[17].mxu1  ;;  %4967 = vpow2.f32 %v4485_v14 }
 0x111   : > { %9582 = vst [vmem:[#allocation17_spill] sm:$0xff] %v6740_v15  ;;  %v4948_v2 = vpop.eup %4947  ;;  %v6756_v8 = vpop.f32.mrb[18].mxu0  ;;  %4969 = vpow2.f32 %v4645_v59  ;;  %v4665_v59 = vmul.f32 -1.442695, %v6754_v6 }
 0x112   : > { %v6758_v19 = vpop.f32.mrb[18].mxu1  ;;  %v6760_v36 = vpop.eup %4949  ;;  %v3798_v44 = vadd.f32 %v3486_v38, %v3476_v61  ;;  %v3487_v47 = vmul.f32 %v4948_v2, %v6618_v25  ;;  %4971 = vpow2.f32 %v4486_v54  ;;  %4436 = vmatmul.mubr.msk.bf16.gmra.mrb[124].mxu0 %vm542_vm0, %v6437_v52  ;;  %v4505_v61 = vmul.f32 -1.442695, %v6751_v46 }
 0x113   : > { %9584 = vst [vmem:[#allocation19_spill] sm:$0xff] %v6760_v36  ;;  %v6764_v14 = vpop.f32.mrb[19].mxu0  ;;  %v6766_v58 = vpop.f32.mrb[19].mxu1  ;;  %4973 = vpow2.f32 %v4646_v10  ;;  %4420 = vmatmul.mubr.msk.bf16.gmra.mrb[124].mxu1 %vm542_vm0, %v6437_v52  ;;  %v9586_v25 = vmov 0  }
 0x114   : > { %v4952_v30 = vpop.eup %4951  ;;  %v3835_v41 = vadd.f32 %v3487_v47, %v3477_v7  ;;  %4975 = vpow2.f32 %v4495_v0  ;;  %1282 = vmatprep.mubr.bf16.mxu1 %v9586_v25  ;;  %1475 = vmatprep.mubr.bf16.mxu0 %v9586_v25 }
 0x115   : > { %v6769_v39 = vpop.eup %4953  ;;  %v3496_v3 = vmul.f32 %v4952_v30, %v6634_v37  ;;  %4977 = vpow2.f32 %v4655_v33  ;;  %v6784_v10 = vpop.f32.mrb[20].mxu0 }
 0x116   : > { %9585 = vst [vmem:[#allocation20_spill] sm:$0xff] %v6769_v39  ;;  %v4956_v2 = vpop.eup %4955  ;;  %4979 = vpow2.f32 %v4496_v60  ;;  %v6786_v52 = vpop.f32.mrb[20].mxu1 }
 0x117   : > { %v6780_v47 = vpop.eup %4957  ;;  %v3799_v37 = vadd.f32 %v3798_v44, %v3496_v3  ;;  %v3497_v56 = vmul.f32 %v4956_v2, %v6640_v40  ;;  %4981 = vpow2.f32 %v4656_v11  ;;  %v6791_v30 = vpop.f32.mrb[21].mxu0 }
 0x118   : > { %9587 = vst [vmem:[#allocation21_spill] sm:$0xff] %v6780_v47  ;;  %v4960_v54 = vpop.eup %4959  ;;  %v6793_v3 = vpop.f32.mrb[21].mxu1  ;;  %4983 = vpow2.f32 %v4505_v61 }
 0x119   : > { %v4962_v0 = vpop.eup %4961  ;;  %v6788_v38 = vadd.f32 %v3835_v41, %v3497_v56  ;;  %v3506_v7 = vmul.f32 %v4960_v54, %v6648_v50  ;;  %v6795_v44 = vpop.f32.mrb[22].mxu0  ;;  %4985 = vpow2.f32 %v4665_v59 }
 0x11a   : > { %v4964_v40 = vpop.eup %4963  ;;  %v2706_v33 = vadd.f32 1.0, %v4962_v0  ;;  %v6797_v60 = vpop.f32.mrb[22].mxu1  ;;  %4437 = vmatmul.mubr.msk.bf16.gmra.mrb[128].mxu0 %vm542_vm0, %v6311_v27 }
 0x11b   : > { %v4966_v2 = vpop.eup %4965  ;;  %v6799_v6 = vadd.f32 %v3799_v37, %v3506_v7  ;;  %v2547_v21 = vadd.f32 1.0, %v4964_v40  ;;  %v6801_v41 = vpop.f32.mrb[23].mxu0  ;;  %4421 = vmatmul.mubr.msk.bf16.gmra.mrb[128].mxu1 %vm542_vm0, %v6311_v27  ;;  %1485 = vmatprep.mubr.bf16.mxu0 %v9586_v25 }
 0x11c   : > { %v6803_v50 = vpop.f32.mrb[23].mxu1  ;;  %v4968_v11 = vpop.eup %4967  ;;  %4987 = vrcp.f32 %v2706_v33  ;;  %v2707_v56 = vadd.f32 1.0, %v4966_v2  ;;  %1292 = vmatprep.mubr.bf16.mxu1 %v9586_v25  ;;  %v6813_v33 = vadd.f32 %v6680_v63, %v6591_v1 }
 0x11d   : > { %v4970_v54 = vpop.eup %4969  ;;  %4989 = vrcp.f32 %v2547_v21  ;;  %v2556_v0 = vadd.f32 1.0, %v4968_v11  ;;  %v6815_v2 = vpop.f32.mrb[24].mxu0 }
 0x11e   : > { %v4972_v61 = vpop.eup %4971  ;;  %4991 = vrcp.f32 %v2707_v56  ;;  %v2716_v37 = vadd.f32 1.0, %v4970_v54  ;;  %v6817_v56 = vpop.f32.mrb[24].mxu1 }
 0x11f   : > { %v4974_v59 = vpop.eup %4973  ;;  %4993 = vrcp.f32 %v2556_v0  ;;  %v2557_v7 = vadd.f32 1.0, %v4972_v61  ;;  %v6819_v54 = vpop.f32.mrb[25].mxu0  ;;  %v6823_v61 = vadd.f32 %v6686_v51, %v6591_v1  ;;  %v6838_v51 = vadd.f32 %v6696_v34, %v6587_v42 }
 0x120   : > { %v4976_v40 = vpop.eup %4975  ;;  %4995 = vrcp.f32 %v2716_v37  ;;  %v2717_v21 = vadd.f32 1.0, %v4974_v59  ;;  %v6825_v37 = vpop.f32.mrb[25].mxu1 }
 0x121   : > { %v4978_v27 = vpop.eup %4977  ;;  %4997 = vrcp.f32 %v2557_v7  ;;  %v2566_v11 = vadd.f32 1.0, %v4976_v40  ;;  %9588 = vst [vmem:[#allocation22_spill] sm:$0xff] %v6823_v61  ;;  %v6827_v63 = vpop.f32.mrb[26].mxu0  ;;  %v6831_v7 = vadd.f32 %v6688_v22, %v6587_v42  ;;  %9589 = vst [vmem:[#allocation23_spill] sm:$0xff] %v6838_v51  ;;  %v6844_v22 = vadd.f32 %v6698_v35, %v6591_v1 }
 0x122   : > { %v4980_v47 = vpop.eup %4979  ;;  %4999 = vrcp.f32 %v2717_v21  ;;  %v2726_v0 = vadd.f32 1.0, %v4978_v27  ;;  %v6833_v40 = vpop.f32.mrb[26].mxu1  ;;  %v4506_v27 = vmul.f32 -1.442695, %v6813_v33  ;;  %4438 = vmatmul.mubr.msk.bf16.gmra.mrb[132].mxu0 %vm542_vm0, %v6345_v43 }
 0x123   : > { %v4982_v59 = vpop.eup %4981  ;;  %5001 = vrcp.f32 %v2566_v11  ;;  %v2567_v39 = vadd.f32 1.0, %v4980_v47  ;;  %v6840_v28 = vpop.f32.mrb[27].mxu0  ;;  %v6848_v11 = vadd.f32 %v6704_v48, %v6591_v1  ;;  %4422 = vmatmul.mubr.msk.bf16.gmra.mrb[132].mxu1 %vm542_vm0, %v6345_v43  ;;  %1495 = vmatprep.mubr.bf16.mxu0 %v9586_v25  ;;  %v4515_v48 = vmul.f32 -1.442695, %v6831_v7 }
 0x124   : > { %v4984_v36 = vpop.eup %4983  ;;  %5003 = vrcp.f32 %v2726_v0  ;;  %v2727_v21 = vadd.f32 1.0, %v4982_v59  ;;  %v6850_v0 = vpop.f32.mrb[27].mxu1  ;;  %1302 = vmatprep.mubr.bf16.mxu1 %v9586_v25  ;;  %v6864_v59 = vadd.f32 %v6736_v29, %v6587_v42  ;;  %v6868_v43 = vadd.f32 %v6738_v5, %v6587_v42 }
 0x125   : > { %v4986_v15 = vpop.eup %4985  ;;  %5005 = vrcp.f32 %v2567_v39  ;;  %v2576_v47 = vadd.f32 1.0, %v4984_v36  ;;  %9590 = vst [vmem:[#allocation24_spill] sm:$0xff] %v6848_v11  ;;  %v4666_v36 = vmul.f32 -1.442695, %v6823_v61  ;;  %v4675_v61 = vmul.f32 -1.442695, %v6838_v51 }
 0x126   : > { %v6856_v34 = vpop.eup %4987  ;;  %5007 = vrcp.f32 %v2727_v21  ;;  %v2736_v39 = vadd.f32 1.0, %v4986_v15  ;;  %9592 = vst [vmem:[#allocation26_spill] sm:$0xff] %v6868_v43  ;;  %v4516_v29 = vmul.f32 -1.442695, %v6844_v22  ;;  %v4676_v18 = vmul.f32 -1.442695, %v6848_v11 }
 0x127   : > { %9591 = vst [vmem:[#allocation25_spill] sm:$0xff] %v6856_v34  ;;  %v4990_v35 = vpop.eup %4989  ;;  %5009 = vrcp.f32 %v2576_v47  ;;  %v6874_v34 = vpop.f32.mrb[28].mxu0  ;;  %v6882_v5 = vadd.f32 %v6745_v26, %v6591_v1  ;;  %v4525_v49 = vmul.f32 -1.442695, %v6864_v59  ;;  %v4685_v9 = vmul.f32 -1.442695, %v6868_v43 }
 0x128   : > { %v6870_v21 = vpop.eup %4991  ;;  %v3507_v15 = vmul.f32 %v4990_v35, %v6675_v57  ;;  %5011 = vrcp.f32 %v2736_v39  ;;  %v6876_v47 = vpop.f32.mrb[28].mxu1 }
 0x129   : > { %9593 = vst [vmem:[#allocation27_spill] sm:$0xff] %v6870_v21  ;;  %v4994_v20 = vpop.eup %4993  ;;  %5013 = vpow2.f32 %v4506_v27  ;;  %v6884_v21 = vpop.f32.mrb[29].mxu0  ;;  %v6894_v27 = vadd.f32 %v6747_v24, %v6591_v1 }
 0x12a   : > { %v6886_v57 = vpop.f32.mrb[29].mxu1  ;;  %v6888_v39 = vpop.eup %4995  ;;  %v3837_v35 = vadd.f32 %v6788_v38, %v3507_v15  ;;  %v3516_v51 = vmul.f32 %v4994_v20, %v6684_v16  ;;  %5015 = vpow2.f32 %v4666_v36  ;;  %v6904_v38 = vadd.f32 %v6756_v8, %v6587_v42  ;;  %4439 = vmatmul.mubr.msk.bf16.gmra.mrb[136].mxu0 %vm542_vm0, %v6361_v55 }
 0x12b   : > { %9594 = vst [vmem:[#allocation28_spill] sm:$0xff] %v6888_v39  ;;  %9595 = vst [vmem:[#allocation29_spill] sm:$0xff] %v6894_v27  ;;  %v6896_v11 = vpop.f32.mrb[30].mxu0  ;;  %v6898_v12 = vpop.f32.mrb[30].mxu1  ;;  %5017 = vpow2.f32 %v4515_v48  ;;  %v6916_v48 = vadd.f32 %v6758_v19, %v6587_v42  ;;  %v4526_v8 = vmul.f32 -1.442695, %v6882_v5  ;;  %v6921_v39 = vadd.f32 %v6764_v14, %v6591_v1  ;;  %4423 = vmatmul.mubr.msk.bf16.gmra.mrb[136].mxu1 %vm542_vm0, %v6361_v55 }
 0x12c   : > { %v4998_v26 = vpop.eup %4997  ;;  %v6906_v20 = vpop.f32.mrb[31].mxu0  ;;  %v3801_v36 = vadd.f32 %v6799_v6, %v3516_v51  ;;  %5019 = vpow2.f32 %v4675_v61  ;;  %v4686_v61 = vmul.f32 -1.442695, %v6894_v27  ;;  %1312 = vmatprep.mubr.bf16.mxu1 %v9586_v25  ;;  %1505 = vmatprep.mubr.bf16.mxu0 %v9586_v25  ;;  %v4535_v51 = vmul.f32 -1.442695, %v6904_v38 }
 0x12d   : > { %v6908_v16 = vpop.f32.mrb[31].mxu1  ;;  %v6910_v24 = vpop.eup %4999  ;;  %v3517_v15 = vmul.f32 %v4998_v26, %v6694_v32  ;;  %9596 = vst [vmem:[#allocation30_spill] sm:$0xff] %v6916_v48  ;;  %5021 = vpow2.f32 %v4516_v29 }
 0x12e   : > { %v5002_v43 = vpop.eup %5001  ;;  %5023 = vpow2.f32 %v4676_v18  ;;  %v6940_v18 = vpop.f32.mrb[32].mxu0 }
 0x12f   : > { %v6927_v6 = vpop.eup %5003  ;;  %v3838_v32 = vadd.f32 %v3837_v35, %v3517_v15  ;;  %v3526_v19 = vmul.f32 %v5002_v43, %v6710_v13  ;;  %5025 = vpow2.f32 %v4525_v49  ;;  %v4695_v35 = vmul.f32 -1.442695, %v6916_v48  ;;  %v6938_v13 = vpop.f32.mrb[32].mxu1 }
 0x130   : > { %9597 = vst [vmem:[#allocation31_spill] sm:$0xff] %v6927_v6  ;;  %v5006_v14 = vpop.eup %5005  ;;  %5027 = vpow2.f32 %v4685_v9  ;;  %v4536_v15 = vmul.f32 -1.442695, %v6921_v39  ;;  %v6943_v27 = vpop.f32.mrb[33].mxu1 }
 0x131   : > { %v6934_v29 = vpop.eup %5007  ;;  %v3802_v26 = vadd.f32 %v3801_v36, %v3526_v19  ;;  %v3527_v55 = vmul.f32 %v5006_v14, %v6730_v23  ;;  %5029 = vpow2.f32 %v4526_v8  ;;  %9599 = vst [vmem:[#allocation33_spill] sm:$0xff] %v6943_v27  ;;  %v6945_v49 = vpop.f32.mrb[33].mxu0 }
 0x132   : > { %9598 = vst [vmem:[#allocation32_spill] sm:$0xff] %v6934_v29  ;;  %v5010_v43 = vpop.eup %5009  ;;  %9600 = vst [vmem:[#allocation34_spill] sm:$0xff] %v6945_v49  ;;  %5031 = vpow2.f32 %v4686_v61  ;;  %v6952_v23 = vpop.f32.mrb[34].mxu1  ;;  %4440 = vmatmul.mubr.msk.bf16.gmra.mrb[140].mxu0 %vm542_vm0, %v6377_v4 }
 0x133   : > { %v6947_v6 = vpop.eup %5011  ;;  %v6949_v36 = vadd.f32 %v3838_v32, %v3527_v55  ;;  %v3536_v9 = vmul.f32 %v5010_v43, %v6751_v46  ;;  %v6954_v19 = vpop.f32.mrb[34].mxu0  ;;  %5033 = vpow2.f32 %v4535_v51  ;;  %4424 = vmatmul.mubr.msk.bf16.gmra.mrb[140].mxu1 %vm542_vm0, %v6377_v4  ;;  %1515 = vmatprep.mubr.bf16.mxu0 %v9586_v25 }
 0x134   : > { %v5014_v14 = vpop.eup %5013  ;;  %v6956_v8 = vpop.f32.mrb[35].mxu1  ;;  %5035 = vpow2.f32 %v4695_v35  ;;  %1322 = vmatprep.mubr.bf16.mxu1 %v9586_v25 }
 0x135   : > { %v6958_v48 = vpop.f32.mrb[35].mxu0  ;;  %v5016_v27 = vpop.eup %5015  ;;  %v6960_v29 = vadd.f32 %v3802_v26, %v3536_v9  ;;  %v2577_v49 = vadd.f32 1.0, %v5014_v14  ;;  %5037 = vpow2.f32 %v4536_v15 }
 0x136   : > { %9601 = vst [vmem:[#allocation35_spill] sm:$0xff] %v6958_v48  ;;  %v5018_v32 = vpop.eup %5017  ;;  %v2737_v55 = vadd.f32 1.0, %v5016_v27  ;;  %v6968_v43 = vpop.f32.mrb[36].mxu1 }
 0x137   : > { %v5020_v46 = vpop.eup %5019  ;;  %5039 = vrcp.f32 %v2577_v49  ;;  %v2586_v61 = vadd.f32 1.0, %v5018_v32  ;;  %v6970_v15 = vpop.f32.mrb[36].mxu0 }
 0x138   : > { %v5022_v51 = vpop.eup %5021  ;;  %5041 = vrcp.f32 %v2737_v55  ;;  %v2746_v26 = vadd.f32 1.0, %v5020_v46  ;;  %9602 = vst [vmem:[#allocation36_spill] sm:$0xff] %v6970_v15  ;;  %v6972_v14 = vpop.f32.mrb[37].mxu1  ;;  %v6978_v55 = vadd.f32 %v6766_v58, %v6591_v1 }
 0x139   : > { %v5024_v35 = vpop.eup %5023  ;;  %5043 = vrcp.f32 %v2586_v61  ;;  %v2587_v27 = vadd.f32 1.0, %v5022_v51  ;;  %9603 = vst [vmem:[#allocation37_spill] sm:$0xff] %v6972_v14  ;;  %v6974_v49 = vpop.f32.mrb[37].mxu0 }
 0x13a   : > { %v5026_v9 = vpop.eup %5025  ;;  %5045 = vrcp.f32 %v2746_v26  ;;  %v2747_v4 = vadd.f32 1.0, %v5024_v35  ;;  %9604 = vst [vmem:[#allocation38_spill] sm:$0xff] %v6974_v49  ;;  %9605 = vst [vmem:[#allocation39_spill] sm:$0xff] %v6978_v55  ;;  %v6980_v46 = vpop.f32.mrb[38].mxu1  ;;  %v6986_v26 = vadd.f32 %v6784_v10, %v6587_v42  ;;  %4441 = vmatmul.mubr.msk.bf16.gmra.mrb[144].mxu0 %vm542_vm0, %v6393_v17 }
 0x13b   : > { %v5028_v32 = vpop.eup %5027  ;;  %5047 = vrcp.f32 %v2587_v27  ;;  %v2596_v48 = vadd.f32 1.0, %v5026_v9  ;;  %v6982_v61 = vpop.f32.mrb[38].mxu0  ;;  %4425 = vmatmul.mubr.msk.bf16.gmra.mrb[144].mxu1 %vm542_vm0, %v6393_v17  ;;  %1525 = vmatprep.mubr.bf16.mxu0 %v9586_v25  ;;  %v7010_v17 = vadd.f32 %v6793_v3, %v6591_v1 }
 0x13c   : > { %9606 = vst [vmem:[#allocation40_spill] sm:$0xff] %v6982_v61  ;;  %v5030_v51 = vpop.eup %5029  ;;  %5049 = vrcp.f32 %v2747_v4  ;;  %v2756_v15 = vadd.f32 1.0, %v5028_v32  ;;  %v6988_v35 = vpop.f32.mrb[39].mxu1  ;;  %v6994_v61 = vadd.f32 %v6786_v52, %v6587_v42  ;;  %v7003_v32 = vadd.f32 %v6791_v30, %v6591_v1  ;;  %1332 = vmatprep.mubr.bf16.mxu1 %v9586_v25 }
 0x13d   : > { %9607 = vst [vmem:[#allocation41_spill] sm:$0xff] %v6988_v35  ;;  %v5032_v49 = vpop.eup %5031  ;;  %5051 = vrcp.f32 %v2596_v48  ;;  %v2597_v27 = vadd.f32 1.0, %v5030_v51  ;;  %v6990_v9 = vpop.f32.mrb[39].mxu0  ;;  %v4696_v48 = vmul.f32 -1.442695, %v6978_v55  ;;  %9610 = vst [vmem:[#allocation44_spill] sm:$0xff] %v7010_v17  ;;  %v7014_v30 = vadd.f32 %v6795_v44, %v6587_v42 }
 0x13e   : > { %9608 = vst [vmem:[#allocation42_spill] sm:$0xff] %v6990_v9  ;;  %v5034_v58 = vpop.eup %5033  ;;  %5053 = vrcp.f32 %v2756_v15  ;;  %v2757_v14 = vadd.f32 1.0, %v5032_v49  ;;  %9609 = vst [vmem:[#allocation43_spill] sm:$0xff] %v6994_v61  ;;  %v4545_v49 = vmul.f32 -1.442695, %v6986_v26  ;;  %v7020_v55 = vpop.f32.mrb[40].mxu1 }
 0x13f   : > { %v5036_v10 = vpop.eup %5035  ;;  %5055 = vrcp.f32 %v2597_v27  ;;  %v2606_v4 = vadd.f32 1.0, %v5034_v58  ;;  %v7018_v58 = vadd.f32 %v6797_v60, %v6587_v42  ;;  %9612 = vst [vmem:[#allocation46_spill] sm:$0xff] %v7020_v55  ;;  %v4705_v3 = vmul.f32 -1.442695, %v6994_v61  ;;  %v7026_v9 = vpop.f32.mrb[40].mxu0 }
 0x140   : > { %v5038_v52 = vpop.eup %5037  ;;  %5057 = vrcp.f32 %v2757_v14  ;;  %v2766_v15 = vadd.f32 1.0, %v5036_v10  ;;  %9613 = vst [vmem:[#allocation47_spill] sm:$0xff] %v7026_v9  ;;  %v4546_v44 = vmul.f32 -1.442695, %v7003_v32  ;;  %v7033_v60 = vadd.f32 %v6801_v41, %v6591_v1 }
 0x141   : > { %v5040_v51 = vpop.eup %5039  ;;  %5059 = vrcp.f32 %v2606_v4  ;;  %v2607_v27 = vadd.f32 1.0, %v5038_v52  ;;  %9611 = vst [vmem:[#allocation45_spill] sm:$0xff] %v7018_v58  ;;  %v7028_v4 = vpop.f32.mrb[41].mxu1  ;;  %v7037_v55 = vadd.f32 %v6803_v50, %v6591_v1  ;;  %v4555_v50 = vmul.f32 -1.442695, %v7014_v30 }
 0x142   : > { %v7022_v14 = vpop.eup %5041  ;;  %v3537_v10 = vmul.f32 %v5040_v51, %v6813_v33  ;;  %5061 = vrcp.f32 %v2766_v15  ;;  %9614 = vst [vmem:[#allocation48_spill] sm:$0xff] %v7028_v4  ;;  %v7039_v33 = vpop.f32.mrb[41].mxu0  ;;  %v4706_v4 = vmul.f32 -1.442695, %v7010_v17  ;;  %4442 = vmatmul.mubr.msk.bf16.gmra.mrb[148].mxu0 %vm542_vm0, %v6409_v31 }
 0x143   : > { %v5044_v52 = vpop.eup %5043  ;;  %5063 = vrcp.f32 %v2607_v27  ;;  %9615 = vst [vmem:[#allocation49_spill] sm:$0xff] %v7037_v55  ;;  %9616 = vst [vmem:[#allocation50_spill] sm:$0xff] %v7039_v33  ;;  %v7041_v15 = vpop.f32.mrb[42].mxu1  ;;  %v4715_v33 = vmul.f32 -1.442695, %v7018_v58  ;;  %4426 = vmatmul.mubr.msk.bf16.gmra.mrb[148].mxu1 %vm542_vm0, %v6409_v31  ;;  %1535 = vmatprep.mubr.bf16.mxu0 %v9586_v25  ;;  %v7085_v31 = vadd.f32 %v6825_v37, %v6591_v1 }
 0x144   : > { %9617 = vst [vmem:[#allocation51_spill] sm:$0xff] %v7041_v15  ;;  %v7043_v51 = vpop.eup %5045  ;;  %v3840_v61 = vadd.f32 %v6949_v36, %v3537_v10  ;;  %v3546_v27 = vmul.f32 %v5044_v52, %v6831_v7  ;;  %5065 = vpow2.f32 %v4696_v48  ;;  %v7048_v9 = vpop.f32.mrb[42].mxu0  ;;  %v7056_v15 = vadd.f32 %v6815_v2, %v6587_v42  ;;  %1342 = vmatprep.mubr.bf16.mxu1 %v9586_v25 }
 0x145   : > { %v7050_v41 = vpop.f32.mrb[43].mxu1  ;;  %v5048_v35 = vpop.eup %5047  ;;  %5067 = vpow2.f32 %v4545_v49  ;;  %v7066_v49 = vadd.f32 %v6817_v56, %v6587_v42  ;;  %v4556_v52 = vmul.f32 -1.442695, %v7033_v60  ;;  %v4716_v58 = vmul.f32 -1.442695, %v7037_v55  ;;  %9618 = vst [vmem:[#allocation52_spill] sm:$0xff] %v7085_v31 }
 0x146   : > { %v7058_v36 = vpop.f32.mrb[43].mxu0  ;;  %v7060_v7 = vpop.eup %5049  ;;  %v3804_v48 = vadd.f32 %v6960_v29, %v3546_v27  ;;  %v3547_v10 = vmul.f32 %v5048_v35, %v6844_v22  ;;  %5069 = vpow2.f32 %v4705_v3  ;;  %v7076_v22 = vadd.f32 %v6819_v54, %v6591_v1 }
 0x147   : > { %v5052_v2 = vpop.eup %5051  ;;  %5071 = vpow2.f32 %v4546_v44  ;;  %v4565_v44 = vmul.f32 -1.442695, %v7056_v15  ;;  %v7088_v54 = vpop.f32.mrb[44].mxu1 }
 0x148   : > { %v7080_v56 = vpop.eup %5053  ;;  %v3841_v29 = vadd.f32 %v3840_v61, %v3547_v10  ;;  %v3556_v35 = vmul.f32 %v5052_v2, %v6864_v59  ;;  %5073 = vpow2.f32 %v4706_v4  ;;  %9619 = vst [vmem:[#allocation53_spill] sm:$0xff] %v7088_v54  ;;  %v7090_v27 = vpop.f32.mrb[44].mxu0  ;;  %v4725_v59 = vmul.f32 -1.442695, %v7066_v49 }
 0x149   : > { %v5056_v3 = vpop.eup %5055  ;;  %5075 = vpow2.f32 %v4555_v50  ;;  %9620 = vst [vmem:[#allocation54_spill] sm:$0xff] %v7090_v27  ;;  %v7096_v4 = vpop.f32.mrb[45].mxu1  ;;  %v4566_v50 = vmul.f32 -1.442695, %v7076_v22 }
 0x14a   : > { %v7092_v55 = vpop.eup %5057  ;;  %v3805_v17 = vadd.f32 %v3804_v48, %v3556_v35  ;;  %v3557_v61 = vmul.f32 %v5056_v3, %v6882_v5  ;;  %5077 = vpow2.f32 %v4715_v33  ;;  %9621 = vst [vmem:[#allocation55_spill] sm:$0xff] %v7096_v4  ;;  %v7098_v37 = vpop.f32.mrb[45].mxu0  ;;  %v4726_v33 = vmul.f32 -1.442695, %v7085_v31  ;;  %4443 = vmatmul.mubr.msk.bf16.gmra.mrb[152].mxu0 %vm542_vm0, %v6425_v45 }
 0x14b   : > { %9622 = vst [vmem:[#allocation56_spill] sm:$0xff] %v7098_v37  ;;  %v5060_v10 = vpop.eup %5059  ;;  %5079 = vpow2.f32 %v4556_v52  ;;  %v7101_v2 = vpop.f32.mrb[46].mxu1  ;;  %4427 = vmatmul.mubr.msk.bf16.gmra.mrb[152].mxu1 %vm542_vm0, %v6425_v45  ;;  %1545 = vmatprep.mubr.bf16.mxu0 %v9586_v25 }
 0x14c   : > { %9623 = vst [vmem:[#allocation57_spill] sm:$0xff] %v7101_v2  ;;  %v7103_v54 = vpop.f32.mrb[46].mxu0  ;;  %v7105_v27 = vpop.eup %5061  ;;  %v3842_v48 = vadd.f32 %v3841_v29, %v3557_v61  ;;  %v3566_v5 = vmul.f32 %v5060_v10, %v6904_v38  ;;  %5081 = vpow2.f32 %v4716_v58  ;;  %1352 = vmatprep.mubr.bf16.mxu1 %v9586_v25 }
 0x14d   : > { %9624 = vst [vmem:[#allocation58_spill] sm:$0xff] %v7103_v54  ;;  %v7109_v35 = vpop.f32.mrb[47].mxu1  ;;  %v7111_v3 = vpop.f32.mrb[47].mxu0  ;;  %5083 = vpow2.f32 %v4565_v44 }
 0x14e   : > { %9625 = vst [vmem:[#allocation59_spill] sm:$0xff] %v7109_v35  ;;  %9626 = vst [vmem:[#allocation60_spill] sm:$0xff] %v7111_v3  ;;  %v5064_v37 = vpop.eup %5063  ;;  %v7113_v4 = vadd.f32 %v3805_v17, %v3566_v5  ;;  %5085 = vpow2.f32 %v4725_v59  ;;  %v7124_v59 = vpop.f32.mrb[48].mxu1 }
 0x14f   : > { %v5066_v52 = vpop.eup %5065  ;;  %v3567_v2 = vmul.f32 %v5064_v37, %v6921_v39  ;;  %5087 = vpow2.f32 %v4566_v50  ;;  %9627 = vst [vmem:[#allocation61_spill] sm:$0xff] %v7124_v59  ;;  %v7126_v10 = vpop.f32.mrb[48].mxu0 }
 0x150   : > { %v5068_v38 = vpop.eup %5067  ;;  %v2767_v58 = vadd.f32 1.0, %v5066_v52  ;;  %5089 = vpow2.f32 %v4726_v33  ;;  %9628 = vst [vmem:[#allocation62_spill] sm:$0xff] %v7126_v10  ;;  %v7128_v50 = vpop.f32.mrb[49].mxu1 }
 0x151   : > { %v5070_v29 = vpop.eup %5069  ;;  %v7122_v44 = vadd.f32 %v3842_v48, %v3567_v2  ;;  %v2616_v17 = vadd.f32 1.0, %v5068_v38  ;;  %9629 = vst [vmem:[#allocation63_spill] sm:$0xff] %v7128_v50  ;;  %v7130_v52 = vpop.f32.mrb[49].mxu0 }
 0x152   : > { %v5072_v39 = vpop.eup %5071  ;;  %5091 = vrcp.f32 %v2767_v58  ;;  %v2776_v61 = vadd.f32 1.0, %v5070_v29  ;;  %9630 = vst [vmem:[#allocation64_spill] sm:$0xff] %v7130_v52  ;;  %v7132_v2 = vpop.f32.mrb[50].mxu1  ;;  %4444 = vmatmul.mubr.msk.bf16.gmra.mrb[156].mxu0 %vm542_vm0, %v6439_v53 }
 0x153   : > { %v5074_v37 = vpop.eup %5073  ;;  %5093 = vrcp.f32 %v2616_v17  ;;  %v2617_v45 = vadd.f32 1.0, %v5072_v39  ;;  %9631 = vst [vmem:[#allocation65_spill] sm:$0xff] %v7132_v2  ;;  %v7134_v38 = vpop.f32.mrb[50].mxu0  ;;  %v7140_v39 = vadd.f32 %v6827_v63, %v6587_v42  ;;  %4428 = vmatmul.mubr.msk.bf16.gmra.mrb[156].mxu1 %vm542_vm0, %v6439_v53  ;;  %v402_v63 = vsub.s32 2, %v6572_v62 }
 0x154   : > { %v5076_v5 = vpop.eup %5075  ;;  %5095 = vrcp.f32 %v2776_v61  ;;  %v2777_v25 = vadd.f32 1.0, %v5074_v37  ;;  %9632 = vst [vmem:[#allocation66_spill] sm:$0xff] %v7134_v38  ;;  %v7136_v58 = vpop.f32.mrb[51].mxu1 }
 0x155   : > { %v5078_v48 = vpop.eup %5077  ;;  %5097 = vrcp.f32 %v2617_v45  ;;  %v2626_v33 = vadd.f32 1.0, %v5076_v5  ;;  %9633 = vst [vmem:[#allocation67_spill] sm:$0xff] %v7136_v58  ;;  %v7142_v61 = vpop.f32.mrb[51].mxu0 }
 0x156   : > { %v5080_v29 = vpop.eup %5079  ;;  %5099 = vrcp.f32 %v2777_v25  ;;  %v2786_v17 = vadd.f32 1.0, %v5078_v48  ;;  %9634 = vst [vmem:[#allocation68_spill] sm:$0xff] %v7142_v61  ;;  %v7150_v25 = vadd.f32 %v6833_v40, %v6587_v42  ;;  %v7161_v40 = vadd.f32 %v6850_v0, %v6591_v1 }
 0x157   : > { %v5082_v37 = vpop.eup %5081  ;;  %5101 = vrcp.f32 %v2626_v33  ;;  %v2627_v52 = vadd.f32 1.0, %v5080_v29  ;;  %v7155_v33 = vadd.f32 %v6840_v28, %v6591_v1  ;;  %v7167_v28 = vadd.f32 %v6874_v34, %v6587_v42 }
 0x158   : > { %v5084_v45 = vpop.eup %5083  ;;  %5103 = vrcp.f32 %v2786_v17  ;;  %v2787_v5 = vadd.f32 1.0, %v5082_v37  ;;  %9635 = vst [vmem:[#allocation69_spill] sm:$0xff] %v7150_v25  ;;  %v4575_v17 = vmul.f32 -1.442695, %v7140_v39  ;;  %9636 = vst [vmem:[#allocation70_spill] sm:$0xff] %v7161_v40  ;;  %v7163_v37 = vpop.f32.mrb[52].mxu1 }
 0x159   : > { %v5086_v48 = vpop.eup %5085  ;;  %5105 = vrcp.f32 %v2627_v52  ;;  %v2636_v61 = vadd.f32 1.0, %v5084_v45  ;;  %9637 = vst [vmem:[#allocation71_spill] sm:$0xff] %v7163_v37  ;;  %v7171_v45 = vadd.f32 %v6876_v47, %v6587_v42  ;;  %v4735_v37 = vmul.f32 -1.442695, %v7150_v25  ;;  %v9691_v25 = vld [vmem:[#allocation32_spill] sm:$0xff] }
 0x15a   : > { %v5088_v58 = vpop.eup %5087  ;;  %5107 = vrcp.f32 %v2787_v5  ;;  %v2796_v53 = vadd.f32 1.0, %v5086_v48  ;;  %v7173_v5 = vpop.f32.mrb[52].mxu0 }
 0x15b   : > { %v5090_v38 = vpop.eup %5089  ;;  %5109 = vrcp.f32 %v2636_v61  ;;  %v2637_v52 = vadd.f32 1.0, %v5088_v58  ;;  %9638 = vst [vmem:[#allocation72_spill] sm:$0xff] %v7171_v45  ;;  %9639 = vst [vmem:[#allocation73_spill] sm:$0xff] %v7173_v5  ;;  %v7175_v48 = vpop.f32.mrb[53].mxu1  ;;  %v7183_v58 = vld [vmem:[%s9506_s3] sm:$0xff] }
 0x15c   : > { %9640 = vst [vmem:[#allocation74_spill] sm:$0xff] %v7175_v48  ;;  %v7177_v29 = vpop.eup %5091  ;;  %5111 = vrcp.f32 %v2796_v53  ;;  %v2797_v0 = vadd.f32 1.0, %v5090_v38  ;;  %v7186_v34 = vrot.slane %v7183_v58, %v402_v63  ;;  %v7188_v47 = vpop.f32.mrb[53].mxu0  ;;  %v4576_v48 = vmul.f32 -1.442695, %v7155_v33 }
 0x15d   : > { %9641 = vst [vmem:[#allocation75_spill] sm:$0xff] %v7188_v47  ;;  %v7190_v61 = vpop.f32.mrb[54].mxu1  ;;  %v5094_v5 = vpop.eup %5093  ;;  %5113 = vrcp.f32 %v2637_v52  ;;  %v7195_v38 = vadd.f32 %v6884_v21, %v6591_v1  ;;  %v7199_v53 = vadd.f32 %v6886_v57, %v6591_v1  ;;  %v4736_v52 = vmul.f32 -1.442695, %v7161_v40 }
 0x15e   : > { %9642 = vst [vmem:[#allocation76_spill] sm:$0xff] %v7190_v61  ;;  %v7201_v2 = vpop.f32.mrb[54].mxu0  ;;  %v7203_v63 = vpop.f32.mrb[55].mxu1  ;;  %v3576_v61 = vmul.f32 %v5094_v5, %v6986_v26  ;;  %5115 = vrcp.f32 %v2797_v0  ;;  %v406_v47 = vsub.s32 3, %v6572_v62  ;;  %v4585_v57 = vmul.f32 -1.442695, %v7167_v28 }
 0x15f   : > { %9643 = vst [vmem:[#allocation77_spill] sm:$0xff] %v7199_v53  ;;  %9644 = vst [vmem:[#allocation78_spill] sm:$0xff] %v7201_v2  ;;  %v7205_v50 = vpop.eup %5095  ;;  %v7210_v10 = vpop.f32.mrb[55].mxu0  ;;  %5117 = vpow2.f32 %v4575_v17  ;;  %v4745_v59 = vmul.f32 -1.442695, %v7171_v45  ;;  %v7224_v0 = vadd.f32 %v6898_v12, %v6587_v42 }
 0x160   : > { %9645 = vst [vmem:[#allocation79_spill] sm:$0xff] %v7203_v63  ;;  %9646 = vst [vmem:[#allocation80_spill] sm:$0xff] %v7210_v10  ;;  %v5098_v21 = vpop.eup %5097  ;;  %v7216_v63 = vadd.f32 %v6896_v11, %v6587_v42  ;;  %v3807_v26 = vadd.f32 %v7113_v4, %v3576_v61  ;;  %5119 = vpow2.f32 %v4735_v37  ;;  %v4586_v10 = vmul.f32 -1.442695, %v7195_v38  ;;  %v7240_v12 = vpop.f32.mrb[56].mxu1 }
 0x161   : > { %v7218_v2 = vpop.eup %5099  ;;  %v3577_v5 = vmul.f32 %v5098_v21, %v7003_v32  ;;  %9647 = vst [vmem:[#allocation81_spill] sm:$0xff] %v7224_v0  ;;  %5121 = vpow2.f32 %v4576_v48  ;;  %v4746_v3 = vmul.f32 -1.442695, %v7199_v53  ;;  %v7230_v11 = vadd.f32 %v6906_v20, %v6591_v1  ;;  %9649 = vst [vmem:[#allocation83_spill] sm:$0xff] %v7240_v12  ;;  %v7242_v37 = vpop.f32.mrb[56].mxu0 }
 0x162   : > { %v5102_v17 = vpop.eup %5101  ;;  %5123 = vpow2.f32 %v4736_v52  ;;  %v7238_v42 = vadd.f32 %v6908_v16, %v6591_v1  ;;  %9650 = vst [vmem:[#allocation84_spill] sm:$0xff] %v7242_v37  ;;  %v4595_v20 = vmul.f32 -1.442695, %v7216_v63  ;;  %v7247_v61 = vadd.f32 %v6938_v13, %v7186_v34  ;;  %v7252_v52 = vpop.f32.mrb[57].mxu0 }
 0x163   : > { %v7232_v35 = vpop.eup %5103  ;;  %v3844_v4 = vadd.f32 %v7122_v44, %v3577_v5  ;;  %v3586_v32 = vmul.f32 %v5102_v17, %v7014_v30  ;;  %5125 = vpow2.f32 %v4585_v57  ;;  %v414_v44 = vsub.s32 5, %v6572_v62  ;;  %v7250_v30 = vpop.f32.mrb[57].mxu1  ;;  %9653 = vst [vmem:[#allocation87_spill] sm:$0xff] %v7252_v52 }
 0x164   : > { %9648 = vst [vmem:[#allocation82_spill] sm:$0xff] %v7238_v42  ;;  %v5106_v48 = vpop.eup %5105  ;;  %9651 = vst [vmem:[#allocation85_spill] sm:$0xff] %v7247_v61  ;;  %5127 = vpow2.f32 %v4745_v59  ;;  %v4755_v57 = vmul.f32 -1.442695, %v7224_v0  ;;  %v7258_v5 = vpop.f32.mrb[58].mxu1 }
 0x165   : > { %9652 = vst [vmem:[#allocation86_spill] sm:$0xff] %v7250_v30  ;;  %v7254_v1 = vpop.eup %5107  ;;  %v3808_v16 = vadd.f32 %v3807_v26, %v3586_v32  ;;  %v3587_v21 = vmul.f32 %v5106_v48, %v7033_v60  ;;  %9654 = vst [vmem:[#allocation88_spill] sm:$0xff] %v7258_v5  ;;  %v7260_v17 = vpop.f32.mrb[58].mxu0  ;;  %5129 = vpow2.f32 %v4586_v10  ;;  %v4596_v37 = vmul.f32 -1.442695, %v7230_v11  ;;  %v9664_v5 = vld [vmem:[#allocation15_spill] sm:$0xff] }
 0x166   : > { %9655 = vst [vmem:[#allocation89_spill] sm:$0xff] %v7260_v17  ;;  %v5110_v13 = vpop.eup %5109  ;;  %v7263_v12 = vpop.f32.mrb[59].mxu1  ;;  %5131 = vpow2.f32 %v4746_v3  ;;  %v4756_v59 = vmul.f32 -1.442695, %v7238_v42  ;;  %v4447_v48 = vmul.f32 -1.442695, %v7247_v61  ;;  %v7286_v3 = vrot.slane %v7183_v58, %v414_v44 }
 0x167   : > { %9656 = vst [vmem:[#allocation90_spill] sm:$0xff] %v7263_v12  ;;  %v7265_v30 = vpop.f32.mrb[59].mxu0  ;;  %v7267_v52 = vpop.eup %5111  ;;  %v3845_v26 = vadd.f32 %v3844_v4, %v3587_v21  ;;  %v3596_v60 = vmul.f32 %v5110_v13, %v7056_v15  ;;  %5133 = vpow2.f32 %v4595_v20  ;;  %v9659_v10 = vsub.s32 4, %v6572_v62  ;;  %v9661_v21 = vld [vmem:[#allocation3_spill] sm:$0xff]  ;;  %v9662_v13 = vld [vmem:[#allocation13_spill] sm:$0xff] }
 0x168   : > { %9657 = vst [vmem:[#allocation91_spill] sm:$0xff] %v7265_v30  ;;  %9658 = vst [vmem:[#allocation92_spill] sm:$0xff] %v7267_v52  ;;  %v5114_v32 = vpop.eup %5113  ;;  %v7278_v12 = vrot.slane %v7183_v58, %v406_v47  ;;  %5135 = vpow2.f32 %v4755_v57  ;;  %v7290_v62 = vmul.f32 %v9662_v13, %v9661_v21  ;;  %v9665_v47 = vld [vmem:[#allocation5_spill] sm:$0xff]  ;;  %v9668_v57 = vld [vmem:[#allocation19_spill] sm:$0xff]  ;;  %v7308_v21 = vpop.f32.mrb[60].mxu0 }
 0x169   : > { %v7275_v17 = vrot.slane %v7183_v58, %v9659_v10  ;;  %v7280_v30 = vpop.eup %5115  ;;  %v7282_v4 = vadd.f32 %v3808_v16, %v3596_v60  ;;  %v3597_v15 = vmul.f32 %v5114_v32, %v7076_v22  ;;  %v9663_v10 = vld [vmem:[#allocation4_spill] sm:$0xff]  ;;  %v9666_v42 = vld [vmem:[#allocation17_spill] sm:$0xff]  ;;  %5137 = vpow2.f32 %v4596_v37  ;;  %v9667_v22 = vld [vmem:[#allocation6_spill] sm:$0xff]  ;;  %v7306_v32 = vpop.f32.mrb[60].mxu1  ;;  %9670 = vst [vmem:[#allocation13_spill] sm:$0xff] %v7308_v21 }
 0x16a   : > { %9660 = vst [vmem:[#allocation93_spill] sm:$0xff] %v7280_v30  ;;  %v5118_v20 = vpop.eup %5117  ;;  %v7294_v54 = vmul.f32 %v9664_v5, %v9663_v10  ;;  %v7298_v0 = vmul.f32 %v9666_v42, %v9665_v47  ;;  %v7302_v60 = vmul.f32 %v9668_v57, %v9667_v22  ;;  %5139 = vpow2.f32 %v4756_v59  ;;  %9669 = vst [vmem:[#allocation3_spill] sm:$0xff] %v7306_v32  ;;  %v9671_v13 = vld [vmem:[#allocation7_spill] sm:$0xff]  ;;  %v9672_v10 = vld [vmem:[#allocation20_spill] sm:$0xff]  ;;  %v7318_v22 = vpop.f32.mrb[61].mxu1 }
 0x16b   : > { %v5120_v16 = vpop.eup %5119  ;;  %v7304_v58 = vadd.f32 %v3845_v26, %v3597_v15  ;;  %v2646_v44 = vadd.f32 1.0, %v5118_v20  ;;  %v7312_v53 = vmul.f32 %v9672_v10, %v9671_v13  ;;  %v9673_v42 = vld [vmem:[#allocation8_spill] sm:$0xff]  ;;  %v9674_v37 = vld [vmem:[#allocation21_spill] sm:$0xff]  ;;  %5141 = vpow2.f32 %v4447_v48  ;;  %9675 = vst [vmem:[#allocation4_spill] sm:$0xff] %v7318_v22  ;;  %v7320_v26 = vpop.f32.mrb[61].mxu0  ;;  %v9679_v21 = vld [vmem:[#allocation10_spill] sm:$0xff] }
 0x16c   : > { %v5122_v5 = vpop.eup %5121  ;;  %v7316_v47 = vmul.f32 %v9674_v37, %v9673_v42  ;;  %v2806_v45 = vadd.f32 1.0, %v5120_v16  ;;  %9676 = vst [vmem:[#allocation15_spill] sm:$0xff] %v7320_v26  ;;  %v9677_v15 = vld [vmem:[#allocation9_spill] sm:$0xff]  ;;  %v9680_v32 = vld [vmem:[#allocation27_spill] sm:$0xff]  ;;  %v7330_v10 = vpop.f32.mrb[62].mxu1  ;;  %v9684_v37 = vld [vmem:[#allocation28_spill] sm:$0xff] }
 0x16d   : > { %v5124_v59 = vpop.eup %5123  ;;  %v9678_v20 = vld [vmem:[#allocation25_spill] sm:$0xff]  ;;  %v7328_v40 = vmul.f32 %v9680_v32, %v9679_v21  ;;  %5143 = vrcp.f32 %v2646_v44  ;;  %v2647_v13 = vadd.f32 1.0, %v5122_v5  ;;  %9681 = vst [vmem:[#allocation5_spill] sm:$0xff] %v7330_v10  ;;  %v7332_v42 = vpop.f32.mrb[62].mxu0  ;;  %v9683_v16 = vld [vmem:[#allocation11_spill] sm:$0xff]  ;;  %v9685_v26 = vld [vmem:[#allocation12_spill] sm:$0xff] }
 0x16e   : > { %v7324_v57 = vmul.f32 %v9678_v20, %v9677_v15  ;;  %9682 = vst [vmem:[#allocation17_spill] sm:$0xff] %v7332_v42  ;;  %v5126_v48 = vpop.eup %5125  ;;  %v7336_v22 = vmul.f32 %v9684_v37, %v9683_v16  ;;  %v7340_v61 = vmul.f32 %v6910_v24, %v9685_v26  ;;  %5145 = vrcp.f32 %v2806_v45  ;;  %v9686_v32 = vld [vmem:[#allocation14_spill] sm:$0xff]  ;;  %v9687_v21 = vld [vmem:[#allocation31_spill] sm:$0xff]  ;;  %v7350_v10 = vpop.f32.mrb[63].mxu1  ;;  %v9690_v37 = vld [vmem:[#allocation16_spill] sm:$0xff] }
 0x16f   : > { %v2807_v15 = vadd.f32 1.0, %v5124_v59  ;;  %v5128_v20 = vpop.eup %5127  ;;  %v7344_v44 = vmul.f32 %v9687_v21, %v9686_v32  ;;  %5147 = vrcp.f32 %v2647_v13  ;;  %v2656_v5 = vadd.f32 1.0, %v5126_v48  ;;  %9689 = vst [vmem:[#allocation19_spill] sm:$0xff] %v7350_v10  ;;  %v9692_v26 = vld [vmem:[#allocation33_spill] sm:$0xff]  ;;  %v7360_v32 = vpop.f32.mrb[63].mxu0  ;;  %v9695_v48 = vld [vmem:[#allocation18_spill] sm:$0xff] }
 0x170   : > { %v7348_v42 = vadd.f32 %v6940_v18, %v7275_v17  ;;  %v5130_v16 = vpop.eup %5129  ;;  %v7354_v24 = vmul.f32 %v9691_v25, %v9690_v37  ;;  %v2816_v45 = vadd.f32 1.0, %v5128_v20  ;;  %v7358_v59 = vadd.f32 %v9692_v26, %v7278_v12  ;;  %9694 = vst [vmem:[#allocation20_spill] sm:$0xff] %v7360_v32  ;;  %v9696_v10 = vld [vmem:[#allocation34_spill] sm:$0xff] }
 0x171   : > { %5149 = vrcp.f32 %v2807_v15  ;;  %v5132_v13 = vpop.eup %5131  ;;  %v7364_v18 = vmul.f32 %v6947_v6, %v9695_v48  ;;  %v2657_v21 = vadd.f32 1.0, %v5130_v16  ;;  %v7368_v30 = vadd.f32 %v9696_v10, %v7286_v3 }
 0x172   : > { %9688 = vst [vmem:[#allocation6_spill] sm:$0xff] %v7348_v42  ;;  %9693 = vst [vmem:[#allocation7_spill] sm:$0xff] %v7358_v59  ;;  %5151 = vrcp.f32 %v2656_v5  ;;  %v5134_v25 = vpop.eup %5133  ;;  %v2817_v15 = vadd.f32 1.0, %v5132_v13  ;;  %v7372_v20 = vadd.f32 %v6952_v23, %v7186_v34  ;;  %v7376_v37 = vadd.f32 %v6954_v19, %v7275_v17  ;;  %v9701_v23 = vld [vmem:[#allocation35_spill] sm:$0xff] }
 0x173   : > { %9697 = vst [vmem:[#allocation8_spill] sm:$0xff] %v7368_v30  ;;  %5153 = vrcp.f32 %v2816_v45  ;;  %v5136_v26 = vpop.eup %5135  ;;  %v2666_v6 = vadd.f32 1.0, %v5134_v25  ;;  %v4449_v5 = vmul.f32 -1.442695, %v7348_v42  ;;  %v7381_v10 = vadd.f32 %v6956_v8, %v7278_v12 }
 0x174   : > { %9698 = vst [vmem:[#allocation21_spill] sm:$0xff] %v7372_v20  ;;  %9699 = vst [vmem:[#allocation9_spill] sm:$0xff] %v7376_v37  ;;  %5155 = vrcp.f32 %v2657_v21  ;;  %v5138_v16 = vpop.eup %5137  ;;  %v2826_v45 = vadd.f32 1.0, %v5136_v26  ;;  %v4448_v13 = vmul.f32 -1.442695, %v7358_v59  ;;  %v7386_v48 = vadd.f32 %v9701_v23, %v7286_v3 }
 0x175   : > { %9700 = vst [vmem:[#allocation25_spill] sm:$0xff] %v7381_v10  ;;  %5157 = vrcp.f32 %v2817_v15  ;;  %v5140_v19 = vpop.eup %5139  ;;  %v2667_v32 = vadd.f32 1.0, %v5138_v16  ;;  %v4450_v21 = vmul.f32 -1.442695, %v7368_v30  ;;  %v7391_v25 = vadd.f32 %v6968_v43, %v7186_v34  ;;  %v7400_v30 = vpop.f32.mrb[64].mxu1 }
 0x176   : > { %9702 = vst [vmem:[#allocation10_spill] sm:$0xff] %v7386_v48  ;;  %5159 = vrcp.f32 %v2666_v6  ;;  %v5142_v8 = vpop.eup %5141  ;;  %v2827_v42 = vadd.f32 1.0, %v5140_v19  ;;  %v4457_v15 = vmul.f32 -1.442695, %v7372_v20  ;;  %v4459_v26 = vmul.f32 -1.442695, %v7376_v37 }
 0x177   : > { %9703 = vst [vmem:[#allocation27_spill] sm:$0xff] %v7391_v25  ;;  %5161 = vrcp.f32 %v2826_v45  ;;  %v5144_v59 = vpop.eup %5143  ;;  %v2518_v23 = vadd.f32 1.0, %v5142_v8  ;;  %v4458_v31 = vmul.f32 -1.442695, %v7381_v10  ;;  %v9704_v6 = vld [vmem:[#allocation36_spill] sm:$0xff]  ;;  %9705 = vst [vmem:[#allocation11_spill] sm:$0xff] %v7400_v30 }
 0x178   : > { %5163 = vrcp.f32 %v2667_v32  ;;  %v7398_v16 = vadd.f32 %v9704_v6, %v7275_v17  ;;  %v7402_v43 = vpop.eup %5145  ;;  %v3606_v45 = vmul.f32 %v5144_v59, %v7140_v39  ;;  %v4460_v19 = vmul.f32 -1.442695, %v7386_v48  ;;  %v9706_v37 = vld [vmem:[#allocation37_spill] sm:$0xff]  ;;  %v7410_v32 = vpop.f32.mrb[64].mxu0  ;;  %v9709_v6 = vld [vmem:[#allocation22_spill] sm:$0xff]  ;;  %v9713_v48 = vld [vmem:[#allocation23_spill] sm:$0xff] }
 0x179   : > { %5165 = vrcp.f32 %v2827_v42  ;;  %v7408_v20 = vadd.f32 %v9706_v37, %v7278_v12  ;;  %9707 = vst [vmem:[#allocation28_spill] sm:$0xff] %v7410_v32  ;;  %v7412_v8 = vpop.f32.mrb[65].mxu1  ;;  %v5148_v10 = vpop.eup %5147  ;;  %v7416_v52 = vmul.f32 %v7022_v14, %v9709_v6  ;;  %v4467_v30 = vmul.f32 -1.442695, %v7391_v25  ;;  %v9710_v39 = vld [vmem:[#allocation38_spill] sm:$0xff] }
 0x17a   : > { %9708 = vst [vmem:[#allocation12_spill] sm:$0xff] %v7412_v8  ;;  %5167 = vrcp.f32 %v2518_v23  ;;  %v7421_v42 = vadd.f32 %v9710_v39, %v7286_v3  ;;  %v7423_v59 = vpop.f32.mrb[65].mxu0  ;;  %v7429_v32 = vmul.f32 %v7043_v51, %v9713_v48  ;;  %v3810_v8 = vadd.f32 %v7282_v4, %v3606_v45  ;;  %v7433_v23 = vpop.f32.mrb[66].mxu1  ;;  %v9716_v51 = vld [vmem:[#allocation40_spill] sm:$0xff] }
 0x17b   : > { %9712 = vst [vmem:[#allocation31_spill] sm:$0xff] %v7423_v59  ;;  %v7425_v37 = vpop.eup %5149  ;;  %v3607_v14 = vmul.f32 %v5148_v10, %v7155_v33  ;;  %5169 = vpow2.f32 %v4449_v5  ;;  %9714 = vst [vmem:[#allocation16_spill] sm:$0xff] %v7433_v23  ;;  %v7435_v6 = vpop.f32.mrb[66].mxu0  ;;  %v4469_v39 = vmul.f32 -1.442695, %v7398_v16  ;;  %v7440_v59 = vadd.f32 %v6980_v46, %v7186_v34  ;;  %v9718_v45 = vld [vmem:[#allocation24_spill] sm:$0xff] }
 0x17c   : > { %9711 = vst [vmem:[#allocation14_spill] sm:$0xff] %v7421_v42  ;;  %9715 = vst [vmem:[#allocation32_spill] sm:$0xff] %v7435_v6  ;;  %v5152_v25 = vpop.eup %5151  ;;  %5171 = vpow2.f32 %v4448_v13  ;;  %v7444_v48 = vadd.f32 %v9716_v51, %v7275_v17  ;;  %v4468_v10 = vmul.f32 -1.442695, %v7408_v20  ;;  %v7453_v6 = vmul.f32 %v7060_v7, %v9718_v45  ;;  %v9719_v51 = vld [vmem:[#allocation41_spill] sm:$0xff]  ;;  %v7469_v7 = vpop.f32.mrb[67].mxu0 }
 0x17d   : > { %v7446_v4 = vpop.eup %5153  ;;  %v3847_v33 = vadd.f32 %v7304_v58, %v3607_v14  ;;  %v3616_v5 = vmul.f32 %v5152_v25, %v7167_v28  ;;  %5173 = vpow2.f32 %v4450_v21  ;;  %v4470_v46 = vmul.f32 -1.442695, %v7421_v42  ;;  %v9723_v28 = vld [vmem:[#allocation26_spill] sm:$0xff]  ;;  %9724 = vst [vmem:[#allocation36_spill] sm:$0xff] %v7469_v7 }
 0x17e   : > { %9717 = vst [vmem:[#allocation33_spill] sm:$0xff] %v7446_v4  ;;  %v5156_v13 = vpop.eup %5155  ;;  %5175 = vpow2.f32 %v4457_v15  ;;  %v7458_v23 = vadd.f32 %v9719_v51, %v7278_v12  ;;  %v7460_v4 = vpop.f32.mrb[67].mxu1  ;;  %v7466_v21 = vmul.f32 %v7080_v56, %v9723_v28  ;;  %v4477_v45 = vmul.f32 -1.442695, %v7440_v59 }
 0x17f   : > { %9721 = vst [vmem:[#allocation34_spill] sm:$0xff] %v7460_v4  ;;  %v7462_v58 = vpop.eup %5157  ;;  %v3811_v25 = vadd.f32 %v3810_v8, %v3616_v5  ;;  %v3617_v14 = vmul.f32 %v5156_v13, %v7195_v38  ;;  %5177 = vpow2.f32 %v4459_v26  ;;  %v4479_v51 = vmul.f32 -1.442695, %v7444_v48  ;;  %v9725_v4 = vld [vmem:[#allocation42_spill] sm:$0xff] }
 0x180   : > { %9720 = vst [vmem:[#allocation18_spill] sm:$0xff] %v7458_v23  ;;  %9722 = vst [vmem:[#allocation35_spill] sm:$0xff] %v7462_v58  ;;  %v5160_v15 = vpop.eup %5159  ;;  %5179 = vpow2.f32 %v4458_v31  ;;  %v7475_v42 = vadd.f32 %v9725_v4, %v7286_v3  ;;  %v9727_v38 = vld [vmem:[#allocation46_spill] sm:$0xff]  ;;  %v9728_v31 = vld [vmem:[#allocation29_spill] sm:$0xff]  ;;  %v7489_v28 = vmul.f32 -1.442695, %v7458_v23 }
 0x181   : > { %v7477_v58 = vpop.eup %5161  ;;  %v3848_v56 = vadd.f32 %v3847_v33, %v3617_v14  ;;  %v3626_v8 = vmul.f32 %v5160_v15, %v7216_v63  ;;  %5181 = vpow2.f32 %v4460_v19  ;;  %v7482_v26 = vadd.f32 %v9727_v38, %v7186_v34  ;;  %v9729_v4 = vld [vmem:[#allocation47_spill] sm:$0xff]  ;;  %v9731_v63 = vld [vmem:[#allocation30_spill] sm:$0xff]  ;;  %v9732_v38 = vld [vmem:[#allocation48_spill] sm:$0xff] }
 0x182   : > { %9726 = vst [vmem:[#allocation37_spill] sm:$0xff] %v7475_v42  ;;  %v5164_v5 = vpop.eup %5163  ;;  %v7486_v13 = vmul.f32 %v7092_v55, %v9728_v31  ;;  %5183 = vpow2.f32 %v4467_v30  ;;  %v7493_v7 = vadd.f32 %v9729_v4, %v7275_v17  ;;  %v7499_v19 = vmul.f32 %v7105_v27, %v9731_v63  ;;  %v9733_v4 = vld [vmem:[#allocation50_spill] sm:$0xff]  ;;  %v9734_v63 = vld [vmem:[#allocation51_spill] sm:$0xff] }
 0x183   : > { %v7495_v33 = vpop.eup %5165  ;;  %v3812_v14 = vadd.f32 %v3811_v25, %v3626_v8  ;;  %v3627_v15 = vmul.f32 %v5164_v5, %v7230_v11  ;;  %5185 = vpow2.f32 %v4469_v39  ;;  %v7505_v30 = vmul.f32 -1.442695, %v7475_v42  ;;  %v7528_v42 = vpop.f32.mrb[68].mxu0 }
 0x184   : > { %9730 = vst [vmem:[#allocation22_spill] sm:$0xff] %v7493_v7  ;;  %v7502_v55 = vpop.eup %5167  ;;  %5187 = vpow2.f32 %v4468_v10  ;;  %v7509_v31 = vadd.f32 %v9732_v38, %v7278_v12  ;;  %v7513_v23 = vadd.f32 %v9733_v4, %v7286_v3  ;;  %v7517_v11 = vmul.f32 -1.442695, %v7482_v26  ;;  %v7526_v4 = vpop.f32.mrb[68].mxu1  ;;  %9736 = vst [vmem:[#allocation23_spill] sm:$0xff] %v7528_v42 }
 0x185   : > { %v5170_v27 = vpop.eup %5169  ;;  %v3813_v25 = vadd.f32 %v3812_v14, %v7290_v62  ;;  %v3849_v8 = vadd.f32 %v3848_v56, %v3627_v15  ;;  %5189 = vpow2.f32 %v4470_v46  ;;  %v7520_v5 = vmul.f32 -1.442695, %v7493_v7  ;;  %9735 = vst [vmem:[#allocation38_spill] sm:$0xff] %v7526_v4  ;;  %v7532_v15 = vpop.f32.mrb[69].mxu1 }
 0x186   : > { %v5172_v39 = vpop.eup %5171  ;;  %v2520_v10 = vadd.f32 1.0, %v5170_v27  ;;  %5191 = vpow2.f32 %v4477_v45  ;;  %v7524_v38 = vadd.f32 %v9734_v63, %v7186_v34  ;;  %9737 = vst [vmem:[#allocation40_spill] sm:$0xff] %v7532_v15  ;;  %v7535_v7 = vmul.f32 -1.442695, %v7509_v31 }
 0x187   : > { %v5174_v62 = vpop.eup %5173  ;;  %v3814_v46 = vadd.f32 %v3813_v25, %v7298_v0  ;;  %v3850_v56 = vadd.f32 %v3849_v8, %v7294_v54  ;;  %v2519_v14 = vadd.f32 1.0, %v5172_v39  ;;  %5193 = vpow2.f32 %v4479_v51  ;;  %v7542_v25 = vpop.f32.mrb[69].mxu0 }
 0x188   : > { %v5176_v45 = vpop.eup %5175  ;;  %5195 = vrcp.f32 %v2520_v10  ;;  %v2521_v27 = vadd.f32 1.0, %v5174_v62  ;;  %v7538_v63 = vmul.f32 -1.442695, %v7513_v23  ;;  %v7545_v39 = vmul.f32 -1.442695, %v7524_v38 }
 0x189   : > { %v5178_v4 = vpop.eup %5177  ;;  %v3815_v42 = vadd.f32 %v3814_v46, %v7312_v53  ;;  %v3851_v0 = vadd.f32 %v3850_v56, %v7302_v60  ;;  %5197 = vrcp.f32 %v2519_v14  ;;  %v2528_v54 = vadd.f32 1.0, %v5176_v45 }
 0x18a   : > { %v5180_v51 = vpop.eup %5179  ;;  %5199 = vrcp.f32 %v2521_v27  ;;  %v2530_v8 = vadd.f32 1.0, %v5178_v4  ;;  %v7549_v10 = vadd.f32 %v7048_v9, %v7275_v17  ;;  %v7555_v4 = vadd.f32 %v7050_v41, %v7278_v12  ;;  %v7561_v9 = vpop.f32.mrb[70].mxu1 }
 0x18b   : > { %v5182_v62 = vpop.eup %5181  ;;  %v3816_v15 = vadd.f32 %v3815_v42, %v7324_v57  ;;  %v3852_v53 = vadd.f32 %v3851_v0, %v7316_v47  ;;  %5201 = vrcp.f32 %v2528_v54  ;;  %v2529_v60 = vadd.f32 1.0, %v5180_v51  ;;  %9738 = vst [vmem:[#allocation24_spill] sm:$0xff] %v7561_v9  ;;  %v7565_v27 = vpop.f32.mrb[70].mxu0 }
 0x18c   : > { %v5184_v46 = vpop.eup %5183  ;;  %5203 = vrcp.f32 %v2530_v8  ;;  %v2531_v56 = vadd.f32 1.0, %v5182_v62  ;;  %v7559_v14 = vadd.f32 %v7058_v36, %v7286_v3  ;;  %9739 = vst [vmem:[#allocation41_spill] sm:$0xff] %v7565_v27  ;;  %v7568_v41 = vmul.f32 -1.442695, %v7549_v10  ;;  %v9740_v36 = vld [vmem:[#allocation53_spill] sm:$0xff]  ;;  %v7580_v27 = vpop.f32.mrb[71].mxu1 }
 0x18d   : > { %v5186_v45 = vpop.eup %5185  ;;  %v3817_v57 = vadd.f32 %v3816_v15, %v7336_v22  ;;  %v3853_v47 = vadd.f32 %v3852_v53, %v7328_v40  ;;  %5205 = vrcp.f32 %v2529_v60  ;;  %v2538_v42 = vadd.f32 1.0, %v5184_v46  ;;  %v9741_v53 = vld [vmem:[#allocation39_spill] sm:$0xff] }
 0x18e   : > { %v5188_v0 = vpop.eup %5187  ;;  %5207 = vrcp.f32 %v2531_v56  ;;  %v2540_v54 = vadd.f32 1.0, %v5186_v45  ;;  %v7572_v51 = vadd.f32 %v9740_v36, %v7186_v34  ;;  %v3727_v60 = vmul.f32 %v7177_v29, %v9741_v53  ;;  %v9742_v46 = vld [vmem:[#allocation43_spill] sm:$0xff]  ;;  %v9746_v53 = vld [vmem:[#allocation49_spill] sm:$0xff] }
 0x18f   : > { %v5190_v8 = vpop.eup %5189  ;;  %v3818_v62 = vadd.f32 %v3817_v57, %v7344_v44  ;;  %v3854_v22 = vadd.f32 %v3853_v47, %v7340_v61  ;;  %5209 = vrcp.f32 %v2538_v42  ;;  %v2539_v40 = vadd.f32 1.0, %v5188_v0  ;;  %v7584_v57 = vpop.f32.mrb[71].mxu0  ;;  %v9744_v42 = vld [vmem:[#allocation44_spill] sm:$0xff]  ;;  %v9745_v0 = vld [vmem:[#allocation45_spill] sm:$0xff] }
 0x190   : > { %v5192_v15 = vpop.eup %5191  ;;  %v3736_v56 = vmul.f32 %v7205_v50, %v9742_v46  ;;  %5211 = vrcp.f32 %v2540_v54  ;;  %v2541_v45 = vadd.f32 1.0, %v5190_v8  ;;  %9743 = vst [vmem:[#allocation26_spill] sm:$0xff] %v7584_v57  ;;  %v3737_v29 = vmul.f32 %v7218_v2, %v9744_v42  ;;  %v9749_v2 = vld [vmem:[#allocation93_spill] sm:$0xff] }
 0x191   : > { %v5194_v36 = vpop.eup %5193  ;;  %v3819_v9 = vadd.f32 %v3818_v62, %v7364_v18  ;;  %v3855_v44 = vadd.f32 %v3854_v22, %v7354_v24  ;;  %5213 = vrcp.f32 %v2539_v40  ;;  %v2548_v61 = vadd.f32 1.0, %v5192_v15  ;;  %v9747_v22 = vld [vmem:[#allocation92_spill] sm:$0xff]  ;;  %v9750_v57 = vld [vmem:[#allocation69_spill] sm:$0xff] }
 0x192   : > { %v5196_v47 = vpop.eup %5195  ;;  %v3746_v50 = vmul.f32 %v7232_v35, %v9745_v0  ;;  %5215 = vrcp.f32 %v2541_v45  ;;  %v2550_v54 = vadd.f32 1.0, %v5194_v36  ;;  %v3747_v46 = vmul.f32 %v7254_v1, %v9746_v53  ;;  %v9748_v15 = vld [vmem:[#allocation52_spill] sm:$0xff]  ;;  %v9754_v53 = vld [vmem:[#allocation21_spill] sm:$0xff] }
 0x193   : > { %v5198_v8 = vpop.eup %5197  ;;  %v3820_v18 = vadd.f32 %v3819_v9, %v7429_v32  ;;  %v3856_v24 = vadd.f32 %v3855_v44, %v7416_v52  ;;  %5217 = vrcp.f32 %v2548_v61  ;;  %v3756_v40 = vmul.f32 %v9747_v22, %v7066_v49  ;;  %v9751_v32 = vld [vmem:[#allocation85_spill] sm:$0xff]  ;;  %v9752_v44 = vld [vmem:[#allocation6_spill] sm:$0xff]  ;;  %v9753_v61 = vld [vmem:[#allocation7_spill] sm:$0xff] }
 0x194   : > { %v5200_v62 = vpop.eup %5199  ;;  %v3757_v42 = vmul.f32 %v9749_v2, %v9748_v15  ;;  %v3766_v35 = vmul.f32 %v7402_v43, %v9750_v57  ;;  %5219 = vrcp.f32 %v2550_v54  ;;  %v3478_v52 = vmul.f32 %v7502_v55, %v9751_v32 }
 0x195   : > { %v5202_v45 = vpop.eup %5201  ;;  %v3821_v36 = vadd.f32 %v3820_v18, %v7466_v21  ;;  %v3857_v1 = vadd.f32 %v3856_v24, %v7453_v6  ;;  %5221 = vpow2.f32 %v7489_v28  ;;  %v3480_v49 = vmul.f32 %v5196_v47, %v9752_v44  ;;  %v9755_v6 = vld [vmem:[#allocation9_spill] sm:$0xff]  ;;  %v9756_v28 = vld [vmem:[#allocation8_spill] sm:$0xff] }
 0x196   : > { %v5204_v9 = vpop.eup %5203  ;;  %v3479_v0 = vmul.f32 %v5198_v8, %v9753_v61  ;;  %v3488_v22 = vmul.f32 %v5202_v45, %v9754_v53  ;;  %5223 = vpow2.f32 %v7505_v30  ;;  %v3481_v18 = vmul.f32 %v5200_v62, %v9756_v28  ;;  %v9757_v47 = vld [vmem:[#allocation25_spill] sm:$0xff]  ;;  %v7616_v8 = vpop.f32.mrb[72].mxu1 }
 0x197   : > { %v5206_v43 = vpop.eup %5205  ;;  %v3822_v57 = vadd.f32 %v3821_v36, %v7499_v19  ;;  %v3858_v21 = vadd.f32 %v3857_v1, %v7486_v13  ;;  %v3490_v54 = vmul.f32 %v5204_v9, %v9755_v6  ;;  %5225 = vpow2.f32 %v7517_v11  ;;  %v7618_v30 = vpop.f32.mrb[72].mxu0  ;;  %v9758_v36 = vld [vmem:[#allocation10_spill] sm:$0xff]  ;;  %v9761_v6 = vld [vmem:[#allocation72_spill] sm:$0xff] }
 0x198   : > { %v5208_v55 = vpop.eup %5207  ;;  %v3872_v24 = vadd.f32 %v3488_v22, %v3478_v52  ;;  %v3489_v15 = vmul.f32 %v5206_v43, %v9757_v47  ;;  %5227 = vpow2.f32 %v7520_v5  ;;  %v7621_v32 = vpop.f32.mrb[73].mxu1  ;;  %v9759_v52 = vld [vmem:[#allocation70_spill] sm:$0xff]  ;;  %v9760_v5 = vld [vmem:[#allocation27_spill] sm:$0xff] }
 0x199   : > { %v5210_v2 = vpop.eup %5209  ;;  %v3823_v19 = vadd.f32 %v3822_v57, %v3736_v56  ;;  %v3859_v45 = vadd.f32 %v3858_v21, %v3727_v60  ;;  %v3946_v13 = vadd.f32 %v3490_v54, %v3480_v49  ;;  %v3491_v1 = vmul.f32 %v5208_v55, %v9758_v36  ;;  %v7623_v11 = vpop.f32.mrb[73].mxu0  ;;  %v9762_v54 = vld [vmem:[#allocation33_spill] sm:$0xff] }
 0x19a   : > { %v5212_v62 = vpop.eup %5211  ;;  %v3767_v9 = vmul.f32 %v7425_v37, %v9759_v52  ;;  %v3909_v44 = vadd.f32 %v3489_v15, %v3479_v0  ;;  %v3498_v61 = vmul.f32 %v5210_v2, %v9760_v5  ;;  %5229 = vpow2.f32 %v7535_v7  ;;  %v7629_v53 = vpop.f32.mrb[74].mxu1  ;;  %v9764_v2 = vld [vmem:[#allocation77_spill] sm:$0xff] }
 0x19b   : > { %v5214_v56 = vpop.eup %5213  ;;  %v3824_v60 = vadd.f32 %v3823_v19, %v3746_v50  ;;  %v3860_v49 = vadd.f32 %v3859_v45, %v3737_v29  ;;  %v3983_v22 = vadd.f32 %v3491_v1, %v3481_v18  ;;  %v3500_v43 = vmul.f32 %v5212_v62, %v7398_v16  ;;  %v7632_v57 = vpop.f32.mrb[74].mxu0  ;;  %v9763_v50 = vld [vmem:[#allocation14_spill] sm:$0xff]  ;;  %v9765_v16 = vld [vmem:[#allocation35_spill] sm:$0xff]  ;;  %v9766_v52 = vld [vmem:[#allocation81_spill] sm:$0xff] }
 0x19c   : > { %v5216_v21 = vpop.eup %5215  ;;  %v3776_v55 = vmul.f32 %v9762_v54, %v9761_v6  ;;  %v3873_v37 = vadd.f32 %v3872_v24, %v3498_v61  ;;  %v3499_v0 = vmul.f32 %v5214_v56, %v7408_v20  ;;  %5231 = vpow2.f32 %v7538_v63  ;;  %v7645_v24 = vpop.f32.mrb[75].mxu1 }
 0x19d   : > { %v5218_v7 = vpop.eup %5217  ;;  %v3825_v28 = vadd.f32 %v3824_v60, %v3756_v40  ;;  %v3861_v47 = vadd.f32 %v3860_v49, %v3747_v46  ;;  %v3947_v15 = vadd.f32 %v3946_v13, %v3500_v43  ;;  %v3501_v29 = vmul.f32 %v5216_v21, %v9763_v50  ;;  %v7650_v13 = vpop.f32.mrb[75].mxu0  ;;  %v9767_v49 = vld [vmem:[#allocation82_spill] sm:$0xff]  ;;  %v9770_v50 = vld [vmem:[#allocation56_spill] sm:$0xff] }
 0x19e   : > { %v5220_v18 = vpop.eup %5219  ;;  %v3777_v19 = vmul.f32 %v9765_v16, %v9764_v2  ;;  %v7641_v45 = vadd.f32 %v3909_v44, %v3499_v0  ;;  %v3508_v36 = vmul.f32 %v5218_v7, %v7440_v59  ;;  %5233 = vpow2.f32 %v7545_v39 }
 0x19f   : > { %v5222_v20 = vpop.eup %5221  ;;  %v3826_v63 = vadd.f32 %v3825_v28, %v3766_v35  ;;  %v3862_v1 = vadd.f32 %v3861_v47, %v3757_v42  ;;  %v7647_v40 = vadd.f32 %v3983_v22, %v3501_v29  ;;  %v3510_v46 = vmul.f32 %v5220_v18, %v7444_v48  ;;  %v9769_v47 = vld [vmem:[#allocation55_spill] sm:$0xff] }
 0x1a0   : > { %v5224_v62 = vpop.eup %5223  ;;  %v3786_v44 = vmul.f32 %v7477_v58, %v9766_v52  ;;  %v7654_v5 = vadd.f32 %v3873_v37, %v3508_v36  ;;  %v2549_v59 = vadd.f32 1.0, %v5222_v20  ;;  %5235 = vpow2.f32 %v7568_v41  ;;  %v9771_v20 = vld [vmem:[#allocation57_spill] sm:$0xff]  ;;  %v7687_v52 = vpop.f32.mrb[76].mxu0 }
 0x1a1   : > { %v5226_v39 = vpop.eup %5225  ;;  %v3827_v61 = vadd.f32 %v3826_v63, %v3776_v55  ;;  %v3863_v56 = vadd.f32 %v3862_v1, %v3767_v9  ;;  %v7657_v35 = vadd.f32 %v3947_v15, %v3510_v46  ;;  %v2551_v42 = vadd.f32 1.0, %v5224_v62  ;;  %v9768_v9 = vld [vmem:[#allocation54_spill] sm:$0xff]  ;;  %v7685_v62 = vpop.f32.mrb[76].mxu1 }
 0x1a2   : > { %v5228_v60 = vpop.eup %5227  ;;  %v3787_v48 = vmul.f32 %v7495_v33, %v9767_v49  ;;  %5237 = vrcp.f32 %v2549_v59  ;;  %v2558_v22 = vadd.f32 1.0, %v5226_v39  ;;  %v4498_v43 = vmul.f32 -1.442695, %v7555_v4  ;;  %v9772_v1 = vld [vmem:[#allocation58_spill] sm:$0xff] }
 0x1a3   : > { %v3828_v58 = vadd.f32 %v3827_v61, %v3786_v44  ;;  %v3864_v21 = vadd.f32 %v3863_v56, %v3777_v19  ;;  %5239 = vrcp.f32 %v2551_v42  ;;  %v2560_v6 = vadd.f32 1.0, %v5228_v60  ;;  %v7689_v61 = vpop.f32.mrb[77].mxu1  ;;  %v7691_v56 = vpop.f32.mrb[77].mxu0 }
 0x1a4   : > { %v5230_v54 = vpop.eup %5229  ;;  %5241 = vrcp.f32 %v2558_v22  ;;  %v4500_v41 = vmul.f32 -1.442695, %v7559_v14  ;;  %v7665_v55 = vadd.f32 %v9768_v9, %v7275_v17  ;;  %v4507_v28 = vmul.f32 -1.442695, %v7572_v51  ;;  %v9774_v9 = vld [vmem:[#allocation60_spill] sm:$0xff] }
 0x1a5   : > { %v3829_v37 = vrot.slane %v3828_v58, 4  ;;  %v3865_v0 = vadd.f32 %v3864_v21, %v3787_v48  ;;  %5243 = vrcp.f32 %v2560_v6  ;;  %v2559_v33 = vadd.f32 1.0, %v5230_v54  ;;  %v9773_v48 = vld [vmem:[#allocation59_spill] sm:$0xff] }
 0x1a6   : > { %v5232_v7 = vpop.eup %5231  ;;  %5245 = vpow2.f32 %v4498_v43  ;;  %v7670_v15 = vadd.f32 %v9769_v47, %v7278_v12  ;;  %v7674_v29 = vadd.f32 %v9770_v50, %v7286_v3  ;;  %v4509_v36 = vmul.f32 -1.442695, %v7665_v55  ;;  %v9775_v47 = vld [vmem:[#allocation18_spill] sm:$0xff] }
 0x1a7   : > { %v3830_v18 = vadd.f32 %v3829_v37, %v3828_v58  ;;  %v3866_v2 = vrot.slane %v3865_v0, 4  ;;  %5247 = vrcp.f32 %v2559_v33  ;;  %v2561_v16 = vadd.f32 1.0, %v5232_v7 }
 0x1a8   : > { %v5234_v19 = vpop.eup %5233  ;;  %5249 = vpow2.f32 %v4500_v41  ;;  %v7679_v63 = vadd.f32 %v9771_v20, %v7186_v34  ;;  %v7683_v46 = vadd.f32 %v9772_v1, %v7275_v17  ;;  %v4508_v60 = vmul.f32 -1.442695, %v7670_v15  ;;  %v9777_v20 = vld [vmem:[#allocation61_spill] sm:$0xff] }
 0x1a9   : > { %v3831_v44 = vrot.slane %v3830_v18, 2  ;;  %v3867_v59 = vadd.f32 %v3866_v2, %v3865_v0  ;;  %5251 = vrcp.f32 %v2561_v16  ;;  %v2568_v39 = vadd.f32 1.0, %v5234_v19  ;;  %v7705_v0 = vpop.f32.mrb[78].mxu1  ;;  %v9776_v16 = vld [vmem:[#allocation37_spill] sm:$0xff] }
 0x1aa   : > { %v5236_v42 = vpop.eup %5235  ;;  %5253 = vpow2.f32 %v4507_v28  ;;  %v4510_v49 = vmul.f32 -1.442695, %v7674_v29  ;;  %v7697_v22 = vadd.f32 %v9773_v48, %v7278_v12  ;;  %v4517_v54 = vmul.f32 -1.442695, %v7679_v63 }
 0x1ab   : > { %v3832_v43 = vadd.f32 %v3831_v44, %v3830_v18  ;;  %v3868_v58 = vrot.slane %v3867_v59, 2  ;;  %5255 = vrcp.f32 %v2568_v39  ;;  %v2570_v21 = vadd.f32 1.0, %v5236_v42  ;;  %v7708_v18 = vpop.f32.mrb[78].mxu0 }
 0x1ac   : > { %v5238_v6 = vpop.eup %5237  ;;  %5257 = vpow2.f32 %v4509_v36  ;;  %v4519_v41 = vmul.f32 -1.442695, %v7683_v46  ;;  %v7703_v37 = vadd.f32 %v9774_v9, %v7286_v3  ;;  %v4518_v36 = vmul.f32 -1.442695, %v7697_v22  ;;  %v9779_v9 = vld [vmem:[#allocation22_spill] sm:$0xff] }
 0x1ad   : > { %v5240_v33 = vpop.eup %5239  ;;  %v3833_v7 = vrot.slane %v3832_v43, 1  ;;  %v3869_v28 = vadd.f32 %v3868_v58, %v3867_v59  ;;  %v3509_v50 = vmul.f32 %v5238_v6, %v9775_v47  ;;  %5259 = vrcp.f32 %v2570_v21  ;;  %v7720_v58 = vpop.f32.mrb[79].mxu1 }
 0x1ae   : > { %v5242_v2 = vpop.eup %5241  ;;  %v3511_v19 = vmul.f32 %v5240_v33, %v9776_v16  ;;  %5261 = vpow2.f32 %v4508_v60  ;;  %v7714_v1 = vadd.f32 %v9777_v20, %v7186_v34  ;;  %v7722_v21 = vpop.f32.mrb[79].mxu0  ;;  %v4520_v47 = vmul.f32 -1.442695, %v7703_v37 }
 0x1af   : > { %v5244_v44 = vpop.eup %5243  ;;  %v7716_v39 = vadd.f32 %v3833_v7, %v3832_v43  ;;  %v3870_v42 = vrot.slane %v3869_v28, 1  ;;  %v3911_v59 = vadd.f32 %v7641_v45, %v3509_v50  ;;  %v3518_v48 = vmul.f32 %v5242_v2, %v7482_v26 }
 0x1b0   : > { %v5246_v6 = vpop.eup %5245  ;;  %v3985_v60 = vadd.f32 %v7647_v40, %v3511_v19  ;;  %v3520_v33 = vmul.f32 %v5244_v44, %v9779_v9  ;;  %5263 = vpow2.f32 %v4510_v49  ;;  %v9781_v40 = vld [vmem:[#allocation62_spill] sm:$0xff] }
 0x1b1   : > { %9778 = vst [vmem:[#allocation42_spill] sm:$0xff] %v7716_v39  ;;  %v5248_v16 = vpop.eup %5247  ;;  %v7727_v43 = vadd.f32 %v3870_v42, %v3869_v28  ;;  %v3875_v7 = vadd.f32 %v7654_v5, %v3518_v48  ;;  %v2569_v45 = vadd.f32 1.0, %v5246_v6  ;;  %5265 = vpow2.f32 %v4517_v54 }
 0x1b2   : > { %v5250_v26 = vpop.eup %5249  ;;  %v3949_v50 = vadd.f32 %v7657_v35, %v3520_v33  ;;  %v3519_v2 = vmul.f32 %v5248_v16, %v7509_v31  ;;  %5267 = vpow2.f32 %v4519_v41  ;;  %v7734_v19 = vadd.f32 %v9781_v40, %v7275_v17  ;;  %v9782_v31 = vld [vmem:[#allocation63_spill] sm:$0xff] }
 0x1b3   : > { %9780 = vst [vmem:[#allocation46_spill] sm:$0xff] %v7727_v43  ;;  %v5252_v49 = vpop.eup %5251  ;;  %5269 = vrcp.f32 %v2569_v45  ;;  %v2571_v28 = vadd.f32 1.0, %v5250_v26  ;;  %v4527_v5 = vmul.f32 -1.442695, %v7714_v1  ;;  %v7742_v35 = vadd.f32 %v9782_v31, %v7278_v12  ;;  %v7746_v45 = vpop.f32.mrb[80].mxu1  ;;  %v9783_v26 = vld [vmem:[#allocation64_spill] sm:$0xff] }
 0x1b4   : > { %v5254_v44 = vpop.eup %5253  ;;  %v3912_v54 = vadd.f32 %v3911_v59, %v3519_v2  ;;  %v3521_v42 = vmul.f32 %v5252_v49, %v7513_v23  ;;  %5271 = vpow2.f32 %v4518_v36  ;;  %v4529_v16 = vmul.f32 -1.442695, %v7734_v19  ;;  %v7748_v59 = vpop.f32.mrb[80].mxu0 }
 0x1b5   : > { %v5256_v41 = vpop.eup %5255  ;;  %5273 = vrcp.f32 %v2571_v28  ;;  %v2578_v48 = vadd.f32 1.0, %v5254_v44  ;;  %v7752_v2 = vadd.f32 %v9783_v26, %v7286_v3  ;;  %v7754_v40 = vpop.f32.mrb[81].mxu1  ;;  %v4528_v28 = vmul.f32 -1.442695, %v7742_v35 }
 0x1b6   : > { %v5258_v6 = vpop.eup %5257  ;;  %v3986_v9 = vadd.f32 %v3985_v60, %v3521_v42  ;;  %v3528_v33 = vmul.f32 %v5256_v41, %v7524_v38  ;;  %5275 = vpow2.f32 %v4520_v47  ;;  %9784 = vst [vmem:[#allocation29_spill] sm:$0xff] %v7754_v40  ;;  %v7756_v49 = vpop.f32.mrb[81].mxu0  ;;  %v9786_v41 = vld [vmem:[#allocation65_spill] sm:$0xff] }
 0x1b7   : > { %v5260_v23 = vpop.eup %5259  ;;  %5277 = vrcp.f32 %v2578_v48  ;;  %v2580_v36 = vadd.f32 1.0, %v5258_v6  ;;  %9785 = vst [vmem:[#allocation47_spill] sm:$0xff] %v7756_v49  ;;  %v7762_v48 = vadd.f32 %v9786_v41, %v7186_v34  ;;  %v7764_v6 = vpop.f32.mrb[82].mxu1 }
 0x1b8   : > { %v5262_v60 = vpop.eup %5261  ;;  %v3876_v38 = vadd.f32 %v3875_v7, %v3528_v33  ;;  %v3530_v47 = vmul.f32 %v5260_v23, %v7549_v10  ;;  %5279 = vpow2.f32 %v4527_v5  ;;  %9787 = vst [vmem:[#allocation30_spill] sm:$0xff] %v7764_v6  ;;  %v4530_v10 = vmul.f32 -1.442695, %v7752_v2  ;;  %v9788_v5 = vld [vmem:[#allocation66_spill] sm:$0xff] }
 0x1b9   : > { %5281 = vrcp.f32 %v2580_v36  ;;  %v2579_v44 = vadd.f32 1.0, %v5262_v60  ;;  %v7769_v23 = vadd.f32 %v9788_v5, %v7275_v17  ;;  %v7771_v36 = vpop.f32.mrb[82].mxu0  ;;  %v9791_v5 = vld [vmem:[#allocation68_spill] sm:$0xff] }
 0x1ba   : > { %v5264_v42 = vpop.eup %5263  ;;  %v3950_v31 = vadd.f32 %v3949_v50, %v3530_v47  ;;  %5283 = vpow2.f32 %v4529_v16  ;;  %9789 = vst [vmem:[#allocation48_spill] sm:$0xff] %v7771_v36  ;;  %v7781_v43 = vadd.f32 %v9791_v5, %v7286_v3  ;;  %v9793_v36 = vld [vmem:[#allocation71_spill] sm:$0xff] }
 0x1bb   : > { %v5266_v26 = vpop.eup %5265  ;;  %5285 = vrcp.f32 %v2579_v44  ;;  %v2581_v20 = vadd.f32 1.0, %v5264_v42  ;;  %v4537_v44 = vmul.f32 -1.442695, %v7762_v48  ;;  %v9790_v42 = vld [vmem:[#allocation67_spill] sm:$0xff] }
 0x1bc   : > { %v5268_v7 = vpop.eup %5267  ;;  %v2588_v33 = vadd.f32 1.0, %v5266_v26  ;;  %5287 = vpow2.f32 %v4528_v28  ;;  %v7777_v28 = vadd.f32 %v9790_v42, %v7278_v12 }
 0x1bd   : > { %v5270_v50 = vpop.eup %5269  ;;  %5289 = vrcp.f32 %v2581_v20  ;;  %v2590_v16 = vadd.f32 1.0, %v5268_v7 }
 0x1be   : > { %v5272_v60 = vpop.eup %5271  ;;  %v3529_v47 = vmul.f32 %v5270_v50, %v7555_v4  ;;  %5291 = vrcp.f32 %v2588_v33  ;;  %v4539_v4 = vmul.f32 -1.442695, %v7769_v23  ;;  %v7785_v33 = vpop.f32.mrb[83].mxu1 }
 0x1bf   : > { %v5274_v41 = vpop.eup %5273  ;;  %5293 = vrcp.f32 %v2590_v16  ;;  %v2589_v26 = vadd.f32 1.0, %v5272_v60  ;;  %9792 = vst [vmem:[#allocation50_spill] sm:$0xff] %v7785_v33  ;;  %v7789_v16 = vadd.f32 %v9793_v36, %v7186_v34  ;;  %v7791_v60 = vpop.f32.mrb[83].mxu0 }
 0x1c0   : > { %v5276_v20 = vpop.eup %5275  ;;  %v3913_v7 = vadd.f32 %v3912_v54, %v3529_v47  ;;  %v3531_v39 = vmul.f32 %v5274_v41, %v7559_v14  ;;  %5295 = vpow2.f32 %v4530_v10  ;;  %9794 = vst [vmem:[#allocation51_spill] sm:$0xff] %v7791_v60  ;;  %v4538_v14 = vmul.f32 -1.442695, %v7777_v28 }
 0x1c1   : > { %v5278_v50 = vpop.eup %5277  ;;  %5297 = vrcp.f32 %v2589_v26  ;;  %v2591_v42 = vadd.f32 1.0, %v5276_v20  ;;  %v4540_v41 = vmul.f32 -1.442695, %v7781_v43  ;;  %v9795_v26 = vld [vmem:[#allocation73_spill] sm:$0xff] }
 0x1c2   : > { %v5280_v5 = vpop.eup %5279  ;;  %v3987_v6 = vadd.f32 %v3986_v9, %v3531_v39  ;;  %v3538_v54 = vmul.f32 %v5278_v50, %v7572_v51  ;;  %5299 = vpow2.f32 %v4537_v44  ;;  %v7798_v20 = vadd.f32 %v9795_v26, %v7275_v17  ;;  %v9796_v39 = vld [vmem:[#allocation74_spill] sm:$0xff]  ;;  %v9797_v26 = vld [vmem:[#allocation75_spill] sm:$0xff] }
 0x1c3   : > { %v5282_v10 = vpop.eup %5281  ;;  %5301 = vrcp.f32 %v2591_v42  ;;  %v2598_v47 = vadd.f32 1.0, %v5280_v5  ;;  %v7803_v51 = vadd.f32 %v9796_v39, %v7278_v12  ;;  %v4547_v50 = vmul.f32 -1.442695, %v7789_v16 }
 0x1c4   : > { %v5284_v36 = vpop.eup %5283  ;;  %v3877_v33 = vadd.f32 %v3876_v38, %v3538_v54  ;;  %v3540_v60 = vmul.f32 %v5282_v10, %v7665_v55  ;;  %5303 = vpow2.f32 %v4539_v4  ;;  %v7809_v38 = vadd.f32 %v9797_v26, %v7286_v3  ;;  %v9798_v10 = vld [vmem:[#allocation76_spill] sm:$0xff] }
 0x1c5   : > { %v5286_v9 = vpop.eup %5285  ;;  %5305 = vrcp.f32 %v2598_v47  ;;  %v2600_v44 = vadd.f32 1.0, %v5284_v36  ;;  %v4549_v54 = vmul.f32 -1.442695, %v7798_v20  ;;  %v7814_v47 = vadd.f32 %v9798_v10, %v7186_v34 }
 0x1c6   : > { %v5288_v42 = vpop.eup %5287  ;;  %v3951_v5 = vadd.f32 %v3950_v31, %v3540_v60  ;;  %v3539_v49 = vmul.f32 %v5286_v9, %v7670_v15  ;;  %5307 = vpow2.f32 %v4538_v14  ;;  %v4548_v15 = vmul.f32 -1.442695, %v7803_v51  ;;  %v7818_v60 = vpop.f32.mrb[84].mxu1 }
 0x1c7   : > { %v5290_v55 = vpop.eup %5289  ;;  %5309 = vrcp.f32 %v2600_v44  ;;  %v2599_v4 = vadd.f32 1.0, %v5288_v42  ;;  %9799 = vst [vmem:[#allocation53_spill] sm:$0xff] %v7818_v60  ;;  %v7820_v14 = vpop.f32.mrb[84].mxu0  ;;  %v9801_v42 = vld [vmem:[#allocation78_spill] sm:$0xff] }
 0x1c8   : > { %v5292_v36 = vpop.eup %5291  ;;  %v3914_v39 = vadd.f32 %v3913_v7, %v3539_v49  ;;  %v3541_v31 = vmul.f32 %v5290_v55, %v7674_v29  ;;  %5311 = vpow2.f32 %v4540_v41  ;;  %9800 = vst [vmem:[#allocation39_spill] sm:$0xff] %v7820_v14  ;;  %v7825_v26 = vadd.f32 %v9801_v42, %v7275_v17  ;;  %v7827_v10 = vpop.f32.mrb[85].mxu1 }
 0x1c9   : > { %v5294_v9 = vpop.eup %5293  ;;  %v3548_v44 = vmul.f32 %v5292_v36, %v7679_v63  ;;  %5313 = vrcp.f32 %v2599_v4  ;;  %9802 = vst [vmem:[#allocation43_spill] sm:$0xff] %v7827_v10  ;;  %v7829_v49 = vpop.f32.mrb[85].mxu0  ;;  %v4550_v55 = vmul.f32 -1.442695, %v7809_v38  ;;  %v4557_v36 = vmul.f32 -1.442695, %v7814_v47 }
 0x1ca   : > { %9803 = vst [vmem:[#allocation44_spill] sm:$0xff] %v7829_v49  ;;  %v5296_v29 = vpop.eup %5295  ;;  %v3988_v7 = vadd.f32 %v3987_v6, %v3541_v31  ;;  %v3550_v41 = vmul.f32 %v5294_v9, %v7683_v46  ;;  %5315 = vpow2.f32 %v4547_v50  ;;  %v7833_v14 = vpop.f32.mrb[86].mxu1  ;;  %v9806_v46 = vld [vmem:[#allocation79_spill] sm:$0xff] }
 0x1cb   : > { %9804 = vst [vmem:[#allocation45_spill] sm:$0xff] %v7833_v14  ;;  %v5298_v60 = vpop.eup %5297  ;;  %v3878_v63 = vadd.f32 %v3877_v33, %v3548_v44  ;;  %v2601_v4 = vadd.f32 1.0, %v5296_v29  ;;  %5317 = vpow2.f32 %v4549_v54  ;;  %v7836_v42 = vpop.f32.mrb[86].mxu0  ;;  %v7841_v6 = vadd.f32 %v9806_v46, %v7278_v12  ;;  %v9807_v29 = vld [vmem:[#allocation80_spill] sm:$0xff] }
 0x1cc   : > { %9805 = vst [vmem:[#allocation49_spill] sm:$0xff] %v7836_v42  ;;  %v5300_v10 = vpop.eup %5299  ;;  %v3952_v40 = vadd.f32 %v3951_v5, %v3550_v41  ;;  %v3549_v49 = vmul.f32 %v5298_v60, %v7697_v22  ;;  %5319 = vpow2.f32 %v4548_v15  ;;  %v4559_v33 = vmul.f32 -1.442695, %v7825_v26  ;;  %v7849_v22 = vpop.f32.mrb[87].mxu1 }
 0x1cd   : > { %v5302_v50 = vpop.eup %5301  ;;  %5321 = vrcp.f32 %v2601_v4  ;;  %v2608_v31 = vadd.f32 1.0, %v5300_v10  ;;  %v7847_v5 = vadd.f32 %v9807_v29, %v7286_v3  ;;  %9808 = vst [vmem:[#allocation92_spill] sm:$0xff] %v7849_v22  ;;  %v7851_v41 = vpop.f32.mrb[87].mxu0 }
 0x1ce   : > { %v5304_v9 = vpop.eup %5303  ;;  %v3915_v54 = vadd.f32 %v3914_v39, %v3549_v49  ;;  %v3551_v44 = vmul.f32 %v5302_v50, %v7703_v37  ;;  %5323 = vpow2.f32 %v4550_v55  ;;  %9809 = vst [vmem:[#allocation52_spill] sm:$0xff] %v7851_v41  ;;  %v4558_v39 = vmul.f32 -1.442695, %v7841_v6  ;;  %v9810_v55 = vld [vmem:[#allocation83_spill] sm:$0xff] }
 0x1cf   : > { %v5306_v15 = vpop.eup %5305  ;;  %5325 = vrcp.f32 %v2608_v31  ;;  %v2610_v60 = vadd.f32 1.0, %v5304_v9  ;;  %v7857_v50 = vadd.f32 %v9810_v55, %v7186_v34  ;;  %v4560_v9 = vmul.f32 -1.442695, %v7847_v5 }
 0x1d0   : > { %v5308_v4 = vpop.eup %5307  ;;  %v3989_v10 = vadd.f32 %v3988_v7, %v3551_v44  ;;  %v3558_v46 = vmul.f32 %v5306_v15, %v7714_v1  ;;  %5327 = vpow2.f32 %v4557_v36 }
 0x1d1   : > { %v5310_v37 = vpop.eup %5309  ;;  %5329 = vrcp.f32 %v2610_v60  ;;  %v2609_v49 = vadd.f32 1.0, %v5308_v4  ;;  %v9811_v60 = vld [vmem:[#allocation84_spill] sm:$0xff] }
 0x1d2   : > { %v5312_v29 = vpop.eup %5311  ;;  %v3879_v22 = vadd.f32 %v3878_v63, %v3558_v46  ;;  %v3560_v31 = vmul.f32 %v5310_v37, %v7734_v19  ;;  %5331 = vpow2.f32 %v4559_v33  ;;  %v7864_v4 = vadd.f32 %v9811_v60, %v7275_v17 }
 0x1d3   : > { %v5314_v7 = vpop.eup %5313  ;;  %5333 = vrcp.f32 %v2609_v49  ;;  %v2611_v1 = vadd.f32 1.0, %v5312_v29  ;;  %v4567_v19 = vmul.f32 -1.442695, %v7857_v50  ;;  %v9812_v49 = vld [vmem:[#allocation86_spill] sm:$0xff] }
 0x1d4   : > { %v5316_v36 = vpop.eup %5315  ;;  %v3953_v44 = vadd.f32 %v3952_v40, %v3560_v31  ;;  %v3559_v15 = vmul.f32 %v5314_v7, %v7742_v35  ;;  %5335 = vpow2.f32 %v4558_v39  ;;  %v7869_v29 = vadd.f32 %v9812_v49, %v7278_v12  ;;  %v7871_v40 = vpop.f32.mrb[88].mxu1  ;;  %v9817_v49 = vld [vmem:[#allocation88_spill] sm:$0xff] }
 0x1d5   : > { %v5318_v55 = vpop.eup %5317  ;;  %5337 = vrcp.f32 %v2611_v1  ;;  %v2618_v63 = vadd.f32 1.0, %v5316_v36  ;;  %9813 = vst [vmem:[#allocation93_spill] sm:$0xff] %v7871_v40  ;;  %v7873_v35 = vpop.f32.mrb[88].mxu0  ;;  %v4569_v36 = vmul.f32 -1.442695, %v7864_v4 }
 0x1d6   : > { %v5320_v33 = vpop.eup %5319  ;;  %v3916_v46 = vadd.f32 %v3915_v54, %v3559_v15  ;;  %v2620_v37 = vadd.f32 1.0, %v5318_v55  ;;  %5339 = vpow2.f32 %v4560_v9  ;;  %9814 = vst [vmem:[#allocation69_spill] sm:$0xff] %v7873_v35  ;;  %v9815_v54 = vld [vmem:[#allocation87_spill] sm:$0xff]  ;;  %v7881_v15 = vpop.f32.mrb[89].mxu1  ;;  %v7885_v35 = vadd.f32 %v9817_v49, %v7186_v34 }
 0x1d7   : > { %v5322_v39 = vpop.eup %5321  ;;  %5341 = vrcp.f32 %v2618_v63  ;;  %v2619_v31 = vadd.f32 1.0, %v5320_v33  ;;  %v7879_v9 = vadd.f32 %v9815_v54, %v7286_v3  ;;  %9816 = vst [vmem:[#allocation85_spill] sm:$0xff] %v7881_v15  ;;  %v7887_v63 = vpop.f32.mrb[89].mxu0  ;;  %v9819_v15 = vld [vmem:[#allocation89_spill] sm:$0xff] }
 0x1d8   : > { %v5324_v7 = vpop.eup %5323  ;;  %v3561_v1 = vmul.f32 %v5322_v39, %v7752_v2  ;;  %5343 = vrcp.f32 %v2620_v37  ;;  %9818 = vst [vmem:[#allocation6_spill] sm:$0xff] %v7887_v63  ;;  %v4568_v39 = vmul.f32 -1.442695, %v7869_v29 }
 0x1d9   : > { %v5326_v60 = vpop.eup %5325  ;;  %5345 = vrcp.f32 %v2619_v31  ;;  %v2621_v55 = vadd.f32 1.0, %v5324_v7  ;;  %v7893_v31 = vadd.f32 %v9819_v15, %v7275_v17  ;;  %v4570_v63 = vmul.f32 -1.442695, %v7879_v9 }
 0x1da   : > { %v5328_v33 = vpop.eup %5327  ;;  %v3990_v2 = vadd.f32 %v3989_v10, %v3561_v1  ;;  %v3568_v37 = vmul.f32 %v5326_v60, %v7762_v48  ;;  %5347 = vpow2.f32 %v4567_v19  ;;  %v7897_v10 = vpop.f32.mrb[90].mxu1  ;;  %v9821_v1 = vld [vmem:[#allocation90_spill] sm:$0xff] }
 0x1db   : > { %v5330_v54 = vpop.eup %5329  ;;  %5349 = vrcp.f32 %v2621_v55  ;;  %v2628_v40 = vadd.f32 1.0, %v5328_v33  ;;  %9820 = vst [vmem:[#allocation7_spill] sm:$0xff] %v7897_v10  ;;  %v7901_v60 = vadd.f32 %v9821_v1, %v7278_v12  ;;  %v9822_v55 = vld [vmem:[#allocation91_spill] sm:$0xff]  ;;  %v7907_v33 = vpop.f32.mrb[90].mxu0 }
 0x1dc   : > { %v5332_v7 = vpop.eup %5331  ;;  %v3880_v41 = vadd.f32 %v3879_v22, %v3568_v37  ;;  %v3570_v49 = vmul.f32 %v5330_v54, %v7769_v23  ;;  %5351 = vpow2.f32 %v4569_v36  ;;  %v7905_v15 = vadd.f32 %v9822_v55, %v7286_v3  ;;  %9823 = vst [vmem:[#allocation21_spill] sm:$0xff] %v7907_v33  ;;  %v9824_v55 = vld [vmem:[#allocation3_spill] sm:$0xff] }
 0x1dd   : > { %v5334_v48 = vpop.eup %5333  ;;  %5353 = vrcp.f32 %v2628_v40  ;;  %v2630_v19 = vadd.f32 1.0, %v5332_v7  ;;  %v4577_v37 = vmul.f32 -1.442695, %v7885_v35  ;;  %v4579_v7 = vmul.f32 -1.442695, %v7893_v31 }
 0x1de   : > { %v5336_v22 = vpop.eup %5335  ;;  %v3954_v23 = vadd.f32 %v3953_v44, %v3570_v49  ;;  %v3569_v36 = vmul.f32 %v5334_v48, %v7777_v28  ;;  %5355 = vpow2.f32 %v4568_v39  ;;  %v7915_v33 = vadd.f32 %v9824_v55, %v7186_v34  ;;  %v7917_v44 = vpop.f32.mrb[91].mxu1 }
 0x1df   : > { %v5338_v54 = vpop.eup %5337  ;;  %5357 = vrcp.f32 %v2630_v19  ;;  %v2629_v40 = vadd.f32 1.0, %v5336_v22  ;;  %9825 = vst [vmem:[#allocation9_spill] sm:$0xff] %v7917_v44  ;;  %v4578_v49 = vmul.f32 -1.442695, %v7901_v60  ;;  %v4580_v48 = vmul.f32 -1.442695, %v7905_v15 }
 0x1e0   : > { %v5340_v1 = vpop.eup %5339  ;;  %v3917_v10 = vadd.f32 %v3916_v46, %v3569_v36  ;;  %v3571_v42 = vmul.f32 %v5338_v54, %v7781_v43  ;;  %5359 = vpow2.f32 %v4570_v63  ;;  %v7921_v19 = vpop.f32.mrb[91].mxu0  ;;  %v9827_v63 = vld [vmem:[#allocation13_spill] sm:$0xff] }
 0x1e1   : > { %v5342_v28 = vpop.eup %5341  ;;  %5361 = vrcp.f32 %v2629_v40  ;;  %v2631_v39 = vadd.f32 1.0, %v5340_v1  ;;  %9826 = vst [vmem:[#allocation8_spill] sm:$0xff] %v7921_v19  ;;  %v7926_v36 = vadd.f32 %v9827_v63, %v7275_v17  ;;  %v9828_v40 = vld [vmem:[#allocation4_spill] sm:$0xff] }
 0x1e2   : > { %v5344_v22 = vpop.eup %5343  ;;  %v3991_v46 = vadd.f32 %v3990_v2, %v3571_v42  ;;  %v3578_v43 = vmul.f32 %v5342_v28, %v7789_v16  ;;  %5363 = vpow2.f32 %v4577_v37  ;;  %v7931_v1 = vadd.f32 %v9828_v40, %v7278_v12  ;;  %v9829_v28 = vld [vmem:[#allocation15_spill] sm:$0xff] }
 0x1e3   : > { %v5346_v54 = vpop.eup %5345  ;;  %v3580_v55 = vmul.f32 %v5344_v22, %v7798_v20  ;;  %5365 = vrcp.f32 %v2631_v39  ;;  %v4587_v16 = vmul.f32 -1.442695, %v7915_v33  ;;  %v7937_v63 = vadd.f32 %v9829_v28, %v7286_v3 }
 0x1e4   : > { %v5348_v44 = vpop.eup %5347  ;;  %v3881_v14 = vadd.f32 %v3880_v41, %v3578_v43  ;;  %v3579_v19 = vmul.f32 %v5346_v54, %v7803_v51  ;;  %5367 = vpow2.f32 %v4579_v7  ;;  %v4589_v41 = vmul.f32 -1.442695, %v7926_v36  ;;  %v7942_v54 = vpop.f32.mrb[92].mxu1 }
 0x1e5   : > { %v5350_v42 = vpop.eup %5349  ;;  %v3955_v2 = vadd.f32 %v3954_v23, %v3580_v55  ;;  %v2638_v37 = vadd.f32 1.0, %v5348_v44  ;;  %5369 = vpow2.f32 %v4578_v49  ;;  %v4588_v7 = vmul.f32 -1.442695, %v7931_v1  ;;  %9830 = vst [vmem:[#allocation25_spill] sm:$0xff] %v7942_v54  ;;  %v7944_v23 = vpop.f32.mrb[92].mxu0 }
 0x1e6   : > { %v5352_v20 = vpop.eup %5351  ;;  %v3918_v39 = vadd.f32 %v3917_v10, %v3579_v19  ;;  %v3581_v22 = vmul.f32 %v5350_v42, %v7809_v38  ;;  %5371 = vpow2.f32 %v4580_v48  ;;  %9831 = vst [vmem:[#allocation10_spill] sm:$0xff] %v7944_v23  ;;  %v9832_v10 = vld [vmem:[#allocation5_spill] sm:$0xff]  ;;  %v7951_v48 = vpop.f32.mrb[93].mxu1 }
 0x1e7   : > { %v5354_v43 = vpop.eup %5353  ;;  %5373 = vrcp.f32 %v2638_v37  ;;  %v2640_v51 = vadd.f32 1.0, %v5352_v20  ;;  %v7949_v38 = vadd.f32 %v9832_v10, %v7186_v34  ;;  %9833 = vst [vmem:[#allocation70_spill] sm:$0xff] %v7951_v48  ;;  %v7953_v19 = vpop.f32.mrb[93].mxu0 }
 0x1e8   : > { %v5356_v44 = vpop.eup %5355  ;;  %v3992_v49 = vadd.f32 %v3991_v46, %v3581_v22  ;;  %v3588_v55 = vmul.f32 %v5354_v43, %v7814_v47  ;;  %5375 = vpow2.f32 %v4587_v16  ;;  %9834 = vst [vmem:[#allocation27_spill] sm:$0xff] %v7953_v19  ;;  %v4590_v46 = vmul.f32 -1.442695, %v7937_v63  ;;  %v7957_v47 = vpop.f32.mrb[94].mxu1  ;;  %v9836_v43 = vld [vmem:[#allocation17_spill] sm:$0xff] }
 0x1e9   : > { %v5358_v40 = vpop.eup %5357  ;;  %5377 = vrcp.f32 %v2640_v51  ;;  %v2639_v42 = vadd.f32 1.0, %v5356_v44  ;;  %9835 = vst [vmem:[#allocation72_spill] sm:$0xff] %v7957_v47  ;;  %v7961_v10 = vadd.f32 %v9836_v43, %v7275_v17  ;;  %v7963_v19 = vpop.f32.mrb[94].mxu0 }
 0x1ea   : > { %v5360_v37 = vpop.eup %5359  ;;  %v3882_v28 = vadd.f32 %v3881_v14, %v3588_v55  ;;  %v3590_v20 = vmul.f32 %v5358_v40, %v7825_v26  ;;  %5379 = vpow2.f32 %v4589_v41  ;;  %9837 = vst [vmem:[#allocation33_spill] sm:$0xff] %v7963_v19  ;;  %v4597_v26 = vmul.f32 -1.442695, %v7949_v38  ;;  %v7972_v19 = vpop.f32.mrb[95].mxu1 }
 0x1eb   : > { %v5362_v16 = vpop.eup %5361  ;;  %5381 = vrcp.f32 %v2639_v42  ;;  %v2641_v22 = vadd.f32 1.0, %v5360_v37  ;;  %v9838_v37 = vld [vmem:[#allocation19_spill] sm:$0xff]  ;;  %9839 = vst [vmem:[#allocation14_spill] sm:$0xff] %v7972_v19 }
 0x1ec   : > { %v5364_v51 = vpop.eup %5363  ;;  %v3956_v44 = vadd.f32 %v3955_v2, %v3590_v20  ;;  %v3589_v14 = vmul.f32 %v5362_v16, %v7841_v6  ;;  %5383 = vpow2.f32 %v4588_v7  ;;  %v7970_v43 = vadd.f32 %v9838_v37, %v7278_v12 }
 0x1ed   : > { %v5366_v41 = vpop.eup %5365  ;;  %5385 = vrcp.f32 %v2641_v22  ;;  %v2648_v55 = vadd.f32 1.0, %v5364_v51  ;;  %v4599_v7 = vmul.f32 -1.442695, %v7961_v10 }
 0x1ee   : > { %v5368_v40 = vpop.eup %5367  ;;  %v3919_v47 = vadd.f32 %v3918_v39, %v3589_v14  ;;  %v3591_v42 = vmul.f32 %v5366_v41, %v7847_v5  ;;  %5387 = vpow2.f32 %v4590_v46  ;;  %v9840_v39 = vld [vmem:[#allocation20_spill] sm:$0xff]  ;;  %v7979_v14 = vpop.f32.mrb[95].mxu0 }
 0x1ef   : > { %v5370_v2 = vpop.eup %5369  ;;  %5389 = vrcp.f32 %v2648_v55  ;;  %v2650_v6 = vadd.f32 1.0, %v5368_v40  ;;  %v7977_v51 = vadd.f32 %v9840_v39, %v7286_v3  ;;  %9841 = vst [vmem:[#allocation77_spill] sm:$0xff] %v7979_v14  ;;  %v4598_v55 = vmul.f32 -1.442695, %v7970_v43  ;;  %v9842_v40 = vld [vmem:[#allocation11_spill] sm:$0xff] }
 0x1f0   : > { %v5372_v20 = vpop.eup %5371  ;;  %v3993_v16 = vadd.f32 %v3992_v49, %v3591_v42  ;;  %v2649_v22 = vadd.f32 1.0, %v5370_v2  ;;  %5391 = vpow2.f32 %v4597_v26  ;;  %v7985_v49 = vadd.f32 %v9842_v40, %v7186_v34  ;;  %v9843_v2 = vld [vmem:[#allocation28_spill] sm:$0xff] }
 0x1f1   : > { %v5374_v5 = vpop.eup %5373  ;;  %5393 = vrcp.f32 %v2650_v6  ;;  %v2651_v46 = vadd.f32 1.0, %v5372_v20  ;;  %v7989_v39 = vadd.f32 %v9843_v2, %v7275_v17  ;;  %v9844_v40 = vld [vmem:[#allocation12_spill] sm:$0xff] }
 0x1f2   : > { %v5376_v41 = vpop.eup %5375  ;;  %v3598_v37 = vmul.f32 %v5374_v5, %v7857_v50  ;;  %5395 = vrcp.f32 %v2649_v22  ;;  %v4600_v50 = vmul.f32 -1.442695, %v7977_v51  ;;  %v7995_v19 = vadd.f32 %v9844_v40, %v7278_v12 }
 0x1f3   : > { %v5378_v26 = vpop.eup %5377  ;;  %5397 = vrcp.f32 %v2651_v46  ;;  %v2658_v42 = vadd.f32 1.0, %v5376_v41  ;;  %v4607_v2 = vmul.f32 -1.442695, %v7985_v49 }
 0x1f4   : > { %v5380_v6 = vpop.eup %5379  ;;  %v3883_v20 = vadd.f32 %v3882_v28, %v3598_v37  ;;  %v3600_v14 = vmul.f32 %v5378_v26, %v7864_v4  ;;  %5399 = vpow2.f32 %v4599_v7  ;;  %v4609_v7 = vmul.f32 -1.442695, %v7989_v39  ;;  %v9845_v37 = vld [vmem:[#allocation31_spill] sm:$0xff] }
 0x1f5   : > { %v5382_v22 = vpop.eup %5381  ;;  %5401 = vrcp.f32 %v2658_v42  ;;  %v2660_v5 = vadd.f32 1.0, %v5380_v6  ;;  %v8002_v26 = vadd.f32 %v9845_v37, %v7286_v3 }
 0x1f6   : > { %v5384_v46 = vpop.eup %5383  ;;  %v3957_v41 = vadd.f32 %v3956_v44, %v3600_v14  ;;  %v3599_v48 = vmul.f32 %v5382_v22, %v7869_v29  ;;  %5403 = vpow2.f32 %v4598_v55  ;;  %v9846_v44 = vld [vmem:[#allocation16_spill] sm:$0xff]  ;;  %v8009_v14 = vpop.f32.mrb[96].mxu1 }
 0x1f7   : > { %v5386_v28 = vpop.eup %5385  ;;  %5405 = vrcp.f32 %v2660_v5  ;;  %v2659_v4 = vadd.f32 1.0, %v5384_v46  ;;  %v8007_v29 = vadd.f32 %v9846_v44, %v7186_v34  ;;  %9847 = vst [vmem:[#allocation35_spill] sm:$0xff] %v8009_v14  ;;  %v8011_v55 = vpop.f32.mrb[96].mxu0  ;;  %v4608_v46 = vmul.f32 -1.442695, %v7995_v19 }
 0x1f8   : > { %v5388_v42 = vpop.eup %5387  ;;  %v3920_v6 = vadd.f32 %v3919_v47, %v3599_v48  ;;  %v3601_v40 = vmul.f32 %v5386_v28, %v7879_v9  ;;  %5407 = vpow2.f32 %v4600_v50  ;;  %9848 = vst [vmem:[#allocation81_spill] sm:$0xff] %v8011_v55  ;;  %v8014_v37 = vpop.f32.mrb[97].mxu1  ;;  %v9850_v47 = vld [vmem:[#allocation32_spill] sm:$0xff] }
 0x1f9   : > { %v5390_v22 = vpop.eup %5389  ;;  %5409 = vrcp.f32 %v2659_v4  ;;  %v2661_v5 = vadd.f32 1.0, %v5388_v42  ;;  %9849 = vst [vmem:[#allocation82_spill] sm:$0xff] %v8014_v37  ;;  %v8019_v50 = vadd.f32 %v9850_v47, %v7275_v17  ;;  %v8021_v28 = vpop.f32.mrb[97].mxu0  ;;  %v4610_v4 = vmul.f32 -1.442695, %v8002_v26  ;;  %v9852_v42 = vld [vmem:[#allocation34_spill] sm:$0xff] }
 0x1fa   : > { %v5392_v23 = vpop.eup %5391  ;;  %v3994_v48 = vadd.f32 %v3993_v16, %v3601_v40  ;;  %v3608_v9 = vmul.f32 %v5390_v22, %v7885_v35  ;;  %5411 = vpow2.f32 %v4607_v2  ;;  %9851 = vst [vmem:[#allocation54_spill] sm:$0xff] %v8021_v28  ;;  %v8026_v14 = vadd.f32 %v9852_v42, %v7278_v12  ;;  %v8030_v40 = vpop.f32.mrb[98].mxu1 }
 0x1fb   : > { %v5394_v44 = vpop.eup %5393  ;;  %5413 = vrcp.f32 %v2661_v5  ;;  %v2668_v55 = vadd.f32 1.0, %v5392_v23  ;;  %v4617_v2 = vmul.f32 -1.442695, %v8007_v29  ;;  %9853 = vst [vmem:[#allocation55_spill] sm:$0xff] %v8030_v40  ;;  %v8032_v22 = vpop.f32.mrb[98].mxu0  ;;  %v9855_v5 = vld [vmem:[#allocation36_spill] sm:$0xff] }
 0x1fc   : > { %v5396_v37 = vpop.eup %5395  ;;  %v3884_v16 = vadd.f32 %v3883_v20, %v3608_v9  ;;  %v3610_v35 = vmul.f32 %v5394_v44, %v7893_v31  ;;  %5415 = vpow2.f32 %v4609_v7  ;;  %9854 = vst [vmem:[#allocation56_spill] sm:$0xff] %v8032_v22  ;;  %v8037_v28 = vadd.f32 %v9855_v5, %v7286_v3  ;;  %v8041_v7 = vpop.f32.mrb[99].mxu1 }
 0x1fd   : > { %v5398_v47 = vpop.eup %5397  ;;  %v3609_v23 = vmul.f32 %v5396_v37, %v7901_v60  ;;  %5417 = vrcp.f32 %v2668_v55  ;;  %v4619_v31 = vmul.f32 -1.442695, %v8019_v50  ;;  %v4618_v60 = vmul.f32 -1.442695, %v8026_v14  ;;  %v8044_v55 = vpop.f32.mrb[99].mxu0 }
 0x1fe   : > { %v5400_v42 = vpop.eup %5399  ;;  %v3958_v54 = vadd.f32 %v3957_v41, %v3610_v35  ;;  %v3611_v20 = vmul.f32 %v5398_v47, %v7905_v15  ;;  %5419 = vpow2.f32 %v4608_v46  ;;  %v9856_v15 = vld [vmem:[#allocation38_spill] sm:$0xff] }
 0x1ff   : > { %v5402_v9 = vpop.eup %5401  ;;  %v3921_v44 = vadd.f32 %v3920_v6, %v3609_v23  ;;  %v2670_v22 = vadd.f32 1.0, %v5400_v42  ;;  %5421 = vpow2.f32 %v4610_v4  ;;  %v8049_v41 = vadd.f32 %v9856_v15, %v7186_v34  ;;  %v9857_v42 = vld [vmem:[#allocation23_spill] sm:$0xff] }
 0x200   : > { %v5404_v37 = vpop.eup %5403  ;;  %v3995_v5 = vadd.f32 %v3994_v48, %v3611_v20  ;;  %v3618_v40 = vmul.f32 %v5402_v9, %v7915_v33  ;;  %5423 = vpow2.f32 %v4617_v2  ;;  %v4620_v6 = vmul.f32 -1.442695, %v8037_v28 }
 0x201   : > { %v5406_v46 = vpop.eup %5405  ;;  %5425 = vrcp.f32 %v2670_v22  ;;  %v2669_v35 = vadd.f32 1.0, %v5404_v37  ;;  %v8055_v48 = vadd.f32 %v9857_v42, %v7275_v17  ;;  %v4627_v22 = vmul.f32 -1.442695, %v8049_v41 }
 0x202   : > { %v5408_v47 = vpop.eup %5407  ;;  %v3885_v4 = vadd.f32 %v3884_v16, %v3618_v40  ;;  %v3620_v23 = vmul.f32 %v5406_v46, %v7926_v36  ;;  %5427 = vpow2.f32 %v4619_v31  ;;  %v9858_v36 = vld [vmem:[#allocation40_spill] sm:$0xff] }
 0x203   : > { %v5410_v33 = vpop.eup %5409  ;;  %5429 = vrcp.f32 %v2669_v35  ;;  %v2671_v2 = vadd.f32 1.0, %v5408_v47  ;;  %v8061_v40 = vadd.f32 %v9858_v36, %v7278_v12  ;;  %v4629_v35 = vmul.f32 -1.442695, %v8055_v48 }
 0x204   : > { %v5412_v20 = vpop.eup %5411  ;;  %v3959_v9 = vadd.f32 %v3958_v54, %v3620_v23  ;;  %v3619_v15 = vmul.f32 %v5410_v33, %v7931_v1  ;;  %5431 = vpow2.f32 %v4618_v60  ;;  %v8065_v54 = vpop.f32.mrb[100].mxu1 }
 0x205   : > { %v5414_v37 = vpop.eup %5413  ;;  %5433 = vrcp.f32 %v2671_v2  ;;  %v2678_v16 = vadd.f32 1.0, %v5412_v20  ;;  %v8067_v1 = vpop.f32.mrb[100].mxu0 }
 0x206   : > { %v5416_v31 = vpop.eup %5415  ;;  %v3922_v46 = vadd.f32 %v3921_v44, %v3619_v15  ;;  %v3621_v42 = vmul.f32 %v5414_v37, %v7937_v63  ;;  %5435 = vpow2.f32 %v4620_v6  ;;  %v8069_v23 = vpop.f32.mrb[101].mxu1  ;;  %v8076_v63 = vadd.f32 %v7542_v25, %v7286_v3 }
 0x207   : > { %v5418_v60 = vpop.eup %5417  ;;  %5437 = vrcp.f32 %v2678_v16  ;;  %v2680_v47 = vadd.f32 1.0, %v5416_v31  ;;  %9859 = vst [vmem:[#allocation57_spill] sm:$0xff] %v8069_v23  ;;  %v8071_v33 = vpop.f32.mrb[101].mxu0  ;;  %v4628_v37 = vmul.f32 -1.442695, %v8061_v40 }
 0x208   : > { %9860 = vst [vmem:[#allocation58_spill] sm:$0xff] %v8071_v33  ;;  %v5420_v2 = vpop.eup %5419  ;;  %v3996_v20 = vadd.f32 %v3995_v5, %v3621_v42  ;;  %v3628_v44 = vmul.f32 %v5418_v60, %v7949_v38  ;;  %5439 = vpow2.f32 %v4627_v22  ;;  %v9861_v33 = vld [vmem:[#allocation24_spill] sm:$0xff]  ;;  %v9862_v22 = vld [vmem:[#allocation41_spill] sm:$0xff] }
 0x209   : > { %v5422_v6 = vpop.eup %5421  ;;  %5441 = vrcp.f32 %v2680_v47  ;;  %v2679_v15 = vadd.f32 1.0, %v5420_v2  ;;  %v8081_v23 = vadd.f32 %v9861_v33, %v7186_v34  ;;  %v8085_v25 = vadd.f32 %v9862_v22, %v7275_v17 }
 0x20a   : > { %v5424_v16 = vpop.eup %5423  ;;  %v3886_v36 = vadd.f32 %v3885_v4, %v3628_v44  ;;  %v2681_v31 = vadd.f32 1.0, %v5422_v6  ;;  %5443 = vpow2.f32 %v4629_v35  ;;  %v4630_v47 = vmul.f32 -1.442695, %v8076_v63 }
 0x20b   : > { %v5426_v5 = vpop.eup %5425  ;;  %5445 = vrcp.f32 %v2679_v15  ;;  %v2688_v38 = vadd.f32 1.0, %v5424_v16  ;;  %v8091_v33 = vadd.f32 %v7580_v27, %v7278_v12  ;;  %v4637_v15 = vmul.f32 -1.442695, %v8081_v23  ;;  %v9863_v27 = vld [vmem:[#allocation26_spill] sm:$0xff] }
 0x20c   : > { %v5428_v42 = vpop.eup %5427  ;;  %v3630_v60 = vmul.f32 %v5426_v5, %v7961_v10  ;;  %5447 = vrcp.f32 %v2681_v31  ;;  %v4639_v31 = vmul.f32 -1.442695, %v8085_v25 }
 0x20d   : > { %v5430_v4 = vpop.eup %5429  ;;  %5449 = vrcp.f32 %v2688_v38  ;;  %v2690_v35 = vadd.f32 1.0, %v5428_v42  ;;  %v8099_v42 = vadd.f32 %v9863_v27, %v7286_v3 }
 0x20e   : > { %v5432_v2 = vpop.eup %5431  ;;  %v3960_v44 = vadd.f32 %v3959_v9, %v3630_v60  ;;  %v3629_v6 = vmul.f32 %v5430_v4, %v7970_v43  ;;  %5451 = vpow2.f32 %v4628_v37  ;;  %v4638_v37 = vmul.f32 -1.442695, %v8091_v33 }
 0x20f   : > { %v5434_v16 = vpop.eup %5433  ;;  %5453 = vrcp.f32 %v2690_v35  ;;  %v2689_v10 = vadd.f32 1.0, %v5432_v2  ;;  %v8104_v60 = vadd.f32 %v7616_v8, %v7186_v34 }
 0x210   : > { %v5436_v5 = vpop.eup %5435  ;;  %v3923_v22 = vadd.f32 %v3922_v46, %v3629_v6  ;;  %v3631_v38 = vmul.f32 %v5434_v16, %v7977_v51  ;;  %5455 = vpow2.f32 %v4630_v47  ;;  %v8109_v51 = vadd.f32 %v7618_v30, %v7275_v17 }
 0x211   : > { %v5438_v9 = vpop.eup %5437  ;;  %5457 = vrcp.f32 %v2689_v10  ;;  %v2691_v43 = vadd.f32 1.0, %v5436_v5  ;;  %v8113_v6 = vadd.f32 %v7621_v32, %v7278_v12  ;;  %v4647_v30 = vmul.f32 -1.442695, %v8104_v60 }
 0x212   : > { %v5440_v4 = vpop.eup %5439  ;;  %v3997_v35 = vadd.f32 %v3996_v20, %v3631_v38  ;;  %v3638_v46 = vmul.f32 %v5438_v9, %v7985_v49  ;;  %5459 = vpow2.f32 %v4637_v15  ;;  %v4640_v20 = vmul.f32 -1.442695, %v8099_v42 }
 0x213   : > { %v5442_v47 = vpop.eup %5441  ;;  %5461 = vrcp.f32 %v2691_v43  ;;  %v2698_v2 = vadd.f32 1.0, %v5440_v4  ;;  %v8120_v5 = vadd.f32 %v7623_v11, %v7286_v3  ;;  %v4648_v4 = vmul.f32 -1.442695, %v8113_v6 }
 0x214   : > { %v5444_v16 = vpop.eup %5443  ;;  %v3887_v10 = vadd.f32 %v3886_v36, %v3638_v46  ;;  %v3640_v8 = vmul.f32 %v5442_v47, %v7989_v39  ;;  %5463 = vpow2.f32 %v4639_v31  ;;  %v4649_v36 = vmul.f32 -1.442695, %v8109_v51  ;;  %v8124_v39 = vpop.f32.mrb[102].mxu1 }
 0x215   : > { %v5446_v49 = vpop.eup %5445  ;;  %5465 = vrcp.f32 %v2698_v2  ;;  %v2700_v15 = vadd.f32 1.0, %v5444_v16  ;;  %v8126_v31 = vpop.f32.mrb[102].mxu0  ;;  %v4650_v16 = vmul.f32 -1.442695, %v8120_v5 }
 0x216   : > { %v5448_v38 = vpop.eup %5447  ;;  %v3961_v27 = vadd.f32 %v3960_v44, %v3640_v8  ;;  %v3639_v32 = vmul.f32 %v5446_v49, %v7995_v19  ;;  %5467 = vpow2.f32 %v4638_v37  ;;  %v8133_v19 = vadd.f32 %v7629_v53, %v7186_v34  ;;  %v8136_v8 = vpop.f32.mrb[103].mxu1 }
 0x217   : > { %v5450_v9 = vpop.eup %5449  ;;  %v3641_v43 = vmul.f32 %v5448_v38, %v8002_v26  ;;  %5469 = vrcp.f32 %v2700_v15 }
 0x218   : > { %v5452_v46 = vpop.eup %5451  ;;  %v3924_v11 = vadd.f32 %v3923_v22, %v3639_v32  ;;  %v3648_v47 = vmul.f32 %v5450_v9, %v8007_v29  ;;  %5471 = vpow2.f32 %v4640_v20  ;;  %v8141_v29 = vadd.f32 %v7632_v57, %v7275_v17  ;;  %v8143_v22 = vpop.f32.mrb[103].mxu0 }
 0x219   : > { %v5454_v44 = vpop.eup %5453  ;;  %v3998_v37 = vadd.f32 %v3997_v35, %v3641_v43  ;;  %v2699_v2 = vadd.f32 1.0, %v5452_v46  ;;  %5473 = vpow2.f32 %v4647_v30  ;;  %v8147_v20 = vadd.f32 %v7645_v24, %v7278_v12 }
 0x21a   : > { %v5456_v26 = vpop.eup %5455  ;;  %v3888_v49 = vadd.f32 %v3887_v10, %v3648_v47  ;;  %v3650_v15 = vmul.f32 %v5454_v44, %v8019_v50  ;;  %5475 = vpow2.f32 %v4649_v36  ;;  %v4657_v50 = vmul.f32 -1.442695, %v8133_v19 }
 0x21b   : > { %v5458_v53 = vpop.eup %5457  ;;  %5477 = vrcp.f32 %v2699_v2  ;;  %v2701_v35 = vadd.f32 1.0, %v5456_v26  ;;  %v4659_v46 = vmul.f32 -1.442695, %v8141_v29  ;;  %v8157_v2 = vadd.f32 %v7650_v13, %v7286_v3  ;;  %v8161_v26 = vpop.f32.mrb[104].mxu0 }
 0x21c   : > { %v5460_v30 = vpop.eup %5459  ;;  %v3962_v38 = vadd.f32 %v3961_v27, %v3650_v15  ;;  %v3649_v10 = vmul.f32 %v5458_v53, %v8026_v14  ;;  %5479 = vpow2.f32 %v4648_v4  ;;  %v4658_v27 = vmul.f32 -1.442695, %v8147_v20  ;;  %v8170_v13 = vpop.f32.mrb[105].mxu0 }
 0x21d   : > { %v5462_v32 = vpop.eup %5461  ;;  %5481 = vrcp.f32 %v2701_v35  ;;  %v2708_v57 = vadd.f32 1.0, %v5460_v30 }
 0x21e   : > { %v5464_v36 = vpop.eup %5463  ;;  %v3925_v9 = vadd.f32 %v3924_v11, %v3649_v10  ;;  %v3651_v43 = vmul.f32 %v5462_v32, %v8037_v28  ;;  %5483 = vpow2.f32 %v4650_v16  ;;  %v8159_v16 = vpop.f32.mrb[104].mxu1 }
 0x21f   : > { %v5466_v47 = vpop.eup %5465  ;;  %5485 = vrcp.f32 %v2708_v57  ;;  %v2710_v24 = vadd.f32 1.0, %v5464_v36  ;;  %v8179_v36 = vpop.f32.mrb[106].mxu0 }
 0x220   : > { %v5468_v44 = vpop.eup %5467  ;;  %v3999_v14 = vadd.f32 %v3998_v37, %v3651_v43  ;;  %v3658_v4 = vmul.f32 %v5466_v47, %v8049_v41  ;;  %5487 = vpow2.f32 %v4657_v50  ;;  %v8166_v41 = vadd.f32 %v7685_v62, %v7186_v34  ;;  %v8168_v37 = vpop.f32.mrb[105].mxu1 }
 0x221   : > { %v5470_v11 = vpop.eup %5469  ;;  %5489 = vrcp.f32 %v2710_v24  ;;  %v2709_v28 = vadd.f32 1.0, %v5468_v44  ;;  %v8174_v50 = vadd.f32 %v7687_v52, %v7275_v17  ;;  %v8176_v32 = vpop.f32.mrb[106].mxu1  ;;  %v4660_v62 = vmul.f32 -1.442695, %v8157_v2 }
 0x222   : > { %v5472_v15 = vpop.eup %5471  ;;  %v3889_v53 = vadd.f32 %v3888_v49, %v3658_v4  ;;  %v3660_v35 = vmul.f32 %v5470_v11, %v8055_v48  ;;  %5491 = vpow2.f32 %v4659_v46  ;;  %v4667_v52 = vmul.f32 -1.442695, %v8166_v41  ;;  %v8191_v11 = vpop.f32.mrb[107].mxu1 }
 0x223   : > { %v5474_v30 = vpop.eup %5473  ;;  %5493 = vrcp.f32 %v2709_v28  ;;  %v2711_v10 = vadd.f32 1.0, %v5472_v15  ;;  %v8185_v44 = vadd.f32 %v7689_v61, %v7278_v12  ;;  %v8189_v4 = vadd.f32 %v7691_v56, %v7286_v3 }
 0x224   : > { %v5476_v49 = vpop.eup %5475  ;;  %v3963_v48 = vadd.f32 %v3962_v38, %v3660_v35  ;;  %v2718_v57 = vadd.f32 1.0, %v5474_v30  ;;  %5495 = vpow2.f32 %v4658_v27  ;;  %v4669_v35 = vmul.f32 -1.442695, %v8174_v50  ;;  %v8195_v30 = vpop.f32.mrb[107].mxu0 }
 0x225   : > { %v5478_v43 = vpop.eup %5477  ;;  %5497 = vrcp.f32 %v2711_v10  ;;  %v2720_v46 = vadd.f32 1.0, %v5476_v49  ;;  %v8199_v49 = vadd.f32 %v7705_v0, %v7186_v34 }
 0x226   : > { %v5480_v47 = vpop.eup %5479  ;;  %v3659_v24 = vmul.f32 %v5478_v43, %v8061_v40  ;;  %5499 = vrcp.f32 %v2718_v57 }
 0x227   : > { %v5482_v38 = vpop.eup %5481  ;;  %5501 = vrcp.f32 %v2720_v46  ;;  %v2719_v27 = vadd.f32 1.0, %v5480_v47  ;;  %v4670_v46 = vmul.f32 -1.442695, %v8189_v4  ;;  %v8206_v47 = vadd.f32 %v7708_v18, %v7275_v17 }
 0x228   : > { %v5484_v28 = vpop.eup %5483  ;;  %v3926_v15 = vadd.f32 %v3925_v9, %v3659_v24  ;;  %v3661_v40 = vmul.f32 %v5482_v38, %v8076_v63  ;;  %5503 = vpow2.f32 %v4660_v62  ;;  %v4668_v9 = vmul.f32 -1.442695, %v8185_v44 }
 0x229   : > { %v5486_v61 = vpop.eup %5485  ;;  %5505 = vrcp.f32 %v2719_v27  ;;  %v2721_v10 = vadd.f32 1.0, %v5484_v28  ;;  %v8215_v27 = vadd.f32 %v7722_v21, %v7286_v3  ;;  %v8226_v21 = vpop.f32.mrb[108].mxu0 }
 0x22a   : > { %v5488_v56 = vpop.eup %5487  ;;  %v4000_v57 = vadd.f32 %v3999_v14, %v3661_v40  ;;  %v3668_v43 = vmul.f32 %v5486_v61, %v8081_v23  ;;  %5507 = vpow2.f32 %v4667_v52  ;;  %v8211_v23 = vadd.f32 %v7720_v58, %v7278_v12 }
 0x22b   : > { %v5490_v63 = vpop.eup %5489  ;;  %5509 = vrcp.f32 %v2721_v10  ;;  %v2728_v62 = vadd.f32 1.0, %v5488_v56  ;;  %v4679_v58 = vmul.f32 -1.442695, %v8206_v47  ;;  %v8222_v61 = vadd.f32 %v7746_v45, %v7186_v34  ;;  %v8224_v10 = vpop.f32.mrb[108].mxu1 }
 0x22c   : > { %v5492_v24 = vpop.eup %5491  ;;  %v3890_v38 = vadd.f32 %v3889_v53, %v3668_v43  ;;  %v3670_v0 = vmul.f32 %v5490_v63, %v8085_v25  ;;  %5511 = vpow2.f32 %v4669_v35  ;;  %v4677_v53 = vmul.f32 -1.442695, %v8199_v49 }
 0x22d   : > { %v5494_v14 = vpop.eup %5493  ;;  %5513 = vrcp.f32 %v2728_v62  ;;  %v2730_v52 = vadd.f32 1.0, %v5492_v24  ;;  %v4678_v43 = vmul.f32 -1.442695, %v8211_v23  ;;  %v4680_v62 = vmul.f32 -1.442695, %v8215_v27  ;;  %v8232_v24 = vpop.f32.mrb[109].mxu1 }
 0x22e   : > { %v5496_v28 = vpop.eup %5495  ;;  %v3964_v40 = vadd.f32 %v3963_v48, %v3670_v0  ;;  %v3669_v18 = vmul.f32 %v5494_v14, %v8091_v33  ;;  %5515 = vpow2.f32 %v4668_v9 }
 0x22f   : > { %v5498_v25 = vpop.eup %5497  ;;  %5517 = vrcp.f32 %v2730_v52  ;;  %v2729_v35 = vadd.f32 1.0, %v5496_v28 }
 0x230   : > { %v5500_v56 = vpop.eup %5499  ;;  %v3927_v48 = vadd.f32 %v3926_v15, %v3669_v18  ;;  %v3671_v33 = vmul.f32 %v5498_v25, %v8099_v42  ;;  %5519 = vpow2.f32 %v4670_v46  ;;  %v8237_v15 = vadd.f32 %v7748_v59, %v7275_v17  ;;  %v8239_v42 = vpop.f32.mrb[109].mxu0 }
 0x231   : > { %v5502_v9 = vpop.eup %5501  ;;  %v3678_v63 = vmul.f32 %v5500_v56, %v8104_v60  ;;  %5521 = vrcp.f32 %v2729_v35  ;;  %9864 = vst [vmem:[#allocation59_spill] sm:$0xff] %v8239_v42  ;;  %v4687_v60 = vmul.f32 -1.442695, %v8222_v61  ;;  %v9866_v56 = vld [vmem:[#allocation47_spill] sm:$0xff] }
 0x232   : > { %v5504_v45 = vpop.eup %5503  ;;  %v4001_v0 = vadd.f32 %v4000_v57, %v3671_v33  ;;  %v3680_v14 = vmul.f32 %v5502_v9, %v8109_v51  ;;  %5523 = vpow2.f32 %v4677_v53  ;;  %v9865_v51 = vld [vmem:[#allocation29_spill] sm:$0xff]  ;;  %v8249_v33 = vadd.f32 %v9866_v56, %v7286_v3 }
 0x233   : > { %v5506_v46 = vpop.eup %5505  ;;  %v3891_v52 = vadd.f32 %v3890_v38, %v3678_v63  ;;  %v2731_v28 = vadd.f32 1.0, %v5504_v45  ;;  %5525 = vpow2.f32 %v4679_v58  ;;  %v8245_v57 = vadd.f32 %v9865_v51, %v7278_v12  ;;  %v8251_v38 = vpop.f32.mrb[110].mxu1 }
 0x234   : > { %v5508_v18 = vpop.eup %5507  ;;  %v3965_v25 = vadd.f32 %v3964_v40, %v3680_v14  ;;  %v3679_v35 = vmul.f32 %v5506_v46, %v8113_v6  ;;  %5527 = vpow2.f32 %v4678_v43  ;;  %9867 = vst [vmem:[#allocation60_spill] sm:$0xff] %v8251_v38  ;;  %v4689_v6 = vmul.f32 -1.442695, %v8237_v15  ;;  %v8255_v43 = vpop.f32.mrb[110].mxu0 }
 0x235   : > { %v5510_v53 = vpop.eup %5509  ;;  %5529 = vrcp.f32 %v2731_v28  ;;  %v2738_v59 = vadd.f32 1.0, %v5508_v18  ;;  %9868 = vst [vmem:[#allocation18_spill] sm:$0xff] %v8255_v43  ;;  %v4688_v18 = vmul.f32 -1.442695, %v8245_v57 }
 0x236   : > { %v5512_v58 = vpop.eup %5511  ;;  %v3928_v9 = vadd.f32 %v3927_v48, %v3679_v35  ;;  %v3681_v40 = vmul.f32 %v5510_v53, %v8120_v5  ;;  %5531 = vpow2.f32 %v4680_v62  ;;  %v4690_v5 = vmul.f32 -1.442695, %v8249_v33  ;;  %v8260_v62 = vpop.f32.mrb[111].mxu1 }
 0x237   : > { %v5514_v63 = vpop.eup %5513  ;;  %5533 = vrcp.f32 %v2738_v59  ;;  %v2740_v45 = vadd.f32 1.0, %v5512_v58  ;;  %9869 = vst [vmem:[#allocation37_spill] sm:$0xff] %v8260_v62  ;;  %v8262_v35 = vpop.f32.mrb[111].mxu0 }
 0x238   : > { %v5516_v14 = vpop.eup %5515  ;;  %v4002_v46 = vadd.f32 %v4001_v0, %v3681_v40  ;;  %v3688_v28 = vmul.f32 %v5514_v63, %v8133_v19  ;;  %5535 = vpow2.f32 %v4687_v60  ;;  %9870 = vst [vmem:[#allocation61_spill] sm:$0xff] %v8262_v35  ;;  %v9871_v0 = vld [vmem:[#allocation30_spill] sm:$0xff] }
 0x239   : > { %v5518_v51 = vpop.eup %5517  ;;  %5537 = vrcp.f32 %v2740_v45  ;;  %v2739_v48 = vadd.f32 1.0, %v5516_v14  ;;  %v8267_v19 = vadd.f32 %v9871_v0, %v7186_v34  ;;  %v9872_v14 = vld [vmem:[#allocation48_spill] sm:$0xff] }
 0x23a   : > { %v5520_v53 = vpop.eup %5519  ;;  %v3892_v56 = vadd.f32 %v3891_v52, %v3688_v28  ;;  %v3690_v59 = vmul.f32 %v5518_v51, %v8141_v29  ;;  %5539 = vpow2.f32 %v4689_v6  ;;  %v8272_v35 = vadd.f32 %v9872_v14, %v7275_v17  ;;  %v9873_v6 = vld [vmem:[#allocation50_spill] sm:$0xff]  ;;  %v9876_v14 = vld [vmem:[#allocation51_spill] sm:$0xff] }
 0x23b   : > { %v5522_v60 = vpop.eup %5521  ;;  %5541 = vrcp.f32 %v2739_v48  ;;  %v2741_v58 = vadd.f32 1.0, %v5520_v53  ;;  %v8276_v28 = vadd.f32 %v9873_v6, %v7278_v12  ;;  %v9879_v6 = vld [vmem:[#allocation53_spill] sm:$0xff] }
 0x23c   : > { %v5524_v40 = vpop.eup %5523  ;;  %v3966_v63 = vadd.f32 %v3965_v25, %v3690_v59  ;;  %v3689_v45 = vmul.f32 %v5522_v60, %v8147_v20  ;;  %5543 = vpow2.f32 %v4688_v18  ;;  %v4697_v25 = vmul.f32 -1.442695, %v8267_v19  ;;  %v8279_v18 = vpop.f32.mrb[112].mxu1 }
 0x23d   : > { %v5526_v52 = vpop.eup %5525  ;;  %5545 = vrcp.f32 %v2741_v58  ;;  %v2748_v29 = vadd.f32 1.0, %v5524_v40  ;;  %9874 = vst [vmem:[#allocation22_spill] sm:$0xff] %v8279_v18  ;;  %v8281_v59 = vpop.f32.mrb[112].mxu0  ;;  %v4699_v40 = vmul.f32 -1.442695, %v8272_v35 }
 0x23e   : > { %v5528_v51 = vpop.eup %5527  ;;  %v3929_v0 = vadd.f32 %v3928_v9, %v3689_v45  ;;  %v2750_v48 = vadd.f32 1.0, %v5526_v52  ;;  %5547 = vpow2.f32 %v4690_v5  ;;  %9875 = vst [vmem:[#allocation62_spill] sm:$0xff] %v8281_v59  ;;  %v8287_v9 = vadd.f32 %v9876_v14, %v7286_v3  ;;  %v8289_v5 = vpop.f32.mrb[113].mxu1 }
 0x23f   : > { %v5530_v53 = vpop.eup %5529  ;;  %5549 = vrcp.f32 %v2748_v29  ;;  %v2749_v20 = vadd.f32 1.0, %v5528_v51  ;;  %9877 = vst [vmem:[#allocation63_spill] sm:$0xff] %v8289_v5  ;;  %v8291_v45 = vpop.f32.mrb[113].mxu0  ;;  %v8295_v51 = vadd.f32 %v9879_v6, %v7186_v34  ;;  %v9880_v5 = vld [vmem:[#allocation39_spill] sm:$0xff] }
 0x240   : > { %v5532_v60 = vpop.eup %5531  ;;  %v3691_v58 = vmul.f32 %v5530_v53, %v8157_v2  ;;  %5551 = vrcp.f32 %v2750_v48  ;;  %9878 = vst [vmem:[#allocation64_spill] sm:$0xff] %v8291_v45  ;;  %v4698_v53 = vmul.f32 -1.442695, %v8276_v28  ;;  %v8301_v45 = vadd.f32 %v9880_v5, %v7275_v17 }
 0x241   : > { %v5534_v52 = vpop.eup %5533  ;;  %5553 = vrcp.f32 %v2749_v20  ;;  %v2751_v29 = vadd.f32 1.0, %v5532_v60  ;;  %v8303_v20 = vpop.f32.mrb[114].mxu1 }
 0x242   : > { %v5536_v59 = vpop.eup %5535  ;;  %v4003_v2 = vadd.f32 %v4002_v46, %v3691_v58  ;;  %v3698_v48 = vmul.f32 %v5534_v52, %v8166_v41  ;;  %5555 = vpow2.f32 %v4697_v25  ;;  %9881 = vst [vmem:[#allocation65_spill] sm:$0xff] %v8303_v20  ;;  %v4700_v46 = vmul.f32 -1.442695, %v8287_v9  ;;  %v8307_v41 = vpop.f32.mrb[114].mxu0  ;;  %v9883_v52 = vld [vmem:[#allocation43_spill] sm:$0xff] }
 0x243   : > { %v5538_v14 = vpop.eup %5537  ;;  %5557 = vrcp.f32 %v2751_v29  ;;  %v2758_v18 = vadd.f32 1.0, %v5536_v59  ;;  %9882 = vst [vmem:[#allocation66_spill] sm:$0xff] %v8307_v41  ;;  %v4707_v59 = vmul.f32 -1.442695, %v8295_v51  ;;  %v8312_v5 = vadd.f32 %v9883_v52, %v7278_v12  ;;  %v9885_v52 = vld [vmem:[#allocation45_spill] sm:$0xff] }
 0x244   : > { %v5540_v60 = vpop.eup %5539  ;;  %v3893_v62 = vadd.f32 %v3892_v56, %v3698_v48  ;;  %v3700_v6 = vmul.f32 %v5538_v14, %v8174_v50  ;;  %5559 = vpow2.f32 %v4699_v40  ;;  %v9884_v50 = vld [vmem:[#allocation44_spill] sm:$0xff] }
 0x245   : > { %v5542_v25 = vpop.eup %5541  ;;  %5561 = vrcp.f32 %v2758_v18  ;;  %v2760_v58 = vadd.f32 1.0, %v5540_v60  ;;  %v8317_v40 = vadd.f32 %v9884_v50, %v7286_v3  ;;  %v4709_v18 = vmul.f32 -1.442695, %v8301_v45 }
 0x246   : > { %v5544_v29 = vpop.eup %5543  ;;  %v3967_v20 = vadd.f32 %v3966_v63, %v3700_v6  ;;  %v3699_v56 = vmul.f32 %v5542_v25, %v8185_v44  ;;  %5563 = vpow2.f32 %v4698_v53  ;;  %v8323_v63 = vadd.f32 %v9885_v52, %v7186_v34  ;;  %v9886_v25 = vld [vmem:[#allocation49_spill] sm:$0xff] }
 0x247   : > { %v5546_v48 = vpop.eup %5545  ;;  %5565 = vrcp.f32 %v2760_v58  ;;  %v2759_v14 = vadd.f32 1.0, %v5544_v29  ;;  %v4708_v6 = vmul.f32 -1.442695, %v8312_v5  ;;  %v8328_v58 = vadd.f32 %v9886_v25, %v7275_v17 }
 0x248   : > { %v5548_v60 = vpop.eup %5547  ;;  %v3930_v41 = vadd.f32 %v3929_v0, %v3699_v56  ;;  %v3701_v43 = vmul.f32 %v5546_v48, %v8189_v4  ;;  %5567 = vpow2.f32 %v4700_v46  ;;  %v4710_v4 = vmul.f32 -1.442695, %v8317_v40  ;;  %v8332_v46 = vpop.f32.mrb[115].mxu1 }
 0x249   : > { %v5550_v44 = vpop.eup %5549  ;;  %5569 = vrcp.f32 %v2759_v14  ;;  %v2761_v53 = vadd.f32 1.0, %v5548_v60  ;;  %9887 = vst [vmem:[#allocation67_spill] sm:$0xff] %v8332_v46  ;;  %v8334_v56 = vpop.f32.mrb[115].mxu0  ;;  %v9889_v60 = vld [vmem:[#allocation92_spill] sm:$0xff] }
 0x24a   : > { %v5552_v29 = vpop.eup %5551  ;;  %v4004_v50 = vadd.f32 %v4003_v2, %v3701_v43  ;;  %v3708_v0 = vmul.f32 %v5550_v44, %v8199_v49  ;;  %5571 = vpow2.f32 %v4707_v59  ;;  %9888 = vst [vmem:[#allocation68_spill] sm:$0xff] %v8334_v56  ;;  %v8339_v52 = vadd.f32 %v9889_v60, %v7278_v12 }
 0x24b   : > { %v5554_v48 = vpop.eup %5553  ;;  %v3710_v14 = vmul.f32 %v5552_v29, %v8206_v47  ;;  %5573 = vrcp.f32 %v2761_v53  ;;  %v4717_v49 = vmul.f32 -1.442695, %v8323_v63  ;;  %v4719_v56 = vmul.f32 -1.442695, %v8328_v58  ;;  %v9890_v29 = vld [vmem:[#allocation52_spill] sm:$0xff] }
 0x24c   : > { %v5556_v25 = vpop.eup %5555  ;;  %v3894_v38 = vadd.f32 %v3893_v62, %v3708_v0  ;;  %v3709_v43 = vmul.f32 %v5554_v48, %v8211_v23  ;;  %5575 = vpow2.f32 %v4709_v18  ;;  %v8347_v60 = vadd.f32 %v9890_v29, %v7286_v3  ;;  %v9891_v48 = vld [vmem:[#allocation93_spill] sm:$0xff] }
 0x24d   : > { %v5558_v2 = vpop.eup %5557  ;;  %v3968_v59 = vadd.f32 %v3967_v20, %v3710_v14  ;;  %v2768_v44 = vadd.f32 1.0, %v5556_v25  ;;  %5577 = vpow2.f32 %v4708_v6  ;;  %v4718_v18 = vmul.f32 -1.442695, %v8339_v52  ;;  %v8355_v14 = vpop.f32.mrb[116].mxu1  ;;  %v9896_v29 = vld [vmem:[#allocation69_spill] sm:$0xff] }
 0x24e   : > { %v5560_v46 = vpop.eup %5559  ;;  %v3931_v47 = vadd.f32 %v3930_v41, %v3709_v43  ;;  %v3711_v53 = vmul.f32 %v5558_v2, %v8215_v27  ;;  %5579 = vpow2.f32 %v4710_v4  ;;  %v8353_v41 = vadd.f32 %v9891_v48, %v7186_v34  ;;  %9892 = vst [vmem:[#allocation71_spill] sm:$0xff] %v8355_v14  ;;  %v8357_v25 = vpop.f32.mrb[116].mxu0 }
 0x24f   : > { %v5562_v62 = vpop.eup %5561  ;;  %5581 = vrcp.f32 %v2768_v44  ;;  %v2770_v23 = vadd.f32 1.0, %v5560_v46  ;;  %9893 = vst [vmem:[#allocation73_spill] sm:$0xff] %v8357_v25 }
 0x250   : > { %v5564_v0 = vpop.eup %5563  ;;  %v4005_v20 = vadd.f32 %v4004_v50, %v3711_v53  ;;  %v3718_v6 = vmul.f32 %v5562_v62, %v8222_v61  ;;  %5583 = vpow2.f32 %v4717_v49  ;;  %v4720_v50 = vmul.f32 -1.442695, %v8347_v60  ;;  %v8361_v61 = vpop.f32.mrb[117].mxu1 }
 0x251   : > { %v5566_v27 = vpop.eup %5565  ;;  %5585 = vrcp.f32 %v2770_v23  ;;  %v2769_v4 = vadd.f32 1.0, %v5564_v0  ;;  %9894 = vst [vmem:[#allocation74_spill] sm:$0xff] %v8361_v61  ;;  %v8363_v49 = vpop.f32.mrb[117].mxu0  ;;  %v8367_v62 = vadd.f32 %v9896_v29, %v7275_v17  ;;  %v9899_v29 = vld [vmem:[#allocation85_spill] sm:$0xff] }
 0x252   : > { %v5568_v43 = vpop.eup %5567  ;;  %v3895_v46 = vadd.f32 %v3894_v38, %v3718_v6  ;;  %v3720_v2 = vmul.f32 %v5566_v27, %v8237_v15  ;;  %5587 = vpow2.f32 %v4719_v56  ;;  %9895 = vst [vmem:[#allocation75_spill] sm:$0xff] %v8363_v49  ;;  %v4727_v15 = vmul.f32 -1.442695, %v8353_v41  ;;  %v8371_v56 = vpop.f32.mrb[118].mxu1 }
 0x253   : > { %v5570_v44 = vpop.eup %5569  ;;  %5589 = vrcp.f32 %v2769_v4  ;;  %v2771_v53 = vadd.f32 1.0, %v5568_v43  ;;  %9897 = vst [vmem:[#allocation76_spill] sm:$0xff] %v8371_v56  ;;  %v8373_v6 = vpop.f32.mrb[118].mxu0 }
 0x254   : > { %v5572_v23 = vpop.eup %5571  ;;  %v3969_v0 = vadd.f32 %v3968_v59, %v3720_v2  ;;  %v3719_v38 = vmul.f32 %v5570_v44, %v8245_v57  ;;  %5591 = vpow2.f32 %v4718_v18  ;;  %9898 = vst [vmem:[#allocation78_spill] sm:$0xff] %v8373_v6  ;;  %v8378_v59 = vadd.f32 %v9899_v29, %v7278_v12  ;;  %v8380_v57 = vpop.f32.mrb[119].mxu1 }
 0x255   : > { %v5574_v48 = vpop.eup %5573  ;;  %5593 = vrcp.f32 %v2771_v53  ;;  %v2778_v27 = vadd.f32 1.0, %v5572_v23  ;;  %9900 = vst [vmem:[#allocation79_spill] sm:$0xff] %v8380_v57  ;;  %v4729_v44 = vmul.f32 -1.442695, %v8367_v62 }
 0x256   : > { %v5576_v4 = vpop.eup %5575  ;;  %v3932_v43 = vadd.f32 %v3931_v47, %v3719_v38  ;;  %v3721_v49 = vmul.f32 %v5574_v48, %v8249_v33  ;;  %5595 = vpow2.f32 %v4720_v50  ;;  %v9901_v47 = vld [vmem:[#allocation6_spill] sm:$0xff]  ;;  %v8387_v33 = vpop.f32.mrb[119].mxu0 }
 0x257   : > { %v5578_v18 = vpop.eup %5577  ;;  %5597 = vrcp.f32 %v2778_v27  ;;  %v2780_v2 = vadd.f32 1.0, %v5576_v4  ;;  %v8385_v23 = vadd.f32 %v9901_v47, %v7286_v3  ;;  %9902 = vst [vmem:[#allocation80_spill] sm:$0xff] %v8387_v33  ;;  %v4728_v27 = vmul.f32 -1.442695, %v8378_v59  ;;  %v9903_v4 = vld [vmem:[#allocation7_spill] sm:$0xff] }
 0x258   : > { %v5580_v6 = vpop.eup %5579  ;;  %v4006_v56 = vadd.f32 %v4005_v20, %v3721_v49  ;;  %v2779_v53 = vadd.f32 1.0, %v5578_v18  ;;  %5599 = vpow2.f32 %v4727_v15  ;;  %v8393_v20 = vadd.f32 %v9903_v4, %v7186_v34  ;;  %v9904_v18 = vld [vmem:[#allocation21_spill] sm:$0xff] }
 0x259   : > { %v5582_v50 = vpop.eup %5581  ;;  %5601 = vrcp.f32 %v2780_v2  ;;  %v2781_v38 = vadd.f32 1.0, %v5580_v6  ;;  %v8397_v47 = vadd.f32 %v9904_v18, %v7275_v17  ;;  %v9905_v4 = vld [vmem:[#allocation9_spill] sm:$0xff] }
 0x25a   : > { %v5584_v48 = vpop.eup %5583  ;;  %v3728_v29 = vmul.f32 %v5582_v50, %v8267_v19  ;;  %5603 = vrcp.f32 %v2779_v53  ;;  %v4730_v19 = vmul.f32 -1.442695, %v8385_v23  ;;  %v8403_v57 = vadd.f32 %v9905_v4, %v7278_v12 }
 0x25b   : > { %v5586_v49 = vpop.eup %5585  ;;  %5605 = vrcp.f32 %v2781_v38  ;;  %v2788_v15 = vadd.f32 1.0, %v5584_v48  ;;  %v4737_v18 = vmul.f32 -1.442695, %v8393_v20 }
 0x25c   : > { %v5588_v33 = vpop.eup %5587  ;;  %v3896_v2 = vadd.f32 %v3895_v46, %v3728_v29  ;;  %v3730_v6 = vmul.f32 %v5586_v49, %v8272_v35  ;;  %5607 = vpow2.f32 %v4729_v44  ;;  %v4739_v44 = vmul.f32 -1.442695, %v8397_v47  ;;  %v9906_v29 = vld [vmem:[#allocation8_spill] sm:$0xff] }
 0x25d   : > { %v5590_v53 = vpop.eup %5589  ;;  %5609 = vrcp.f32 %v2788_v15  ;;  %v2790_v50 = vadd.f32 1.0, %v5588_v33  ;;  %v8410_v49 = vadd.f32 %v9906_v29, %v7286_v3  ;;  %v8412_v33 = vpop.f32.mrb[120].mxu1  ;;  %v4738_v29 = vmul.f32 -1.442695, %v8403_v57 }
 0x25e   : > { %v5592_v38 = vpop.eup %5591  ;;  %v3970_v48 = vadd.f32 %v3969_v0, %v3730_v6  ;;  %v3729_v61 = vmul.f32 %v5590_v53, %v8276_v28  ;;  %5611 = vpow2.f32 %v4728_v27  ;;  %9907 = vst [vmem:[#allocation83_spill] sm:$0xff] %v8412_v33  ;;  %v8414_v15 = vpop.f32.mrb[120].mxu0  ;;  %v9909_v27 = vld [vmem:[#allocation25_spill] sm:$0xff]  ;;  %v9911_v33 = vld [vmem:[#allocation10_spill] sm:$0xff] }
 0x25f   : > { %v5594_v46 = vpop.eup %5593  ;;  %5613 = vrcp.f32 %v2790_v50  ;;  %v2789_v35 = vadd.f32 1.0, %v5592_v38  ;;  %9908 = vst [vmem:[#allocation84_spill] sm:$0xff] %v8414_v15  ;;  %v8419_v6 = vadd.f32 %v9909_v27, %v7186_v34  ;;  %v8421_v53 = vpop.f32.mrb[121].mxu1  ;;  %v8426_v25 = vadd.f32 %v9911_v33, %v7275_v17 }
 0x260   : > { %v5596_v4 = vpop.eup %5595  ;;  %v3933_v0 = vadd.f32 %v3932_v43, %v3729_v61  ;;  %v3731_v28 = vmul.f32 %v5594_v46, %v8287_v9  ;;  %5615 = vpow2.f32 %v4730_v19  ;;  %9910 = vst [vmem:[#allocation86_spill] sm:$0xff] %v8421_v53  ;;  %v9912_v43 = vld [vmem:[#allocation70_spill] sm:$0xff] }
 0x261   : > { %v5598_v50 = vpop.eup %5597  ;;  %5617 = vrcp.f32 %v2789_v35  ;;  %v2791_v38 = vadd.f32 1.0, %v5596_v4  ;;  %v8431_v19 = vadd.f32 %v9912_v43, %v7278_v12  ;;  %v4740_v35 = vmul.f32 -1.442695, %v8410_v49  ;;  %v8434_v4 = vpop.f32.mrb[121].mxu0 }
 0x262   : > { %v5600_v15 = vpop.eup %5599  ;;  %v4007_v61 = vadd.f32 %v4006_v56, %v3731_v28  ;;  %v3738_v9 = vmul.f32 %v5598_v50, %v8295_v51  ;;  %5619 = vpow2.f32 %v4737_v18  ;;  %9913 = vst [vmem:[#allocation87_spill] sm:$0xff] %v8434_v4  ;;  %v4747_v56 = vmul.f32 -1.442695, %v8419_v6  ;;  %v9914_v50 = vld [vmem:[#allocation27_spill] sm:$0xff] }
 0x263   : > { %v5602_v46 = vpop.eup %5601  ;;  %5621 = vrcp.f32 %v2791_v38  ;;  %v2798_v27 = vadd.f32 1.0, %v5600_v15  ;;  %v4749_v28 = vmul.f32 -1.442695, %v8426_v25  ;;  %v8442_v15 = vadd.f32 %v9914_v50, %v7286_v3  ;;  %v8444_v38 = vpop.f32.mrb[122].mxu1 }
 0x264   : > { %v5604_v53 = vpop.eup %5603  ;;  %v3897_v14 = vadd.f32 %v3896_v2, %v3738_v9  ;;  %v3740_v33 = vmul.f32 %v5602_v46, %v8301_v45  ;;  %5623 = vpow2.f32 %v4739_v44  ;;  %9915 = vst [vmem:[#allocation88_spill] sm:$0xff] %v8444_v38  ;;  %v4748_v45 = vmul.f32 -1.442695, %v8431_v19  ;;  %v8448_v44 = vpop.f32.mrb[122].mxu0  ;;  %v9916_v46 = vld [vmem:[#allocation72_spill] sm:$0xff] }
 0x265   : > { %v5606_v51 = vpop.eup %5605  ;;  %v3739_v18 = vmul.f32 %v5604_v53, %v8312_v5  ;;  %5625 = vrcp.f32 %v2798_v27  ;;  %v8452_v27 = vadd.f32 %v9916_v46, %v7186_v34 }
 0x266   : > { %v5608_v43 = vpop.eup %5607  ;;  %v3971_v4 = vadd.f32 %v3970_v48, %v3740_v33  ;;  %v3741_v2 = vmul.f32 %v5606_v51, %v8317_v40  ;;  %5627 = vpow2.f32 %v4738_v29  ;;  %v9917_v40 = vld [vmem:[#allocation33_spill] sm:$0xff]  ;;  %v8460_v51 = vpop.f32.mrb[123].mxu1 }
 0x267   : > { %v5610_v9 = vpop.eup %5609  ;;  %v3934_v5 = vadd.f32 %v3933_v0, %v3739_v18  ;;  %v2800_v53 = vadd.f32 1.0, %v5608_v43  ;;  %5629 = vpow2.f32 %v4740_v35  ;;  %v8457_v48 = vadd.f32 %v9917_v40, %v7275_v17 }
 0x268   : > { %v5612_v50 = vpop.eup %5611  ;;  %v4008_v42 = vadd.f32 %v4007_v61, %v3741_v2  ;;  %v3748_v38 = vmul.f32 %v5610_v9, %v8323_v63  ;;  %5631 = vpow2.f32 %v4747_v56  ;;  %v4750_v0 = vmul.f32 -1.442695, %v8442_v15  ;;  %v9918_v61 = vld [vmem:[#allocation2_spill] sm:$0xff]  ;;  %v8464_v63 = vpop.f32.mrb[123].mxu0 }
 0x269   : > { %v5614_v29 = vpop.eup %5613  ;;  %5633 = vrcp.f32 %v2800_v53  ;;  %v2799_v33 = vadd.f32 1.0, %v5612_v50  ;;  %v418_v43 = vsub.s32 6, %v9918_v61  ;;  %9919 = vst [vmem:[#allocation89_spill] sm:$0xff] %v8464_v63  ;;  %v4757_v2 = vmul.f32 -1.442695, %v8452_v27 }
 0x26a   : > { %v5616_v35 = vpop.eup %5615  ;;  %v3898_v18 = vadd.f32 %v3897_v14, %v3748_v38  ;;  %v3750_v34 = vmul.f32 %v5614_v29, %v8328_v58  ;;  %5635 = vpow2.f32 %v4749_v28  ;;  %v4759_v50 = vmul.f32 -1.442695, %v8457_v48  ;;  %v389_v58 = vld [vmem:[%s9506_s3 + $0x8] sm:$0x3]  ;;  %v9920_v38 = vld [vmem:[#allocation14_spill] sm:$0xff] }
 0x26b   : > { %v5618_v56 = vpop.eup %5617  ;;  %5637 = vrcp.f32 %v2799_v33  ;;  %v2801_v17 = vadd.f32 1.0, %v5616_v35  ;;  %v8474_v40 = vadd.f32 %v9920_v38, %v7278_v12  ;;  %v422_v29 = vsub.s32 7, %v9918_v61 }
 0x26c   : > { %v5620_v9 = vpop.eup %5619  ;;  %v3972_v53 = vadd.f32 %v3971_v4, %v3750_v34  ;;  %v3749_v46 = vmul.f32 %v5618_v56, %v8339_v52  ;;  %5639 = vpow2.f32 %v4748_v45  ;;  %v6190_v45 = vld [vmem:[%s9506_s3] sm:$0xff] }
 0x26d   : > { %v5622_v14 = vpop.eup %5621  ;;  %5641 = vrcp.f32 %v2801_v17  ;;  %v2808_v28 = vadd.f32 1.0, %v5620_v9  ;;  %v8481_v35 = vrot.slane %v6190_v45, %v418_v43  ;;  %v9921_v17 = vsub.s32 0, %v9918_v61 }
 0x26e   : > { %v5624_v33 = vpop.eup %5623  ;;  %v3935_v4 = vadd.f32 %v3934_v5, %v3749_v46  ;;  %v3751_v52 = vmul.f32 %v5622_v14, %v8347_v60  ;;  %5643 = vpow2.f32 %v4750_v0  ;;  %v9922_v60 = vld [vmem:[#allocation77_spill] sm:$0xff]  ;;  %v4758_v14 = vmul.f32 -1.442695, %v8474_v40 }
 0x26f   : > { %v5626_v34 = vpop.eup %5625  ;;  %5645 = vrcp.f32 %v2808_v28  ;;  %v2810_v56 = vadd.f32 1.0, %v5624_v33  ;;  %v8485_v12 = vrot.slane %v389_v58, %v9921_v17  ;;  %v8490_v0 = vadd.f32 %v9922_v60, %v7286_v3  ;;  %v8495_v33 = vpop.f32.mrb[124].mxu1 }
 0x270   : > { %v5628_v9 = vpop.eup %5627  ;;  %v4009_v38 = vadd.f32 %v4008_v42, %v3751_v52  ;;  %v3758_v5 = vmul.f32 %v5626_v34, %v8353_v41  ;;  %5647 = vpow2.f32 %v4757_v2  ;;  %v8493_v28 = vrot.slane %v6190_v45, %v422_v29  ;;  %9923 = vst [vmem:[#allocation90_spill] sm:$0xff] %v8495_v33  ;;  %v8497_v17 = vpop.f32.mrb[124].mxu0  ;;  %v9925_v41 = vld [vmem:[#allocation35_spill] sm:$0xff]  ;;  %v9928_v45 = vld [vmem:[#allocation81_spill] sm:$0xff] }
 0x271   : > { %v5630_v46 = vpop.eup %5629  ;;  %5649 = vrcp.f32 %v2810_v56  ;;  %v2809_v43 = vadd.f32 1.0, %v5628_v9  ;;  %9924 = vst [vmem:[#allocation91_spill] sm:$0xff] %v8497_v17  ;;  %v8501_v2 = vadd.f32 %v9925_v41, %v8481_v35  ;;  %v8503_v3 = vpop.f32.mrb[125].mxu1  ;;  %v8509_v9 = vadd.f32 %v9928_v45, %v8485_v12  ;;  %v9932_v45 = vld [vmem:[#allocation82_spill] sm:$0xff] }
 0x272   : > { %v5632_v63 = vpop.eup %5631  ;;  %v3899_v42 = vadd.f32 %v3898_v18, %v3758_v5  ;;  %v2811_v52 = vadd.f32 1.0, %v5630_v46  ;;  %5651 = vpow2.f32 %v4759_v50  ;;  %9926 = vst [vmem:[#allocation3_spill] sm:$0xff] %v8503_v3  ;;  %v8505_v34 = vpop.f32.mrb[125].mxu0  ;;  %v4760_v5 = vmul.f32 -1.442695, %v8490_v0 }
 0x273   : > { %9927 = vst [vmem:[#allocation13_spill] sm:$0xff] %v8505_v34  ;;  %v5634_v56 = vpop.eup %5633  ;;  %5653 = vrcp.f32 %v2809_v43  ;;  %v2818_v29 = vadd.f32 1.0, %v5632_v63  ;;  %v8511_v60 = vpop.f32.mrb[126].mxu1  ;;  %v9930_v46 = vsub.s32 1, %v9918_v61  ;;  %v8523_v3 = vadd.f32 %v9932_v45, %v8493_v28  ;;  %v9934_v45 = vld [vmem:[#allocation54_spill] sm:$0xff] }
 0x274   : > { %9929 = vst [vmem:[#allocation4_spill] sm:$0xff] %v8511_v60  ;;  %v5636_v18 = vpop.eup %5635  ;;  %v3760_v50 = vmul.f32 %v5634_v56, %v8367_v62  ;;  %5655 = vrcp.f32 %v2811_v52  ;;  %v8519_v34 = vpop.f32.mrb[126].mxu0  ;;  %v4451_v52 = vmul.f32 -1.442695, %v8501_v2 }
 0x275   : > { %v8517_v41 = vrot.slane %v389_v58, %v9930_v46  ;;  %9931 = vst [vmem:[#allocation15_spill] sm:$0xff] %v8519_v34  ;;  %v5638_v43 = vpop.eup %5637  ;;  %5657 = vrcp.f32 %v2818_v29  ;;  %v2820_v63 = vadd.f32 1.0, %v5636_v18  ;;  %v4453_v46 = vmul.f32 -1.442695, %v8509_v9  ;;  %v8528_v34 = vpop.f32.mrb[127].mxu1 }
 0x276   : > { %v5640_v60 = vpop.eup %5639  ;;  %v3973_v17 = vadd.f32 %v3972_v53, %v3760_v50  ;;  %v3759_v62 = vmul.f32 %v5638_v43, %v8378_v59  ;;  %5659 = vpow2.f32 %v4758_v14  ;;  %9933 = vst [vmem:[#allocation5_spill] sm:$0xff] %v8528_v34  ;;  %v8535_v59 = vpop.f32.mrb[127].mxu0  ;;  %v9936_v43 = vld [vmem:[#allocation55_spill] sm:$0xff] }
 0x277   : > { %v5642_v56 = vpop.eup %5641  ;;  %5661 = vrcp.f32 %v2820_v63  ;;  %v2819_v58 = vadd.f32 1.0, %v5640_v60  ;;  %v8533_v53 = vadd.f32 %v9934_v45, %v8517_v41  ;;  %9935 = vst [vmem:[#allocation17_spill] sm:$0xff] %v8535_v59  ;;  %v4452_v60 = vmul.f32 -1.442695, %v8523_v3 }
 0x278   : > { %v5644_v29 = vpop.eup %5643  ;;  %v3936_v18 = vadd.f32 %v3935_v4, %v3759_v62  ;;  %v3761_v33 = vmul.f32 %v5642_v56, %v8385_v23  ;;  %5663 = vpow2.f32 %v4760_v5  ;;  %v8540_v63 = vadd.f32 %v9936_v43, %v8481_v35  ;;  %v9937_v5 = vld [vmem:[#allocation56_spill] sm:$0xff] }
 0x279   : > { %v5646_v14 = vpop.eup %5645  ;;  %5665 = vrcp.f32 %v2819_v58  ;;  %v2821_v50 = vadd.f32 1.0, %v5644_v29  ;;  %v8545_v62 = vadd.f32 %v9937_v5, %v8485_v12  ;;  %v8549_v58 = vadd.f32 %v8041_v7, %v8493_v28 }
 0x27a   : > { %v5648_v34 = vpop.eup %5647  ;;  %v4010_v4 = vadd.f32 %v4009_v38, %v3761_v33  ;;  %v3768_v23 = vmul.f32 %v5646_v14, %v8393_v20  ;;  %5667 = vpow2.f32 %v4451_v52  ;;  %v4454_v38 = vmul.f32 -1.442695, %v8533_v53 }
 0x27b   : > { %v5650_v56 = vpop.eup %5649  ;;  %5669 = vrcp.f32 %v2821_v50  ;;  %v2828_v45 = vadd.f32 1.0, %v5648_v34  ;;  %v4461_v52 = vmul.f32 -1.442695, %v8540_v63  ;;  %v8556_v14 = vadd.f32 %v8044_v55, %v8517_v41 }
 0x27c   : > { %v5652_v29 = vpop.eup %5651  ;;  %v3900_v59 = vadd.f32 %v3899_v42, %v3768_v23  ;;  %v3770_v43 = vmul.f32 %v5650_v56, %v8397_v47  ;;  %5671 = vpow2.f32 %v4453_v46  ;;  %v4463_v42 = vmul.f32 -1.442695, %v8545_v62 }
 0x27d   : > { %v5654_v20 = vpop.eup %5653  ;;  %5673 = vrcp.f32 %v2828_v45  ;;  %v2830_v33 = vadd.f32 1.0, %v5652_v29  ;;  %v4462_v23 = vmul.f32 -1.442695, %v8549_v58  ;;  %v8565_v55 = vadd.f32 %v8065_v54, %v8481_v35 }
 0x27e   : > { %v5656_v34 = vpop.eup %5655  ;;  %v3974_v50 = vadd.f32 %v3973_v17, %v3770_v43  ;;  %v3769_v7 = vmul.f32 %v5654_v20, %v8403_v57  ;;  %5675 = vpow2.f32 %v4452_v60  ;;  %v4464_v29 = vmul.f32 -1.442695, %v8556_v14 }
 0x27f   : > { %v5658_v47 = vpop.eup %5657  ;;  %v3771_v46 = vmul.f32 %v5656_v34, %v8410_v49  ;;  %5677 = vrcp.f32 %v2830_v33  ;;  %v9939_v33 = vld [vmem:[#allocation57_spill] sm:$0xff] }
 0x280   : > { %v5660_v5 = vpop.eup %5659  ;;  %v3937_v56 = vadd.f32 %v3936_v18, %v3769_v7  ;;  %v3778_v45 = vmul.f32 %v5658_v47, %v8419_v6  ;;  %5679 = vpow2.f32 %v4454_v38  ;;  %v8571_v18 = vadd.f32 %v8067_v1, %v8485_v12  ;;  %v8573_v6 = vpop.f32.mrb[128].mxu1 }
 0x281   : > { %v5662_v17 = vpop.eup %5661  ;;  %v4011_v57 = vadd.f32 %v4010_v4, %v3771_v46  ;;  %v2829_v60 = vadd.f32 1.0, %v5660_v5  ;;  %5681 = vpow2.f32 %v4461_v52  ;;  %v8575_v38 = vpop.f32.mrb[128].mxu0  ;;  %v8579_v52 = vadd.f32 %v9939_v33, %v8493_v28 }
 0x282   : > { %v5664_v43 = vpop.eup %5663  ;;  %v3901_v49 = vadd.f32 %v3900_v59, %v3778_v45  ;;  %v3780_v20 = vmul.f32 %v5662_v17, %v8426_v25  ;;  %5683 = vpow2.f32 %v4463_v42  ;;  %9938 = vst [vmem:[#allocation19_spill] sm:$0xff] %v8575_v38  ;;  %v8581_v34 = vpop.f32.mrb[129].mxu1  ;;  %v4471_v42 = vmul.f32 -1.442695, %v8565_v55 }
 0x283   : > { %v5666_v54 = vpop.eup %5665  ;;  %5685 = vrcp.f32 %v2829_v60  ;;  %v2831_v4 = vadd.f32 1.0, %v5664_v43  ;;  %9940 = vst [vmem:[#allocation20_spill] sm:$0xff] %v8581_v34  ;;  %v8583_v59 = vpop.f32.mrb[129].mxu0  ;;  %v4473_v43 = vmul.f32 -1.442695, %v8571_v18 }
 0x284   : > { %9941 = vst [vmem:[#allocation11_spill] sm:$0xff] %v8583_v59  ;;  %v5668_v25 = vpop.eup %5667  ;;  %v3975_v7 = vadd.f32 %v3974_v50, %v3780_v20  ;;  %v3779_v1 = vmul.f32 %v5666_v54, %v8431_v19  ;;  %5687 = vpow2.f32 %v4462_v23  ;;  %v8587_v5 = vpop.f32.mrb[130].mxu1 }
 0x285   : > { %v5670_v47 = vpop.eup %5669  ;;  %5689 = vrcp.f32 %v2831_v4  ;;  %v2522_v46 = vadd.f32 1.0, %v5668_v25  ;;  %9942 = vst [vmem:[#allocation28_spill] sm:$0xff] %v8587_v5  ;;  %v8591_v33 = vpop.f32.mrb[130].mxu0  ;;  %v4472_v4 = vmul.f32 -1.442695, %v8579_v52 }
 0x286   : > { %v5672_v45 = vpop.eup %5671  ;;  %v3938_v17 = vadd.f32 %v3937_v56, %v3779_v1  ;;  %v3781_v60 = vmul.f32 %v5670_v47, %v8442_v15  ;;  %5691 = vpow2.f32 %v4464_v29  ;;  %9943 = vst [vmem:[#allocation12_spill] sm:$0xff] %v8591_v33  ;;  %v8595_v25 = vpop.f32.mrb[131].mxu1  ;;  %v6216_v29 = vmov 1966171168  }
 0x287   : > { %v5674_v50 = vpop.eup %5673  ;;  %5693 = vrcp.f32 %v2522_v46  ;;  %v2524_v19 = vadd.f32 1.0, %v5672_v45  ;;  %9944 = vst [vmem:[#allocation31_spill] sm:$0xff] %v8595_v25  ;;  %v8597_v56 = vpop.f32.mrb[131].mxu0  ;;  %v4183_v1 = vunpack.c.l.s4 %v6216_v29  ;;  %v8611_v29 = vadd.f32 %v8124_v39, %v8481_v35 }
 0x288   : > { %v5676_v23 = vpop.eup %5675  ;;  %v4012_v20 = vadd.f32 %v4011_v57, %v3781_v60  ;;  %v3788_v54 = vmul.f32 %v5674_v50, %v8452_v27  ;;  %5695 = vpow2.f32 %v4471_v42  ;;  %9945 = vst [vmem:[#allocation16_spill] sm:$0xff] %v8597_v56  ;;  %v8624_v39 = vadd.f32 %v8136_v8, %v8493_v28 }
 0x289   : > { %v5678_v15 = vpop.eup %5677  ;;  %5697 = vrcp.f32 %v2524_v19  ;;  %v2523_v47 = vadd.f32 1.0, %v5676_v23  ;;  %v4184_v56 = vunpack.c.0.s8 %v4183_v1  ;;  %v9946_v19 = vld [vmem:[#allocation58_spill] sm:$0xff]  ;;  %v8615_v1 = vadd.f32 %v8126_v31, %v8485_v12 }
 0x28a   : > { %v5680_v33 = vpop.eup %5679  ;;  %v3902_v5 = vadd.f32 %v3901_v49, %v3788_v54  ;;  %v3790_v46 = vmul.f32 %v5678_v15, %v8457_v48  ;;  %5699 = vpow2.f32 %v4473_v43  ;;  %v8602_v23 = vadd.f32 %v9946_v19, %v8517_v41  ;;  %v8607_v15 = vpop.f32.mrb[132].mxu0 }
 0x28b   : > { %v5682_v57 = vpop.eup %5681  ;;  %5701 = vrcp.f32 %v2523_v47  ;;  %v2525_v27 = vadd.f32 1.0, %v5680_v33  ;;  %v8605_v33 = vpop.f32.mrb[132].mxu1  ;;  %9948 = vst [vmem:[#allocation34_spill] sm:$0xff] %v8607_v15  ;;  %v8628_v31 = vadd.f32 %v8143_v22, %v8517_v41 }
 0x28c   : > { %v5684_v42 = vpop.eup %5683  ;;  %v3903_v45 = vrot.slane %v3902_v5, 4  ;;  %v3976_v60 = vadd.f32 %v3975_v7, %v3790_v46  ;;  %v2532_v50 = vadd.f32 1.0, %v5682_v57  ;;  %5703 = vpow2.f32 %v4472_v4  ;;  %9947 = vst [vmem:[#allocation32_spill] sm:$0xff] %v8605_v33 }
 0x28d   : > { %v5686_v25 = vpop.eup %5685  ;;  %5705 = vrcp.f32 %v2525_v27  ;;  %v2534_v59 = vadd.f32 1.0, %v5684_v42  ;;  %v8620_v27 = vpop.f32.mrb[133].mxu0 }
 0x28e   : > { %v5688_v49 = vpop.eup %5687  ;;  %v3904_v54 = vadd.f32 %v3903_v45, %v3902_v5  ;;  %v3977_v48 = vrot.slane %v3976_v60, 4  ;;  %v3789_v43 = vmul.f32 %v5686_v25, %v8474_v40  ;;  %5707 = vrcp.f32 %v2532_v50  ;;  %v8617_v5 = vpop.f32.mrb[133].mxu1  ;;  %9950 = vst [vmem:[#allocation38_spill] sm:$0xff] %v8620_v27 }
 0x28f   : > { %v5690_v7 = vpop.eup %5689  ;;  %5709 = vrcp.f32 %v2534_v59  ;;  %v2533_v4 = vadd.f32 1.0, %v5688_v49  ;;  %9949 = vst [vmem:[#allocation36_spill] sm:$0xff] %v8617_v5  ;;  %v4481_v27 = vmul.f32 -1.442695, %v8611_v29  ;;  %v4484_v5 = vmul.f32 -1.442695, %v8628_v31 }
 0x290   : > { %v5692_v47 = vpop.eup %5691  ;;  %v3905_v40 = vrot.slane %v3904_v54, 2  ;;  %v3978_v25 = vadd.f32 %v3977_v48, %v3976_v60  ;;  %v3939_v46 = vadd.f32 %v3938_v17, %v3789_v43  ;;  %v3791_v57 = vmul.f32 %v5690_v7, %v8490_v0  ;;  %v8634_v7 = vpop.f32.mrb[134].mxu1 }
 0x291   : > { %v5694_v59 = vpop.eup %5693  ;;  %5711 = vrcp.f32 %v2533_v4  ;;  %v2535_v42 = vadd.f32 1.0, %v5692_v47  ;;  %v8631_v0 = vsub.s32 %v4184_v56, %v9918_v61  ;;  %v4474_v43 = vmul.f32 -1.442695, %v8602_v23  ;;  %9952 = vst [vmem:[#allocation40_spill] sm:$0xff] %v8634_v7 }
 0x292   : > { %v5696_v45 = vpop.eup %5695  ;;  %v3906_v50 = vadd.f32 %v3905_v40, %v3904_v54  ;;  %v3979_v19 = vrot.slane %v3978_v25, 2  ;;  %v3940_v60 = vrot.slane %v3939_v46, 4  ;;  %v4013_v17 = vadd.f32 %v4012_v20, %v3791_v57 }
 0x293   : > { %v5698_v49 = vpop.eup %5697  ;;  %9951 = vst [vmem:[#allocation23_spill] sm:$0xff] %v8631_v0  ;;  %5713 = vrcp.f32 %v2535_v42  ;;  %v2542_v48 = vadd.f32 1.0, %v5696_v45  ;;  %v4483_v57 = vmul.f32 -1.442695, %v8615_v1  ;;  %v4482_v45 = vmul.f32 -1.442695, %v8624_v39 }
 0x294   : > { %v5700_v8 = vpop.eup %5699  ;;  %v3980_v4 = vadd.f32 %v3979_v19, %v3978_v25  ;;  %v3941_v47 = vadd.f32 %v3940_v60, %v3939_v46  ;;  %v4014_v22 = vrot.slane %v4013_v17, 4  ;;  %v3907_v40 = vrot.slane %v3906_v50, 1  ;;  %v8644_v19 = vpop.f32.mrb[134].mxu0 }
 0x295   : > { %v5702_v54 = vpop.eup %5701  ;;  %5715 = vrcp.f32 %v2542_v48  ;;  %v2544_v20 = vadd.f32 1.0, %v5700_v8  ;;  %v8642_v46 = vadd.f32 %v8159_v16, %v8481_v35  ;;  %9953 = vst [vmem:[#allocation24_spill] sm:$0xff] %v8644_v19  ;;  %v3482_v33 = vmul.f32 %v5694_v59, %v8501_v2  ;;  %v8653_v16 = vpop.f32.mrb[135].mxu1 }
 0x296   : > { %v5704_v61 = vpop.eup %5703  ;;  %v3942_v56 = vrot.slane %v3941_v47, 2  ;;  %v4015_v42 = vadd.f32 %v4014_v22, %v4013_v17  ;;  %v3981_v15 = vrot.slane %v3980_v4, 1  ;;  %v8649_v17 = vadd.f32 %v8161_v26, %v8485_v12 }
 0x297   : > { %v5706_v7 = vpop.eup %5705  ;;  %5717 = vrcp.f32 %v2544_v20  ;;  %v2543_v25 = vadd.f32 1.0, %v5704_v61  ;;  %v3908_v34 = vadd.f32 %v3907_v40, %v3906_v50  ;;  %v3484_v20 = vmul.f32 %v5698_v49, %v8509_v9 }
 0x298   : > { %v5708_v60 = vpop.eup %5707  ;;  %v3943_v48 = vadd.f32 %v3942_v56, %v3941_v47  ;;  %v4016_v8 = vrot.slane %v4015_v42, 2  ;;  %v8656_v56 = vpop.f32.mrb[135].mxu0  ;;  %v8658_v59 = vadd.f32 %v3981_v15, %v3980_v4  ;;  %v3483_v26 = vmul.f32 %v5702_v54, %v8523_v3  ;;  %v9957_v4 = vld [vmem:[#allocation46_spill] sm:$0xff] }
 0x299   : > { %v5710_v22 = vpop.eup %5709  ;;  %v3492_v61 = vmul.f32 %v5708_v60, %v8540_v63  ;;  %5719 = vrcp.f32 %v2543_v25  ;;  %v8669_v15 = vadd.f32 %v8170_v13, %v8517_v41  ;;  %v4493_v54 = vmul.f32 -1.442695, %v8649_v17 }
 0x29a   : > { %v3944_v38 = vrot.slane %v3943_v48, 1  ;;  %v4017_v19 = vadd.f32 %v4016_v8, %v4015_v42  ;;  %v3494_v47 = vmul.f32 %v5710_v22, %v8545_v62  ;;  %5721 = vpow2.f32 %v4474_v43  ;;  %9954 = vst [vmem:[#allocation41_spill] sm:$0xff] %v8658_v59  ;;  %v8697_v8 = vpop.f32.mrb[136].mxu0 }
 0x29b   : > { %v5712_v2 = vpop.eup %5711  ;;  %v4020_v50 = vadd.f32 %v3492_v61, %v3482_v33  ;;  %5723 = vpow2.f32 %v4481_v27  ;;  %v3485_v42 = vmul.f32 %v5706_v7, %v8533_v53  ;;  %v8665_v62 = vadd.f32 %v8168_v37, %v8493_v28 }
 0x29c   : > { %v3945_v9 = vadd.f32 %v3944_v38, %v3943_v48  ;;  %v4018_v49 = vrot.slane %v4017_v19, 1  ;;  %v4094_v63 = vadd.f32 %v3494_v47, %v3484_v20  ;;  %v3493_v40 = vmul.f32 %v5712_v2, %v8549_v58  ;;  %v9956_v58 = vld [vmem:[#allocation42_spill] sm:$0xff]  ;;  %v8695_v48 = vpop.f32.mrb[136].mxu1  ;;  %v8707_v47 = vpop.f32.mrb[137].mxu0 }
 0x29d   : > { %v5714_v25 = vpop.eup %5713  ;;  %5725 = vpow2.f32 %v4483_v57  ;;  %v9958_v53 = vcombine.low %v9956_v58, %v9957_v4  ;;  %v4491_v37 = vmul.f32 -1.442695, %v8642_v46  ;;  %v4492_v60 = vmul.f32 -1.442695, %v8665_v62 }
 0x29e   : > { %v4179_v3 = vcombine.low %v3908_v34, %v3945_v9  ;;  %v8671_v33 = vadd.f32 %v4018_v49, %v4017_v19  ;;  %v4057_v38 = vadd.f32 %v3493_v40, %v3483_v26  ;;  %v3495_v27 = vmul.f32 %v5714_v25, %v8556_v14  ;;  %v8715_v9 = vpop.f32.mrb[138].mxu0 }
 0x29f   : > { %v5716_v43 = vpop.eup %5715  ;;  %v8678_v7 = vrot.slane %v9958_v53, %v8631_v0  ;;  %5727 = vpow2.f32 %v4482_v45  ;;  %v8693_v45 = vadd.f32 %v8176_v32, %v8481_v35  ;;  %v8711_v32 = vadd.f32 %v8179_v36, %v8485_v12  ;;  %v8734_v53 = vpop.f32.mrb[139].mxu0 }
 0x2a0   : > { %9955 = vst [vmem:[#allocation26_spill] sm:$0xff] %v8671_v33  ;;  %v8683_v13 = vrot.slane %v4179_v3, %v8631_v0  ;;  %v8687_v57 = vadd.f32 %v3495_v27, %v3485_v42  ;;  %v3502_v14 = vmul.f32 %v5716_v43, %v8565_v55  ;;  %5729 = vpow2.f32 %v4484_v5  ;;  %v8705_v5 = vpop.f32.mrb[137].mxu1 }
 0x2a1   : > { %9959 = vst [vmem:[#allocation29_spill] sm:$0xff] %v8678_v7  ;;  %v5718_v19 = vpop.eup %5717  ;;  %v4494_v55 = vmul.f32 -1.442695, %v8669_v15  ;;  %5731 = vpow2.f32 %v4491_v37  ;;  %v8713_v26 = vpop.f32.mrb[138].mxu1  ;;  %v4501_v42 = vmul.f32 -1.442695, %v8693_v45  ;;  %v8723_v3 = vadd.f32 %v8191_v11, %v8493_v28 }
 0x2a2   : > { %9960 = vst [vmem:[#allocation47_spill] sm:$0xff] %v8683_v13  ;;  %v8701_v20 = vadd.f32 %v4020_v50, %v3502_v14  ;;  %v3504_v61 = vmul.f32 %v5718_v19, %v8571_v18  ;;  %5733 = vpow2.f32 %v4493_v54  ;;  %v8732_v58 = vpop.f32.mrb[139].mxu1 }
 0x2a3   : > { %v5720_v2 = vpop.eup %5719  ;;  %5735 = vpow2.f32 %v4492_v60 }
 0x2a4   : > { %v5722_v50 = vpop.eup %5721  ;;  %v8717_v49 = vadd.f32 %v4094_v63, %v3504_v61  ;;  %v3503_v18 = vmul.f32 %v5720_v2, %v8579_v52  ;;  %5737 = vpow2.f32 %v4494_v55  ;;  %v4503_v63 = vmul.f32 -1.442695, %v8711_v32 }
 0x2a5   : > { %v5724_v40 = vpop.eup %5723  ;;  %v2545_v25 = vadd.f32 1.0, %v5722_v50  ;;  %v8730_v52 = vadd.f32 %v8195_v30, %v8517_v41  ;;  %v8740_v30 = vadd.f32 %v8224_v10, %v8481_v35  ;;  %v8744_v61 = vadd.f32 %v8226_v21, %v8485_v12  ;;  %v8752_v10 = vpop.f32.mrb[140].mxu0 }
 0x2a6   : > { %v8725_v36 = vadd.f32 %v4057_v38, %v3503_v18  ;;  %v2552_v27 = vadd.f32 1.0, %v5724_v40  ;;  %v4502_v38 = vmul.f32 -1.442695, %v8723_v3  ;;  %v8748_v40 = vadd.f32 %v8232_v24, %v8493_v28 }
 0x2a7   : > { %v5726_v43 = vpop.eup %5725  ;;  %5739 = vrcp.f32 %v2545_v25  ;;  %v4504_v14 = vmul.f32 -1.442695, %v8730_v52  ;;  %v8750_v25 = vpop.f32.mrb[140].mxu1  ;;  %v4511_v21 = vmul.f32 -1.442695, %v8740_v30 }
 0x2a8   : > { %5741 = vrcp.f32 %v2552_v27  ;;  %v2554_v4 = vadd.f32 1.0, %v5726_v43  ;;  %v9961_v43 = vld [vmem:[#allocation59_spill] sm:$0xff] }
 0x2a9   : > { %v5728_v11 = vpop.eup %5727  ;;  %5743 = vpow2.f32 %v4501_v42 }
 0x2aa   : > { %5745 = vrcp.f32 %v2554_v4  ;;  %v2553_v37 = vadd.f32 1.0, %v5728_v11  ;;  %v5730_v54 = vpop.eup %5729 }
 0x2ab   : > { %5747 = vpow2.f32 %v4503_v63  ;;  %v2555_v19 = vadd.f32 1.0, %v5730_v54  ;;  %v5732_v60 = vpop.eup %5731  ;;  %v8757_v63 = vadd.f32 %v9961_v43, %v8517_v41  ;;  %v8761_v54 = vpop.f32.mrb[141].mxu1 }
 0x2ac   : > { %5749 = vrcp.f32 %v2553_v37  ;;  %v5734_v55 = vpop.eup %5733  ;;  %v2562_v2 = vadd.f32 1.0, %v5732_v60 }
 0x2ad   : > { %5751 = vpow2.f32 %v4502_v38  ;;  %v5736_v50 = vpop.eup %5735  ;;  %v2564_v18 = vadd.f32 1.0, %v5734_v55  ;;  %v4513_v38 = vmul.f32 -1.442695, %v8744_v61  ;;  %v4512_v55 = vmul.f32 -1.442695, %v8748_v40 }
 0x2ae   : > { %5753 = vrcp.f32 %v2555_v19  ;;  %v5738_v42 = vpop.eup %5737  ;;  %v2563_v27 = vadd.f32 1.0, %v5736_v50 }
 0x2af   : > { %5755 = vpow2.f32 %v4504_v14  ;;  %v2565_v11 = vadd.f32 1.0, %v5738_v42  ;;  %v8763_v14 = vpop.f32.mrb[141].mxu0 }
 0x2b0   : > { %5757 = vrcp.f32 %v2562_v2  ;;  %v9962_v2 = vld [vmem:[#allocation60_spill] sm:$0xff] }
 0x2b1   : > { %v5740_v4 = vpop.eup %5739  ;;  %5759 = vrcp.f32 %v2564_v18  ;;  %v8769_v50 = vadd.f32 %v9962_v2, %v8481_v35 }
 0x2b2   : > { %v5742_v24 = vpop.eup %5741  ;;  %v3505_v37 = vmul.f32 %v5740_v4, %v8602_v23  ;;  %5761 = vrcp.f32 %v2563_v27  ;;  %v4514_v23 = vmul.f32 -1.442695, %v8757_v63 }
 0x2b3   : > { %v5744_v19 = vpop.eup %5743  ;;  %v3512_v60 = vmul.f32 %v5742_v24, %v8611_v29  ;;  %5763 = vrcp.f32 %v2565_v11  ;;  %v9963_v29 = vld [vmem:[#allocation18_spill] sm:$0xff]  ;;  %v8779_v24 = vpop.f32.mrb[142].mxu1 }
 0x2b4   : > { %v5746_v18 = vpop.eup %5745  ;;  %v4132_v42 = vadd.f32 %v8687_v57, %v3505_v37  ;;  %v2572_v43 = vadd.f32 1.0, %v5744_v19  ;;  %5765 = vpow2.f32 %v4511_v21  ;;  %v8777_v11 = vadd.f32 %v9963_v29, %v8485_v12  ;;  %v9964_v57 = vld [vmem:[#allocation37_spill] sm:$0xff]  ;;  %v9966_v29 = vld [vmem:[#allocation22_spill] sm:$0xff] }
 0x2b5   : > { %v5748_v27 = vpop.eup %5747  ;;  %v4022_v4 = vadd.f32 %v8701_v20, %v3512_v60  ;;  %v3514_v22 = vmul.f32 %v5746_v18, %v8615_v1  ;;  %5767 = vpow2.f32 %v4513_v38  ;;  %v8783_v21 = vadd.f32 %v9964_v57, %v8493_v28  ;;  %v9965_v37 = vld [vmem:[#allocation61_spill] sm:$0xff]  ;;  %v8789_v20 = vpop.f32.mrb[142].mxu0 }
 0x2b6   : > { %v5750_v2 = vpop.eup %5749  ;;  %5769 = vrcp.f32 %v2572_v43  ;;  %v2574_v34 = vadd.f32 1.0, %v5748_v27  ;;  %v8787_v19 = vadd.f32 %v9965_v37, %v8517_v41  ;;  %v4521_v18 = vmul.f32 -1.442695, %v8769_v50 }
 0x2b7   : > { %v5752_v1 = vpop.eup %5751  ;;  %v4096_v38 = vadd.f32 %v8717_v49, %v3514_v22  ;;  %v3513_v60 = vmul.f32 %v5750_v2, %v8624_v39  ;;  %5771 = vpow2.f32 %v4512_v55  ;;  %v8796_v57 = vadd.f32 %v9966_v29, %v8481_v35  ;;  %v8801_v49 = vpop.f32.mrb[143].mxu1 }
 0x2b8   : > { %v5754_v43 = vpop.eup %5753  ;;  %5773 = vrcp.f32 %v2574_v34  ;;  %v2573_v27 = vadd.f32 1.0, %v5752_v1  ;;  %v4523_v22 = vmul.f32 -1.442695, %v8777_v11  ;;  %v4522_v34 = vmul.f32 -1.442695, %v8783_v21  ;;  %v8805_v1 = vpop.f32.mrb[143].mxu0 }
 0x2b9   : > { %v5756_v13 = vpop.eup %5755  ;;  %v4059_v37 = vadd.f32 %v8725_v36, %v3513_v60  ;;  %v3515_v7 = vmul.f32 %v5754_v43, %v8628_v31  ;;  %5775 = vpow2.f32 %v4514_v23  ;;  %v4524_v2 = vmul.f32 -1.442695, %v8787_v19  ;;  %9967 = vst [vmem:[#allocation30_spill] sm:$0xff] %v8805_v1  ;;  %v9968_v31 = vld [vmem:[#allocation62_spill] sm:$0xff] }
 0x2ba   : > { %v5758_v39 = vpop.eup %5757  ;;  %5777 = vrcp.f32 %v2573_v27  ;;  %v2575_v55 = vadd.f32 1.0, %v5756_v13  ;;  %v8810_v23 = vadd.f32 %v9968_v31, %v8485_v12  ;;  %v4531_v13 = vmul.f32 -1.442695, %v8796_v57  ;;  %v9970_v31 = vld [vmem:[#allocation64_spill] sm:$0xff] }
 0x2bb   : > { %v5760_v29 = vpop.eup %5759  ;;  %v4133_v33 = vadd.f32 %v4132_v42, %v3515_v7  ;;  %v3522_v36 = vmul.f32 %v5758_v39, %v8642_v46  ;;  %5779 = vpow2.f32 %v4521_v18  ;;  %v9969_v7 = vld [vmem:[#allocation63_spill] sm:$0xff] }
 0x2bc   : > { %v5762_v60 = vpop.eup %5761  ;;  %v3524_v43 = vmul.f32 %v5760_v29, %v8649_v17  ;;  %5781 = vrcp.f32 %v2575_v55  ;;  %v8817_v42 = vadd.f32 %v9969_v7, %v8493_v28  ;;  %v8822_v17 = vadd.f32 %v9970_v31, %v8517_v41 }
 0x2bd   : > { %v5764_v27 = vpop.eup %5763  ;;  %v4023_v59 = vadd.f32 %v4022_v4, %v3522_v36  ;;  %v3523_v0 = vmul.f32 %v5762_v60, %v8665_v62  ;;  %5783 = vpow2.f32 %v4523_v22  ;;  %v4533_v62 = vmul.f32 -1.442695, %v8810_v23  ;;  %v8825_v60 = vpop.f32.mrb[144].mxu1 }
 0x2be   : > { %v5766_v46 = vpop.eup %5765  ;;  %v4097_v18 = vadd.f32 %v4096_v38, %v3524_v43  ;;  %v3525_v39 = vmul.f32 %v5764_v27, %v8669_v15  ;;  %5785 = vpow2.f32 %v4522_v34  ;;  %9971 = vst [vmem:[#allocation48_spill] sm:$0xff] %v8825_v60  ;;  %v8827_v38 = vpop.f32.mrb[144].mxu0  ;;  %v4532_v43 = vmul.f32 -1.442695, %v8817_v42 }
 0x2bf   : > { %v5768_v55 = vpop.eup %5767  ;;  %v4060_v29 = vadd.f32 %v4059_v37, %v3523_v0  ;;  %v2582_v1 = vadd.f32 1.0, %v5766_v46  ;;  %5787 = vpow2.f32 %v4524_v2  ;;  %9972 = vst [vmem:[#allocation50_spill] sm:$0xff] %v8827_v38  ;;  %v9973_v0 = vld [vmem:[#allocation65_spill] sm:$0xff]  ;;  %v8835_v2 = vpop.f32.mrb[145].mxu1 }
 0x2c0   : > { %v5770_v4 = vpop.eup %5769  ;;  %v4134_v22 = vadd.f32 %v4133_v33, %v3525_v39  ;;  %v2584_v36 = vadd.f32 1.0, %v5768_v55  ;;  %5789 = vpow2.f32 %v4531_v13  ;;  %v8833_v37 = vadd.f32 %v9973_v0, %v8481_v35  ;;  %9974 = vst [vmem:[#allocation51_spill] sm:$0xff] %v8835_v2  ;;  %v8837_v27 = vpop.f32.mrb[145].mxu0 }
 0x2c1   : > { %v5772_v15 = vpop.eup %5771  ;;  %v3532_v34 = vmul.f32 %v5770_v4, %v8693_v45  ;;  %5791 = vrcp.f32 %v2582_v1  ;;  %9975 = vst [vmem:[#allocation53_spill] sm:$0xff] %v8837_v27  ;;  %v4534_v45 = vmul.f32 -1.442695, %v8822_v17  ;;  %v8841_v1 = vpop.f32.mrb[146].mxu1 }
 0x2c2   : > { %v5774_v33 = vpop.eup %5773  ;;  %5793 = vrcp.f32 %v2584_v36  ;;  %v2583_v13 = vadd.f32 1.0, %v5772_v15  ;;  %9976 = vst [vmem:[#allocation39_spill] sm:$0xff] %v8841_v1  ;;  %v8843_v4 = vpop.f32.mrb[146].mxu0  ;;  %v4541_v36 = vmul.f32 -1.442695, %v8833_v37 }
 0x2c3   : > { %v5776_v7 = vpop.eup %5775  ;;  %v4024_v46 = vadd.f32 %v4023_v59, %v3532_v34  ;;  %v3534_v39 = vmul.f32 %v5774_v33, %v8711_v32  ;;  %5795 = vpow2.f32 %v4533_v62  ;;  %9977 = vst [vmem:[#allocation43_spill] sm:$0xff] %v8843_v4  ;;  %v9978_v62 = vld [vmem:[#allocation66_spill] sm:$0xff] }
 0x2c4   : > { %v5778_v31 = vpop.eup %5777  ;;  %5797 = vrcp.f32 %v2583_v13  ;;  %v2585_v55 = vadd.f32 1.0, %v5776_v7  ;;  %v8849_v15 = vadd.f32 %v9978_v62, %v8485_v12  ;;  %v9979_v7 = vld [vmem:[#allocation67_spill] sm:$0xff]  ;;  %v9981_v62 = vld [vmem:[#allocation68_spill] sm:$0xff] }
 0x2c5   : > { %v5780_v0 = vpop.eup %5779  ;;  %v4098_v2 = vadd.f32 %v4097_v18, %v3534_v39  ;;  %v3533_v27 = vmul.f32 %v5778_v31, %v8723_v3  ;;  %5799 = vpow2.f32 %v4532_v43  ;;  %v8854_v18 = vadd.f32 %v9979_v7, %v8493_v28  ;;  %v8856_v3 = vpop.f32.mrb[147].mxu1 }
 0x2c6   : > { %v5782_v59 = vpop.eup %5781  ;;  %5801 = vrcp.f32 %v2585_v55  ;;  %v2592_v32 = vadd.f32 1.0, %v5780_v0  ;;  %9980 = vst [vmem:[#allocation44_spill] sm:$0xff] %v8856_v3  ;;  %v8860_v4 = vadd.f32 %v9981_v62, %v8517_v41 }
 0x2c7   : > { %v5784_v34 = vpop.eup %5783  ;;  %v4061_v33 = vadd.f32 %v4060_v29, %v3533_v27  ;;  %v3535_v13 = vmul.f32 %v5782_v59, %v8730_v52  ;;  %5803 = vpow2.f32 %v4534_v45  ;;  %v4543_v27 = vmul.f32 -1.442695, %v8849_v15 }
 0x2c8   : > { %v5786_v43 = vpop.eup %5785  ;;  %5805 = vrcp.f32 %v2592_v32  ;;  %v2594_v39 = vadd.f32 1.0, %v5784_v34  ;;  %v4542_v7 = vmul.f32 -1.442695, %v8854_v18  ;;  %v9982_v32 = vld [vmem:[#allocation71_spill] sm:$0xff]  ;;  %v4544_v62 = vmul.f32 -1.442695, %v8860_v4 }
 0x2c9   : > { %v5788_v31 = vpop.eup %5787  ;;  %v4135_v55 = vadd.f32 %v4134_v22, %v3535_v13  ;;  %v2593_v0 = vadd.f32 1.0, %v5786_v43  ;;  %5807 = vpow2.f32 %v4541_v36  ;;  %v8866_v34 = vadd.f32 %v9982_v32, %v8481_v35  ;;  %v8868_v22 = vpop.f32.mrb[147].mxu0  ;;  %v9984_v43 = vld [vmem:[#allocation73_spill] sm:$0xff] }
 0x2ca   : > { %v5790_v29 = vpop.eup %5789  ;;  %5809 = vrcp.f32 %v2594_v39  ;;  %v2595_v52 = vadd.f32 1.0, %v5788_v31  ;;  %9983 = vst [vmem:[#allocation45_spill] sm:$0xff] %v8868_v22  ;;  %v8873_v39 = vadd.f32 %v9984_v43, %v8485_v12  ;;  %v9985_v22 = vld [vmem:[#allocation74_spill] sm:$0xff] }
 0x2cb   : > { %v5792_v45 = vpop.eup %5791  ;;  %5811 = vrcp.f32 %v2593_v0  ;;  %v2602_v59 = vadd.f32 1.0, %v5790_v29  ;;  %v8879_v1 = vadd.f32 %v9985_v22, %v8493_v28  ;;  %v4551_v43 = vmul.f32 -1.442695, %v8866_v34 }
 0x2cc   : > { %v5794_v36 = vpop.eup %5793  ;;  %v3542_v13 = vmul.f32 %v5792_v45, %v8740_v30  ;;  %5813 = vrcp.f32 %v2595_v52 }
 0x2cd   : > { %v5796_v31 = vpop.eup %5795  ;;  %v3544_v0 = vmul.f32 %v5794_v36, %v8744_v61  ;;  %5815 = vrcp.f32 %v2602_v59  ;;  %v4553_v59 = vmul.f32 -1.442695, %v8873_v39 }
 0x2ce   : > { %v5798_v29 = vpop.eup %5797  ;;  %v4025_v3 = vadd.f32 %v4024_v46, %v3542_v13  ;;  %v2604_v32 = vadd.f32 1.0, %v5796_v31  ;;  %5817 = vpow2.f32 %v4543_v27  ;;  %v9986_v46 = vld [vmem:[#allocation75_spill] sm:$0xff]  ;;  %v8895_v31 = vpop.f32.mrb[148].mxu0 }
 0x2cf   : > { %v5800_v30 = vpop.eup %5799  ;;  %v4099_v52 = vadd.f32 %v4098_v2, %v3544_v0  ;;  %v3543_v45 = vmul.f32 %v5798_v29, %v8748_v40  ;;  %5819 = vpow2.f32 %v4542_v7  ;;  %v8886_v36 = vadd.f32 %v9986_v46, %v8517_v41  ;;  %v9987_v2 = vld [vmem:[#allocation76_spill] sm:$0xff]  ;;  %v8893_v7 = vpop.f32.mrb[148].mxu1  ;;  %9989 = vst [vmem:[#allocation92_spill] sm:$0xff] %v8895_v31 }
 0x2d0   : > { %v5802_v38 = vpop.eup %5801  ;;  %5821 = vrcp.f32 %v2604_v32  ;;  %v2603_v61 = vadd.f32 1.0, %v5800_v30  ;;  %v8891_v40 = vadd.f32 %v9987_v2, %v8481_v35  ;;  %9988 = vst [vmem:[#allocation49_spill] sm:$0xff] %v8893_v7  ;;  %v9990_v32 = vld [vmem:[#allocation78_spill] sm:$0xff]  ;;  %v8901_v46 = vpop.f32.mrb[149].mxu1 }
 0x2d1   : > { %v5804_v27 = vpop.eup %5803  ;;  %v4062_v13 = vadd.f32 %v4061_v33, %v3543_v45  ;;  %v3545_v22 = vmul.f32 %v5802_v38, %v8757_v63  ;;  %5823 = vpow2.f32 %v4544_v62  ;;  %v8899_v30 = vadd.f32 %v9990_v32, %v8485_v12  ;;  %9991 = vst [vmem:[#allocation52_spill] sm:$0xff] %v8901_v46  ;;  %v8903_v33 = vpop.f32.mrb[149].mxu0 }
 0x2d2   : > { %v5806_v0 = vpop.eup %5805  ;;  %5825 = vrcp.f32 %v2603_v61  ;;  %v2605_v29 = vadd.f32 1.0, %v5804_v27  ;;  %9992 = vst [vmem:[#allocation93_spill] sm:$0xff] %v8903_v33  ;;  %v4552_v45 = vmul.f32 -1.442695, %v8879_v1  ;;  %v4554_v61 = vmul.f32 -1.442695, %v8886_v36 }
 0x2d3   : > { %v5808_v63 = vpop.eup %5807  ;;  %v4136_v38 = vadd.f32 %v4135_v55, %v3545_v22  ;;  %v3552_v62 = vmul.f32 %v5806_v0, %v8769_v50  ;;  %5827 = vpow2.f32 %v4551_v43  ;;  %v9993_v27 = vld [vmem:[#allocation79_spill] sm:$0xff]  ;;  %v4561_v55 = vmul.f32 -1.442695, %v8891_v40  ;;  %v8914_v50 = vpop.f32.mrb[150].mxu1 }
 0x2d4   : > { %v5810_v2 = vpop.eup %5809  ;;  %5829 = vrcp.f32 %v2605_v29  ;;  %v2612_v31 = vadd.f32 1.0, %v5808_v63  ;;  %v8910_v32 = vadd.f32 %v9993_v27, %v8493_v28  ;;  %v8916_v43 = vpop.f32.mrb[150].mxu0  ;;  %v4563_v29 = vmul.f32 -1.442695, %v8899_v30 }
 0x2d5   : > { %v5812_v7 = vpop.eup %5811  ;;  %v4026_v46 = vadd.f32 %v4025_v3, %v3552_v62  ;;  %v3554_v33 = vmul.f32 %v5810_v2, %v8777_v11  ;;  %5831 = vpow2.f32 %v4553_v59  ;;  %9994 = vst [vmem:[#allocation69_spill] sm:$0xff] %v8916_v43  ;;  %v9995_v11 = vld [vmem:[#allocation80_spill] sm:$0xff]  ;;  %v8925_v59 = vpop.f32.mrb[151].mxu1 }
 0x2d6   : > { %v5814_v22 = vpop.eup %5813  ;;  %v3553_v0 = vmul.f32 %v5812_v7, %v8783_v21  ;;  %5833 = vrcp.f32 %v2612_v31  ;;  %v8923_v3 = vadd.f32 %v9995_v11, %v8517_v41  ;;  %9996 = vst [vmem:[#allocation85_spill] sm:$0xff] %v8925_v59  ;;  %v8927_v62 = vpop.f32.mrb[151].mxu0  ;;  %v4562_v7 = vmul.f32 -1.442695, %v8910_v32 }
 0x2d7   : > { %v5816_v63 = vpop.eup %5815  ;;  %v4100_v27 = vadd.f32 %v4099_v52, %v3554_v33  ;;  %v3555_v60 = vmul.f32 %v5814_v22, %v8787_v19  ;;  %5835 = vpow2.f32 %v4552_v45  ;;  %9997 = vst [vmem:[#allocation6_spill] sm:$0xff] %v8927_v62  ;;  %v9998_v19 = vld [vmem:[#allocation83_spill] sm:$0xff] }
 0x2d8   : > { %v5818_v2 = vpop.eup %5817  ;;  %v4063_v43 = vadd.f32 %v4062_v13, %v3553_v0  ;;  %v3562_v21 = vmul.f32 %v5816_v63, %v8796_v57  ;;  %5837 = vpow2.f32 %v4554_v61  ;;  %v8933_v45 = vadd.f32 %v9998_v19, %v8481_v35  ;;  %v9999_v61 = vld [vmem:[#allocation84_spill] sm:$0xff] }
 0x2d9   : > { %v5820_v31 = vpop.eup %5819  ;;  %v4137_v52 = vadd.f32 %v4136_v38, %v3555_v60  ;;  %v2614_v33 = vadd.f32 1.0, %v5818_v2  ;;  %5839 = vpow2.f32 %v4561_v55  ;;  %v4564_v57 = vmul.f32 -1.442695, %v8923_v3 }
 0x2da   : > { %v5822_v22 = vpop.eup %5821  ;;  %v4027_v11 = vadd.f32 %v4026_v46, %v3562_v21  ;;  %v2613_v59 = vadd.f32 1.0, %v5820_v31  ;;  %5841 = vpow2.f32 %v4563_v29  ;;  %v8939_v0 = vadd.f32 %v9999_v61, %v8485_v12 }
 0x2db   : > { %v5824_v62 = vpop.eup %5823  ;;  %v3564_v13 = vmul.f32 %v5822_v22, %v8810_v23  ;;  %5843 = vrcp.f32 %v2614_v33  ;;  %v4571_v46 = vmul.f32 -1.442695, %v8933_v45  ;;  %v8945_v22 = vpop.f32.mrb[152].mxu1 }
 0x2dc   : > { %v5826_v60 = vpop.eup %5825  ;;  %5845 = vrcp.f32 %v2613_v59  ;;  %v2615_v38 = vadd.f32 1.0, %v5824_v62  ;;  %v4573_v19 = vmul.f32 -1.442695, %v8939_v0  ;;  %v8947_v59 = vpop.f32.mrb[152].mxu0  ;;  %v10001_v62 = vld [vmem:[#allocation86_spill] sm:$0xff] }
 0x2dd   : > { %v5828_v55 = vpop.eup %5827  ;;  %v4101_v63 = vadd.f32 %v4100_v27, %v3564_v13  ;;  %v3563_v2 = vmul.f32 %v5826_v60, %v8817_v42  ;;  %5847 = vpow2.f32 %v4562_v7  ;;  %10000 = vst [vmem:[#allocation7_spill] sm:$0xff] %v8947_v59  ;;  %v8951_v7 = vadd.f32 %v10001_v62, %v8493_v28  ;;  %v8953_v13 = vpop.f32.mrb[153].mxu1  ;;  %v10004_v60 = vld [vmem:[#allocation87_spill] sm:$0xff]  ;;  %v10005_v62 = vld [vmem:[#allocation88_spill] sm:$0xff] }
 0x2de   : > { %v5830_v29 = vpop.eup %5829  ;;  %5849 = vrcp.f32 %v2615_v38  ;;  %v2622_v23 = vadd.f32 1.0, %v5828_v55  ;;  %10002 = vst [vmem:[#allocation21_spill] sm:$0xff] %v8953_v13  ;;  %v8955_v61 = vpop.f32.mrb[153].mxu0  ;;  %v8960_v38 = vadd.f32 %v10004_v60, %v8517_v41  ;;  %v8964_v13 = vadd.f32 %v10005_v62, %v8481_v35 }
 0x2df   : > { %v5832_v21 = vpop.eup %5831  ;;  %v4064_v31 = vadd.f32 %v4063_v43, %v3563_v2  ;;  %v3565_v33 = vmul.f32 %v5830_v29, %v8822_v17  ;;  %5851 = vpow2.f32 %v4564_v57  ;;  %10003 = vst [vmem:[#allocation9_spill] sm:$0xff] %v8955_v61  ;;  %v8979_v60 = vpop.f32.mrb[154].mxu0 }
 0x2e0   : > { %v5834_v27 = vpop.eup %5833  ;;  %5853 = vrcp.f32 %v2622_v23  ;;  %v2624_v42 = vadd.f32 1.0, %v5832_v21  ;;  %10007 = vst [vmem:[#allocation25_spill] sm:$0xff] %v8979_v60 }
 0x2e1   : > { %v5836_v43 = vpop.eup %5835  ;;  %v4138_v17 = vadd.f32 %v4137_v52, %v3565_v33  ;;  %v3572_v57 = vmul.f32 %v5834_v27, %v8833_v37  ;;  %5855 = vpow2.f32 %v4571_v46  ;;  %v4572_v37 = vmul.f32 -1.442695, %v8951_v7 }
 0x2e2   : > { %v5838_v55 = vpop.eup %5837  ;;  %5857 = vrcp.f32 %v2624_v42  ;;  %v2623_v2 = vadd.f32 1.0, %v5836_v43  ;;  %v8969_v46 = vadd.f32 %v8448_v44, %v8485_v12  ;;  %v8975_v43 = vadd.f32 %v8460_v51, %v8493_v28 }
 0x2e3   : > { %v5840_v29 = vpop.eup %5839  ;;  %v4028_v23 = vadd.f32 %v4027_v11, %v3572_v57  ;;  %v2625_v21 = vadd.f32 1.0, %v5838_v55  ;;  %5859 = vpow2.f32 %v4573_v19  ;;  %v4574_v11 = vmul.f32 -1.442695, %v8960_v38  ;;  %v8977_v57 = vpop.f32.mrb[154].mxu1 }
 0x2e4   : > { %v5842_v61 = vpop.eup %5841  ;;  %5861 = vrcp.f32 %v2623_v2  ;;  %v2632_v52 = vadd.f32 1.0, %v5840_v29  ;;  %10006 = vst [vmem:[#allocation8_spill] sm:$0xff] %v8977_v57  ;;  %v8989_v57 = vpop.f32.mrb[155].mxu1 }
 0x2e5   : > { %v5844_v33 = vpop.eup %5843  ;;  %5863 = vrcp.f32 %v2625_v21  ;;  %v2634_v27 = vadd.f32 1.0, %v5842_v61  ;;  %v4581_v61 = vmul.f32 -1.442695, %v8964_v13  ;;  %10009 = vst [vmem:[#allocation10_spill] sm:$0xff] %v8989_v57 }
 0x2e6   : > { %v5846_v42 = vpop.eup %5845  ;;  %v3574_v19 = vmul.f32 %v5844_v33, %v8849_v15  ;;  %5865 = vrcp.f32 %v2632_v52  ;;  %v4583_v15 = vmul.f32 -1.442695, %v8969_v46  ;;  %v10008_v33 = vld [vmem:[#allocation89_spill] sm:$0xff] }
 0x2e7   : > { %v5848_v55 = vpop.eup %5847  ;;  %v3573_v44 = vmul.f32 %v5846_v42, %v8854_v18  ;;  %5867 = vrcp.f32 %v2634_v27  ;;  %v8987_v60 = vadd.f32 %v10008_v33, %v8517_v41 }
 0x2e8   : > { %v5850_v2 = vpop.eup %5849  ;;  %v4102_v29 = vadd.f32 %v4101_v63, %v3574_v19  ;;  %v2633_v21 = vadd.f32 1.0, %v5848_v55  ;;  %5869 = vpow2.f32 %v4572_v37  ;;  %v4582_v63 = vmul.f32 -1.442695, %v8975_v43  ;;  %v10010_v37 = vld [vmem:[#allocation90_spill] sm:$0xff]  ;;  %v8996_v19 = vpop.f32.mrb[155].mxu0  ;;  %v10012_v55 = vld [vmem:[#allocation91_spill] sm:$0xff] }
 0x2e9   : > { %v5852_v62 = vpop.eup %5851  ;;  %v4065_v52 = vadd.f32 %v4064_v31, %v3573_v44  ;;  %v3575_v51 = vmul.f32 %v5850_v2, %v8860_v4  ;;  %5871 = vpow2.f32 %v4574_v11  ;;  %v8994_v42 = vadd.f32 %v10010_v37, %v8481_v35  ;;  %10011 = vst [vmem:[#allocation70_spill] sm:$0xff] %v8996_v19 }
 0x2ea   : > { %v5854_v18 = vpop.eup %5853  ;;  %5873 = vrcp.f32 %v2633_v21  ;;  %v2635_v27 = vadd.f32 1.0, %v5852_v62  ;;  %v9001_v44 = vadd.f32 %v10012_v55, %v8485_v12  ;;  %v10013_v62 = vld [vmem:[#allocation3_spill] sm:$0xff] }
 0x2eb   : > { %v5856_v31 = vpop.eup %5855  ;;  %v4139_v4 = vadd.f32 %v4138_v17, %v3575_v51  ;;  %v3582_v11 = vmul.f32 %v5854_v18, %v8866_v34  ;;  %5875 = vpow2.f32 %v4581_v61  ;;  %v9005_v33 = vadd.f32 %v10013_v62, %v8493_v28  ;;  %v10014_v18 = vld [vmem:[#allocation13_spill] sm:$0xff] }
 0x2ec   : > { %v5858_v2 = vpop.eup %5857  ;;  %5877 = vrcp.f32 %v2635_v27  ;;  %v2642_v21 = vadd.f32 1.0, %v5856_v31  ;;  %v4584_v17 = vmul.f32 -1.442695, %v8987_v60  ;;  %v4591_v51 = vmul.f32 -1.442695, %v8994_v42 }
 0x2ed   : > { %v5860_v37 = vpop.eup %5859  ;;  %v4029_v57 = vadd.f32 %v4028_v23, %v3582_v11  ;;  %v3584_v19 = vmul.f32 %v5858_v2, %v8873_v39  ;;  %5879 = vpow2.f32 %v4583_v15  ;;  %v9012_v27 = vadd.f32 %v10014_v18, %v8517_v41  ;;  %v10015_v18 = vld [vmem:[#allocation4_spill] sm:$0xff] }
 0x2ee   : > { %v5862_v34 = vpop.eup %5861  ;;  %5881 = vrcp.f32 %v2642_v21  ;;  %v2644_v61 = vadd.f32 1.0, %v5860_v37  ;;  %v4593_v23 = vmul.f32 -1.442695, %v9001_v44  ;;  %v4592_v11 = vmul.f32 -1.442695, %v9005_v33 }
 0x2ef   : > { %v5864_v31 = vpop.eup %5863  ;;  %v4103_v55 = vadd.f32 %v4102_v29, %v3584_v19  ;;  %v3583_v62 = vmul.f32 %v5862_v34, %v8879_v1  ;;  %5883 = vpow2.f32 %v4582_v63  ;;  %v9021_v59 = vadd.f32 %v10015_v18, %v8481_v35  ;;  %v9023_v29 = vpop.f32.mrb[156].mxu1 }
 0x2f0   : > { %v5866_v39 = vpop.eup %5865  ;;  %v3585_v15 = vmul.f32 %v5864_v31, %v8886_v36  ;;  %5885 = vrcp.f32 %v2644_v61  ;;  %v9025_v1 = vpop.f32.mrb[156].mxu0  ;;  %v4594_v34 = vmul.f32 -1.442695, %v9012_v27 }
 0x2f1   : > { %v5868_v2 = vpop.eup %5867  ;;  %v4066_v21 = vadd.f32 %v4065_v52, %v3583_v62  ;;  %v3592_v37 = vmul.f32 %v5866_v39, %v8891_v40  ;;  %5887 = vpow2.f32 %v4584_v17  ;;  %10016 = vst [vmem:[#allocation27_spill] sm:$0xff] %v9025_v1  ;;  %v9029_v61 = vpop.f32.mrb[157].mxu1  ;;  %v10019_v62 = vld [vmem:[#allocation15_spill] sm:$0xff] }
 0x2f2   : > { %v5870_v63 = vpop.eup %5869  ;;  %v4140_v19 = vadd.f32 %v4139_v4, %v3585_v15  ;;  %v3594_v36 = vmul.f32 %v5868_v2, %v8899_v30  ;;  %5889 = vpow2.f32 %v4591_v51  ;;  %10017 = vst [vmem:[#allocation72_spill] sm:$0xff] %v9029_v61  ;;  %v9031_v52 = vpop.f32.mrb[157].mxu0  ;;  %v9035_v39 = vadd.f32 %v10019_v62, %v8485_v12 }
 0x2f3   : > { %10018 = vst [vmem:[#allocation33_spill] sm:$0xff] %v9031_v52  ;;  %v5872_v40 = vpop.eup %5871  ;;  %v4030_v17 = vadd.f32 %v4029_v57, %v3592_v37  ;;  %v2643_v31 = vadd.f32 1.0, %v5870_v63  ;;  %5891 = vpow2.f32 %v4593_v23  ;;  %v9037_v18 = vpop.f32.mrb[158].mxu1  ;;  %v4601_v57 = vmul.f32 -1.442695, %v9021_v59  ;;  %v10022_v23 = vld [vmem:[#allocation5_spill] sm:$0xff] }
 0x2f4   : > { %10020 = vst [vmem:[#allocation2_spill] sm:$0xff] %v9037_v18  ;;  %v5874_v4 = vpop.eup %5873  ;;  %v4104_v15 = vadd.f32 %v4103_v55, %v3594_v36  ;;  %v2645_v30 = vadd.f32 1.0, %v5872_v40  ;;  %5893 = vpow2.f32 %v4592_v11  ;;  %v9039_v51 = vpop.f32.mrb[158].mxu0  ;;  %v9045_v37 = vadd.f32 %v10022_v23, %v8493_v28 }
 0x2f5   : > { %10021 = vst [vmem:[#allocation14_spill] sm:$0xff] %v9039_v51  ;;  %v5876_v2 = vpop.eup %5875  ;;  %v3593_v61 = vmul.f32 %v5874_v4, %v8910_v32  ;;  %5895 = vrcp.f32 %v2643_v31  ;;  %v4603_v11 = vmul.f32 -1.442695, %v9035_v39  ;;  %v9049_v36 = vpop.f32.mrb[159].mxu1 }
 0x2f6   : > { %v5878_v63 = vpop.eup %5877  ;;  %5897 = vrcp.f32 %v2645_v30  ;;  %v2652_v62 = vadd.f32 1.0, %v5876_v2  ;;  %10023 = vst [vmem:[#allocation77_spill] sm:$0xff] %v9049_v36  ;;  %v9051_v31 = vpop.f32.mrb[159].mxu0  ;;  %v4602_v30 = vmul.f32 -1.442695, %v9045_v37 }
 0x2f7   : > { %v5880_v18 = vpop.eup %5879  ;;  %v4067_v52 = vadd.f32 %v4066_v21, %v3593_v61  ;;  %v3595_v55 = vmul.f32 %v5878_v63, %v8923_v3  ;;  %5899 = vpow2.f32 %v4594_v34  ;;  %10024 = vst [vmem:[#allocation35_spill] sm:$0xff] %v9051_v31  ;;  %v10025_v34 = vld [vmem:[#allocation17_spill] sm:$0xff] }
 0x2f8   : > { %v5882_v32 = vpop.eup %5881  ;;  %5901 = vrcp.f32 %v2652_v62  ;;  %v2654_v40 = vadd.f32 1.0, %v5880_v18  ;;  %v9057_v61 = vadd.f32 %v10025_v34, %v8517_v41 }
 0x2f9   : > { %v5884_v4 = vpop.eup %5883  ;;  %v4141_v23 = vadd.f32 %v4140_v19, %v3595_v55  ;;  %v3602_v51 = vmul.f32 %v5882_v32, %v8933_v45  ;;  %5903 = vpow2.f32 %v4601_v57  ;;  %v9062_v19 = vadd.f32 %v8573_v6, %v8481_v35 }
 0x2fa   : > { %v5886_v21 = vpop.eup %5885  ;;  %5905 = vrcp.f32 %v2654_v40  ;;  %v2653_v3 = vadd.f32 1.0, %v5884_v4  ;;  %v10026_v40 = vld [vmem:[#allocation19_spill] sm:$0xff] }
 0x2fb   : > { %v5888_v2 = vpop.eup %5887  ;;  %v4031_v63 = vadd.f32 %v4030_v17, %v3602_v51  ;;  %v3604_v18 = vmul.f32 %v5886_v21, %v8939_v0  ;;  %5907 = vpow2.f32 %v4603_v11  ;;  %v9066_v4 = vadd.f32 %v10026_v40, %v8485_v12  ;;  %v10027_v51 = vld [vmem:[#allocation20_spill] sm:$0xff] }
 0x2fc   : > { %v5890_v45 = vpop.eup %5889  ;;  %5909 = vrcp.f32 %v2653_v3  ;;  %v2655_v57 = vadd.f32 1.0, %v5888_v2  ;;  %v4604_v0 = vmul.f32 -1.442695, %v9057_v61  ;;  %v9071_v6 = vadd.f32 %v10027_v51, %v8493_v28  ;;  %v10028_v2 = vld [vmem:[#allocation11_spill] sm:$0xff] }
 0x2fd   : > { %v5892_v62 = vpop.eup %5891  ;;  %v4105_v55 = vadd.f32 %v4104_v15, %v3604_v18  ;;  %v2662_v32 = vadd.f32 1.0, %v5890_v45  ;;  %5911 = vpow2.f32 %v4602_v30  ;;  %v4611_v15 = vmul.f32 -1.442695, %v9062_v19 }
 0x2fe   : > { %v5894_v34 = vpop.eup %5893  ;;  %5913 = vrcp.f32 %v2655_v57  ;;  %v2664_v17 = vadd.f32 1.0, %v5892_v62  ;;  %v9077_v18 = vadd.f32 %v10028_v2, %v8517_v41  ;;  %v4613_v62 = vmul.f32 -1.442695, %v9066_v4 }
 0x2ff   : > { %v5896_v11 = vpop.eup %5895  ;;  %5915 = vrcp.f32 %v2662_v32  ;;  %v2663_v21 = vadd.f32 1.0, %v5894_v34  ;;  %v4612_v34 = vmul.f32 -1.442695, %v9071_v6 }
 0x300   : > { %v5898_v3 = vpop.eup %5897  ;;  %v3603_v30 = vmul.f32 %v5896_v11, %v8951_v7  ;;  %5917 = vrcp.f32 %v2664_v17  ;;  %v10029_v17 = vld [vmem:[#allocation28_spill] sm:$0xff] }
 0x301   : > { %v5900_v45 = vpop.eup %5899  ;;  %v3605_v57 = vmul.f32 %v5898_v3, %v8960_v38  ;;  %5919 = vrcp.f32 %v2663_v21  ;;  %v9085_v11 = vadd.f32 %v10029_v17, %v8481_v35  ;;  %v4614_v21 = vmul.f32 -1.442695, %v9077_v18 }
 0x302   : > { %v5902_v40 = vpop.eup %5901  ;;  %v4068_v51 = vadd.f32 %v4067_v52, %v3603_v30  ;;  %v2665_v32 = vadd.f32 1.0, %v5900_v45  ;;  %5921 = vpow2.f32 %v4604_v0  ;;  %v10030_v52 = vld [vmem:[#allocation12_spill] sm:$0xff] }
 0x303   : > { %v5904_v31 = vpop.eup %5903  ;;  %v4142_v36 = vadd.f32 %v4141_v23, %v3605_v57  ;;  %v3612_v7 = vmul.f32 %v5902_v40, %v8964_v13  ;;  %5923 = vpow2.f32 %v4611_v15  ;;  %v9090_v3 = vadd.f32 %v10030_v52, %v8485_v12  ;;  %v10031_v13 = vld [vmem:[#allocation31_spill] sm:$0xff] }
 0x304   : > { %v5906_v2 = vpop.eup %5905  ;;  %5925 = vrcp.f32 %v2665_v32  ;;  %v2672_v38 = vadd.f32 1.0, %v5904_v31  ;;  %v9095_v15 = vadd.f32 %v10031_v13, %v8493_v28  ;;  %v10032_v31 = vld [vmem:[#allocation16_spill] sm:$0xff] }
 0x305   : > { %v5908_v0 = vpop.eup %5907  ;;  %v4032_v30 = vadd.f32 %v4031_v63, %v3612_v7  ;;  %v3614_v23 = vmul.f32 %v5906_v2, %v8969_v46  ;;  %5927 = vpow2.f32 %v4613_v62  ;;  %v9099_v40 = vadd.f32 %v10032_v31, %v8517_v41  ;;  %v10033_v2 = vld [vmem:[#allocation32_spill] sm:$0xff] }
 0x306   : > { %v5910_v45 = vpop.eup %5909  ;;  %5929 = vrcp.f32 %v2672_v38  ;;  %v2674_v57 = vadd.f32 1.0, %v5908_v0  ;;  %v4621_v63 = vmul.f32 -1.442695, %v9085_v11  ;;  %v4623_v7 = vmul.f32 -1.442695, %v9090_v3 }
 0x307   : > { %v5912_v32 = vpop.eup %5911  ;;  %v4106_v17 = vadd.f32 %v4105_v55, %v3614_v23  ;;  %v3613_v52 = vmul.f32 %v5910_v45, %v8975_v43  ;;  %5931 = vpow2.f32 %v4612_v34  ;;  %v9106_v38 = vadd.f32 %v10033_v2, %v8481_v35  ;;  %v10034_v2 = vld [vmem:[#allocation34_spill] sm:$0xff] }
 0x308   : > { %v5914_v46 = vpop.eup %5913  ;;  %5933 = vrcp.f32 %v2674_v57  ;;  %v2673_v62 = vadd.f32 1.0, %v5912_v32  ;;  %v4622_v55 = vmul.f32 -1.442695, %v9095_v15  ;;  %v4624_v23 = vmul.f32 -1.442695, %v9099_v40 }
 0x309   : > { %v5916_v0 = vpop.eup %5915  ;;  %v4069_v13 = vadd.f32 %v4068_v51, %v3613_v52  ;;  %v3615_v31 = vmul.f32 %v5914_v46, %v8987_v60  ;;  %5935 = vpow2.f32 %v4614_v21  ;;  %v9115_v1 = vadd.f32 %v10034_v2, %v8485_v12 }
 0x30a   : > { %v5918_v43 = vpop.eup %5917  ;;  %v3622_v34 = vmul.f32 %v5916_v0, %v8994_v42  ;;  %5937 = vrcp.f32 %v2673_v62  ;;  %v4631_v52 = vmul.f32 -1.442695, %v9106_v38 }
 0x30b   : > { %v5920_v45 = vpop.eup %5919  ;;  %v4143_v57 = vadd.f32 %v4142_v36, %v3615_v31  ;;  %v3624_v32 = vmul.f32 %v5918_v43, %v9001_v44  ;;  %5939 = vpow2.f32 %v4621_v63  ;;  %v10035_v36 = vld [vmem:[#allocation36_spill] sm:$0xff] }
 0x30c   : > { %v5922_v51 = vpop.eup %5921  ;;  %v4033_v60 = vadd.f32 %v4032_v30, %v3622_v34  ;;  %v3623_v21 = vmul.f32 %v5920_v45, %v9005_v33  ;;  %5941 = vpow2.f32 %v4623_v7  ;;  %v9121_v0 = vadd.f32 %v10035_v36, %v8493_v28  ;;  %v10036_v7 = vld [vmem:[#allocation38_spill] sm:$0xff] }
 0x30d   : > { %v5924_v42 = vpop.eup %5923  ;;  %v4107_v46 = vadd.f32 %v4106_v17, %v3624_v32  ;;  %v2675_v62 = vadd.f32 1.0, %v5922_v51  ;;  %5943 = vpow2.f32 %v4622_v55  ;;  %v4633_v33 = vmul.f32 -1.442695, %v9115_v1 }
 0x30e   : > { %v5926_v44 = vpop.eup %5925  ;;  %v4070_v63 = vadd.f32 %v4069_v13, %v3623_v21  ;;  %v2682_v31 = vadd.f32 1.0, %v5924_v42  ;;  %5945 = vpow2.f32 %v4624_v23  ;;  %v9127_v34 = vadd.f32 %v10036_v7, %v8517_v41 }
 0x30f   : > { %v5928_v43 = vpop.eup %5927  ;;  %v3625_v30 = vmul.f32 %v5926_v44, %v9012_v27  ;;  %5947 = vrcp.f32 %v2675_v62  ;;  %v4632_v13 = vmul.f32 -1.442695, %v9121_v0 }
 0x310   : > { %v5930_v17 = vpop.eup %5929  ;;  %5949 = vrcp.f32 %v2682_v31  ;;  %v2684_v55 = vadd.f32 1.0, %v5928_v43  ;;  %v4634_v62 = vmul.f32 -1.442695, %v9127_v34 }
 0x311   : > { %v5932_v45 = vpop.eup %5931  ;;  %v4144_v32 = vadd.f32 %v4143_v57, %v3625_v30  ;;  %v3632_v2 = vmul.f32 %v5930_v17, %v9021_v59  ;;  %5951 = vpow2.f32 %v4631_v52  ;;  %v10037_v57 = vld [vmem:[#allocation40_spill] sm:$0xff] }
 0x312   : > { %v5934_v23 = vpop.eup %5933  ;;  %5953 = vrcp.f32 %v2684_v55  ;;  %v2683_v27 = vadd.f32 1.0, %v5932_v45  ;;  %v9135_v31 = vadd.f32 %v10037_v57, %v8481_v35  ;;  %v10038_v30 = vld [vmem:[#allocation24_spill] sm:$0xff]  ;;  %v9144_v45 = vadd.f32 %v8653_v16, %v8493_v28 }
 0x313   : > { %v5936_v51 = vpop.eup %5935  ;;  %v4034_v21 = vadd.f32 %v4033_v60, %v3632_v2  ;;  %v3634_v42 = vmul.f32 %v5934_v23, %v9035_v39  ;;  %5955 = vpow2.f32 %v4633_v33  ;;  %v9140_v60 = vadd.f32 %v10038_v30, %v8485_v12 }
 0x314   : > { %v5938_v36 = vpop.eup %5937  ;;  %5957 = vrcp.f32 %v2683_v27  ;;  %v2685_v44 = vadd.f32 1.0, %v5936_v51  ;;  %v9150_v51 = vadd.f32 %v8656_v56, %v8517_v41  ;;  %v9155_v16 = vadd.f32 %v8695_v48, %v8481_v35 }
 0x315   : > { %v5940_v59 = vpop.eup %5939  ;;  %v4108_v52 = vadd.f32 %v4107_v46, %v3634_v42  ;;  %v3633_v43 = vmul.f32 %v5938_v36, %v9045_v37  ;;  %5959 = vpow2.f32 %v4632_v13  ;;  %v4641_v37 = vmul.f32 -1.442695, %v9135_v31 }
 0x316   : > { %v5942_v39 = vpop.eup %5941  ;;  %5961 = vrcp.f32 %v2685_v44  ;;  %v2692_v33 = vadd.f32 1.0, %v5940_v59  ;;  %v4643_v27 = vmul.f32 -1.442695, %v9140_v60  ;;  %v4642_v57 = vmul.f32 -1.442695, %v9144_v45 }
 0x317   : > { %v5944_v7 = vpop.eup %5943  ;;  %v4071_v17 = vadd.f32 %v4070_v63, %v3633_v43  ;;  %v2694_v55 = vadd.f32 1.0, %v5942_v39  ;;  %5963 = vpow2.f32 %v4634_v62  ;;  %v9159_v62 = vadd.f32 %v8697_v8, %v8485_v12 }
 0x318   : > { %v5946_v2 = vpop.eup %5945  ;;  %5965 = vrcp.f32 %v2692_v33  ;;  %v2693_v46 = vadd.f32 1.0, %v5944_v7  ;;  %v4644_v39 = vmul.f32 -1.442695, %v9150_v51  ;;  %v4651_v7 = vmul.f32 -1.442695, %v9155_v16 }
 0x319   : > { %v5948_v13 = vpop.eup %5947  ;;  %5967 = vrcp.f32 %v2694_v55  ;;  %v2695_v23 = vadd.f32 1.0, %v5946_v2 }
 0x31a   : > { %v5950_v63 = vpop.eup %5949  ;;  %v3635_v42 = vmul.f32 %v5948_v13, %v9057_v61  ;;  %5969 = vrcp.f32 %v2693_v46  ;;  %v9165_v61 = vadd.f32 %v8705_v5, %v8493_v28  ;;  %v9180_v13 = vadd.f32 %v8713_v26, %v8481_v35 }
 0x31b   : > { %v5952_v36 = vpop.eup %5951  ;;  %v3642_v44 = vmul.f32 %v5950_v63, %v9062_v19  ;;  %5971 = vrcp.f32 %v2695_v23  ;;  %v9190_v63 = vadd.f32 %v8715_v9, %v8485_v12  ;;  %v10039_v26 = vlaneseq }
 0x31c   : > { %v5954_v56 = vpop.eup %5953  ;;  %v4145_v59 = vadd.f32 %v4144_v32, %v3635_v42  ;;  %v2702_v43 = vadd.f32 1.0, %v5952_v36  ;;  %5973 = vpow2.f32 %v4641_v37  ;;  %v4653_v32 = vmul.f32 -1.442695, %v9159_v62 }
 0x31d   : > { %v5956_v48 = vpop.eup %5955  ;;  %v4035_v30 = vadd.f32 %v4034_v21, %v3642_v44  ;;  %v3644_v8 = vmul.f32 %v5954_v56, %v9066_v4  ;;  %5975 = vpow2.f32 %v4643_v27  ;;  %v9174_v21 = vadd.f32 %v8707_v47, %v8517_v41 }
 0x31e   : > { %v5958_v19 = vpop.eup %5957  ;;  %5977 = vrcp.f32 %v2702_v43  ;;  %v2704_v33 = vadd.f32 1.0, %v5956_v48  ;;  %v4652_v37 = vmul.f32 -1.442695, %v9165_v61  ;;  %vm9193_vm1 = vcmp.lt.s32.totalorder %v10039_v26, 256 }
 0x31f   : > { %v5960_v55 = vpop.eup %5959  ;;  %v4109_v2 = vadd.f32 %v4108_v52, %v3644_v8  ;;  %v3643_v5 = vmul.f32 %v5958_v19, %v9071_v6  ;;  %5979 = vpow2.f32 %v4642_v57  ;;  %v4654_v44 = vmul.f32 -1.442695, %v9174_v21 }
 0x320   : > { %v5962_v4 = vpop.eup %5961  ;;  %5981 = vrcp.f32 %v2704_v33  ;;  %v2703_v46 = vadd.f32 1.0, %v5960_v55  ;;  %v6217_v57 = vmov 0.0   ;;  %v4661_v43 = vmul.f32 -1.442695, %v9180_v13 }
 0x321   : > { %v5964_v23 = vpop.eup %5963  ;;  %v4072_v27 = vadd.f32 %v4071_v17, %v3643_v5  ;;  %v3645_v52 = vmul.f32 %v5962_v4, %v9077_v18  ;;  %5983 = vpow2.f32 %v4644_v39  ;;  %248 = vst.msk [vmem:[%s9186_s7 + $0x8] sm:$0x3] %vm9193_vm1, %v6217_v57  ;;  %v9227_v57 = vadd.f32 %v8752_v10, %v8485_v12 }
 0x322   : > { %v5966_v47 = vpop.eup %5965  ;;  %5985 = vrcp.f32 %v2703_v46  ;;  %v2705_v6 = vadd.f32 1.0, %v5964_v23  ;;  %v9219_v46 = vadd.f32 %v8750_v25, %v8481_v35  ;;  %v9236_v10 = vadd.f32 %v8763_v14, %v8517_v41 }
 0x323   : > { %v5968_v18 = vpop.eup %5967  ;;  %v4146_v17 = vadd.f32 %v4145_v59, %v3645_v52  ;;  %v3652_v36 = vmul.f32 %v5966_v47, %v9085_v11  ;;  %5987 = vpow2.f32 %v4651_v7  ;;  %v9207_v11 = vadd.f32 %v8732_v58, %v8493_v28 }
 0x324   : > { %v5970_v56 = vpop.eup %5969  ;;  %v3654_v9 = vmul.f32 %v5968_v18, %v9090_v3  ;;  %5989 = vrcp.f32 %v2705_v6  ;;  %v4663_v7 = vmul.f32 -1.442695, %v9190_v63  ;;  %v4671_v25 = vmul.f32 -1.442695, %v9219_v46 }
 0x325   : > { %v5972_v48 = vpop.eup %5971  ;;  %v4036_v8 = vadd.f32 %v4035_v30, %v3652_v36  ;;  %v3653_v39 = vmul.f32 %v5970_v56, %v9095_v15  ;;  %5991 = vpow2.f32 %v4653_v32  ;;  %v9213_v30 = vadd.f32 %v8734_v53, %v8517_v41 }
 0x326   : > { %v5974_v59 = vpop.eup %5973  ;;  %v4110_v19 = vadd.f32 %v4109_v2, %v3654_v9  ;;  %v3655_v33 = vmul.f32 %v5972_v48, %v9099_v40  ;;  %5993 = vpow2.f32 %v4652_v37  ;;  %v4662_v40 = vmul.f32 -1.442695, %v9207_v11 }
 0x327   : > { %v5976_v3 = vpop.eup %5975  ;;  %v4073_v55 = vadd.f32 %v4072_v27, %v3653_v39  ;;  %v2712_v5 = vadd.f32 1.0, %v5974_v59  ;;  %5995 = vpow2.f32 %v4654_v44  ;;  %v4664_v47 = vmul.f32 -1.442695, %v9213_v30 }
 0x328   : > { %v5978_v15 = vpop.eup %5977  ;;  %v4147_v32 = vadd.f32 %v4146_v17, %v3655_v33  ;;  %v2714_v4 = vadd.f32 1.0, %v5976_v3  ;;  %5997 = vpow2.f32 %v4661_v43  ;;  %v9232_v43 = vadd.f32 %v8761_v54, %v8493_v28 }
 0x329   : > { %v5980_v58 = vpop.eup %5979  ;;  %v3662_v2 = vmul.f32 %v5978_v15, %v9106_v38  ;;  %5999 = vrcp.f32 %v2712_v5  ;;  %v9241_v54 = vadd.f32 %v8779_v24, %v8481_v35  ;;  %v9247_v14 = vadd.f32 %v8789_v20, %v8485_v12 }
 0x32a   : > { %v5982_v37 = vpop.eup %5981  ;;  %6001 = vrcp.f32 %v2714_v4  ;;  %v2713_v23 = vadd.f32 1.0, %v5980_v58  ;;  %v4674_v24 = vmul.f32 -1.442695, %v9236_v10  ;;  %v9255_v20 = vadd.f32 %v8801_v49, %v8493_v28 }
 0x32b   : > { %v5984_v27 = vpop.eup %5983  ;;  %v4037_v53 = vadd.f32 %v4036_v8, %v3662_v2  ;;  %v3664_v52 = vmul.f32 %v5982_v37, %v9115_v1  ;;  %6003 = vpow2.f32 %v4663_v7  ;;  %v4681_v37 = vmul.f32 -1.442695, %v9241_v54 }
 0x32c   : > { %v5986_v6 = vpop.eup %5985  ;;  %6005 = vrcp.f32 %v2713_v23  ;;  %v2715_v38 = vadd.f32 1.0, %v5984_v27 }
 0x32d   : > { %v5988_v26 = vpop.eup %5987  ;;  %v4111_v18 = vadd.f32 %v4110_v19, %v3664_v52  ;;  %v3663_v17 = vmul.f32 %v5986_v6, %v9121_v0  ;;  %6007 = vpow2.f32 %v4662_v40 }
 0x32e   : > { %v5990_v36 = vpop.eup %5989  ;;  %6009 = vrcp.f32 %v2715_v38  ;;  %v2722_v44 = vadd.f32 1.0, %v5988_v26 }
 0x32f   : > { %v5992_v1 = vpop.eup %5991  ;;  %v4074_v56 = vadd.f32 %v4073_v55, %v3663_v17  ;;  %v3665_v9 = vmul.f32 %v5990_v36, %v9127_v34  ;;  %6011 = vpow2.f32 %v4664_v47  ;;  %v4673_v34 = vmul.f32 -1.442695, %v9227_v57  ;;  %v10044_v36 = vld [vmem:[#allocation50_spill] sm:$0xff] }
 0x330   : > { %v5994_v0 = vpop.eup %5993  ;;  %6013 = vrcp.f32 %v2722_v44  ;;  %v2724_v48 = vadd.f32 1.0, %v5992_v1  ;;  %v4672_v55 = vmul.f32 -1.442695, %v9232_v43  ;;  %v4683_v47 = vmul.f32 -1.442695, %v9247_v14 }
 0x331   : > { %v5996_v8 = vpop.eup %5995  ;;  %v4148_v39 = vadd.f32 %v4147_v32, %v3665_v9  ;;  %v2723_v59 = vadd.f32 1.0, %v5994_v0  ;;  %6015 = vpow2.f32 %v4671_v25  ;;  %v9269_v44 = vadd.f32 %v10044_v36, %v8485_v12 }
 0x332   : > { %v5998_v19 = vpop.eup %5997  ;;  %6017 = vrcp.f32 %v2724_v48  ;;  %v2725_v33 = vadd.f32 1.0, %v5996_v8 }
 0x333   : > { %v6000_v7 = vpop.eup %5999  ;;  %6019 = vrcp.f32 %v2723_v59  ;;  %v2732_v3 = vadd.f32 1.0, %v5998_v19  ;;  %v10045_v59 = vld [vmem:[#allocation51_spill] sm:$0xff] }
 0x334   : > { %v6002_v5 = vpop.eup %6001  ;;  %v3672_v15 = vmul.f32 %v6000_v7, %v9135_v31  ;;  %6021 = vrcp.f32 %v2725_v33  ;;  %v9276_v19 = vadd.f32 %v10045_v59, %v8493_v28 }
 0x335   : > { %v6004_v32 = vpop.eup %6003  ;;  %v3674_v4 = vmul.f32 %v6002_v5, %v9140_v60  ;;  %6023 = vrcp.f32 %v2732_v3 }
 0x336   : > { %v6006_v58 = vpop.eup %6005  ;;  %v4038_v2 = vadd.f32 %v4037_v53, %v3672_v15  ;;  %v2734_v40 = vadd.f32 1.0, %v6004_v32  ;;  %6025 = vpow2.f32 %v4673_v34  ;;  %v10042_v53 = vld [vmem:[#allocation30_spill] sm:$0xff] }
 0x337   : > { %v6008_v23 = vpop.eup %6007  ;;  %v4112_v27 = vadd.f32 %v4111_v18, %v3674_v4  ;;  %v3673_v31 = vmul.f32 %v6006_v58, %v9144_v45  ;;  %6027 = vpow2.f32 %v4672_v55  ;;  %v9260_v6 = vadd.f32 %v10042_v53, %v8517_v41  ;;  %v10043_v45 = vld [vmem:[#allocation48_spill] sm:$0xff]  ;;  %v10046_v4 = vld [vmem:[#allocation53_spill] sm:$0xff] }
 0x338   : > { %v6010_v52 = vpop.eup %6009  ;;  %6029 = vrcp.f32 %v2734_v40  ;;  %v2733_v60 = vadd.f32 1.0, %v6008_v23  ;;  %v9265_v17 = vadd.f32 %v10043_v45, %v8481_v35  ;;  %v4693_v55 = vmul.f32 -1.442695, %v9269_v44 }
 0x339   : > { %v6012_v38 = vpop.eup %6011  ;;  %v4075_v26 = vadd.f32 %v4074_v56, %v3673_v31  ;;  %v3675_v18 = vmul.f32 %v6010_v52, %v9150_v51  ;;  %6031 = vpow2.f32 %v4674_v24  ;;  %v4682_v56 = vmul.f32 -1.442695, %v9255_v20 }
 0x33a   : > { %v6014_v49 = vpop.eup %6013  ;;  %6033 = vrcp.f32 %v2733_v60  ;;  %v2735_v25 = vadd.f32 1.0, %v6012_v38  ;;  %v4684_v8 = vmul.f32 -1.442695, %v9260_v6  ;;  %v9285_v24 = vadd.f32 %v10046_v4, %v8517_v41  ;;  %v10048_v38 = vld [vmem:[#allocation43_spill] sm:$0xff]  ;;  %v10051_v4 = vld [vmem:[#allocation49_spill] sm:$0xff] }
 0x33b   : > { %v6016_v1 = vpop.eup %6015  ;;  %v4149_v9 = vadd.f32 %v4148_v39, %v3675_v18  ;;  %v3682_v0 = vmul.f32 %v6014_v49, %v9155_v16  ;;  %6035 = vpow2.f32 %v4681_v37  ;;  %v4691_v39 = vmul.f32 -1.442695, %v9265_v17 }
 0x33c   : > { %v6018_v51 = vpop.eup %6017  ;;  %6037 = vrcp.f32 %v2735_v25  ;;  %v2742_v48 = vadd.f32 1.0, %v6016_v1  ;;  %v4692_v40 = vmul.f32 -1.442695, %v9276_v19 }
 0x33d   : > { %v6020_v33 = vpop.eup %6019  ;;  %v4039_v34 = vadd.f32 %v4038_v2, %v3682_v0  ;;  %v3684_v7 = vmul.f32 %v6018_v51, %v9159_v62  ;;  %6039 = vpow2.f32 %v4683_v47 }
 0x33e   : > { %v6022_v16 = vpop.eup %6021  ;;  %v3683_v3 = vmul.f32 %v6020_v33, %v9165_v61  ;;  %6041 = vrcp.f32 %v2742_v48  ;;  %v10049_v33 = vld [vmem:[#allocation44_spill] sm:$0xff] }
 0x33f   : > { %v6024_v5 = vpop.eup %6023  ;;  %v4113_v15 = vadd.f32 %v4112_v27, %v3684_v7  ;;  %v3685_v32 = vmul.f32 %v6022_v16, %v9174_v21  ;;  %6043 = vpow2.f32 %v4682_v56  ;;  %v10047_v27 = vld [vmem:[#allocation39_spill] sm:$0xff]  ;;  %v10050_v16 = vld [vmem:[#allocation45_spill] sm:$0xff] }
 0x340   : > { %v6026_v58 = vpop.eup %6025  ;;  %v4076_v62 = vadd.f32 %v4075_v26, %v3683_v3  ;;  %v3692_v2 = vmul.f32 %v6024_v5, %v9180_v13  ;;  %6045 = vpow2.f32 %v4684_v8  ;;  %v9291_v31 = vadd.f32 %v10047_v27, %v8481_v35 }
 0x341   : > { %v6028_v61 = vpop.eup %6027  ;;  %v4150_v37 = vadd.f32 %v4149_v9, %v3685_v32  ;;  %v2744_v23 = vadd.f32 1.0, %v6026_v58  ;;  %6047 = vpow2.f32 %v4691_v39  ;;  %v4694_v13 = vmul.f32 -1.442695, %v9285_v24 }
 0x342   : > { %v6030_v21 = vpop.eup %6029  ;;  %v4040_v52 = vadd.f32 %v4039_v34, %v3692_v2  ;;  %v2743_v60 = vadd.f32 1.0, %v6028_v61  ;;  %6049 = vpow2.f32 %v4693_v55  ;;  %v9297_v26 = vadd.f32 %v10048_v38, %v8485_v12 }
 0x343   : > { %v6032_v47 = vpop.eup %6031  ;;  %v3694_v53 = vmul.f32 %v6030_v21, %v9190_v63  ;;  %6051 = vrcp.f32 %v2744_v23  ;;  %v4701_v1 = vmul.f32 -1.442695, %v9291_v31  ;;  %v9305_v34 = vadd.f32 %v10049_v33, %v8493_v28 }
 0x344   : > { %v6034_v18 = vpop.eup %6033  ;;  %6053 = vrcp.f32 %v2743_v60  ;;  %v2745_v45 = vadd.f32 1.0, %v6032_v47  ;;  %v4703_v48 = vmul.f32 -1.442695, %v9297_v26  ;;  %v9310_v3 = vadd.f32 %v10050_v16, %v8517_v41  ;;  %v10053_v60 = vld [vmem:[#allocation52_spill] sm:$0xff]  ;;  %v10056_v16 = vld [vmem:[#allocation85_spill] sm:$0xff] }
 0x345   : > { %v6036_v49 = vpop.eup %6035  ;;  %v4114_v25 = vadd.f32 %v4113_v15, %v3694_v53  ;;  %v3693_v36 = vmul.f32 %v6034_v18, %v9207_v11  ;;  %6055 = vpow2.f32 %v4692_v40  ;;  %v9314_v58 = vadd.f32 %v10051_v4, %v8481_v35  ;;  %v10052_v40 = vld [vmem:[#allocation92_spill] sm:$0xff] }
 0x346   : > { %v6038_v9 = vpop.eup %6037  ;;  %6057 = vrcp.f32 %v2745_v45  ;;  %v2752_v63 = vadd.f32 1.0, %v6036_v49  ;;  %v9319_v61 = vadd.f32 %v10052_v40, %v8485_v12  ;;  %v4704_v27 = vmul.f32 -1.442695, %v9310_v3 }
 0x347   : > { %v6040_v0 = vpop.eup %6039  ;;  %v4077_v56 = vadd.f32 %v4076_v62, %v3693_v36  ;;  %v3695_v51 = vmul.f32 %v6038_v9, %v9213_v30  ;;  %6059 = vpow2.f32 %v4694_v13  ;;  %v9325_v47 = vadd.f32 %v10053_v60, %v8493_v28 }
 0x348   : > { %v6042_v8 = vpop.eup %6041  ;;  %6061 = vrcp.f32 %v2752_v63  ;;  %v2754_v59 = vadd.f32 1.0, %v6040_v0  ;;  %v4711_v38 = vmul.f32 -1.442695, %v9314_v58  ;;  %v4713_v36 = vmul.f32 -1.442695, %v9319_v61  ;;  %v10054_v63 = vld [vmem:[#allocation93_spill] sm:$0xff] }
 0x349   : > { %v6044_v11 = vpop.eup %6043  ;;  %v4151_v7 = vadd.f32 %v4150_v37, %v3695_v51  ;;  %v3702_v39 = vmul.f32 %v6042_v8, %v9219_v46  ;;  %6063 = vpow2.f32 %v4701_v1  ;;  %v4702_v46 = vmul.f32 -1.442695, %v9305_v34 }
 0x34a   : > { %v6046_v30 = vpop.eup %6045  ;;  %6065 = vrcp.f32 %v2754_v59  ;;  %v2753_v55 = vadd.f32 1.0, %v6044_v11  ;;  %v9333_v0 = vadd.f32 %v10054_v63, %v8517_v41 }
 0x34b   : > { %v6048_v5 = vpop.eup %6047  ;;  %v4041_v15 = vadd.f32 %v4040_v52, %v3702_v39  ;;  %v2755_v32 = vadd.f32 1.0, %v6046_v30  ;;  %6067 = vpow2.f32 %v4703_v48  ;;  %v4712_v48 = vmul.f32 -1.442695, %v9325_v47 }
 0x34c   : > { %v6050_v62 = vpop.eup %6049  ;;  %6069 = vrcp.f32 %v2753_v55  ;;  %v2762_v2 = vadd.f32 1.0, %v6048_v5  ;;  %v9347_v30 = vadd.f32 %v10056_v16, %v8493_v28 }
 0x34d   : > { %v6052_v37 = vpop.eup %6051  ;;  %6071 = vrcp.f32 %v2755_v32  ;;  %v2764_v23 = vadd.f32 1.0, %v6050_v62  ;;  %v10057_v62 = vld [vmem:[#allocation6_spill] sm:$0xff] }
 0x34e   : > { %v6054_v21 = vpop.eup %6053  ;;  %v3704_v52 = vmul.f32 %v6052_v37, %v9227_v57  ;;  %6073 = vrcp.f32 %v2762_v2  ;;  %v9354_v2 = vadd.f32 %v10057_v62, %v8517_v41 }
 0x34f   : > { %v6056_v53 = vpop.eup %6055  ;;  %v3703_v13 = vmul.f32 %v6054_v21, %v9232_v43  ;;  %6075 = vrcp.f32 %v2764_v23 }
 0x350   : > { %v6058_v18 = vpop.eup %6057  ;;  %v4115_v45 = vadd.f32 %v4114_v25, %v3704_v52  ;;  %v2763_v49 = vadd.f32 1.0, %v6056_v53  ;;  %6077 = vpow2.f32 %v4702_v46  ;;  %v9338_v25 = vadd.f32 %v8914_v50, %v8481_v35 }
 0x351   : > { %v6060_v1 = vpop.eup %6059  ;;  %v4078_v9 = vadd.f32 %v4077_v56, %v3703_v13  ;;  %v3705_v57 = vmul.f32 %v6058_v18, %v9236_v10  ;;  %6079 = vpow2.f32 %v4704_v27  ;;  %v10055_v10 = vld [vmem:[#allocation69_spill] sm:$0xff]  ;;  %v4722_v27 = vmul.f32 -1.442695, %v9347_v30 }
 0x352   : > { %v6062_v51 = vpop.eup %6061  ;;  %6081 = vrcp.f32 %v2763_v49  ;;  %v2765_v43 = vadd.f32 1.0, %v6060_v1  ;;  %v9343_v33 = vadd.f32 %v10055_v10, %v8485_v12  ;;  %v4721_v4 = vmul.f32 -1.442695, %v9338_v25 }
 0x353   : > { %v6064_v8 = vpop.eup %6063  ;;  %v4152_v59 = vadd.f32 %v4151_v7, %v3705_v57  ;;  %v3712_v56 = vmul.f32 %v6062_v51, %v9241_v54  ;;  %6083 = vpow2.f32 %v4711_v38  ;;  %v4714_v7 = vmul.f32 -1.442695, %v9333_v0  ;;  %v10059_v51 = vld [vmem:[#allocation21_spill] sm:$0xff] }
 0x354   : > { %v6066_v11 = vpop.eup %6065  ;;  %6085 = vrcp.f32 %v2765_v43  ;;  %v2772_v39 = vadd.f32 1.0, %v6064_v8  ;;  %v9363_v53 = vadd.f32 %v8945_v22, %v8481_v35  ;;  %v4724_v18 = vmul.f32 -1.442695, %v9354_v2 }
 0x355   : > { %v6068_v55 = vpop.eup %6067  ;;  %v4042_v5 = vadd.f32 %v4041_v15, %v3712_v56  ;;  %v3714_v50 = vmul.f32 %v6066_v11, %v9247_v14  ;;  %6087 = vpow2.f32 %v4713_v36  ;;  %v4723_v15 = vmul.f32 -1.442695, %v9343_v33  ;;  %v10058_v36 = vld [vmem:[#allocation7_spill] sm:$0xff] }
 0x356   : > { %v6070_v54 = vpop.eup %6069  ;;  %6089 = vrcp.f32 %v2772_v39  ;;  %v2774_v32 = vadd.f32 1.0, %v6068_v55  ;;  %v9369_v1 = vadd.f32 %v10058_v36, %v8485_v12  ;;  %v9375_v43 = vadd.f32 %v10059_v51, %v8493_v28 }
 0x357   : > { %v6072_v46 = vpop.eup %6071  ;;  %v4116_v40 = vadd.f32 %v4115_v45, %v3714_v50  ;;  %v3713_v37 = vmul.f32 %v6070_v54, %v9255_v20  ;;  %6091 = vpow2.f32 %v4712_v48 }
 0x358   : > { %v6074_v14 = vpop.eup %6073  ;;  %v3715_v23 = vmul.f32 %v6072_v46, %v9260_v6  ;;  %6093 = vrcp.f32 %v2774_v32  ;;  %v4733_v11 = vmul.f32 -1.442695, %v9369_v1  ;;  %v4732_v50 = vmul.f32 -1.442695, %v9375_v43  ;;  %v10060_v32 = vld [vmem:[#allocation9_spill] sm:$0xff] }
 0x359   : > { %v6076_v21 = vpop.eup %6075  ;;  %v4079_v52 = vadd.f32 %v4078_v9, %v3713_v37  ;;  %v3722_v60 = vmul.f32 %v6074_v14, %v9265_v17  ;;  %6095 = vpow2.f32 %v4714_v7 }
 0x35a   : > { %v6078_v13 = vpop.eup %6077  ;;  %v4153_v20 = vadd.f32 %v4152_v59, %v3715_v23  ;;  %v3724_v38 = vmul.f32 %v6076_v21, %v9269_v44  ;;  %6097 = vpow2.f32 %v4721_v4  ;;  %v4731_v44 = vmul.f32 -1.442695, %v9363_v53  ;;  %v10062_v21 = vld [vmem:[#allocation25_spill] sm:$0xff] }
 0x35b   : > { %v6080_v6 = vpop.eup %6079  ;;  %v4043_v45 = vadd.f32 %v4042_v5, %v3722_v60  ;;  %v2773_v49 = vadd.f32 1.0, %v6078_v13  ;;  %6099 = vpow2.f32 %v4723_v15  ;;  %v9383_v4 = vadd.f32 %v10060_v32, %v8517_v41  ;;  %v10067_v32 = vld [vmem:[#allocation33_spill] sm:$0xff] }
 0x35c   : > { %v6082_v17 = vpop.eup %6081  ;;  %v4117_v9 = vadd.f32 %v4116_v40, %v3724_v38  ;;  %v2775_v57 = vadd.f32 1.0, %v6080_v6  ;;  %6101 = vpow2.f32 %v4722_v27  ;;  %v10061_v40 = vld [vmem:[#allocation8_spill] sm:$0xff] }
 0x35d   : > { %v6084_v22 = vpop.eup %6083  ;;  %v3723_v63 = vmul.f32 %v6082_v17, %v9276_v19  ;;  %6103 = vrcp.f32 %v2773_v49  ;;  %v9388_v37 = vadd.f32 %v10061_v40, %v8481_v35  ;;  %v10064_v17 = vld [vmem:[#allocation70_spill] sm:$0xff] }
 0x35e   : > { %v6086_v48 = vpop.eup %6085  ;;  %6105 = vrcp.f32 %v2775_v57  ;;  %v2782_v8 = vadd.f32 1.0, %v6084_v22 }
 0x35f   : > { %v6088_v59 = vpop.eup %6087  ;;  %v4080_v56 = vadd.f32 %v4079_v52, %v3723_v63  ;;  %v3725_v10 = vmul.f32 %v6086_v48, %v9285_v24  ;;  %6107 = vpow2.f32 %v4724_v18  ;;  %v9392_v52 = vadd.f32 %v10062_v21, %v8485_v12 }
 0x360   : > { %v6090_v39 = vpop.eup %6089  ;;  %6109 = vrcp.f32 %v2782_v8  ;;  %v2784_v19 = vadd.f32 1.0, %v6088_v59 }
 0x361   : > { %v6092_v16 = vpop.eup %6091  ;;  %v4154_v55 = vadd.f32 %v4153_v20, %v3725_v10  ;;  %v3732_v5 = vmul.f32 %v6090_v39, %v9291_v31  ;;  %6111 = vpow2.f32 %v4731_v44  ;;  %v10063_v20 = vld [vmem:[#allocation10_spill] sm:$0xff]  ;;  %v4743_v63 = vmul.f32 -1.442695, %v9392_v52 }
 0x362   : > { %v6094_v7 = vpop.eup %6093  ;;  %6113 = vrcp.f32 %v2784_v19  ;;  %v2783_v54 = vadd.f32 1.0, %v6092_v16  ;;  %v9397_v38 = vadd.f32 %v10063_v20, %v8493_v28 }
 0x363   : > { %v6096_v24 = vpop.eup %6095  ;;  %v4044_v62 = vadd.f32 %v4043_v45, %v3732_v5  ;;  %v3734_v46 = vmul.f32 %v6094_v7, %v9297_v26  ;;  %6115 = vpow2.f32 %v4733_v11  ;;  %v4734_v26 = vmul.f32 -1.442695, %v9383_v4 }
 0x364   : > { %v6098_v31 = vpop.eup %6097  ;;  %6117 = vrcp.f32 %v2783_v54  ;;  %v2785_v15 = vadd.f32 1.0, %v6096_v24  ;;  %v4741_v45 = vmul.f32 -1.442695, %v9388_v37  ;;  %v4742_v8 = vmul.f32 -1.442695, %v9397_v38 }
 0x365   : > { %v6100_v14 = vpop.eup %6099  ;;  %v4118_v23 = vadd.f32 %v4117_v9, %v3734_v46  ;;  %v2792_v27 = vadd.f32 1.0, %v6098_v31  ;;  %6119 = vpow2.f32 %v4732_v50  ;;  %v9403_v9 = vadd.f32 %v10064_v17, %v8517_v41 }
 0x366   : > { %v6102_v60 = vpop.eup %6101  ;;  %6121 = vrcp.f32 %v2785_v15  ;;  %v2794_v13 = vadd.f32 1.0, %v6100_v14  ;;  %v9411_v11 = vadd.f32 %v9023_v29, %v8481_v35  ;;  %v9425_v24 = vadd.f32 %v10067_v32, %v8517_v41 }
 0x367   : > { %v6104_v18 = vpop.eup %6103  ;;  %6123 = vrcp.f32 %v2792_v27  ;;  %v2793_v6 = vadd.f32 1.0, %v6102_v60  ;;  %v4744_v19 = vmul.f32 -1.442695, %v9403_v9  ;;  %v10068_v27 = vld [vmem:[#allocation2_spill] sm:$0xff] }
 0x368   : > { %v6106_v49 = vpop.eup %6105  ;;  %v3733_v36 = vmul.f32 %v6104_v18, %v9305_v34  ;;  %6125 = vrcp.f32 %v2794_v13  ;;  %v9432_v21 = vadd.f32 %v10068_v27, %v8481_v35  ;;  %v4754_v18 = vmul.f32 -1.442695, %v9425_v24  ;;  %v10069_v35 = vld [vmem:[#allocation14_spill] sm:$0xff] }
 0x369   : > { %v6108_v57 = vpop.eup %6107  ;;  %v3735_v22 = vmul.f32 %v6106_v49, %v9310_v3  ;;  %6127 = vrcp.f32 %v2793_v6 }
 0x36a   : > { %v6110_v44 = vpop.eup %6109  ;;  %v4081_v51 = vadd.f32 %v4080_v56, %v3733_v36  ;;  %v2795_v48 = vadd.f32 1.0, %v6108_v57  ;;  %6129 = vpow2.f32 %v4734_v26  ;;  %v10065_v56 = vld [vmem:[#allocation27_spill] sm:$0xff]  ;;  %v9441_v36 = vadd.f32 %v10069_v35, %v8485_v12 }
 0x36b   : > { %v6112_v59 = vpop.eup %6111  ;;  %v4155_v10 = vadd.f32 %v4154_v55, %v3735_v22  ;;  %v3742_v34 = vmul.f32 %v6110_v44, %v9314_v58  ;;  %6131 = vpow2.f32 %v4741_v45  ;;  %v9416_v16 = vadd.f32 %v10065_v56, %v8485_v12  ;;  %v10066_v58 = vld [vmem:[#allocation72_spill] sm:$0xff] }
 0x36c   : > { %v6114_v39 = vpop.eup %6113  ;;  %6133 = vrcp.f32 %v2795_v48  ;;  %v2802_v3 = vadd.f32 1.0, %v6112_v59  ;;  %v9421_v7 = vadd.f32 %v10066_v58, %v8493_v28  ;;  %v4761_v22 = vmul.f32 -1.442695, %v9432_v21 }
 0x36d   : > { %v6116_v5 = vpop.eup %6115  ;;  %v4045_v50 = vadd.f32 %v4044_v62, %v3742_v34  ;;  %v3744_v55 = vmul.f32 %v6114_v39, %v9319_v61  ;;  %6135 = vpow2.f32 %v4743_v63  ;;  %v4751_v62 = vmul.f32 -1.442695, %v9411_v11  ;;  %v10071_v34 = vld [vmem:[#allocation35_spill] sm:$0xff] }
 0x36e   : > { %v6118_v29 = vpop.eup %6117  ;;  %6137 = vrcp.f32 %v2802_v3  ;;  %v2804_v54 = vadd.f32 1.0, %v6116_v5  ;;  %v4753_v14 = vmul.f32 -1.442695, %v9416_v16  ;;  %v9453_v39 = vadd.f32 %v10071_v34, %v8517_v41 }
 0x36f   : > { %v6120_v46 = vpop.eup %6119  ;;  %v4119_v40 = vadd.f32 %v4118_v23, %v3744_v55  ;;  %v3743_v31 = vmul.f32 %v6118_v29, %v9325_v47  ;;  %6139 = vpow2.f32 %v4742_v8  ;;  %v4752_v23 = vmul.f32 -1.442695, %v9421_v7 }
 0x370   : > { %v6122_v61 = vpop.eup %6121  ;;  %6141 = vrcp.f32 %v2804_v54  ;;  %v2803_v15 = vadd.f32 1.0, %v6120_v46  ;;  %v4764_v41 = vmul.f32 -1.442695, %v9453_v39 }
 0x371   : > { %v6124_v60 = vpop.eup %6123  ;;  %v4082_v13 = vadd.f32 %v4081_v51, %v3743_v31  ;;  %v3745_v26 = vmul.f32 %v6122_v61, %v9333_v0  ;;  %6143 = vpow2.f32 %v4744_v19  ;;  %v10070_v51 = vld [vmem:[#allocation77_spill] sm:$0xff] }
 0x372   : > { %v6126_v47 = vpop.eup %6125  ;;  %v3752_v20 = vmul.f32 %v6124_v60, %v9338_v25  ;;  %6145 = vrcp.f32 %v2803_v15  ;;  %v9447_v48 = vadd.f32 %v10070_v51, %v8493_v28 }
 0x373   : > { %v6128_v6 = vpop.eup %6127  ;;  %v4156_v45 = vadd.f32 %v4155_v10, %v3745_v26  ;;  %v3754_v49 = vmul.f32 %v6126_v47, %v9343_v33  ;;  %6147 = vpow2.f32 %v4751_v62 }
 0x374   : > { %v6130_v17 = vpop.eup %6129  ;;  %v4046_v0 = vadd.f32 %v4045_v50, %v3752_v20  ;;  %v3753_v57 = vmul.f32 %v6128_v6, %v9347_v30  ;;  %6149 = vpow2.f32 %v4753_v14  ;;  %v4763_v30 = vmul.f32 -1.442695, %v9441_v36 }
 0x375   : > { %v6132_v25 = vpop.eup %6131  ;;  %v4120_v63 = vadd.f32 %v4119_v40, %v3754_v49  ;;  %v2805_v44 = vadd.f32 1.0, %v6130_v17  ;;  %6151 = vpow2.f32 %v4752_v23  ;;  %v4762_v50 = vmul.f32 -1.442695, %v9447_v48 }
 0x376   : > { %v6134_v33 = vpop.eup %6133  ;;  %v4083_v8 = vadd.f32 %v4082_v13, %v3753_v57  ;;  %v2812_v59 = vadd.f32 1.0, %v6132_v25  ;;  %6153 = vpow2.f32 %v4754_v18 }
 0x377   : > { %v6136_v12 = vpop.eup %6135  ;;  %v3755_v10 = vmul.f32 %v6134_v33, %v9354_v2  ;;  %6155 = vrcp.f32 %v2805_v44 }
 0x378   : > { %v6138_v3 = vpop.eup %6137  ;;  %6157 = vrcp.f32 %v2812_v59  ;;  %v2814_v19 = vadd.f32 1.0, %v6136_v12 }
 0x379   : > { %v6140_v56 = vpop.eup %6139  ;;  %v4157_v28 = vadd.f32 %v4156_v45, %v3755_v10  ;;  %v3762_v5 = vmul.f32 %v6138_v3, %v9363_v53  ;;  %6159 = vpow2.f32 %v4761_v22 }
 0x37a   : > { %v6142_v55 = vpop.eup %6141  ;;  %6161 = vrcp.f32 %v2814_v19  ;;  %v2813_v2 = vadd.f32 1.0, %v6140_v56 }
 0x37b   : > { %v6144_v58 = vpop.eup %6143  ;;  %v4047_v29 = vadd.f32 %v4046_v0, %v3762_v5  ;;  %v3764_v54 = vmul.f32 %v6142_v55, %v9369_v1  ;;  %6163 = vpow2.f32 %v4763_v30 }
 0x37c   : > { %v6146_v32 = vpop.eup %6145  ;;  %6165 = vrcp.f32 %v2813_v2  ;;  %v2815_v46 = vadd.f32 1.0, %v6144_v58 }
 0x37d   : > { %v6148_v40 = vpop.eup %6147  ;;  %v4121_v31 = vadd.f32 %v4120_v63, %v3764_v54  ;;  %v3763_v53 = vmul.f32 %v6146_v32, %v9375_v43  ;;  %6167 = vpow2.f32 %v4762_v50 }
 0x37e   : > { %v6150_v62 = vpop.eup %6149  ;;  %6169 = vrcp.f32 %v2815_v46  ;;  %v2822_v61 = vadd.f32 1.0, %v6148_v40 }
 0x37f   : > { %v6152_v15 = vpop.eup %6151  ;;  %v4084_v14 = vadd.f32 %v4083_v8, %v3763_v53  ;;  %v2824_v27 = vadd.f32 1.0, %v6150_v62  ;;  %6171 = vpow2.f32 %v4764_v41 }
 0x380   : > { %v6154_v60 = vpop.eup %6153  ;;  %6173 = vrcp.f32 %v2822_v61  ;;  %v2823_v1 = vadd.f32 1.0, %v6152_v15 }
 0x381   : > { %v6156_v13 = vpop.eup %6155  ;;  %6175 = vrcp.f32 %v2824_v27  ;;  %v2825_v26 = vadd.f32 1.0, %v6154_v60 }
 0x382   : > { %v6158_v23 = vpop.eup %6157  ;;  %v3765_v47 = vmul.f32 %v6156_v13, %v9383_v4  ;;  %6177 = vrcp.f32 %v2823_v1 }
 0x383   : > { %v6160_v20 = vpop.eup %6159  ;;  %v3772_v43 = vmul.f32 %v6158_v23, %v9388_v37  ;;  %6179 = vrcp.f32 %v2825_v26 }
 0x384   : > { %v6162_v18 = vpop.eup %6161  ;;  %v4158_v6 = vadd.f32 %v4157_v28, %v3765_v47  ;;  %v2832_v45 = vadd.f32 1.0, %v6160_v20 }
 0x385   : > { %v6164_v49 = vpop.eup %6163  ;;  %v4048_v35 = vadd.f32 %v4047_v29, %v3772_v43  ;;  %v3774_v17 = vmul.f32 %v6162_v18, %v9392_v52 }
 0x386   : > { %v6166_v0 = vpop.eup %6165  ;;  %6181 = vrcp.f32 %v2832_v45  ;;  %v2834_v57 = vadd.f32 1.0, %v6164_v49 }
 0x387   : > { %v6168_v22 = vpop.eup %6167  ;;  %v4122_v25 = vadd.f32 %v4121_v31, %v3774_v17  ;;  %v3773_v63 = vmul.f32 %v6166_v0, %v9397_v38  ;;  %v10073_v17 = vld [vmem:[#allocation41_spill] sm:$0xff]  ;;  %v10074_v0 = vld [vmem:[#allocation26_spill] sm:$0xff] }
 0x388   : > { %v6170_v4 = vpop.eup %6169  ;;  %6183 = vrcp.f32 %v2834_v57  ;;  %v2833_v44 = vadd.f32 1.0, %v6168_v22  ;;  %v10075_v57 = vcombine.low %v10073_v17, %v10074_v0 }
 0x389   : > { %v6172_v51 = vpop.eup %6171  ;;  %v4085_v37 = vadd.f32 %v4084_v14, %v3773_v63  ;;  %v3775_v33 = vmul.f32 %v6170_v4, %v9403_v9 }
 0x38a   : > { %v6174_v8 = vpop.eup %6173  ;;  %6185 = vrcp.f32 %v2833_v44  ;;  %v2835_v59 = vadd.f32 1.0, %v6172_v51  ;;  %v3797_v51 = vld [vmem:[%s9186_s7 + $0x8] sm:$0x3] }
 0x38b   : > { %v6176_v12 = vpop.eup %6175  ;;  %v4159_v10 = vadd.f32 %v4158_v6, %v3775_v33  ;;  %v3782_v52 = vmul.f32 %v6174_v8, %v9411_v11  ;;  %v10077_v33 = vld [vmem:[#allocation47_spill] sm:$0xff] }
 0x38c   : > { %v6178_v30 = vpop.eup %6177  ;;  %v3784_v34 = vmul.f32 %v6176_v12, %v9416_v16  ;;  %6187 = vrcp.f32 %v2835_v59 }
 0x38d   : > { %v6180_v3 = vpop.eup %6179  ;;  %v4049_v38 = vadd.f32 %v4048_v35, %v3782_v52  ;;  %v3783_v19 = vmul.f32 %v6178_v30, %v9421_v7  ;;  %v10072_v35 = vld [vmem:[#allocation23_spill] sm:$0xff] }
 0x38e   : > { %v4123_v56 = vadd.f32 %v4122_v25, %v3784_v34  ;;  %v3785_v28 = vmul.f32 %v6180_v3, %v9425_v24  ;;  %v4202_v22 = vrot.slane %v10075_v57, %v10072_v35 }
 0x38f   : > { %v4086_v5 = vadd.f32 %v4085_v37, %v3783_v19  ;;  %v10076_v37 = vld [vmem:[#allocation29_spill] sm:$0xff] }
 0x390   : > { %v6182_v9 = vpop.eup %6181  ;;  %v4160_v50 = vadd.f32 %v4159_v10, %v3785_v28  ;;  %v10078_v8 = vcombine.low %v10076_v37, %v10077_v33 }
 0x391   : > { %v3792_v55 = vmul.f32 %v6182_v9, %v9432_v21 }
 0x392   : > { %v6184_v2 = vpop.eup %6183  ;;  %v4218_v59 = vrot.slane %v10078_v8, %v10072_v35 }
 0x393   : > { %v4050_v58 = vadd.f32 %v4049_v38, %v3792_v55  ;;  %v3794_v11 = vmul.f32 %v6184_v2, %v9441_v36 }
 0x394   : > { %v6186_v29 = vpop.eup %6185 }
 0x395   : > { %v4051_v54 = vrot.slane %v4050_v58, 4  ;;  %v4124_v16 = vadd.f32 %v4123_v56, %v3794_v11  ;;  %v3793_v41 = vmul.f32 %v6186_v29, %v9447_v48 }
 0x396   : > { %v6188_v32 = vpop.eup %6187 }
 0x397   : > { %v4052_v46 = vadd.f32 %v4051_v54, %v4050_v58  ;;  %v4125_v7 = vrot.slane %v4124_v16, 4  ;;  %v4087_v40 = vadd.f32 %v4086_v5, %v3793_v41  ;;  %v3795_v24 = vmul.f32 %v6188_v32, %v9453_v39 }
 0x399   : > { %v4053_v31 = vrot.slane %v4052_v46, 2  ;;  %v4126_v53 = vadd.f32 %v4125_v7, %v4124_v16  ;;  %v4088_v62 = vrot.slane %v4087_v40, 4  ;;  %v4161_v61 = vadd.f32 %v4160_v50, %v3795_v24 }
 0x39b   : > { %v4054_v21 = vadd.f32 %v4053_v31, %v4052_v46  ;;  %v4127_v15 = vrot.slane %v4126_v53, 2  ;;  %v4089_v14 = vadd.f32 %v4088_v62, %v4087_v40  ;;  %v4162_v27 = vrot.slane %v4161_v61, 4 }
 0x39d   : > { %v4055_v36 = vrot.slane %v4054_v21, 1  ;;  %v4128_v60 = vadd.f32 %v4127_v15, %v4126_v53  ;;  %v4090_v1 = vrot.slane %v4089_v14, 2  ;;  %v4163_v13 = vadd.f32 %v4162_v27, %v4161_v61 }
 0x39f   : > { %v4129_v26 = vrot.slane %v4128_v60, 1  ;;  %v4091_v48 = vadd.f32 %v4090_v1, %v4089_v14  ;;  %v4164_v23 = vrot.slane %v4163_v13, 2  ;;  %v4056_v47 = vadd.f32 %v4055_v36, %v4054_v21 }
 0x3a1   : > { %v4092_v20 = vrot.slane %v4091_v48, 1  ;;  %v4165_v43 = vadd.f32 %v4164_v23, %v4163_v13  ;;  %v4130_v39 = vadd.f32 %v4129_v26, %v4128_v60 }
 0x3a3   : > { %v4093_v18 = vadd.f32 %v4092_v20, %v4091_v48  ;;  %v4166_v6 = vrot.slane %v4165_v43, 1 }
 0x3a5   : > { %v4181_v45 = vcombine.low %v4056_v47, %v4093_v18  ;;  %v4167_v49 = vadd.f32 %v4166_v6, %v4165_v43 }
 0x3a7   : > { %v4209_v25 = vrot.slane %v4181_v45, %v10072_v35  ;;  %v4227_v63 = vcombine.low %v4130_v39, %v4167_v49 }
 0x3a9   : > { %v4211_v4 = vcombine.low %v4202_v22, %v4209_v25  ;;  %v4234_v44 = vrot.slane %v4227_v63, %v10072_v35 }
 0x3ab   : > { %v4225_v12 = vrot.slane %v4211_v4, %v10072_v35  ;;  %v4241_v10 = vrot.slane %v4234_v44, %v10072_v35 }
 0x3ad   : > { %v4226_v52 = vcombine.low %v4218_v59, %v4225_v12  ;;  %v4245_v30 = vadd.f32 %v4241_v10, %v3797_v51 }
 0x3af   : > { %4251 = vst.msk [vmem:[%s9186_s7 + $0x8] sm:$0x3] %vm9193_vm1, %v4245_v30  ;;  %v4257_v34 = vmul.f32 0.00390625, %v4226_v52 }
 0x3b1   : > { %4259 = vst [vmem:[%s9186_s7] sm:$0xff] %v4257_v34 }
 0x3b6   : > { %v4256_v3 = vld [vmem:[%s9186_s7 + $0x8] sm:$0x3] }
 0x3b7   : > { %v4258_v38 = vmul.f32 0.00390625, %v4256_v3 }
 0x3b9   : > { %4260 = vst.msk [vmem:[%s9186_s7 + $0x8] sm:$0x3] %vm9193_vm1, %v4258_v38 }
 0x3ba PF: > { %s14_s17 = sadd.s32 1, %s6213_s17   ;;  %s10079_s15 = smov %s6209_s16 }
 0x3bb   : > { %p11_p5 = scmp.ge.s32.totalorder %s14_s17, 4   ;;  %s10080_s16 = smov %s10082_s18 }
 0x3bd   :  { %13 = sbr.rel (!%p11_p5) target bundleno = 2 (0x2), region = 77 }

</bundles_post_ra>
